<compile_context>
chip_gen: v7x
topology: tpu7x:2x2x1
jax: 0.10.0
libtpu: 0.0.40
codegen_flags: <defaults>
</compile_context>

<pallas_src>
import jax
import jax.numpy as jnp
from jax import lax
from jax.experimental import pallas as pl
from jax.experimental.pallas import tpu as pltpu

# ----------------------------- configuration ("args") -----------------------------
N_WAY = 5                        # n_way
N_SUPPORT = 1                    # n_support
N_QUERY = 3                      # n_query
C_IN, H_IN, W_IN = 3, 16, 16
D_IN = C_IN * H_IN * W_IN        # 768
HID = 128                        # hidden width of base learner (full 128-lane vreg)
C_PAD = 128                      # class dim padded to lane-dense 128
NS = N_WAY * N_SUPPORT           # 5 real support rows
NQ = N_WAY * N_QUERY             # 15 real query rows
NS_PAD = 8                       # padded support rows (sublane multiple)
NQ_PAD = 16                      # padded query rows
NUM_MAML = 2                     # args.num_maml (ensemble size)
META_BATCH = 2                   # args.batch_size (tasks per meta-batch)
UPDATE_STEP = 2                  # args.update_step
INNER_LR = 0.01                  # inner-loop SGD learning rate
ORTHO_LAMBDA = 0.01              # weight on the orthogonality regularizer
NEG_INF = -1e30
STATS_W = 128                    # lane-dense per-task stats row


# ----------------------------- fused Pallas kernel -----------------------------
def _fused_task_kernel(sig_ref, xs_ref, xsT_ref, xq_ref, xqT_ref, ys_ref, yq_ref,
                       w1e_ref, b1e_ref, w2e_ref, b2e_ref,
                       stats_ref, dw1_ref, db1_ref, dw2_ref, db2_ref,
                       wp1, bp1, wp2, bp2):
    """One meta-batch task per grid step; task params stay resident in VMEM."""
    t = pl.program_id(0)

    xs = xs_ref[0]                       # (NS_PAD, D_IN)
    xsT = xsT_ref[0]                     # (D_IN, NS_PAD)
    xq = xq_ref[0]                       # (NQ_PAD, D_IN)
    xqT = xqT_ref[0]                     # (D_IN, NQ_PAD)
    ys = ys_ref[...]                     # (NS_PAD, C_PAD) one-hot (padded cols = 0)
    yq = yq_ref[...]                     # (NQ_PAD, C_PAD)

    # padded classes -> -inf logit bias ; padded rows -> zero weight in loss/grads
    cls_neg = jnp.where(
        lax.broadcasted_iota(jnp.int32, (1, C_PAD), 1) < N_WAY, 0.0, NEG_INF)
    ms = (lax.broadcasted_iota(jnp.int32, (NS_PAD, 1), 0) < NS).astype(jnp.float32)
    mq = (lax.broadcasted_iota(jnp.int32, (NQ_PAD, 1), 0) < NQ).astype(jnp.float32)
    inv_ns = 1.0 / NS
    inv_nq = 1.0 / NQ

    # ---- sigma-weighted init of the task learner (sigmas precomputed outside).
    # In-place accumulation into scratch: no full (768,128) temporary lives
    # alongside the ensemble tile being loaded (v5e store-slot relief).
    s0 = sig_ref[t, 0]
    wp1[...] = s0 * w1e_ref[0]
    bp1[...] = s0 * b1e_ref[0]
    wp2[...] = s0 * w2e_ref[0]
    bp2[...] = s0 * b2e_ref[0]
    for i in range(1, NUM_MAML):
        si = sig_ref[t, i]
        wp1[...] = wp1[...] + si * w1e_ref[i]
        bp1[...] = bp1[...] + si * b1e_ref[i]
        wp2[...] = wp2[...] + si * w2e_ref[i]
        bp2[...] = bp2[...] + si * b2e_ref[i]

    # ---- finetuning.maml_inner_adapt: UPDATE_STEP first-order SGD steps (fused)
    for _ in range(UPDATE_STEP):
        b1 = bp1[...]
        w2 = wp2[...]
        b2 = bp2[...]
        a1 = jnp.dot(xs, wp1[...], preferred_element_type=jnp.float32) + b1
        h = jnp.maximum(a1, 0.0)
        logits = jnp.dot(h, w2, preferred_element_type=jnp.float32) + b2 + cls_neg
        m = jnp.max(logits, axis=-1, keepdims=True)
        e = jnp.exp(logits - m)
        p = e / jnp.sum(e, axis=-1, keepdims=True)
        dlog = (p - ys) * (ms * inv_ns)                                    # row-masked
        dw2 = lax.dot_general(h, dlog, (((0,), (0,)), ((), ())),
                              preferred_element_type=jnp.float32)
        db2 = jnp.sum(dlog, axis=0, keepdims=True)
        dh = lax.dot_general(dlog, w2, (((1,), (1,)), ((), ())),
                             preferred_element_type=jnp.float32)
        da1 = jnp.where(a1 > 0.0, dh, 0.0)
        dw1 = jnp.dot(xsT, da1, preferred_element_type=jnp.float32)        # no transpose
        db1 = jnp.sum(da1, axis=0, keepdims=True)
        # in-place SGD update of the resident task params
        wp1[...] = wp1[...] - INNER_LR * dw1
        bp1[...] = b1 - INNER_LR * db1
        wp2[...] = w2 - INNER_LR * dw2
        bp2[...] = b2 - INNER_LR * db2

    # ---- query set: loss, accuracy, first-order meta-gradients
    w2 = wp2[...]
    a1 = jnp.dot(xq, wp1[...], preferred_element_type=jnp.float32) + bp1[...]
    h = jnp.maximum(a1, 0.0)
    logits = jnp.dot(h, w2, preferred_element_type=jnp.float32) + bp2[...] + cls_neg
    m = jnp.max(logits, axis=-1, keepdims=True)
    e = jnp.exp(logits - m)
    s = jnp.sum(e, axis=-1, keepdims=True)
    p = e / s
    lse = m + jnp.log(s)
    tl = jnp.sum(logits * yq, axis=-1, keepdims=True)
    loss_s = jnp.sum((lse - tl) * mq) * inv_nq

    # argmax accuracy with first-index tie-break (matches torch.argmax semantics)
    cls_f = lax.broadcasted_iota(jnp.int32, (NQ_PAD, C_PAD), 1).astype(jnp.float32)
    pred = jnp.min(jnp.where(logits >= m, cls_f, float(C_PAD)),
                   axis=-1, keepdims=True)
    label = jnp.sum(cls_f * yq, axis=-1, keepdims=True)
    acc_s = jnp.sum((pred == label).astype(jnp.float32) * mq) * inv_nq

    dlog = (p - yq) * (mq * inv_nq)
    dw2_q = lax.dot_general(h, dlog, (((0,), (0,)), ((), ())),
                            preferred_element_type=jnp.float32)
    db2_q = jnp.sum(dlog, axis=0, keepdims=True)
    dh = lax.dot_general(dlog, w2, (((1,), (1,)), ((), ())),
                         preferred_element_type=jnp.float32)
    da1 = jnp.where(a1 > 0.0, dh, 0.0)
    dw1_q = jnp.dot(xqT, da1, preferred_element_type=jnp.float32)
    db1_q = jnp.sum(da1, axis=0, keepdims=True)

    # per-task raw grads; sigma scaling + task reduction happen in JAX
    dw1_ref[0] = dw1_q
    db1_ref[0] = db1_q
    dw2_ref[0] = dw2_q
    db2_ref[0] = db2_q

    # per-task scalars (loss, acc, |theta_ft|^2, <theta_i, theta_ft>) packed into
    # one lane-dense (8,128) tile -> full unmasked store, parallel-axis safe.
    ff_s = (jnp.sum(wp1[...] * wp1[...]) + jnp.sum(bp1[...] * bp1[...])
            + jnp.sum(w2 * w2) + jnp.sum(bp2[...] * bp2[...]))
    lane = lax.broadcasted_iota(jnp.int32, (8, STATS_W), 1)
    stats = jnp.where(lane == 0, loss_s, 0.0)
    stats = jnp.where(lane == 1, acc_s, stats)
    stats = jnp.where(lane == 2, ff_s, stats)
    for i in range(NUM_MAML):
        c_i = (jnp.sum(w1e_ref[i] * wp1[...]) + jnp.sum(b1e_ref[i] * bp1[...])
               + jnp.sum(w2e_ref[i] * w2) + jnp.sum(b2e_ref[i] * bp2[...]))
        stats = jnp.where(lane == 3 + i, c_i, stats)
    stats_ref[0] = stats


# ----------------------------- Pallas wrapper -----------------------------
def _per_task(shape):
    return pl.BlockSpec((1,) + shape, lambda t: (t, 0, 0))


def _const2(shape):
    return pl.BlockSpec(shape, lambda t: (0, 0))


def _const3(shape):
    return pl.BlockSpec(shape, lambda t: (0, 0, 0))


def xb_maml_meta_batch(sigmas, x_sup, x_sup_t, x_qry, x_qry_t, y_sup, y_qry,
                       w1e, b1e, w2e, b2e):
    out_shape = (
        jax.ShapeDtypeStruct((META_BATCH, 8, STATS_W), jnp.float32),       # stats/task
        jax.ShapeDtypeStruct((META_BATCH, D_IN, HID), jnp.float32),        # dW1/task
        jax.ShapeDtypeStruct((META_BATCH, 1, HID), jnp.float32),           # dB1/task
        jax.ShapeDtypeStruct((META_BATCH, HID, C_PAD), jnp.float32),       # dW2/task
        jax.ShapeDtypeStruct((META_BATCH, 1, C_PAD), jnp.float32),         # dB2/task
    )
    grid_spec = pltpu.PrefetchScalarGridSpec(
        num_scalar_prefetch=0,
        grid=(META_BATCH,),
        in_specs=[
            pl.BlockSpec(memory_space=pltpu.MemorySpace.SMEM),             # sigmas
            _per_task((NS_PAD, D_IN)),                                     # support x
            _per_task((D_IN, NS_PAD)),                                     # support x^T
            _per_task((NQ_PAD, D_IN)),                                     # query x
            _per_task((D_IN, NQ_PAD)),                                     # query x^T
            _const2((NS_PAD, C_PAD)),                                      # support 1-hot
            _const2((NQ_PAD, C_PAD)),                                      # query 1-hot
            _const3((NUM_MAML, D_IN, HID)),                                # W1 ensemble
            _const3((NUM_MAML, 1, HID)),                                   # b1 ensemble
            _const3((NUM_MAML, HID, C_PAD)),                               # W2 ensemble
            _const3((NUM_MAML, 1, C_PAD)),                                 # b2 ensemble
        ],
        out_specs=(
            _per_task((8, STATS_W)),
            _per_task((D_IN, HID)),
            _per_task((1, HID)),
            _per_task((HID, C_PAD)),
            _per_task((1, C_PAD)),
        ),
        scratch_shapes=[
            pltpu.VMEM((D_IN, HID), jnp.float32),                          # working w1
            pltpu.VMEM((1, HID), jnp.float32),                             # working b1
            pltpu.VMEM((HID, C_PAD), jnp.float32),                         # working w2
            pltpu.VMEM((1, C_PAD), jnp.float32),                           # working b2
        ],
    )
    return pl.pallas_call(
        _fused_task_kernel,
        out_shape=out_shape,
        grid_spec=grid_spec,
        compiler_params=pltpu.CompilerParams(
            # Every output block is indexed by the task id and scratch is fully
            # re-initialized each step -> the task axis is truly parallel
            # (v7x: both TensorCores pick up tasks).
            dimension_semantics=("parallel",),
        ),
    )(sigmas, x_sup, x_sup_t, x_qry, x_qry_t, y_sup, y_qry, w1e, b1e, w2e, b2e)


# ----------------------------- plain-JAX glue -----------------------------
def make_mlp_params(key, d, h, c):
    k1, k2 = jax.random.split(key)
    return dict(
        w1=jax.random.normal(k1, (d, h), jnp.float32) * (2.0 / d) ** 0.5,
        b1=jnp.zeros((1, h), jnp.float32),
        w2=jax.random.normal(k2, (h, c), jnp.float32) * (1.0 / h) ** 0.5,
        b2=jnp.zeros((1, c), jnp.float32),
    )


def prepare_tasks(task_batches):
    """split_support_query on NCHW tasks, flatten to (rows, D), pad + transpose."""
    b = task_batches.reshape(META_BATCH, N_WAY, N_SUPPORT + N_QUERY, C_IN, H_IN, W_IN)
    x_sup_raw = b[:, :, :N_SUPPORT].reshape(META_BATCH, NS, D_IN)
    x_qry_raw = b[:, :, N_SUPPORT:].reshape(META_BATCH, NQ, D_IN)
    x_sup = jnp.pad(x_sup_raw, ((0, 0), (0, NS_PAD - NS), (0, 0)))
    x_qry = jnp.pad(x_qry_raw, ((0, 0), (0, NQ_PAD - NQ), (0, 0)))
    x_sup_t = jnp.transpose(x_sup, (0, 2, 1))
    x_qry_t = jnp.transpose(x_qry, (0, 2, 1))
    train_target = jnp.repeat(jnp.arange(N_WAY), N_SUPPORT)
    y_sup = jnp.pad(jax.nn.one_hot(train_target, N_WAY, dtype=jnp.float32),
                    ((0, NS_PAD - NS), (0, C_PAD - N_WAY)))
    test_target = jnp.repeat(jnp.arange(N_WAY), N_QUERY)
    y_qry = jnp.pad(jax.nn.one_hot(test_target, N_WAY, dtype=jnp.float32),
                    ((0, NQ_PAD - NQ), (0, C_PAD - N_WAY)))
    return x_sup_raw, x_sup, x_sup_t, x_qry, x_qry_t, y_sup, y_qry, train_target


def compute_sigmas(x_sup_raw, train_target, w1e, b1e, w2r, b2r):
    """ensemble_model.outputs sigmas: one wide batched matmul over tasks+members."""
    a1 = jnp.einsum('tnd,kdh->tknh', x_sup_raw, w1e) + b1e[:, 0, :][None, :, None, :]
    h = jnp.maximum(a1, 0.0)
    logits = jnp.einsum('tknh,khc->tknc', h, w2r) + b2r[:, 0, :][None, :, None, :]
    m = jnp.max(logits, axis=-1, keepdims=True)
    lse = (m + jnp.log(jnp.sum(jnp.exp(logits - m), axis=-1, keepdims=True)))[..., 0]
    oh = jax.nn.one_hot(train_target, N_WAY, dtype=jnp.float32)            # (NS, C)
    tl = jnp.einsum('tknc,nc->tkn', logits, oh)
    sup_loss = jnp.mean(lse - tl, axis=-1)                                 # (MB, K)
    return jax.nn.softmax(-sup_loss, axis=-1)                              # (MB, K)


def ensemble_gram(ensemble_params):
    theta = jnp.stack([jnp.concatenate([p["w1"].ravel(), p["b1"].ravel(),
                                        p["w2"].ravel(), p["b2"].ravel()])
                       for p in ensemble_params])                          # (K, P)
    return theta @ theta.T


def xb_maml_forward(ensemble_params, task_batches):
    """Mirrors XB_MAML.forward over a meta-batch; heavy per-task work in Pallas."""
    (x_sup_raw, x_sup, x_sup_t, x_qry, x_qry_t,
     y_sup, y_qry, train_target) = prepare_tasks(task_batches)

    w1e = jnp.stack([p["w1"] for p in ensemble_params])                    # (K, D, HID)
    b1e = jnp.stack([p["b1"] for p in ensemble_params])                    # (K, 1, HID)
    w2r = jnp.stack([p["w2"] for p in ensemble_params])                    # (K, HID, N_WAY)
    b2r = jnp.stack([p["b2"] for p in ensemble_params])                    # (K, 1, N_WAY)

    # task-independent pieces computed once in XLA (off the kernel critical path)
    sigmas = compute_sigmas(x_sup_raw, train_target, w1e, b1e, w2r, b2r)   # (MB, K)
    g_ens = ensemble_gram(ensemble_params)                                 # (K, K)

    # pad class dim to lane-dense 128 for the kernel
    w2e = jnp.pad(w2r, ((0, 0), (0, 0), (0, C_PAD - N_WAY)))
    b2e = jnp.pad(b2r, ((0, 0), (0, 0), (0, C_PAD - N_WAY)))

    stats, dw1_q, db1_q, dw2_q, db2_q = xb_maml_meta_batch(
        sigmas, x_sup, x_sup_t, x_qry, x_qry_t, y_sup, y_qry, w1e, b1e, w2e, b2e)

    row = stats[:, 0, :]                                                   # (MB, 128)
    loss_t = row[:, 0]
    acc_t = row[:, 1]
    ff_t = row[:, 2]
    c_cross = row[:, 3:3 + NUM_MAML]                                       # (MB, K)

    # projection_error per task: tiny k x k solve from Gram + in-kernel cross terms
    gpp = g_ens + 1e-6 * jnp.eye(NUM_MAML, dtype=jnp.float32)
    sol = jnp.linalg.solve(gpp, c_cross.T)                                 # (K, MB)
    res2 = jnp.maximum(ff_t - jnp.sum(c_cross * sol.T, axis=1), 0.0)
    err_mean = jnp.mean(jnp.sqrt(res2))

    # orthogonal_regularization from the ensemble Gram
    ortho_sum = 0.0
    for i in range(NUM_MAML):
        for j in range(i + 1, NUM_MAML):
            ortho_sum = ortho_sum + ORTHO_LAMBDA * (g_ens[i, j] ** 2) / (
                g_ens[i, i] * g_ens[j, j] + 1e-12)

    loss_ = jnp.mean(loss_t) + ortho_sum
    acc = jnp.mean(acc_t)

    # sigma-scaled, batch-averaged first-order meta-gradients per ensemble member:
    # grad_i = sum_t sigma[t,i] * grad_task[t] / META_BATCH  (task reduction in JAX)
    scale = sigmas * (1.0 / META_BATCH)                                    # (MB, K)
    gw1 = jnp.einsum('tk,tdh->kdh', scale, dw1_q)
    gb1 = jnp.einsum('tk,tdh->kdh', scale, db1_q)
    gw2 = jnp.einsum('tk,tdh->kdh', scale, dw2_q)[:, :, :N_WAY]
    gb2 = jnp.einsum('tk,tdh->kdh', scale, db2_q)[:, :, :N_WAY]
    gradients = [dict(w1=gw1[i], b1=gb1[i], w2=gw2[i], b2=gb2[i])
                 for i in range(NUM_MAML)]

    # TODO(synk): ensemble optimizer.step(), autograd of the orthogonality
    # regularizer, moving-average convergence check and Add_MAML ensemble
    # expansion are host-side training control flow left outside the kernel.
    return acc, loss_, err_mean, gradients


# ----------------------------- main -----------------------------
if __name__ == "__main__":
    key = jax.random.PRNGKey(0)
    k_ens, k_data = jax.random.split(key)

    ens_keys = jax.random.split(k_ens, NUM_MAML)
    ensemble_params = [make_mlp_params(k, D_IN, HID, N_WAY) for k in ens_keys]

    task_batches = jax.random.normal(
        k_data, (META_BATCH, N_WAY * (N_SUPPORT + N_QUERY), C_IN, H_IN, W_IN),
        jnp.float32)

    acc, loss_, err_mean, gradients = jax.jit(xb_maml_forward)(
        ensemble_params, task_batches)
    jax.block_until_ready((acc, loss_, err_mean, gradients))
    print("KERNEL_OK")
</pallas_src>

<mosaic_0001>
module attributes {stable_mosaic.version = 11 : i64} {
  func.func @_fused_task_kernel(%arg0: i32, %arg1: memref<2x2xf32, #tpu.memory_space<smem>>, %arg2: memref<1x8x768xf32, #tpu.memory_space<vmem>>, %arg3: memref<1x768x8xf32, #tpu.memory_space<vmem>>, %arg4: memref<1x16x768xf32, #tpu.memory_space<vmem>>, %arg5: memref<1x768x16xf32, #tpu.memory_space<vmem>>, %arg6: memref<8x128xf32, #tpu.memory_space<vmem>>, %arg7: memref<16x128xf32, #tpu.memory_space<vmem>>, %arg8: memref<2x768x128xf32, #tpu.memory_space<vmem>>, %arg9: memref<2x1x128xf32, #tpu.memory_space<vmem>>, %arg10: memref<2x128x128xf32, #tpu.memory_space<vmem>>, %arg11: memref<2x1x128xf32, #tpu.memory_space<vmem>>, %arg12: memref<1x8x128xf32, #tpu.memory_space<vmem>>, %arg13: memref<1x768x128xf32, #tpu.memory_space<vmem>>, %arg14: memref<1x1x128xf32, #tpu.memory_space<vmem>>, %arg15: memref<1x128x128xf32, #tpu.memory_space<vmem>>, %arg16: memref<1x1x128xf32, #tpu.memory_space<vmem>>, %arg17: memref<768x128xf32, #tpu.memory_space<vmem>>, %arg18: memref<1x128xf32, #tpu.memory_space<vmem>>, %arg19: memref<128x128xf32, #tpu.memory_space<vmem>>, %arg20: memref<1x128xf32, #tpu.memory_space<vmem>>) attributes {dimension_semantics = [#tpu.dimension_semantics<parallel>], iteration_bounds = array<i64: 2>, scalar_prefetch = 0 : i64, scratch_operands = 4 : i64, tpu.core_type = #tpu.core_type<tc>, window_params = [{transform_indices = @transform_0, window_bounds = array<i64: 2, 2>}, {transform_indices = @transform_1, window_bounds = array<i64: 1, 8, 768>}, {transform_indices = @transform_2, window_bounds = array<i64: 1, 768, 8>}, {transform_indices = @transform_3, window_bounds = array<i64: 1, 16, 768>}, {transform_indices = @transform_4, window_bounds = array<i64: 1, 768, 16>}, {pipeline_mode = #tpu.pipeline_mode<synchronous>, transform_indices = @transform_5, window_bounds = array<i64: 8, 128>}, {pipeline_mode = #tpu.pipeline_mode<synchronous>, transform_indices = @transform_6, window_bounds = array<i64: 16, 128>}, {pipeline_mode = #tpu.pipeline_mode<synchronous>, transform_indices = @transform_7, window_bounds = array<i64: 2, 768, 128>}, {pipeline_mode = #tpu.pipeline_mode<synchronous>, transform_indices = @transform_8, window_bounds = array<i64: 2, 1, 128>}, {pipeline_mode = #tpu.pipeline_mode<synchronous>, transform_indices = @transform_9, window_bounds = array<i64: 2, 128, 128>}, {pipeline_mode = #tpu.pipeline_mode<synchronous>, transform_indices = @transform_10, window_bounds = array<i64: 2, 1, 128>}, {transform_indices = @transform_11, window_bounds = array<i64: 1, 8, 128>}, {transform_indices = @transform_12, window_bounds = array<i64: 1, 768, 128>}, {transform_indices = @transform_13, window_bounds = array<i64: 1, 1, 128>}, {transform_indices = @transform_14, window_bounds = array<i64: 1, 128, 128>}, {transform_indices = @transform_15, window_bounds = array<i64: 1, 1, 128>}]} {
    %c0 = arith.constant 0 : index
    %c0_0 = arith.constant 0 : index
    %c0_1 = arith.constant 0 : index
    %0 = vector.load %arg2[%c0, %c0_0, %c0_1] : memref<1x8x768xf32, #tpu.memory_space<vmem>>, vector<1x8x768xf32>
    %1 = vector.shape_cast %0 : vector<1x8x768xf32> to vector<8x768xf32>
    %c0_2 = arith.constant 0 : index
    %c0_3 = arith.constant 0 : index
    %c0_4 = arith.constant 0 : index
    %2 = vector.load %arg3[%c0_2, %c0_3, %c0_4] : memref<1x768x8xf32, #tpu.memory_space<vmem>>, vector<1x768x8xf32>
    %3 = vector.shape_cast %2 : vector<1x768x8xf32> to vector<768x8xf32>
    %c0_5 = arith.constant 0 : index
    %c0_6 = arith.constant 0 : index
    %c0_7 = arith.constant 0 : index
    %4 = vector.load %arg4[%c0_5, %c0_6, %c0_7] : memref<1x16x768xf32, #tpu.memory_space<vmem>>, vector<1x16x768xf32>
    %5 = vector.shape_cast %4 : vector<1x16x768xf32> to vector<16x768xf32>
    %c0_8 = arith.constant 0 : index
    %c0_9 = arith.constant 0 : index
    %c0_10 = arith.constant 0 : index
    %6 = vector.load %arg5[%c0_8, %c0_9, %c0_10] : memref<1x768x16xf32, #tpu.memory_space<vmem>>, vector<1x768x16xf32>
    %7 = vector.shape_cast %6 : vector<1x768x16xf32> to vector<768x16xf32>
    %c0_11 = arith.constant 0 : index
    %c0_12 = arith.constant 0 : index
    %8 = vector.load %arg6[%c0_11, %c0_12] : memref<8x128xf32, #tpu.memory_space<vmem>>, vector<8x128xf32>
    %c0_13 = arith.constant 0 : index
    %c0_14 = arith.constant 0 : index
    %9 = vector.load %arg7[%c0_13, %c0_14] : memref<16x128xf32, #tpu.memory_space<vmem>>, vector<16x128xf32>
    %10 = tpu.iota {dimensions = array<i32: 1>} : vector<1x128xi32>
    %c5_i32 = arith.constant 5 : i32
    %11 = vector.broadcast %c5_i32 : i32 to vector<1x128xi32>
    %12 = arith.cmpi slt, %10, %11 : vector<1x128xi32>
    %cst = arith.constant 0.000000e+00 : f32
    %cst_15 = arith.constant -1.000000e+30 : f32
    %13 = vector.broadcast %cst : f32 to vector<1x128xf32>
    %14 = vector.broadcast %cst_15 : f32 to vector<1x128xf32>
    %15 = arith.select %12, %13, %14 : vector<1x128xi1>, vector<1x128xf32>
    %16 = tpu.iota {dimensions = array<i32: 0>} : vector<8x1xi32>
    %c5_i32_16 = arith.constant 5 : i32
    %17 = vector.broadcast %c5_i32_16 : i32 to vector<8x1xi32>
    %18 = arith.cmpi slt, %16, %17 : vector<8x1xi32>
    %19 = arith.extui %18 : vector<8x1xi1> to vector<8x1xi32>
    %20 = arith.sitofp %19 : vector<8x1xi32> to vector<8x1xf32>
    %21 = tpu.iota {dimensions = array<i32: 0>} : vector<16x1xi32>
    %c15_i32 = arith.constant 15 : i32
    %22 = vector.broadcast %c15_i32 : i32 to vector<16x1xi32>
    %23 = arith.cmpi slt, %21, %22 : vector<16x1xi32>
    %24 = arith.extui %23 : vector<16x1xi1> to vector<16x1xi32>
    %25 = arith.sitofp %24 : vector<16x1xi32> to vector<16x1xf32>
    %26 = arith.index_cast %arg0 : i32 to index
    %c0_17 = arith.constant 0 : index
    %27 = memref.load %arg1[%26, %c0_17] : memref<2x2xf32, #tpu.memory_space<smem>>
    %c0_18 = arith.constant 0 : index
    %c0_19 = arith.constant 0 : index
    %c0_20 = arith.constant 0 : index
    %28 = vector.load %arg8[%c0_18, %c0_19, %c0_20] : memref<2x768x128xf32, #tpu.memory_space<vmem>>, vector<1x768x128xf32>
    %29 = vector.shape_cast %28 : vector<1x768x128xf32> to vector<768x128xf32>
    %30 = vector.broadcast %27 : f32 to vector<768x128xf32>
    %31 = arith.mulf %30, %29 : vector<768x128xf32>
    %c0_21 = arith.constant 0 : index
    %c0_22 = arith.constant 0 : index
    %32 = vector.load %arg17[%c0_21, %c0_22] : memref<768x128xf32, #tpu.memory_space<vmem>>, vector<768x128xf32>
    tpu.vector_store %arg17[%c0_21, %c0_22], %31 {strides = array<i32>} : memref<768x128xf32, #tpu.memory_space<vmem>>, vector<768x128xf32>,
    %c0_23 = arith.constant 0 : index
    %c0_24 = arith.constant 0 : index
    %c0_25 = arith.constant 0 : index
    %33 = vector.load %arg9[%c0_23, %c0_24, %c0_25] : memref<2x1x128xf32, #tpu.memory_space<vmem>>, vector<1x1x128xf32>
    %34 = vector.shape_cast %33 : vector<1x1x128xf32> to vector<1x128xf32>
    %35 = vector.broadcast %27 : f32 to vector<1x128xf32>
    %36 = arith.mulf %35, %34 : vector<1x128xf32>
    %c0_26 = arith.constant 0 : index
    %c0_27 = arith.constant 0 : index
    %37 = vector.load %arg18[%c0_26, %c0_27] : memref<1x128xf32, #tpu.memory_space<vmem>>, vector<1x128xf32>
    tpu.vector_store %arg18[%c0_26, %c0_27], %36 {strides = array<i32>} : memref<1x128xf32, #tpu.memory_space<vmem>>, vector<1x128xf32>,
    %c0_28 = arith.constant 0 : index
    %c0_29 = arith.constant 0 : index
    %c0_30 = arith.constant 0 : index
    %38 = vector.load %arg10[%c0_28, %c0_29, %c0_30] : memref<2x128x128xf32, #tpu.memory_space<vmem>>, vector<1x128x128xf32>
    %39 = vector.shape_cast %38 : vector<1x128x128xf32> to vector<128x128xf32>
    %40 = vector.broadcast %27 : f32 to vector<128x128xf32>
    %41 = arith.mulf %40, %39 : vector<128x128xf32>
    %c0_31 = arith.constant 0 : index
    %c0_32 = arith.constant 0 : index
    %42 = vector.load %arg19[%c0_31, %c0_32] : memref<128x128xf32, #tpu.memory_space<vmem>>, vector<128x128xf32>
    tpu.vector_store %arg19[%c0_31, %c0_32], %41 {strides = array<i32>} : memref<128x128xf32, #tpu.memory_space<vmem>>, vector<128x128xf32>,
    %c0_33 = arith.constant 0 : index
    %c0_34 = arith.constant 0 : index
    %c0_35 = arith.constant 0 : index
    %43 = vector.load %arg11[%c0_33, %c0_34, %c0_35] : memref<2x1x128xf32, #tpu.memory_space<vmem>>, vector<1x1x128xf32>
    %44 = vector.shape_cast %43 : vector<1x1x128xf32> to vector<1x128xf32>
    %45 = vector.broadcast %27 : f32 to vector<1x128xf32>
    %46 = arith.mulf %45, %44 : vector<1x128xf32>
    %c0_36 = arith.constant 0 : index
    %c0_37 = arith.constant 0 : index
    %47 = vector.load %arg20[%c0_36, %c0_37] : memref<1x128xf32, #tpu.memory_space<vmem>>, vector<1x128xf32>
    tpu.vector_store %arg20[%c0_36, %c0_37], %46 {strides = array<i32>} : memref<1x128xf32, #tpu.memory_space<vmem>>, vector<1x128xf32>,
    %48 = arith.index_cast %arg0 : i32 to index
    %c1 = arith.constant 1 : index
    %49 = memref.load %arg1[%48, %c1] : memref<2x2xf32, #tpu.memory_space<smem>>
    %c0_38 = arith.constant 0 : index
    %c0_39 = arith.constant 0 : index
    %50 = vector.load %arg17[%c0_38, %c0_39] : memref<768x128xf32, #tpu.memory_space<vmem>>, vector<768x128xf32>
    %c1_40 = arith.constant 1 : index
    %c0_41 = arith.constant 0 : index
    %c0_42 = arith.constant 0 : index
    %51 = vector.load %arg8[%c1_40, %c0_41, %c0_42] : memref<2x768x128xf32, #tpu.memory_space<vmem>>, vector<1x768x128xf32>
    %52 = vector.shape_cast %51 : vector<1x768x128xf32> to vector<768x128xf32>
    %53 = vector.broadcast %49 : f32 to vector<768x128xf32>
    %54 = arith.mulf %53, %52 : vector<768x128xf32>
    %55 = arith.addf %50, %54 : vector<768x128xf32>
    %c0_43 = arith.constant 0 : index
    %c0_44 = arith.constant 0 : index
    %56 = vector.load %arg17[%c0_43, %c0_44] : memref<768x128xf32, #tpu.memory_space<vmem>>, vector<768x128xf32>
    tpu.vector_store %arg17[%c0_43, %c0_44], %55 {strides = array<i32>} : memref<768x128xf32, #tpu.memory_space<vmem>>, vector<768x128xf32>,
    %c0_45 = arith.constant 0 : index
    %c0_46 = arith.constant 0 : index
    %57 = vector.load %arg18[%c0_45, %c0_46] : memref<1x128xf32, #tpu.memory_space<vmem>>, vector<1x128xf32>
    %c1_47 = arith.constant 1 : index
    %c0_48 = arith.constant 0 : index
    %c0_49 = arith.constant 0 : index
    %58 = vector.load %arg9[%c1_47, %c0_48, %c0_49] : memref<2x1x128xf32, #tpu.memory_space<vmem>>, vector<1x1x128xf32>
    %59 = vector.shape_cast %58 : vector<1x1x128xf32> to vector<1x128xf32>
    %60 = vector.broadcast %49 : f32 to vector<1x128xf32>
    %61 = arith.mulf %60, %59 : vector<1x128xf32>
    %62 = arith.addf %57, %61 : vector<1x128xf32>
    %c0_50 = arith.constant 0 : index
    %c0_51 = arith.constant 0 : index
    %63 = vector.load %arg18[%c0_50, %c0_51] : memref<1x128xf32, #tpu.memory_space<vmem>>, vector<1x128xf32>
    tpu.vector_store %arg18[%c0_50, %c0_51], %62 {strides = array<i32>} : memref<1x128xf32, #tpu.memory_space<vmem>>, vector<1x128xf32>,
    %c0_52 = arith.constant 0 : index
    %c0_53 = arith.constant 0 : index
    %64 = vector.load %arg19[%c0_52, %c0_53] : memref<128x128xf32, #tpu.memory_space<vmem>>, vector<128x128xf32>
    %c1_54 = arith.constant 1 : index
    %c0_55 = arith.constant 0 : index
    %c0_56 = arith.constant 0 : index
    %65 = vector.load %arg10[%c1_54, %c0_55, %c0_56] : memref<2x128x128xf32, #tpu.memory_space<vmem>>, vector<1x128x128xf32>
    %66 = vector.shape_cast %65 : vector<1x128x128xf32> to vector<128x128xf32>
    %67 = vector.broadcast %49 : f32 to vector<128x128xf32>
    %68 = arith.mulf %67, %66 : vector<128x128xf32>
    %69 = arith.addf %64, %68 : vector<128x128xf32>
    %c0_57 = arith.constant 0 : index
    %c0_58 = arith.constant 0 : index
    %70 = vector.load %arg19[%c0_57, %c0_58] : memref<128x128xf32, #tpu.memory_space<vmem>>, vector<128x128xf32>
    tpu.vector_store %arg19[%c0_57, %c0_58], %69 {strides = array<i32>} : memref<128x128xf32, #tpu.memory_space<vmem>>, vector<128x128xf32>,
    %c0_59 = arith.constant 0 : index
    %c0_60 = arith.constant 0 : index
    %71 = vector.load %arg20[%c0_59, %c0_60] : memref<1x128xf32, #tpu.memory_space<vmem>>, vector<1x128xf32>
    %c1_61 = arith.constant 1 : index
    %c0_62 = arith.constant 0 : index
    %c0_63 = arith.constant 0 : index
    %72 = vector.load %arg11[%c1_61, %c0_62, %c0_63] : memref<2x1x128xf32, #tpu.memory_space<vmem>>, vector<1x1x128xf32>
    %73 = vector.shape_cast %72 : vector<1x1x128xf32> to vector<1x128xf32>
    %74 = vector.broadcast %49 : f32 to vector<1x128xf32>
    %75 = arith.mulf %74, %73 : vector<1x128xf32>
    %76 = arith.addf %71, %75 : vector<1x128xf32>
    %c0_64 = arith.constant 0 : index
    %c0_65 = arith.constant 0 : index
    %77 = vector.load %arg20[%c0_64, %c0_65] : memref<1x128xf32, #tpu.memory_space<vmem>>, vector<1x128xf32>
    tpu.vector_store %arg20[%c0_64, %c0_65], %76 {strides = array<i32>} : memref<1x128xf32, #tpu.memory_space<vmem>>, vector<1x128xf32>,
    %c0_66 = arith.constant 0 : index
    %c0_67 = arith.constant 0 : index
    %78 = vector.load %arg18[%c0_66, %c0_67] : memref<1x128xf32, #tpu.memory_space<vmem>>, vector<1x128xf32>
    %c0_68 = arith.constant 0 : index
    %c0_69 = arith.constant 0 : index
    %79 = vector.load %arg19[%c0_68, %c0_69] : memref<128x128xf32, #tpu.memory_space<vmem>>, vector<128x128xf32>
    %c0_70 = arith.constant 0 : index
    %c0_71 = arith.constant 0 : index
    %80 = vector.load %arg20[%c0_70, %c0_71] : memref<1x128xf32, #tpu.memory_space<vmem>>, vector<1x128xf32>
    %c0_72 = arith.constant 0 : index
    %c0_73 = arith.constant 0 : index
    %81 = vector.load %arg17[%c0_72, %c0_73] : memref<768x128xf32, #tpu.memory_space<vmem>>, vector<768x128xf32>
    %cst_74 = arith.constant dense<0.000000e+00> : vector<8x128xf32>
    %82 = tpu.matmul %1, %81, %cst_74 {dimension_numbers = #tpu.dot_dimension_numbers<[1], [0], [0], [1], [0, 0, 1, 1], [], []>} : vector<8x768xf32>, vector<768x128xf32>, vector<8x128xf32> -> vector<8x128xf32>
    %83 = vector.broadcast %78 : vector<1x128xf32> to vector<8x128xf32>
    %84 = arith.addf %82, %83 : vector<8x128xf32>
    %cst_75 = arith.constant 0.000000e+00 : f32
    %85 = vector.broadcast %cst_75 : f32 to vector<8x128xf32>
    %86 = arith.maximumf %84, %85 : vector<8x128xf32>
    %cst_76 = arith.constant dense<0.000000e+00> : vector<8x128xf32>
    %87 = tpu.matmul %86, %79, %cst_76 {dimension_numbers = #tpu.dot_dimension_numbers<[1], [0], [0], [1], [0, 0, 1, 1], [], []>} : vector<8x128xf32>, vector<128x128xf32>, vector<8x128xf32> -> vector<8x128xf32>
    %88 = vector.broadcast %80 : vector<1x128xf32> to vector<8x128xf32>
    %89 = arith.addf %87, %88 : vector<8x128xf32>
    %90 = vector.broadcast %15 : vector<1x128xf32> to vector<8x128xf32>
    %91 = arith.addf %89, %90 : vector<8x128xf32>
    %cst_77 = arith.constant dense<0xFF800000> : vector<8xf32>
    %92 = vector.multi_reduction <maximumf>, %91, %cst_77 [1] : vector<8x128xf32> to vector<8xf32>
    %93 = vector.shape_cast %92 : vector<8xf32> to vector<8x1xf32>
    %94 = vector.broadcast %93 : vector<8x1xf32> to vector<8x128xf32>
    %95 = arith.subf %91, %94 : vector<8x128xf32>
    %96 = math.exp %95 : vector<8x128xf32>
    %cst_78 = arith.constant dense<0.000000e+00> : vector<8xf32>
    %97 = vector.multi_reduction <add>, %96, %cst_78 [1] : vector<8x128xf32> to vector<8xf32>
    %98 = vector.shape_cast %97 : vector<8xf32> to vector<8x1xf32>
    %99 = vector.broadcast %98 : vector<8x1xf32> to vector<8x128xf32>
    %100 = arith.divf %96, %99 : vector<8x128xf32>
    %101 = arith.subf %100, %8 : vector<8x128xf32>
    %cst_79 = arith.constant 2.000000e-01 : f32
    %102 = vector.broadcast %cst_79 : f32 to vector<8x1xf32>
    %103 = arith.mulf %20, %102 : vector<8x1xf32>
    %104 = vector.broadcast %103 : vector<8x1xf32> to vector<8x128xf32>
    %105 = arith.mulf %101, %104 : vector<8x128xf32>
    %cst_80 = arith.constant dense<0.000000e+00> : vector<128x128xf32>
    %106 = tpu.matmul %86, %105, %cst_80 {dimension_numbers = #tpu.dot_dimension_numbers<[0], [0], [1], [1], [0, 1, 1, 1], [], []>} : vector<8x128xf32>, vector<8x128xf32>, vector<128x128xf32> -> vector<128x128xf32>
    %cst_81 = arith.constant dense<0.000000e+00> : vector<128xf32>
    %107 = vector.multi_reduction <add>, %105, %cst_81 [0] : vector<8x128xf32> to vector<128xf32>
    %108 = vector.shape_cast %107 : vector<128xf32> to vector<1x128xf32>
    %cst_82 = arith.constant dense<0.000000e+00> : vector<8x128xf32>
    %109 = tpu.matmul %105, %79, %cst_82 {dimension_numbers = #tpu.dot_dimension_numbers<[1], [1], [0], [0], [0, 0, 1, 0], [], []>} : vector<8x128xf32>, vector<128x128xf32>, vector<8x128xf32> -> vector<8x128xf32>
    %cst_83 = arith.constant 0.000000e+00 : f32
    %110 = vector.broadcast %cst_83 : f32 to vector<8x128xf32>
    %111 = arith.cmpf ogt, %84, %110 : vector<8x128xf32>
    %cst_84 = arith.constant 0.000000e+00 : f32
    %112 = vector.broadcast %cst_84 : f32 to vector<8x128xf32>
    %113 = arith.select %111, %109, %112 : vector<8x128xi1>, vector<8x128xf32>
    %cst_85 = arith.constant dense<0.000000e+00> : vector<768x128xf32>
    %114 = tpu.matmul %3, %113, %cst_85 {dimension_numbers = #tpu.dot_dimension_numbers<[1], [0], [0], [1], [0, 0, 1, 1], [], []>} : vector<768x8xf32>, vector<8x128xf32>, vector<768x128xf32> -> vector<768x128xf32>
    %cst_86 = arith.constant dense<0.000000e+00> : vector<128xf32>
    %115 = vector.multi_reduction <add>, %113, %cst_86 [0] : vector<8x128xf32> to vector<128xf32>
    %116 = vector.shape_cast %115 : vector<128xf32> to vector<1x128xf32>
    %c0_87 = arith.constant 0 : index
    %c0_88 = arith.constant 0 : index
    %117 = vector.load %arg17[%c0_87, %c0_88] : memref<768x128xf32, #tpu.memory_space<vmem>>, vector<768x128xf32>
    %cst_89 = arith.constant 0.00999999977 : f32
    %118 = vector.broadcast %cst_89 : f32 to vector<768x128xf32>
    %119 = arith.mulf %118, %114 : vector<768x128xf32>
    %120 = arith.subf %117, %119 : vector<768x128xf32>
    %c0_90 = arith.constant 0 : index
    %c0_91 = arith.constant 0 : index
    %121 = vector.load %arg17[%c0_90, %c0_91] : memref<768x128xf32, #tpu.memory_space<vmem>>, vector<768x128xf32>
    tpu.vector_store %arg17[%c0_90, %c0_91], %120 {strides = array<i32>} : memref<768x128xf32, #tpu.memory_space<vmem>>, vector<768x128xf32>,
    %cst_92 = arith.constant 0.00999999977 : f32
    %122 = vector.broadcast %cst_92 : f32 to vector<1x128xf32>
    %123 = arith.mulf %122, %116 : vector<1x128xf32>
    %124 = arith.subf %78, %123 : vector<1x128xf32>
    %c0_93 = arith.constant 0 : index
    %c0_94 = arith.constant 0 : index
    %125 = vector.load %arg18[%c0_93, %c0_94] : memref<1x128xf32, #tpu.memory_space<vmem>>, vector<1x128xf32>
    tpu.vector_store %arg18[%c0_93, %c0_94], %124 {strides = array<i32>} : memref<1x128xf32, #tpu.memory_space<vmem>>, vector<1x128xf32>,
    %cst_95 = arith.constant 0.00999999977 : f32
    %126 = vector.broadcast %cst_95 : f32 to vector<128x128xf32>
    %127 = arith.mulf %126, %106 : vector<128x128xf32>
    %128 = arith.subf %79, %127 : vector<128x128xf32>
    %c0_96 = arith.constant 0 : index
    %c0_97 = arith.constant 0 : index
    %129 = vector.load %arg19[%c0_96, %c0_97] : memref<128x128xf32, #tpu.memory_space<vmem>>, vector<128x128xf32>
    tpu.vector_store %arg19[%c0_96, %c0_97], %128 {strides = array<i32>} : memref<128x128xf32, #tpu.memory_space<vmem>>, vector<128x128xf32>,
    %cst_98 = arith.constant 0.00999999977 : f32
    %130 = vector.broadcast %cst_98 : f32 to vector<1x128xf32>
    %131 = arith.mulf %130, %108 : vector<1x128xf32>
    %132 = arith.subf %80, %131 : vector<1x128xf32>
    %c0_99 = arith.constant 0 : index
    %c0_100 = arith.constant 0 : index
    %133 = vector.load %arg20[%c0_99, %c0_100] : memref<1x128xf32, #tpu.memory_space<vmem>>, vector<1x128xf32>
    tpu.vector_store %arg20[%c0_99, %c0_100], %132 {strides = array<i32>} : memref<1x128xf32, #tpu.memory_space<vmem>>, vector<1x128xf32>,
    %c0_101 = arith.constant 0 : index
    %c0_102 = arith.constant 0 : index
    %134 = vector.load %arg18[%c0_101, %c0_102] : memref<1x128xf32, #tpu.memory_space<vmem>>, vector<1x128xf32>
    %c0_103 = arith.constant 0 : index
    %c0_104 = arith.constant 0 : index
    %135 = vector.load %arg19[%c0_103, %c0_104] : memref<128x128xf32, #tpu.memory_space<vmem>>, vector<128x128xf32>
    %c0_105 = arith.constant 0 : index
    %c0_106 = arith.constant 0 : index
    %136 = vector.load %arg20[%c0_105, %c0_106] : memref<1x128xf32, #tpu.memory_space<vmem>>, vector<1x128xf32>
    %c0_107 = arith.constant 0 : index
    %c0_108 = arith.constant 0 : index
    %137 = vector.load %arg17[%c0_107, %c0_108] : memref<768x128xf32, #tpu.memory_space<vmem>>, vector<768x128xf32>
    %cst_109 = arith.constant dense<0.000000e+00> : vector<8x128xf32>
    %138 = tpu.matmul %1, %137, %cst_109 {dimension_numbers = #tpu.dot_dimension_numbers<[1], [0], [0], [1], [0, 0, 1, 1], [], []>} : vector<8x768xf32>, vector<768x128xf32>, vector<8x128xf32> -> vector<8x128xf32>
    %139 = vector.broadcast %134 : vector<1x128xf32> to vector<8x128xf32>
    %140 = arith.addf %138, %139 : vector<8x128xf32>
    %cst_110 = arith.constant 0.000000e+00 : f32
    %141 = vector.broadcast %cst_110 : f32 to vector<8x128xf32>
    %142 = arith.maximumf %140, %141 : vector<8x128xf32>
    %cst_111 = arith.constant dense<0.000000e+00> : vector<8x128xf32>
    %143 = tpu.matmul %142, %135, %cst_111 {dimension_numbers = #tpu.dot_dimension_numbers<[1], [0], [0], [1], [0, 0, 1, 1], [], []>} : vector<8x128xf32>, vector<128x128xf32>, vector<8x128xf32> -> vector<8x128xf32>
    %144 = vector.broadcast %136 : vector<1x128xf32> to vector<8x128xf32>
    %145 = arith.addf %143, %144 : vector<8x128xf32>
    %146 = vector.broadcast %15 : vector<1x128xf32> to vector<8x128xf32>
    %147 = arith.addf %145, %146 : vector<8x128xf32>
    %cst_112 = arith.constant dense<0xFF800000> : vector<8xf32>
    %148 = vector.multi_reduction <maximumf>, %147, %cst_112 [1] : vector<8x128xf32> to vector<8xf32>
    %149 = vector.shape_cast %148 : vector<8xf32> to vector<8x1xf32>
    %150 = vector.broadcast %149 : vector<8x1xf32> to vector<8x128xf32>
    %151 = arith.subf %147, %150 : vector<8x128xf32>
    %152 = math.exp %151 : vector<8x128xf32>
    %cst_113 = arith.constant dense<0.000000e+00> : vector<8xf32>
    %153 = vector.multi_reduction <add>, %152, %cst_113 [1] : vector<8x128xf32> to vector<8xf32>
    %154 = vector.shape_cast %153 : vector<8xf32> to vector<8x1xf32>
    %155 = vector.broadcast %154 : vector<8x1xf32> to vector<8x128xf32>
    %156 = arith.divf %152, %155 : vector<8x128xf32>
    %157 = arith.subf %156, %8 : vector<8x128xf32>
    %cst_114 = arith.constant 2.000000e-01 : f32
    %158 = vector.broadcast %cst_114 : f32 to vector<8x1xf32>
    %159 = arith.mulf %20, %158 : vector<8x1xf32>
    %160 = vector.broadcast %159 : vector<8x1xf32> to vector<8x128xf32>
    %161 = arith.mulf %157, %160 : vector<8x128xf32>
    %cst_115 = arith.constant dense<0.000000e+00> : vector<128x128xf32>
    %162 = tpu.matmul %142, %161, %cst_115 {dimension_numbers = #tpu.dot_dimension_numbers<[0], [0], [1], [1], [0, 1, 1, 1], [], []>} : vector<8x128xf32>, vector<8x128xf32>, vector<128x128xf32> -> vector<128x128xf32>
    %cst_116 = arith.constant dense<0.000000e+00> : vector<128xf32>
    %163 = vector.multi_reduction <add>, %161, %cst_116 [0] : vector<8x128xf32> to vector<128xf32>
    %164 = vector.shape_cast %163 : vector<128xf32> to vector<1x128xf32>
    %cst_117 = arith.constant dense<0.000000e+00> : vector<8x128xf32>
    %165 = tpu.matmul %161, %135, %cst_117 {dimension_numbers = #tpu.dot_dimension_numbers<[1], [1], [0], [0], [0, 0, 1, 0], [], []>} : vector<8x128xf32>, vector<128x128xf32>, vector<8x128xf32> -> vector<8x128xf32>
    %cst_118 = arith.constant 0.000000e+00 : f32
    %166 = vector.broadcast %cst_118 : f32 to vector<8x128xf32>
    %167 = arith.cmpf ogt, %140, %166 : vector<8x128xf32>
    %cst_119 = arith.constant 0.000000e+00 : f32
    %168 = vector.broadcast %cst_119 : f32 to vector<8x128xf32>
    %169 = arith.select %167, %165, %168 : vector<8x128xi1>, vector<8x128xf32>
    %cst_120 = arith.constant dense<0.000000e+00> : vector<768x128xf32>
    %170 = tpu.matmul %3, %169, %cst_120 {dimension_numbers = #tpu.dot_dimension_numbers<[1], [0], [0], [1], [0, 0, 1, 1], [], []>} : vector<768x8xf32>, vector<8x128xf32>, vector<768x128xf32> -> vector<768x128xf32>
    %cst_121 = arith.constant dense<0.000000e+00> : vector<128xf32>
    %171 = vector.multi_reduction <add>, %169, %cst_121 [0] : vector<8x128xf32> to vector<128xf32>
    %172 = vector.shape_cast %171 : vector<128xf32> to vector<1x128xf32>
    %c0_122 = arith.constant 0 : index
    %c0_123 = arith.constant 0 : index
    %173 = vector.load %arg17[%c0_122, %c0_123] : memref<768x128xf32, #tpu.memory_space<vmem>>, vector<768x128xf32>
    %cst_124 = arith.constant 0.00999999977 : f32
    %174 = vector.broadcast %cst_124 : f32 to vector<768x128xf32>
    %175 = arith.mulf %174, %170 : vector<768x128xf32>
    %176 = arith.subf %173, %175 : vector<768x128xf32>
    %c0_125 = arith.constant 0 : index
    %c0_126 = arith.constant 0 : index
    %177 = vector.load %arg17[%c0_125, %c0_126] : memref<768x128xf32, #tpu.memory_space<vmem>>, vector<768x128xf32>
    tpu.vector_store %arg17[%c0_125, %c0_126], %176 {strides = array<i32>} : memref<768x128xf32, #tpu.memory_space<vmem>>, vector<768x128xf32>,
    %cst_127 = arith.constant 0.00999999977 : f32
    %178 = vector.broadcast %cst_127 : f32 to vector<1x128xf32>
    %179 = arith.mulf %178, %172 : vector<1x128xf32>
    %180 = arith.subf %134, %179 : vector<1x128xf32>
    %c0_128 = arith.constant 0 : index
    %c0_129 = arith.constant 0 : index
    %181 = vector.load %arg18[%c0_128, %c0_129] : memref<1x128xf32, #tpu.memory_space<vmem>>, vector<1x128xf32>
    tpu.vector_store %arg18[%c0_128, %c0_129], %180 {strides = array<i32>} : memref<1x128xf32, #tpu.memory_space<vmem>>, vector<1x128xf32>,
    %cst_130 = arith.constant 0.00999999977 : f32
    %182 = vector.broadcast %cst_130 : f32 to vector<128x128xf32>
    %183 = arith.mulf %182, %162 : vector<128x128xf32>
    %184 = arith.subf %135, %183 : vector<128x128xf32>
    %c0_131 = arith.constant 0 : index
    %c0_132 = arith.constant 0 : index
    %185 = vector.load %arg19[%c0_131, %c0_132] : memref<128x128xf32, #tpu.memory_space<vmem>>, vector<128x128xf32>
    tpu.vector_store %arg19[%c0_131, %c0_132], %184 {strides = array<i32>} : memref<128x128xf32, #tpu.memory_space<vmem>>, vector<128x128xf32>,
    %cst_133 = arith.constant 0.00999999977 : f32
    %186 = vector.broadcast %cst_133 : f32 to vector<1x128xf32>
    %187 = arith.mulf %186, %164 : vector<1x128xf32>
    %188 = arith.subf %136, %187 : vector<1x128xf32>
    %c0_134 = arith.constant 0 : index
    %c0_135 = arith.constant 0 : index
    %189 = vector.load %arg20[%c0_134, %c0_135] : memref<1x128xf32, #tpu.memory_space<vmem>>, vector<1x128xf32>
    tpu.vector_store %arg20[%c0_134, %c0_135], %188 {strides = array<i32>} : memref<1x128xf32, #tpu.memory_space<vmem>>, vector<1x128xf32>,
    %c0_136 = arith.constant 0 : index
    %c0_137 = arith.constant 0 : index
    %190 = vector.load %arg19[%c0_136, %c0_137] : memref<128x128xf32, #tpu.memory_space<vmem>>, vector<128x128xf32>
    %c0_138 = arith.constant 0 : index
    %c0_139 = arith.constant 0 : index
    %191 = vector.load %arg17[%c0_138, %c0_139] : memref<768x128xf32, #tpu.memory_space<vmem>>, vector<768x128xf32>
    %cst_140 = arith.constant dense<0.000000e+00> : vector<16x128xf32>
    %192 = tpu.matmul %5, %191, %cst_140 {dimension_numbers = #tpu.dot_dimension_numbers<[1], [0], [0], [1], [0, 0, 1, 1], [], []>} : vector<16x768xf32>, vector<768x128xf32>, vector<16x128xf32> -> vector<16x128xf32>
    %c0_141 = arith.constant 0 : index
    %c0_142 = arith.constant 0 : index
    %193 = vector.load %arg18[%c0_141, %c0_142] : memref<1x128xf32, #tpu.memory_space<vmem>>, vector<1x128xf32>
    %194 = vector.broadcast %193 : vector<1x128xf32> to vector<16x128xf32>
    %195 = arith.addf %192, %194 : vector<16x128xf32>
    %cst_143 = arith.constant 0.000000e+00 : f32
    %196 = vector.broadcast %cst_143 : f32 to vector<16x128xf32>
    %197 = arith.maximumf %195, %196 : vector<16x128xf32>
    %cst_144 = arith.constant dense<0.000000e+00> : vector<16x128xf32>
    %198 = tpu.matmul %197, %190, %cst_144 {dimension_numbers = #tpu.dot_dimension_numbers<[1], [0], [0], [1], [0, 0, 1, 1], [], []>} : vector<16x128xf32>, vector<128x128xf32>, vector<16x128xf32> -> vector<16x128xf32>
    %c0_145 = arith.constant 0 : index
    %c0_146 = arith.constant 0 : index
    %199 = vector.load %arg20[%c0_145, %c0_146] : memref<1x128xf32, #tpu.memory_space<vmem>>, vector<1x128xf32>
    %200 = vector.broadcast %199 : vector<1x128xf32> to vector<16x128xf32>
    %201 = arith.addf %198, %200 : vector<16x128xf32>
    %202 = vector.broadcast %15 : vector<1x128xf32> to vector<16x128xf32>
    %203 = arith.addf %201, %202 : vector<16x128xf32>
    %cst_147 = arith.constant dense<0xFF800000> : vector<16xf32>
    %204 = vector.multi_reduction <maximumf>, %203, %cst_147 [1] : vector<16x128xf32> to vector<16xf32>
    %205 = vector.shape_cast %204 : vector<16xf32> to vector<16x1xf32>
    %206 = vector.broadcast %205 : vector<16x1xf32> to vector<16x128xf32>
    %207 = arith.subf %203, %206 : vector<16x128xf32>
    %208 = math.exp %207 : vector<16x128xf32>
    %cst_148 = arith.constant dense<0.000000e+00> : vector<16xf32>
    %209 = vector.multi_reduction <add>, %208, %cst_148 [1] : vector<16x128xf32> to vector<16xf32>
    %210 = vector.shape_cast %209 : vector<16xf32> to vector<16x1xf32>
    %211 = vector.broadcast %210 : vector<16x1xf32> to vector<16x128xf32>
    %212 = arith.divf %208, %211 : vector<16x128xf32>
    %213 = math.log %210 : vector<16x1xf32>
    %214 = arith.addf %205, %213 : vector<16x1xf32>
    %215 = arith.mulf %203, %9 : vector<16x128xf32>
    %cst_149 = arith.constant dense<0.000000e+00> : vector<16xf32>
    %216 = vector.multi_reduction <add>, %215, %cst_149 [1] : vector<16x128xf32> to vector<16xf32>
    %217 = vector.shape_cast %216 : vector<16xf32> to vector<16x1xf32>
    %218 = arith.subf %214, %217 : vector<16x1xf32>
    %219 = arith.mulf %218, %25 : vector<16x1xf32>
    %220 = vector.shape_cast %219 : vector<16x1xf32> to vector<1x16x1xf32>
    %cst_150 = arith.constant dense<0.000000e+00> : vector<1xf32>
    %221 = vector.multi_reduction <add>, %220, %cst_150 [1, 2] : vector<1x16x1xf32> to vector<1xf32>
    %222 = vector.shape_cast %221 : vector<1xf32> to vector<1x1x1xf32>
    %223 = vector.extract %222[0, 0, 0] : f32 from vector<1x1x1xf32>
    %cst_151 = arith.constant 0.0666666701 : f32
    %224 = arith.mulf %223, %cst_151 : f32
    %225 = tpu.iota {dimensions = array<i32: 1>} : vector<16x128xi32>
    %226 = arith.sitofp %225 : vector<16x128xi32> to vector<16x128xf32>
    %227 = vector.broadcast %205 : vector<16x1xf32> to vector<16x128xf32>
    %228 = arith.cmpf oge, %203, %227 : vector<16x128xf32>
    %cst_152 = arith.constant 1.280000e+02 : f32
    %229 = vector.broadcast %cst_152 : f32 to vector<16x128xf32>
    %230 = arith.select %228, %226, %229 : vector<16x128xi1>, vector<16x128xf32>
    %cst_153 = arith.constant dense<0x7F800000> : vector<16xf32>
    %231 = vector.multi_reduction <minimumf>, %230, %cst_153 [1] : vector<16x128xf32> to vector<16xf32>
    %232 = vector.shape_cast %231 : vector<16xf32> to vector<16x1xf32>
    %233 = arith.mulf %226, %9 : vector<16x128xf32>
    %cst_154 = arith.constant dense<0.000000e+00> : vector<16xf32>
    %234 = vector.multi_reduction <add>, %233, %cst_154 [1] : vector<16x128xf32> to vector<16xf32>
    %235 = vector.shape_cast %234 : vector<16xf32> to vector<16x1xf32>
    %236 = arith.cmpf oeq, %232, %235 : vector<16x1xf32>
    %237 = arith.extui %236 : vector<16x1xi1> to vector<16x1xi32>
    %238 = arith.sitofp %237 : vector<16x1xi32> to vector<16x1xf32>
    %239 = arith.mulf %238, %25 : vector<16x1xf32>
    %240 = vector.shape_cast %239 : vector<16x1xf32> to vector<1x16x1xf32>
    %cst_155 = arith.constant dense<0.000000e+00> : vector<1xf32>
    %241 = vector.multi_reduction <add>, %240, %cst_155 [1, 2] : vector<1x16x1xf32> to vector<1xf32>
    %242 = vector.shape_cast %241 : vector<1xf32> to vector<1x1x1xf32>
    %243 = vector.extract %242[0, 0, 0] : f32 from vector<1x1x1xf32>
    %cst_156 = arith.constant 0.0666666701 : f32
    %244 = arith.mulf %243, %cst_156 : f32
    %245 = arith.subf %212, %9 : vector<16x128xf32>
    %cst_157 = arith.constant 0.0666666701 : f32
    %246 = vector.broadcast %cst_157 : f32 to vector<16x1xf32>
    %247 = arith.mulf %25, %246 : vector<16x1xf32>
    %248 = vector.broadcast %247 : vector<16x1xf32> to vector<16x128xf32>
    %249 = arith.mulf %245, %248 : vector<16x128xf32>
    %cst_158 = arith.constant dense<0.000000e+00> : vector<128x128xf32>
    %250 = tpu.matmul %197, %249, %cst_158 {dimension_numbers = #tpu.dot_dimension_numbers<[0], [0], [1], [1], [0, 1, 1, 1], [], []>} : vector<16x128xf32>, vector<16x128xf32>, vector<128x128xf32> -> vector<128x128xf32>
    %cst_159 = arith.constant dense<0.000000e+00> : vector<128xf32>
    %251 = vector.multi_reduction <add>, %249, %cst_159 [0] : vector<16x128xf32> to vector<128xf32>
    %252 = vector.shape_cast %251 : vector<128xf32> to vector<1x128xf32>
    %cst_160 = arith.constant dense<0.000000e+00> : vector<16x128xf32>
    %253 = tpu.matmul %249, %190, %cst_160 {dimension_numbers = #tpu.dot_dimension_numbers<[1], [1], [0], [0], [0, 0, 1, 0], [], []>} : vector<16x128xf32>, vector<128x128xf32>, vector<16x128xf32> -> vector<16x128xf32>
    %cst_161 = arith.constant 0.000000e+00 : f32
    %254 = vector.broadcast %cst_161 : f32 to vector<16x128xf32>
    %255 = arith.cmpf ogt, %195, %254 : vector<16x128xf32>
    %cst_162 = arith.constant 0.000000e+00 : f32
    %256 = vector.broadcast %cst_162 : f32 to vector<16x128xf32>
    %257 = arith.select %255, %253, %256 : vector<16x128xi1>, vector<16x128xf32>
    %cst_163 = arith.constant dense<0.000000e+00> : vector<768x128xf32>
    %258 = tpu.matmul %7, %257, %cst_163 {dimension_numbers = #tpu.dot_dimension_numbers<[1], [0], [0], [1], [0, 0, 1, 1], [], []>} : vector<768x16xf32>, vector<16x128xf32>, vector<768x128xf32> -> vector<768x128xf32>
    %cst_164 = arith.constant dense<0.000000e+00> : vector<128xf32>
    %259 = vector.multi_reduction <add>, %257, %cst_164 [0] : vector<16x128xf32> to vector<128xf32>
    %260 = vector.shape_cast %259 : vector<128xf32> to vector<1x128xf32>
    %c0_165 = arith.constant 0 : index
    %c0_166 = arith.constant 0 : index
    %c0_167 = arith.constant 0 : index
    %261 = vector.load %arg13[%c0_165, %c0_166, %c0_167] : memref<1x768x128xf32, #tpu.memory_space<vmem>>, vector<1x768x128xf32>
    %262 = vector.shape_cast %261 : vector<1x768x128xf32> to vector<768x128xf32>
    %263 = vector.shape_cast %258 : vector<768x128xf32> to vector<1x768x128xf32>
    tpu.vector_store %arg13[%c0_165, %c0_166, %c0_167], %263 {strides = array<i32>} : memref<1x768x128xf32, #tpu.memory_space<vmem>>, vector<1x768x128xf32>,
    %c0_168 = arith.constant 0 : index
    %c0_169 = arith.constant 0 : index
    %c0_170 = arith.constant 0 : index
    %264 = vector.load %arg14[%c0_168, %c0_169, %c0_170] : memref<1x1x128xf32, #tpu.memory_space<vmem>>, vector<1x1x128xf32>
    %265 = vector.shape_cast %264 : vector<1x1x128xf32> to vector<1x128xf32>
    %266 = vector.shape_cast %260 : vector<1x128xf32> to vector<1x1x128xf32>
    tpu.vector_store %arg14[%c0_168, %c0_169, %c0_170], %266 {strides = array<i32>} : memref<1x1x128xf32, #tpu.memory_space<vmem>>, vector<1x1x128xf32>,
    %c0_171 = arith.constant 0 : index
    %c0_172 = arith.constant 0 : index
    %c0_173 = arith.constant 0 : index
    %267 = vector.load %arg15[%c0_171, %c0_172, %c0_173] : memref<1x128x128xf32, #tpu.memory_space<vmem>>, vector<1x128x128xf32>
    %268 = vector.shape_cast %267 : vector<1x128x128xf32> to vector<128x128xf32>
    %269 = vector.shape_cast %250 : vector<128x128xf32> to vector<1x128x128xf32>
    tpu.vector_store %arg15[%c0_171, %c0_172, %c0_173], %269 {strides = array<i32>} : memref<1x128x128xf32, #tpu.memory_space<vmem>>, vector<1x128x128xf32>,
    %c0_174 = arith.constant 0 : index
    %c0_175 = arith.constant 0 : index
    %c0_176 = arith.constant 0 : index
    %270 = vector.load %arg16[%c0_174, %c0_175, %c0_176] : memref<1x1x128xf32, #tpu.memory_space<vmem>>, vector<1x1x128xf32>
    %271 = vector.shape_cast %270 : vector<1x1x128xf32> to vector<1x128xf32>
    %272 = vector.shape_cast %252 : vector<1x128xf32> to vector<1x1x128xf32>
    tpu.vector_store %arg16[%c0_174, %c0_175, %c0_176], %272 {strides = array<i32>} : memref<1x1x128xf32, #tpu.memory_space<vmem>>, vector<1x1x128xf32>,
    %c0_177 = arith.constant 0 : index
    %c0_178 = arith.constant 0 : index
    %273 = vector.load %arg17[%c0_177, %c0_178] : memref<768x128xf32, #tpu.memory_space<vmem>>, vector<768x128xf32>
    %c0_179 = arith.constant 0 : index
    %c0_180 = arith.constant 0 : index
    %274 = vector.load %arg17[%c0_179, %c0_180] : memref<768x128xf32, #tpu.memory_space<vmem>>, vector<768x128xf32>
    %275 = arith.mulf %273, %274 : vector<768x128xf32>
    %276 = vector.shape_cast %275 : vector<768x128xf32> to vector<1x768x128xf32>
    %cst_181 = arith.constant dense<0.000000e+00> : vector<1xf32>
    %277 = vector.multi_reduction <add>, %276, %cst_181 [1, 2] : vector<1x768x128xf32> to vector<1xf32>
    %278 = vector.shape_cast %277 : vector<1xf32> to vector<1x1x1xf32>
    %279 = vector.extract %278[0, 0, 0] : f32 from vector<1x1x1xf32>
    %c0_182 = arith.constant 0 : index
    %c0_183 = arith.constant 0 : index
    %280 = vector.load %arg18[%c0_182, %c0_183] : memref<1x128xf32, #tpu.memory_space<vmem>>, vector<1x128xf32>
    %c0_184 = arith.constant 0 : index
    %c0_185 = arith.constant 0 : index
    %281 = vector.load %arg18[%c0_184, %c0_185] : memref<1x128xf32, #tpu.memory_space<vmem>>, vector<1x128xf32>
    %282 = arith.mulf %280, %281 : vector<1x128xf32>
    %283 = vector.shape_cast %282 : vector<1x128xf32> to vector<1x1x128xf32>
    %cst_186 = arith.constant dense<0.000000e+00> : vector<1xf32>
    %284 = vector.multi_reduction <add>, %283, %cst_186 [1, 2] : vector<1x1x128xf32> to vector<1xf32>
    %285 = vector.shape_cast %284 : vector<1xf32> to vector<1x1x1xf32>
    %286 = vector.extract %285[0, 0, 0] : f32 from vector<1x1x1xf32>
    %287 = arith.addf %279, %286 : f32
    %288 = arith.mulf %190, %190 : vector<128x128xf32>
    %289 = vector.shape_cast %288 : vector<128x128xf32> to vector<1x128x128xf32>
    %cst_187 = arith.constant dense<0.000000e+00> : vector<1xf32>
    %290 = vector.multi_reduction <add>, %289, %cst_187 [1, 2] : vector<1x128x128xf32> to vector<1xf32>
    %291 = vector.shape_cast %290 : vector<1xf32> to vector<1x1x1xf32>
    %292 = vector.extract %291[0, 0, 0] : f32 from vector<1x1x1xf32>
    %293 = arith.addf %287, %292 : f32
    %c0_188 = arith.constant 0 : index
    %c0_189 = arith.constant 0 : index
    %294 = vector.load %arg20[%c0_188, %c0_189] : memref<1x128xf32, #tpu.memory_space<vmem>>, vector<1x128xf32>
    %c0_190 = arith.constant 0 : index
    %c0_191 = arith.constant 0 : index
    %295 = vector.load %arg20[%c0_190, %c0_191] : memref<1x128xf32, #tpu.memory_space<vmem>>, vector<1x128xf32>
    %296 = arith.mulf %294, %295 : vector<1x128xf32>
    %297 = vector.shape_cast %296 : vector<1x128xf32> to vector<1x1x128xf32>
    %cst_192 = arith.constant dense<0.000000e+00> : vector<1xf32>
    %298 = vector.multi_reduction <add>, %297, %cst_192 [1, 2] : vector<1x1x128xf32> to vector<1xf32>
    %299 = vector.shape_cast %298 : vector<1xf32> to vector<1x1x1xf32>
    %300 = vector.extract %299[0, 0, 0] : f32 from vector<1x1x1xf32>
    %301 = arith.addf %293, %300 : f32
    %302 = tpu.iota {dimensions = array<i32: 1>} : vector<8x128xi32>
    %c0_i32 = arith.constant 0 : i32
    %303 = vector.broadcast %c0_i32 : i32 to vector<8x128xi32>
    %304 = arith.cmpi eq, %302, %303 : vector<8x128xi32>
    %cst_193 = arith.constant 0.000000e+00 : f32
    %305 = vector.broadcast %224 : f32 to vector<8x128xf32>
    %306 = vector.broadcast %cst_193 : f32 to vector<8x128xf32>
    %307 = arith.select %304, %305, %306 : vector<8x128xi1>, vector<8x128xf32>
    %c1_i32 = arith.constant 1 : i32
    %308 = vector.broadcast %c1_i32 : i32 to vector<8x128xi32>
    %309 = arith.cmpi eq, %302, %308 : vector<8x128xi32>
    %310 = vector.broadcast %244 : f32 to vector<8x128xf32>
    %311 = arith.select %309, %310, %307 : vector<8x128xi1>, vector<8x128xf32>
    %c2_i32 = arith.constant 2 : i32
    %312 = vector.broadcast %c2_i32 : i32 to vector<8x128xi32>
    %313 = arith.cmpi eq, %302, %312 : vector<8x128xi32>
    %314 = vector.broadcast %301 : f32 to vector<8x128xf32>
    %315 = arith.select %313, %314, %311 : vector<8x128xi1>, vector<8x128xf32>
    %c0_194 = arith.constant 0 : index
    %c0_195 = arith.constant 0 : index
    %c0_196 = arith.constant 0 : index
    %316 = vector.load %arg8[%c0_194, %c0_195, %c0_196] : memref<2x768x128xf32, #tpu.memory_space<vmem>>, vector<1x768x128xf32>
    %317 = vector.shape_cast %316 : vector<1x768x128xf32> to vector<768x128xf32>
    %c0_197 = arith.constant 0 : index
    %c0_198 = arith.constant 0 : index
    %318 = vector.load %arg17[%c0_197, %c0_198] : memref<768x128xf32, #tpu.memory_space<vmem>>, vector<768x128xf32>
    %319 = arith.mulf %317, %318 : vector<768x128xf32>
    %320 = vector.shape_cast %319 : vector<768x128xf32> to vector<1x768x128xf32>
    %cst_199 = arith.constant dense<0.000000e+00> : vector<1xf32>
    %321 = vector.multi_reduction <add>, %320, %cst_199 [1, 2] : vector<1x768x128xf32> to vector<1xf32>
    %322 = vector.shape_cast %321 : vector<1xf32> to vector<1x1x1xf32>
    %323 = vector.extract %322[0, 0, 0] : f32 from vector<1x1x1xf32>
    %c0_200 = arith.constant 0 : index
    %c0_201 = arith.constant 0 : index
    %c0_202 = arith.constant 0 : index
    %324 = vector.load %arg9[%c0_200, %c0_201, %c0_202] : memref<2x1x128xf32, #tpu.memory_space<vmem>>, vector<1x1x128xf32>
    %325 = vector.shape_cast %324 : vector<1x1x128xf32> to vector<1x128xf32>
    %c0_203 = arith.constant 0 : index
    %c0_204 = arith.constant 0 : index
    %326 = vector.load %arg18[%c0_203, %c0_204] : memref<1x128xf32, #tpu.memory_space<vmem>>, vector<1x128xf32>
    %327 = arith.mulf %325, %326 : vector<1x128xf32>
    %328 = vector.shape_cast %327 : vector<1x128xf32> to vector<1x1x128xf32>
    %cst_205 = arith.constant dense<0.000000e+00> : vector<1xf32>
    %329 = vector.multi_reduction <add>, %328, %cst_205 [1, 2] : vector<1x1x128xf32> to vector<1xf32>
    %330 = vector.shape_cast %329 : vector<1xf32> to vector<1x1x1xf32>
    %331 = vector.extract %330[0, 0, 0] : f32 from vector<1x1x1xf32>
    %332 = arith.addf %323, %331 : f32
    %c0_206 = arith.constant 0 : index
    %c0_207 = arith.constant 0 : index
    %c0_208 = arith.constant 0 : index
    %333 = vector.load %arg10[%c0_206, %c0_207, %c0_208] : memref<2x128x128xf32, #tpu.memory_space<vmem>>, vector<1x128x128xf32>
    %334 = vector.shape_cast %333 : vector<1x128x128xf32> to vector<128x128xf32>
    %335 = arith.mulf %334, %190 : vector<128x128xf32>
    %336 = vector.shape_cast %335 : vector<128x128xf32> to vector<1x128x128xf32>
    %cst_209 = arith.constant dense<0.000000e+00> : vector<1xf32>
    %337 = vector.multi_reduction <add>, %336, %cst_209 [1, 2] : vector<1x128x128xf32> to vector<1xf32>
    %338 = vector.shape_cast %337 : vector<1xf32> to vector<1x1x1xf32>
    %339 = vector.extract %338[0, 0, 0] : f32 from vector<1x1x1xf32>
    %340 = arith.addf %332, %339 : f32
    %c0_210 = arith.constant 0 : index
    %c0_211 = arith.constant 0 : index
    %c0_212 = arith.constant 0 : index
    %341 = vector.load %arg11[%c0_210, %c0_211, %c0_212] : memref<2x1x128xf32, #tpu.memory_space<vmem>>, vector<1x1x128xf32>
    %342 = vector.shape_cast %341 : vector<1x1x128xf32> to vector<1x128xf32>
    %c0_213 = arith.constant 0 : index
    %c0_214 = arith.constant 0 : index
    %343 = vector.load %arg20[%c0_213, %c0_214] : memref<1x128xf32, #tpu.memory_space<vmem>>, vector<1x128xf32>
    %344 = arith.mulf %342, %343 : vector<1x128xf32>
    %345 = vector.shape_cast %344 : vector<1x128xf32> to vector<1x1x128xf32>
    %cst_215 = arith.constant dense<0.000000e+00> : vector<1xf32>
    %346 = vector.multi_reduction <add>, %345, %cst_215 [1, 2] : vector<1x1x128xf32> to vector<1xf32>
    %347 = vector.shape_cast %346 : vector<1xf32> to vector<1x1x1xf32>
    %348 = vector.extract %347[0, 0, 0] : f32 from vector<1x1x1xf32>
    %349 = arith.addf %340, %348 : f32
    %c3_i32 = arith.constant 3 : i32
    %350 = vector.broadcast %c3_i32 : i32 to vector<8x128xi32>
    %351 = arith.cmpi eq, %302, %350 : vector<8x128xi32>
    %352 = vector.broadcast %349 : f32 to vector<8x128xf32>
    %353 = arith.select %351, %352, %315 : vector<8x128xi1>, vector<8x128xf32>
    %c1_216 = arith.constant 1 : index
    %c0_217 = arith.constant 0 : index
    %c0_218 = arith.constant 0 : index
    %354 = vector.load %arg8[%c1_216, %c0_217, %c0_218] : memref<2x768x128xf32, #tpu.memory_space<vmem>>, vector<1x768x128xf32>
    %355 = vector.shape_cast %354 : vector<1x768x128xf32> to vector<768x128xf32>
    %c0_219 = arith.constant 0 : index
    %c0_220 = arith.constant 0 : index
    %356 = vector.load %arg17[%c0_219, %c0_220] : memref<768x128xf32, #tpu.memory_space<vmem>>, vector<768x128xf32>
    %357 = arith.mulf %355, %356 : vector<768x128xf32>
    %358 = vector.shape_cast %357 : vector<768x128xf32> to vector<1x768x128xf32>
    %cst_221 = arith.constant dense<0.000000e+00> : vector<1xf32>
    %359 = vector.multi_reduction <add>, %358, %cst_221 [1, 2] : vector<1x768x128xf32> to vector<1xf32>
    %360 = vector.shape_cast %359 : vector<1xf32> to vector<1x1x1xf32>
    %361 = vector.extract %360[0, 0, 0] : f32 from vector<1x1x1xf32>
    %c1_222 = arith.constant 1 : index
    %c0_223 = arith.constant 0 : index
    %c0_224 = arith.constant 0 : index
    %362 = vector.load %arg9[%c1_222, %c0_223, %c0_224] : memref<2x1x128xf32, #tpu.memory_space<vmem>>, vector<1x1x128xf32>
    %363 = vector.shape_cast %362 : vector<1x1x128xf32> to vector<1x128xf32>
    %c0_225 = arith.constant 0 : index
    %c0_226 = arith.constant 0 : index
    %364 = vector.load %arg18[%c0_225, %c0_226] : memref<1x128xf32, #tpu.memory_space<vmem>>, vector<1x128xf32>
    %365 = arith.mulf %363, %364 : vector<1x128xf32>
    %366 = vector.shape_cast %365 : vector<1x128xf32> to vector<1x1x128xf32>
    %cst_227 = arith.constant dense<0.000000e+00> : vector<1xf32>
    %367 = vector.multi_reduction <add>, %366, %cst_227 [1, 2] : vector<1x1x128xf32> to vector<1xf32>
    %368 = vector.shape_cast %367 : vector<1xf32> to vector<1x1x1xf32>
    %369 = vector.extract %368[0, 0, 0] : f32 from vector<1x1x1xf32>
    %370 = arith.addf %361, %369 : f32
    %c1_228 = arith.constant 1 : index
    %c0_229 = arith.constant 0 : index
    %c0_230 = arith.constant 0 : index
    %371 = vector.load %arg10[%c1_228, %c0_229, %c0_230] : memref<2x128x128xf32, #tpu.memory_space<vmem>>, vector<1x128x128xf32>
    %372 = vector.shape_cast %371 : vector<1x128x128xf32> to vector<128x128xf32>
    %373 = arith.mulf %372, %190 : vector<128x128xf32>
    %374 = vector.shape_cast %373 : vector<128x128xf32> to vector<1x128x128xf32>
    %cst_231 = arith.constant dense<0.000000e+00> : vector<1xf32>
    %375 = vector.multi_reduction <add>, %374, %cst_231 [1, 2] : vector<1x128x128xf32> to vector<1xf32>
    %376 = vector.shape_cast %375 : vector<1xf32> to vector<1x1x1xf32>
    %377 = vector.extract %376[0, 0, 0] : f32 from vector<1x1x1xf32>
    %378 = arith.addf %370, %377 : f32
    %c1_232 = arith.constant 1 : index
    %c0_233 = arith.constant 0 : index
    %c0_234 = arith.constant 0 : index
    %379 = vector.load %arg11[%c1_232, %c0_233, %c0_234] : memref<2x1x128xf32, #tpu.memory_space<vmem>>, vector<1x1x128xf32>
    %380 = vector.shape_cast %379 : vector<1x1x128xf32> to vector<1x128xf32>
    %c0_235 = arith.constant 0 : index
    %c0_236 = arith.constant 0 : index
    %381 = vector.load %arg20[%c0_235, %c0_236] : memref<1x128xf32, #tpu.memory_space<vmem>>, vector<1x128xf32>
    %382 = arith.mulf %380, %381 : vector<1x128xf32>
    %383 = vector.shape_cast %382 : vector<1x128xf32> to vector<1x1x128xf32>
    %cst_237 = arith.constant dense<0.000000e+00> : vector<1xf32>
    %384 = vector.multi_reduction <add>, %383, %cst_237 [1, 2] : vector<1x1x128xf32> to vector<1xf32>
    %385 = vector.shape_cast %384 : vector<1xf32> to vector<1x1x1xf32>
    %386 = vector.extract %385[0, 0, 0] : f32 from vector<1x1x1xf32>
    %387 = arith.addf %378, %386 : f32
    %c4_i32 = arith.constant 4 : i32
    %388 = vector.broadcast %c4_i32 : i32 to vector<8x128xi32>
    %389 = arith.cmpi eq, %302, %388 : vector<8x128xi32>
    %390 = vector.broadcast %387 : f32 to vector<8x128xf32>
    %391 = arith.select %389, %390, %353 : vector<8x128xi1>, vector<8x128xf32>
    %c0_238 = arith.constant 0 : index
    %c0_239 = arith.constant 0 : index
    %c0_240 = arith.constant 0 : index
    %392 = vector.load %arg12[%c0_238, %c0_239, %c0_240] : memref<1x8x128xf32, #tpu.memory_space<vmem>>, vector<1x8x128xf32>
    %393 = vector.shape_cast %392 : vector<1x8x128xf32> to vector<8x128xf32>
    %394 = vector.shape_cast %391 : vector<8x128xf32> to vector<1x8x128xf32>
    tpu.vector_store %arg12[%c0_238, %c0_239, %c0_240], %394 {strides = array<i32>} : memref<1x8x128xf32, #tpu.memory_space<vmem>>, vector<1x8x128xf32>,
    return
  }
  func.func @transform_0(%arg0: i32) -> (i32, i32) {
    %c0_i32 = arith.constant 0 : i32
    %c0_i32_0 = arith.constant 0 : i32
    %c0_i32_1 = arith.constant 0 : i32
    return %c0_i32, %c0_i32_0 : i32, i32
  }
  func.func @transform_1(%arg0: i32) -> (i32, i32, i32) {
    %c0_i32 = arith.constant 0 : i32
    %c0_i32_0 = arith.constant 0 : i32
    %c0_i32_1 = arith.constant 0 : i32
    return %arg0, %c0_i32, %c0_i32_0 : i32, i32, i32
  }
  func.func @transform_2(%arg0: i32) -> (i32, i32, i32) {
    %c0_i32 = arith.constant 0 : i32
    %c0_i32_0 = arith.constant 0 : i32
    %c0_i32_1 = arith.constant 0 : i32
    return %arg0, %c0_i32, %c0_i32_0 : i32, i32, i32
  }
  func.func @transform_3(%arg0: i32) -> (i32, i32, i32) {
    %c0_i32 = arith.constant 0 : i32
    %c0_i32_0 = arith.constant 0 : i32
    %c0_i32_1 = arith.constant 0 : i32
    return %arg0, %c0_i32, %c0_i32_0 : i32, i32, i32
  }
  func.func @transform_4(%arg0: i32) -> (i32, i32, i32) {
    %c0_i32 = arith.constant 0 : i32
    %c0_i32_0 = arith.constant 0 : i32
    %c0_i32_1 = arith.constant 0 : i32
    return %arg0, %c0_i32, %c0_i32_0 : i32, i32, i32
  }
  func.func @transform_5(%arg0: i32) -> (i32, i32) {
    %c0_i32 = arith.constant 0 : i32
    %c0_i32_0 = arith.constant 0 : i32
    %c0_i32_1 = arith.constant 0 : i32
    return %c0_i32, %c0_i32_0 : i32, i32
  }
  func.func @transform_6(%arg0: i32) -> (i32, i32) {
    %c0_i32 = arith.constant 0 : i32
    %c0_i32_0 = arith.constant 0 : i32
    %c0_i32_1 = arith.constant 0 : i32
    return %c0_i32, %c0_i32_0 : i32, i32
  }
  func.func @transform_7(%arg0: i32) -> (i32, i32, i32) {
    %c0_i32 = arith.constant 0 : i32
    %c0_i32_0 = arith.constant 0 : i32
    %c0_i32_1 = arith.constant 0 : i32
    %c0_i32_2 = arith.constant 0 : i32
    return %c0_i32, %c0_i32_0, %c0_i32_1 : i32, i32, i32
  }
  func.func @transform_8(%arg0: i32) -> (i32, i32, i32) {
    %c0_i32 = arith.constant 0 : i32
    %c0_i32_0 = arith.constant 0 : i32
    %c0_i32_1 = arith.constant 0 : i32
    %c0_i32_2 = arith.constant 0 : i32
    return %c0_i32, %c0_i32_0, %c0_i32_1 : i32, i32, i32
  }
  func.func @transform_9(%arg0: i32) -> (i32, i32, i32) {
    %c0_i32 = arith.constant 0 : i32
    %c0_i32_0 = arith.constant 0 : i32
    %c0_i32_1 = arith.constant 0 : i32
    %c0_i32_2 = arith.constant 0 : i32
    return %c0_i32, %c0_i32_0, %c0_i32_1 : i32, i32, i32
  }
  func.func @transform_10(%arg0: i32) -> (i32, i32, i32) {
    %c0_i32 = arith.constant 0 : i32
    %c0_i32_0 = arith.constant 0 : i32
    %c0_i32_1 = arith.constant 0 : i32
    %c0_i32_2 = arith.constant 0 : i32
    return %c0_i32, %c0_i32_0, %c0_i32_1 : i32, i32, i32
  }
  func.func @transform_11(%arg0: i32) -> (i32, i32, i32) {
    %c0_i32 = arith.constant 0 : i32
    %c0_i32_0 = arith.constant 0 : i32
    %c0_i32_1 = arith.constant 0 : i32
    return %arg0, %c0_i32, %c0_i32_0 : i32, i32, i32
  }
  func.func @transform_12(%arg0: i32) -> (i32, i32, i32) {
    %c0_i32 = arith.constant 0 : i32
    %c0_i32_0 = arith.constant 0 : i32
    %c0_i32_1 = arith.constant 0 : i32
    return %arg0, %c0_i32, %c0_i32_0 : i32, i32, i32
  }
  func.func @transform_13(%arg0: i32) -> (i32, i32, i32) {
    %c0_i32 = arith.constant 0 : i32
    %c0_i32_0 = arith.constant 0 : i32
    %c0_i32_1 = arith.constant 0 : i32
    return %arg0, %c0_i32, %c0_i32_0 : i32, i32, i32
  }
  func.func @transform_14(%arg0: i32) -> (i32, i32, i32) {
    %c0_i32 = arith.constant 0 : i32
    %c0_i32_0 = arith.constant 0 : i32
    %c0_i32_1 = arith.constant 0 : i32
    return %arg0, %c0_i32, %c0_i32_0 : i32, i32, i32
  }
  func.func @transform_15(%arg0: i32) -> (i32, i32, i32) {
    %c0_i32 = arith.constant 0 : i32
    %c0_i32_0 = arith.constant 0 : i32
    %c0_i32_1 = arith.constant 0 : i32
    return %arg0, %c0_i32, %c0_i32_0 : i32, i32, i32
  }
}

</mosaic_0001>

<bundles_post_ra>
// kernel: eq.30
= control target key start
LH: loop header
LB: loop body
LE: loop exit
PB: predicated region body
PF: predicated region fallthrough
CT: control target
= control target key end

     0   :  { %s43_s10 = smov 12   ;;  %s44_s11 = smov 6   ;;  %vm3_vm0 = vcmask 23552   ;;  %vm9_vm1 = vcmask 121952   ;;  %vm15_vm2 = vcmask 97352   ;;  %vm21_vm3 = vcmask 72752   ;;  %s75_s0 = inlined_call_operand.vmem [shape: s32[5,3], index: 0, kind: input, shape index: {}]   ;;  %s76_s1 = inlined_call_operand.vmem [shape: s32[15], index: 1, kind: output, shape index: {}]  }
   0x1   :  { %v35_v0 = vld [vmem:[%s75_s0 + $0x4] sm:$0x1]   ;;  %v37_v1 = vld [vmem:[%s75_s0 + $0x2] sm:$0x1]   ;;  %v36_v2 = vld [vmem:[%s75_s0 + $0x3] sm:$0x1]  }
   0x2   :  { %7 = vrot.lane.b32.xlu0 %v35_v0, %s43_s10  ;;  %19 = vrot.lane.b32.xlu1 %v37_v1, %s44_s11  ;;  %v38_v3 = vld [vmem:[%s75_s0 + $0x1] sm:$0x1]   ;;  %v2_v4 = vld [vmem:[%s75_s0] sm:$0x1]   ;;  %s45_s0 = smov 9   ;;  %s46_s18 = smov 3  }
   0x3   :  { %4 = vst.msk [vmem:[#allocation0] sm:$0x1] %vm3_vm0, %v2_v4   ;;  %vm27_vm4 = vcmask 48152  }
   0x6   :  { %13 = vrot.lane.b32.xlu0 %v36_v2, %s45_s0  ;;  %25 = vrot.lane.b32.xlu1 %v38_v3, %s46_s18 }
  0x74   :  { %v8_v5 = vpop.permute.xlu0 %7   ;;  %v20_v6 = vpop.permute.xlu1 %19  }
  0x75   :  { %10 = vst.msk [vmem:[#allocation0] sm:$0x1] %vm9_vm1, %v8_v5  }
  0x78   :  { %v14_v7 = vpop.permute.xlu0 %13   ;;  %v26_v8 = vpop.permute.xlu1 %25  }
  0x79   :  { %16 = vst.msk [vmem:[#allocation0] sm:$0x1] %vm15_vm2, %v14_v7  }
  0x7a   :  { %22 = vst.msk [vmem:[#allocation0] sm:$0x1] %vm21_vm3, %v20_v6  }
  0x7b   :  { %28 = vst.msk [vmem:[#allocation0] sm:$0x1] %vm27_vm4, %v26_v8  }
  0x82   :  { %v32_v9 = vld [vmem:[#allocation0] sm:$0x1] }
  0x83   :  { %34 = vst [vmem:[%s76_s1] sm:$0x1] %v32_v9 }

// kernel: custom-call.8
= control target key start
LH: loop header
LB: loop body
LE: loop exit
PB: predicated region body
PF: predicated region fallthrough
CT: control target
= control target key end

     0   :  { %5 = vsyncpa [#allocation6], 0  ;;  %v75_v1 = vlaneseq  ;;  %v526_v2 = vmov 0   ;;  %s555_s14 = smov 0   ;;  %s605_s0 = inlined_call_operand.vmem [shape: f32[2,2], index: 0, kind: input, shape index: {}]   ;;  %s606_s1 = inlined_call_operand.vmem [shape: f32[2,2], index: 1, kind: output, shape index: {0}]   ;;  %s607_s2 = inlined_call_operand.hbm [shape: s32[2], index: 2, kind: output, shape index: {1}]   ;;  %s608_s3 = inlined_call_operand.vmem [shape: s32[2], index: 3, kind: output, shape index: {2}]  }
   0x1   :  { %v66_v0 = vld [vmem:[%s605_s0] sm:$0x3]  ;;  %74 = vst [vmem:[#allocation4] sm:$0x1] %v526_v2 }
   0x2   :  { %67 = vst [vmem:[#allocation1] sm:$0x3] %v66_v0  ;;  %v552_v3 = vshrl.u32 %v75_v1, 7 }
   0x4   :  { %79 = vst [vmem:[#allocation9] sm:$0xff] %v552_v3 }
   0x9   :  { %v70_v4 = vld [vmem:[#allocation1] sm:$0x3] }
   0xa   :  { %71 = vst [vmem:[#allocation0] sm:$0x3] %v70_v4 }
  0x11   :  { %v72_v5 = vld [vmem:[#allocation0] sm:$0xff] }
  0x12   :  { %73 = vst [vmem:[#allocation2] sm:$0xff] %v72_v5 }
  0x13 LB: > { %vm95_vm0 = vcmp.lt.s32.totalorder %v552_v3, 2  ;;  %v562_v8 = vstv %s524_s14  ;;  %s136_s0 = ssub.s32 128, %s524_s14  ;;  %v142_v38 = vand.u32 127, %v75_v1  ;;  %v145_v40 = vld [vmem:[#allocation4] ss:$0 sm:$0xff]  ;;  %s148_s15 = scalar_lea.vmem [#allocation2], %s524_s14  ;;  %s524_s14 = sphi %s555_s14, %s85_s14  }
  0x14   : > { %vm94_vm1 = vcmp.ge.s32.totalorder %v552_v3, %v562_v8  ;;  %s154_s17 = scalar_lea.vmem [#allocation9], %s524_s14  ;;  %vm174_vm15 = vcmp.gt.s32.totalorder %v552_v3, %v562_v8  ;;  %s85_s14 = sadd.s32 1, %s524_s14  }
  0x15   : > { %vm96_vm3 = vmand %vm94_vm1, %vm95_vm0  ;;  %vm166_vm12 = vcmp.gt.s32.totalorder %v142_v38, %v562_v8  ;;  %vm143_vm13 = vcmp.eq.s32.totalorder %v142_v38, %v562_v8  ;;  %v156_v42 = vld [vmem:[%s154_s17] ss:$0 sm:$0xff]  ;;  %p82_p0 = scmp.ge.s32.totalorder %s85_s14, 2  }
  0x16   : > { %vm178_vm1 = vmand %vm174_vm15, %vm143_vm13  ;;  %s527_s20 = smov (%p82_p0), [#allocation5]  }
  0x17   :  { %s319_s21 = sshll.u32 (%p82_p0), %s527_s20, 4  ;;  %s320_s21 = int_to_ptr.vmem [resolvable:$true] %s319_s21 }
  0x18   :  { %s494_s24 = scalar_lea.vmem (%p82_p0), %s320_s21, 16  ;;  %s498_s25 = scalar_lea.vmem (%p82_p0), %s320_s21, 32 }
  0x19   : > { %v90_v6 = vld [vmem:[#allocation2] sm:$0xff]  ;;  %v150_v41 = vld [vmem:[%s148_s15] ss:$0 sm:$0xff]  ;;  %p495_p1 = scmp.ne.s32.totalorder (%p82_p0), %s320_s21, %s494_s24  ;;  %p499_p2 = scmp.lt.s32.totalorder (%p82_p0), %s320_s21, %s320_s21 }
  0x1a   : > { %v91_v7 = vand.u32 2147483647, %v90_v6  ;;  %p500_p3 = scmp.lt.s32.totalorder (%p82_p0), %s498_s25, %s494_s24 }
  0x1c   : > { %vm473_vm2 = vcmp.gt.f32.partialorder %v91_v7, -inf  ;;  %p501_p4 = por (%p82_p0), %p500_p3, %p499_p2 }
  0x1d   : > { %vm98_vm4 = vmand %vm96_vm3, %vm473_vm2 }
  0x1e   : > { %v99_v9 = vsel %vm98_vm4, %v552_v3, %v562_v8  ;;  %v100_v10 = vsel %vm98_vm4, %v91_v7, -inf  ;;  %p502_p5 = pnand (%p82_p0), %p501_p4, %p495_p1 }
  0x1f   : > { %v101_v11 = vrot.slane %v100_v10, 1  ;;  %v102_v12 = vrot.slane %v99_v9, 1 }
  0x21   : > { %vm103_vm5 = vcmp.ge.f32.partialorder %v101_v11, %v100_v10  ;;  %v106_v13 = vrot.slane %v101_v11, 1  ;;  %v107_v14 = vrot.slane %v102_v12, 1 }
  0x22   : > { %v104_v15 = vsel %vm103_vm5, %v101_v11, %v100_v10  ;;  %v105_v16 = vsel %vm103_vm5, %v102_v12, %v99_v9 }
  0x23   : > { %vm108_vm6 = vcmp.ge.f32.partialorder %v106_v13, %v104_v15  ;;  %v111_v17 = vrot.slane %v106_v13, 1  ;;  %v112_v18 = vrot.slane %v107_v14, 1 }
  0x24   : > { %v109_v19 = vsel %vm108_vm6, %v106_v13, %v104_v15  ;;  %v110_v20 = vsel %vm108_vm6, %v107_v14, %v105_v16 }
  0x25   : > { %vm113_vm7 = vcmp.ge.f32.partialorder %v111_v17, %v109_v19  ;;  %v116_v21 = vrot.slane %v111_v17, 1  ;;  %v117_v22 = vrot.slane %v112_v18, 1 }
  0x26   : > { %v114_v23 = vsel %vm113_vm7, %v111_v17, %v109_v19  ;;  %v115_v24 = vsel %vm113_vm7, %v112_v18, %v110_v20 }
  0x27   : > { %vm118_vm8 = vcmp.ge.f32.partialorder %v116_v21, %v114_v23  ;;  %v121_v25 = vrot.slane %v116_v21, 1  ;;  %v122_v26 = vrot.slane %v117_v22, 1 }
  0x28   : > { %v119_v27 = vsel %vm118_vm8, %v116_v21, %v114_v23  ;;  %v120_v28 = vsel %vm118_vm8, %v117_v22, %v115_v24 }
  0x29   : > { %vm123_vm9 = vcmp.ge.f32.partialorder %v121_v25, %v119_v27  ;;  %v126_v29 = vrot.slane %v121_v25, 1  ;;  %v127_v30 = vrot.slane %v122_v26, 1 }
  0x2a   : > { %v124_v31 = vsel %vm123_vm9, %v121_v25, %v119_v27  ;;  %v125_v32 = vsel %vm123_vm9, %v122_v26, %v120_v28 }
  0x2b   : > { %vm128_vm10 = vcmp.ge.f32.partialorder %v126_v29, %v124_v31  ;;  %v131_v33 = vrot.slane %v126_v29, 1  ;;  %v132_v34 = vrot.slane %v127_v30, 1 }
  0x2c   : > { %v129_v35 = vsel %vm128_vm10, %v126_v29, %v124_v31  ;;  %v130_v36 = vsel %vm128_vm10, %v127_v30, %v125_v32 }
  0x2d   : > { %vm133_vm11 = vcmp.ge.f32.partialorder %v131_v33, %v129_v35 }
  0x2e   : > { %v135_v37 = vsel %vm133_vm11, %v132_v34, %v130_v36 }
  0x2f   : > { %137 = vrot.lane.b32.xlu0 %v135_v37, %s136_s0 }
  0xa1   : > { %v138_v39 = vpop.permute.xlu0 %137 }
  0xa2   : > { %480 = vpush %v138_v39 }
  0xd3   : > { %s481_s16 = spop %480 }
  0xd4   : > { %v144_v43 = vstv %s481_s16  ;;  %s149_s18 = scalar_lea.vmem [#allocation2], %s481_s16  ;;  %s155_s19 = scalar_lea.vmem [#allocation9], %s481_s16 }
  0xd5   : > { %v151_v44 = vld [vmem:[%s149_s18] ss:$0 sm:$0xff]  ;;  %v146_v46 = vsel %vm143_vm13, %v144_v43, %v145_v40 }
  0xd6   : > { %v157_v45 = vld [vmem:[%s155_s19] ss:$0 sm:$0xff]  ;;  %152 = vst [vmem:[%s149_s18] sm:$0x1] %v150_v41  ;;  %vm160_vm14 = vcmp.ne.f32.partialorder %v151_v44, 0.0  ;;  %147 = vst [vmem:[#allocation4] sm:$0x1] %v146_v46 }
  0xd7   : > { %158 = vst [vmem:[%s155_s19] sm:$0x1] %v156_v42  ;;  %153 = vst [vmem:[%s148_s15] sm:$0x1] %v151_v44  ;;  %v167_v53 = vsel %vm166_vm12, %v151_v44, 0.0 }
  0xd8   : > { %159 = vst [vmem:[%s154_s17] sm:$0x1] %v157_v45  ;;  %vm161_vm0 = vmand %vm143_vm13, %vm160_vm14 }
  0xd9   : > { %v162_v47 = vsel %vm161_vm0, %v151_v44, 1.0 }
  0xda   : > { %v175_v48 = vsel %vm174_vm15, %v162_v47, 1.0 }
  0xdb   : > { %492 = vrcp.f32 %v175_v48 }
  0xdd   :  { %v243_v59 = vld [vmem:[#allocation4] sm:$0x1] (%p82_p0) }
  0xde   : > { %v171_v50 = vld [vmem:[#allocation2] sm:$0xff]  ;;  %245 = vst [vmem:[#allocation5] sm:$0x1] (%p82_p0), %v243_v59 }
  0xdf   :  { %v185_v57 = vld [vmem:[#allocation9] sm:$0xff] (%p82_p0) }
  0xe5   : > { %v493_v49 = vpop.eup %492 }
  0xe6   : > { %v177_v51 = vmul.f32 %v493_v49, %v171_v50 }
  0xe8   : > { %v179_v52 = vsel %vm178_vm1, %v177_v51, 0.0 }
  0xe9   : > { %180 = vadd.xlane.f32.xlu0 %v179_v52 }
 0x116   :  { %201 = vxpose.xlu0.b32.start.end [1/1] (short) (narrow) (%p82_p0), %v185_v57, 8 }
 0x175   :  { %84 = sbr.rel (!%p82_p0) target bundleno = 19 (0x13), region = 163 }
 0x176   : > { %v181_v54 = vpop.xlane.xlu0 %180 }
 0x177   : > { %v182_v55 = vmul.f32 %v181_v54, %v167_v53 }
 0x179   : > { %v183_v56 = vsub.f32 %v177_v51, %v182_v55 }
 0x17b   : > { %184 = vst [vmem:[#allocation2] sm:$0xff] %v183_v56 }
 0x182   :  { %v237_v58 = vld [vmem:[#allocation2] sm:$0x3] }
 0x183   :  { %239 = vst [vmem:[#allocation3] sm:$0x3] %v237_v58 }
 0x18a   :  { %v312_v60 = vld [vmem:[#allocation3] sm:$0x3] }
 0x18b   :  { %313 = vst [vmem:[%s606_s1] sm:$0x3] %v312_v60 }
 0x18c   :  { %505 = shalt.err (!%p502_p5)
}
 0x18d   :  { %s506_s28 = scalar_lea.hbm %s607_s2, 16 }
 0x18e   :  { %p507_p6 = scmp.ne.s32.totalorder %s607_s2, %s506_s28  ;;  %p510_p7 = scmp.lt.u32.totalorder %s506_s28, %s607_s2 }
 0x190   :  { %p512_p8 = pnand %p510_p7, %p507_p6 }
 0x192   :  { %515 = shalt.err (!%p512_p8)
}
 0x193   :  { %322 = dma.vmem_to_hbm [thread:$0]  %s320_s21, 16, %s607_s2, [#allocation6]  }
 0x196   :  { %v217_v61 = vpop.trf.xlu0 }
 0x197   :  { %233 = vst [vmem:[#allocation7] sm:$0x1] %v217_v61 }
 0x19e   :  { %v249_v62 = vld [vmem:[#allocation7] sm:$0x1] }
 0x19f   :  { %251 = vst [vmem:[#allocation8] sm:$0x1] %v249_v62 }
 0x1a6   :  { %v385_v63 = vld [vmem:[#allocation8] sm:$0x1] }
 0x1a7   :  { %386 = vst [vmem:[%s608_s3] sm:$0x1] %v385_v63 }
 0x1a8   :  { %520 = dma.done.wait [#allocation6], 16  }
 0x1a9   :  { %521 = vsyncadd [#allocation6], 4294967280 }
 0x1aa   :  { %392 = vsyncpa [#allocation6], 1 }

// kernel: xb_maml_forward.1
= control target key start
LH: loop header
LB: loop body
LE: loop exit
PB: predicated region body
PF: predicated region fallthrough
CT: control target
= control target key end

     0   :  { %s15540_s0 = inlined_call_operand.vmem [shape: f32[2,2], index: 0, kind: input, shape index: {}]   ;;  %s15541_s1 = inlined_call_operand.vmem [shape: f32[2,8,768], index: 1, kind: input, shape index: {}]   ;;  %s15542_s2 = inlined_call_operand.vmem [shape: f32[2,768,8], index: 2, kind: input, shape index: {}]   ;;  %s15543_s3 = inlined_call_operand.vmem [shape: f32[2,16,768], index: 3, kind: input, shape index: {}]   ;;  %s15544_s4 = inlined_call_operand.vmem [shape: f32[2,768,16], index: 4, kind: input, shape index: {}]   ;;  %s15545_s5 = inlined_call_operand.vmem [shape: f32[8,128], index: 5, kind: input, shape index: {}]   ;;  %s15546_s6 = inlined_call_operand.vmem [shape: f32[16,128], index: 6, kind: input, shape index: {}]   ;;  %s15547_s7 = inlined_call_operand.vmem [shape: f32[2,768,128], index: 7, kind: input, shape index: {}]   ;;  %s15548_s8 = inlined_call_operand.vmem [shape: f32[2,1,128], index: 8, kind: input, shape index: {}]   ;;  %s15549_s9 = inlined_call_operand.vmem [shape: f32[2,128,128], index: 9, kind: input, shape index: {}]   ;;  %s15550_s10 = inlined_call_operand.vmem [shape: f32[2,1,128], index: 10, kind: input, shape index: {}]   ;;  %s15551_s11 = inlined_call_operand.vmem [shape: f32[2,8,128], index: 11, kind: output, shape index: {0}]   ;;  %s15552_s12 = inlined_call_operand.vmem [shape: f32[2,768,128], index: 12, kind: output, shape index: {1}]   ;;  %s15553_s13 = inlined_call_operand.vmem [shape: f32[2,1,128], index: 13, kind: output, shape index: {2}]   ;;  %s15554_s14 = inlined_call_operand.vmem [shape: f32[2,128,128], index: 14, kind: output, shape index: {3}]   ;;  %s15555_s15 = inlined_call_operand.vmem [shape: f32[2,1,128], index: 15, kind: output, shape index: {4}]  }
   0x1   :  { %15771 = sst [smem:[#allocation149_spill]] %s15540_s0 }
   0x2   :  { %15772 = sst [smem:[#allocation150_spill]] %s15541_s1 }
   0x3   :  { %15773 = sst [smem:[#allocation151_spill]] %s15542_s2 }
   0x4   :  { %21 = vsyncpa [#allocation7], 0  ;;  %s11264_s18 = smov 0  }
   0x5 LB: > { %s11270_s19 = sadd.s32 4294967295, %s11177_s18   ;;  %p8422_p0 = scmp.ge.s32.totalorder %s11177_s18, 1  ;;  %s11177_s18 = sphi %s11264_s18, %s27_s18  }
   0x6   : > { %p413_p1 = scmp.lt.s32.totalorder %s11177_s18, 3  ;;  %s15774_s0 = sld [smem:[#allocation149_spill]] }
   0x7   : > { %p11014_p3 = scmp.eq.s32.totalorder %s11270_s19, 0 }
   0x8   : > { %p11277_p2 = pnand %p8422_p0, %p413_p1 }
   0xa   : > { %p11010_p4 = pneg %p11277_p2 }
   0xc   : > { %s426_s22 = sshll.u32 %s15774_s0, 4  ;;  %p11011_p5 = pnand %p11014_p3, %p11010_p4  ;;  %s427_s22 = int_to_ptr.vmem [resolvable:$true] %s426_s22 }
   0xd   : > { %s11152_s24 = scalar_lea.vmem %s427_s22, 32  ;;  %p11160_p10 = scmp.lt.s32.totalorder %s427_s22, %s427_s22 }
   0xe   : > { %p11153_p6 = scmp.ne.s32.totalorder %s427_s22, %s11152_s24  ;;  %p11154_p7 = pneg %p11011_p5 }
   0xf   : > { %p11161_p11 = scmp.lt.s32.totalorder %s11152_s24, %s11152_s24 }
  0x10   : > { %p11155_p8 = pnand %p11154_p7, %p11153_p6 }
  0x11   : > { %p11162_p12 = por %p11161_p11, %p11160_p10 }
  0x12   : > { %p11156_p9 = pneg %p11155_p8 }
  0x14   : > { %p11163_p13 = pnand %p11162_p12, %p11156_p9 }
  0x16   : > { %11166 = shalt.err (!%p11163_p13)
}
  0x17   : > { %s11179_s25 = smov [#allocation6]   ;;  %489 = sbr.rel (%p11277_p2) target bundleno = 4262 (0x10a6), region = 64 }
  0x18   : > { %11013 = dma.vmem_to_smem (!%p11011_p5), %s427_s22, 32, %s11179_s25, [#allocation7]  }
  0x1e   : > { %11172 = dma.done.wait (%p11014_p3), [#allocation7], 32  }
  0x1f   : > { %11174 = vsyncadd (%p11014_p3), [#allocation7], 4294967264 }
  0x20   : > { %495 = sfence }
  0x21   : > { %s8437_s26 = sshll.u32 %s11270_s19, 7  ;;  %v855_v0 = vld [vmem:[%s15547_s7 + $0x80] sm:$0xff]  ;;  %v856_v1 = vld [vmem:[%s15547_s7 + $0x88] sm:$0xff]  ;;  %v857_v33 = vld [vmem:[%s15547_s7 + $0x90] sm:$0xff]  ;;  %p568_p0 = scmp.lt.s32.totalorder %s11270_s19, 1  ;;  %vm11181_vm0 = vmmov 0  }
  0x22   : > { %s838_s27 = sld [smem:[#allocation6 + %s8437_s26]]  ;;  %s1182_s28 = sadd.s32 1, %s8437_s26  ;;  %v8454_v2 = vld [vmem:[%s15547_s7 + $0x380] sm:$0xff]  ;;  %v8455_v3 = vld [vmem:[%s15547_s7 + $0x388] sm:$0xff]  ;;  %v858_v34 = vld [vmem:[%s15547_s7 + $0x98] sm:$0xff]  ;;  %vm2211_vm2 = vcmask 64512  }
  0x23   : > { %s1183_s29 = sld [smem:[#allocation6 + %s1182_s28]]  ;;  %v839_v4 = vld [vmem:[%s15547_s7] sm:$0xff]  ;;  %v840_v5 = vld [vmem:[%s15547_s7 + $0x8] sm:$0xff]  ;;  %v8456_v35 = vld [vmem:[%s15547_s7 + $0x390] sm:$0xff]  ;;  %s16224_s19 = smov (!%p568_p0, %s11270_s19), 1  ;;  %vm7363_vm11 = vcmask 1040384  }
  0x24   : > { %v8438_v6 = vld [vmem:[%s15547_s7 + $0x300] sm:$0xff]  ;;  %v8439_v7 = vld [vmem:[%s15547_s7 + $0x308] sm:$0xff]  ;;  %v8457_v40 = vld [vmem:[%s15547_s7 + $0x398] sm:$0xff]  ;;  %s10975_s21 = smul.u32 48, %s16224_s19  ;;  %s15792_s1 = sld [smem:[#allocation150_spill]]  ;;  %vm5743_vm14 = vcmask 7168  }
  0x25   : > { %v887_v9 = vld [vmem:[%s15547_s7 + $0x180] sm:$0xff]  ;;  %v888_v10 = vld [vmem:[%s15547_s7 + $0x188] sm:$0xff]  ;;  %v841_v45 = vld [vmem:[%s15547_s7 + $0x10] sm:$0xff]  ;;  %s12653_s26 = smul.u32 768, %s16224_s19  ;;  %s15860_s2 = sld [smem:[#allocation151_spill]] }
  0x26   : > { %v8486_v11 = vld [vmem:[%s15547_s7 + $0x480] sm:$0xff]  ;;  %v8487_v16 = vld [vmem:[%s15547_s7 + $0x488] sm:$0xff]  ;;  %v842_v46 = vld [vmem:[%s15547_s7 + $0x18] sm:$0xff]  ;;  %s10977_s23 = smul.u32 96, %s16224_s19  ;;  %s607_s25 = scalar_lea.vmem %s15555_s15, %s16224_s19 }
  0x27   : > { %v871_v21 = vld [vmem:[%s15547_s7 + $0x100] sm:$0xff]  ;;  %v872_v22 = vld [vmem:[%s15547_s7 + $0x108] sm:$0xff]  ;;  %v8440_v47 = vld [vmem:[%s15547_s7 + $0x310] sm:$0xff]  ;;  %s9012_s22 = sshll.u32 %s16224_s19, 7 }
  0x28   : > { %v11317_v8 = vstv %s838_s27  ;;  %v8470_v27 = vld [vmem:[%s15547_s7 + $0x400] sm:$0xff]  ;;  %v8471_v28 = vld [vmem:[%s15547_s7 + $0x408] sm:$0xff]  ;;  %v8441_v52 = vld [vmem:[%s15547_s7 + $0x318] sm:$0xff]  ;;  %s13905_s27 = scalar_lea.vmem %s15543_s3, %s10977_s23  ;;  %s15206_s24 = scalar_lea.vmem %s15554_s14, %s9012_s22 }
  0x29   : > { %v952_v12 = vmul.f32 %v11317_v8, %v855_v0  ;;  %v953_v13 = vmul.f32 %v11317_v8, %v856_v1  ;;  %v11330_v14 = vstv %s1183_s29  ;;  %v936_v15 = vmul.f32 %v11317_v8, %v839_v4  ;;  %v889_v53 = vld [vmem:[%s15547_s7 + $0x190] sm:$0xff]  ;;  %v890_v58 = vld [vmem:[%s15547_s7 + $0x198] sm:$0xff]  ;;  %s15144_s29 = scalar_lea.vmem %s15544_s4, %s12653_s26 }
  0x2a   : > { %v1394_v17 = vmul.f32 %v8454_v2, %v11330_v14  ;;  %v1395_v18 = vmul.f32 %v8455_v3, %v11330_v14  ;;  %v937_v19 = vmul.f32 %v11317_v8, %v840_v5  ;;  %v1378_v20 = vmul.f32 %v8438_v6, %v11330_v14  ;;  %v8488_v59 = vld [vmem:[%s15547_s7 + $0x490] sm:$0xff]  ;;  %v8489_v60 = vld [vmem:[%s15547_s7 + $0x498] sm:$0xff]  ;;  %s11722_s28 = scalar_lea.vmem %s15792_s1, %s10975_s21 }
  0x2b   : > { %v1379_v23 = vmul.f32 %v8439_v7, %v11330_v14  ;;  %v984_v24 = vmul.f32 %v11317_v8, %v887_v9  ;;  %v985_v25 = vmul.f32 %v11317_v8, %v888_v10  ;;  %v1426_v26 = vmul.f32 %v8486_v11, %v11330_v14  ;;  %v873_v1 = vld [vmem:[%s15547_s7 + $0x110] sm:$0xff]  ;;  %v874_v2 = vld [vmem:[%s15547_s7 + $0x118] sm:$0xff]  ;;  %s12659_s16 = scalar_lea.vmem %s15860_s2, %s12653_s26 }
  0x2c   : > { %v11356_v29 = vadd.f32 %v1394_v17, %v952_v12  ;;  %v11358_v30 = vadd.f32 %v1395_v18, %v953_v13  ;;  %v11360_v31 = vadd.f32 %v1378_v20, %v936_v15  ;;  %v1427_v32 = vmul.f32 %v8487_v16, %v11330_v14  ;;  %v8472_v7 = vld [vmem:[%s15547_s7 + $0x410] sm:$0xff]  ;;  %v8473_v9 = vld [vmem:[%s15547_s7 + $0x418] sm:$0xff]  ;;  %v859_v15 = vld [vmem:[%s15547_s7 + $0xa0] sm:$0xff] }
  0x2d   : > { %v11372_v36 = vadd.f32 %v1379_v23, %v937_v19  ;;  %v11374_v37 = vadd.f32 %v1426_v26, %v984_v24  ;;  %v968_v38 = vmul.f32 %v11317_v8, %v871_v21  ;;  %v969_v39 = vmul.f32 %v11317_v8, %v872_v22  ;;  %v860_v16 = vld [vmem:[%s15547_s7 + $0xa8] sm:$0xff]  ;;  %v8458_v17 = vld [vmem:[%s15547_s7 + $0x3a0] sm:$0xff] }
  0x2e   : > { %v10515_v41 = vpack.c.bf16 %v11358_v30, %v11356_v29  ;;  %v11383_v42 = vadd.f32 %v1427_v32, %v985_v25  ;;  %v1410_v43 = vmul.f32 %v8470_v27, %v11330_v14  ;;  %v1411_v44 = vmul.f32 %v8471_v28, %v11330_v14  ;;  %v8459_v22 = vld [vmem:[%s15547_s7 + $0x3a8] sm:$0xff]  ;;  %v843_v27 = vld [vmem:[%s15547_s7 + $0x20] sm:$0xff] }
  0x2f   : > { %15776 = vst [vmem:[#allocation9_spill] sm:$0xff] %v11374_v37  ;;  %v10517_v48 = vpack.c.bf16 %v11372_v36, %v11360_v31  ;;  %v954_v49 = vmul.f32 %v11317_v8, %v857_v33  ;;  %v955_v50 = vmul.f32 %v11317_v8, %v858_v34  ;;  %v1396_v51 = vmul.f32 %v8456_v35, %v11330_v14  ;;  %v844_v28 = vld [vmem:[%s15547_s7 + $0x28] sm:$0xff]  ;;  %v8442_v32 = vld [vmem:[%s15547_s7 + $0x320] sm:$0xff] }
  0x30   : > { %15777 = vst [vmem:[#allocation10_spill] sm:$0xff] %v11383_v42  ;;  %10516 = vmatprep.subr.bf16.mxu0 %v10515_v41  ;;  %v10547_v54 = vpack.c.bf16 %v11383_v42, %v11374_v37  ;;  %v11409_v55 = vadd.f32 %v1410_v43, %v968_v38  ;;  %v11411_v56 = vadd.f32 %v1411_v44, %v969_v39  ;;  %v8443_v39 = vld [vmem:[%s15547_s7 + $0x328] sm:$0xff] }
  0x31   : > { %v1397_v57 = vmul.f32 %v8457_v40, %v11330_v14  ;;  %10518 = vmatpush3.bf16.msra.mxu0 %v10517_v48  ;;  %v11423_v61 = vadd.f32 %v1396_v51, %v954_v49  ;;  %v938_v62 = vmul.f32 %v11317_v8, %v841_v45  ;;  %v939_v63 = vmul.f32 %v11317_v8, %v842_v46  ;;  %v891_v40 = vld [vmem:[%s15547_s7 + $0x1a0] sm:$0xff]  ;;  %v892_v46 = vld [vmem:[%s15547_s7 + $0x1a8] sm:$0xff] }
  0x32   : > { %15778 = vst [vmem:[#allocation11_spill] sm:$0xff] %v11409_v55  ;;  %15779 = vst [vmem:[#allocation12_spill] sm:$0xff] %v11411_v56  ;;  %v1380_v0 = vmul.f32 %v8440_v47, %v11330_v14  ;;  %10548 = vmatprep.subr.bf16.mxu1 %v10547_v54  ;;  %v10549_v3 = vpack.c.bf16 %v11411_v56, %v11409_v55  ;;  %v1381_v5 = vmul.f32 %v8441_v52, %v11330_v14  ;;  %v8490_v47 = vld [vmem:[%s15547_s7 + $0x4a0] sm:$0xff]  ;;  %v8491_v48 = vld [vmem:[%s15547_s7 + $0x4a8] sm:$0xff] }
  0x33   : > { %v11436_v4 = vadd.f32 %v1397_v57, %v955_v50  ;;  %v986_v6 = vmul.f32 %v11317_v8, %v889_v53  ;;  %v987_v11 = vmul.f32 %v11317_v8, %v890_v58  ;;  %v1428_v12 = vmul.f32 %v8488_v59, %v11330_v14  ;;  %v875_v53 = vld [vmem:[%s15547_s7 + $0x120] sm:$0xff]  ;;  %v876_v54 = vld [vmem:[%s15547_s7 + $0x128] sm:$0xff] }
  0x34   : > { %v11446_v10 = vadd.f32 %v1380_v0, %v938_v62  ;;  %v1429_v13 = vmul.f32 %v8489_v60, %v11330_v14  ;;  %10550 = vmatpush3.bf16.msra.mxu1 %v10549_v3  ;;  %v11462_v19 = vadd.f32 %v1381_v5, %v939_v63  ;;  %v970_v20 = vmul.f32 %v11317_v8, %v873_v1  ;;  %v8474_v62 = vld [vmem:[%s15547_s7 + $0x420] sm:$0xff]  ;;  %v8475_v63 = vld [vmem:[%s15547_s7 + $0x428] sm:$0xff]  ;;  %v861_v5 = vld [vmem:[%s15547_s7 + $0xb0] sm:$0xff] }
  0x35   : > { %v10519_v18 = vpack.c.bf16 %v11436_v4, %v11423_v61  ;;  %v971_v21 = vmul.f32 %v11317_v8, %v874_v2  ;;  %v11469_v23 = vadd.f32 %v1428_v12, %v986_v6  ;;  %v1412_v25 = vmul.f32 %v8472_v7, %v11330_v14  ;;  %v862_v6 = vld [vmem:[%s15547_s7 + $0xb8] sm:$0xff]  ;;  %v8460_v7 = vld [vmem:[%s15547_s7 + $0x3b0] sm:$0xff] }
  0x36   : > { %v11471_v24 = vadd.f32 %v1429_v13, %v987_v11  ;;  %v1413_v26 = vmul.f32 %v8473_v9, %v11330_v14  ;;  %v10521_v33 = vpack.c.bf16 %v11462_v19, %v11446_v10  ;;  %v956_v34 = vmul.f32 %v11317_v8, %v859_v15  ;;  %v8461_v15 = vld [vmem:[%s15547_s7 + $0x3b8] sm:$0xff] }
  0x37   : > { %15780 = vst [vmem:[#allocation13_spill] sm:$0xff] %v11469_v23  ;;  %10520 = vmatprep.subr.bf16.mxu0 %v10519_v18  ;;  %v957_v35 = vmul.f32 %v11317_v8, %v860_v16  ;;  %v1398_v38 = vmul.f32 %v8458_v17, %v11330_v14  ;;  %v11497_v43 = vadd.f32 %v1412_v25, %v970_v20  ;;  %v8444_v25 = vld [vmem:[%s15547_s7 + $0x330] sm:$0xff] }
  0x38   : > { %15781 = vst [vmem:[#allocation14_spill] sm:$0xff] %v11471_v24  ;;  %v10551_v41 = vpack.c.bf16 %v11471_v24, %v11469_v23  ;;  %v11499_v44 = vadd.f32 %v1413_v26, %v971_v21  ;;  %v1399_v45 = vmul.f32 %v8459_v22, %v11330_v14  ;;  %10522 = vmatpush3.bf16.msra.mxu0 %v10521_v33  ;;  %v845_v21 = vld [vmem:[%s15547_s7 + $0x30] sm:$0xff]  ;;  %v846_v22 = vld [vmem:[%s15547_s7 + $0x38] sm:$0xff] }
  0x39   : > { %15782 = vst [vmem:[#allocation15_spill] sm:$0xff] %v11497_v43  ;;  %v11511_v49 = vadd.f32 %v1398_v38, %v956_v34  ;;  %v940_v50 = vmul.f32 %v11317_v8, %v843_v27  ;;  %v941_v51 = vmul.f32 %v11317_v8, %v844_v28  ;;  %v1382_v52 = vmul.f32 %v8442_v32, %v11330_v14  ;;  %v8445_v33 = vld [vmem:[%s15547_s7 + $0x338] sm:$0xff]  ;;  %v893_v34 = vld [vmem:[%s15547_s7 + $0x1b0] sm:$0xff] }
  0x3a   : > { %15783 = vst [vmem:[#allocation16_spill] sm:$0xff] %v11499_v44  ;;  %10552 = vmatprep.subr.bf16.mxu1 %v10551_v41  ;;  %v10553_v57 = vpack.c.bf16 %v11499_v44, %v11497_v43  ;;  %v11524_v58 = vadd.f32 %v1399_v45, %v957_v35  ;;  %v1383_v59 = vmul.f32 %v8443_v39, %v11330_v14  ;;  %v894_v41 = vld [vmem:[%s15547_s7 + $0x1b8] sm:$0xff]  ;;  %v8492_v45 = vld [vmem:[%s15547_s7 + $0x4b0] sm:$0xff] }
  0x3b   : > { %v988_v60 = vmul.f32 %v11317_v8, %v891_v40  ;;  %v11534_v0 = vadd.f32 %v1382_v52, %v940_v50  ;;  %v989_v1 = vmul.f32 %v11317_v8, %v892_v46  ;;  %v1430_v2 = vmul.f32 %v8490_v47, %v11330_v14  ;;  %v8493_v46 = vld [vmem:[%s15547_s7 + $0x4b8] sm:$0xff]  ;;  %v877_v52 = vld [vmem:[%s15547_s7 + $0x130] sm:$0xff] }
  0x3c   : > { %v1431_v3 = vmul.f32 %v8491_v48, %v11330_v14  ;;  %10554 = vmatpush3.bf16.msra.mxu1 %v10553_v57  ;;  %v10523_v9 = vpack.c.bf16 %v11524_v58, %v11511_v49  ;;  %v11550_v11 = vadd.f32 %v1383_v59, %v941_v51  ;;  %v972_v12 = vmul.f32 %v11317_v8, %v875_v53  ;;  %v878_v53 = vld [vmem:[%s15547_s7 + $0x138] sm:$0xff] }
  0x3d   : > { %v973_v13 = vmul.f32 %v11317_v8, %v876_v54  ;;  %v11558_v16 = vadd.f32 %v1430_v2, %v988_v60  ;;  %v1414_v18 = vmul.f32 %v8474_v62, %v11330_v14  ;;  %v1415_v20 = vmul.f32 %v8475_v63, %v11330_v14  ;;  %v8476_v62 = vld [vmem:[%s15547_s7 + $0x430] sm:$0xff]  ;;  %v8477_v63 = vld [vmem:[%s15547_s7 + $0x438] sm:$0xff] }
  0x3e   : > { %v11560_v17 = vadd.f32 %v1431_v3, %v989_v1  ;;  %10524 = vmatprep.subr.bf16.mxu0 %v10523_v9  ;;  %v10525_v26 = vpack.c.bf16 %v11550_v11, %v11534_v0  ;;  %v958_v27 = vmul.f32 %v11317_v8, %v861_v5  ;;  %v959_v28 = vmul.f32 %v11317_v8, %v862_v6  ;;  %v863_v6 = vld [vmem:[%s15547_s7 + $0xc0] sm:$0xff]  ;;  %v8521_v44 = vld [vmem:[%s15547_s7 + $0x598] sm:$0xff] }
  0x3f   : > { %15784 = vst [vmem:[#allocation17_spill] sm:$0xff] %v11558_v16  ;;  %v1400_v32 = vmul.f32 %v8460_v7, %v11330_v14  ;;  %v11586_v38 = vadd.f32 %v1414_v18, %v972_v12  ;;  %v11588_v39 = vadd.f32 %v1415_v20, %v973_v13  ;;  %v1401_v40 = vmul.f32 %v8461_v15, %v11330_v14  ;;  %v864_v7 = vld [vmem:[%s15547_s7 + $0xc8] sm:$0xff]  ;;  %v8462_v9 = vld [vmem:[%s15547_s7 + $0x3c0] sm:$0xff] }
  0x40   : > { %15785 = vst [vmem:[#allocation18_spill] sm:$0xff] %v11560_v17  ;;  %v10555_v35 = vpack.c.bf16 %v11560_v17, %v11558_v16  ;;  %10526 = vmatpush3.bf16.msra.mxu0 %v10525_v26  ;;  %v942_v48 = vmul.f32 %v11317_v8, %v845_v21  ;;  %v943_v50 = vmul.f32 %v11317_v8, %v846_v22  ;;  %v8463_v20 = vld [vmem:[%s15547_s7 + $0x3c8] sm:$0xff] }
  0x41   : > { %15786 = vst [vmem:[#allocation19_spill] sm:$0xff] %v11586_v38  ;;  %15787 = vst [vmem:[#allocation20_spill] sm:$0xff] %v11588_v39  ;;  %v11600_v47 = vadd.f32 %v1400_v32, %v958_v27  ;;  %v1384_v51 = vmul.f32 %v8444_v25, %v11330_v14  ;;  %v10557_v54 = vpack.c.bf16 %v11588_v39, %v11586_v38  ;;  %v847_v27 = vld [vmem:[%s15547_s7 + $0x40] sm:$0xff]  ;;  %v8501_v38 = vld [vmem:[%s15547_s7 + $0x4f8] sm:$0xff] }
  0x42   : > { %10556 = vmatprep.subr.bf16.mxu1 %v10555_v35  ;;  %v11618_v57 = vadd.f32 %v1401_v40, %v959_v28  ;;  %v1385_v59 = vmul.f32 %v8445_v33, %v11330_v14  ;;  %v990_v60 = vmul.f32 %v11317_v8, %v893_v34  ;;  %v991_v2 = vmul.f32 %v11317_v8, %v894_v41  ;;  %v848_v28 = vld [vmem:[%s15547_s7 + $0x48] sm:$0xff]  ;;  %v8446_v32 = vld [vmem:[%s15547_s7 + $0x340] sm:$0xff] }
  0x43   : > { %v11628_v1 = vadd.f32 %v1384_v51, %v942_v48  ;;  %v1432_v3 = vmul.f32 %v8492_v45, %v11330_v14  ;;  %v1433_v5 = vmul.f32 %v8493_v46, %v11330_v14  ;;  %10558 = vmatpush3.bf16.msra.mxu1 %v10557_v54  ;;  %v974_v15 = vmul.f32 %v11317_v8, %v877_v52  ;;  %v8447_v41 = vld [vmem:[%s15547_s7 + $0x348] sm:$0xff]  ;;  %v895_v45 = vld [vmem:[%s15547_s7 + $0x1c0] sm:$0xff] }
  0x44   : > { %v10527_v12 = vpack.c.bf16 %v11618_v57, %v11600_v47  ;;  %v11644_v13 = vadd.f32 %v1385_v59, %v943_v50  ;;  %v975_v18 = vmul.f32 %v11317_v8, %v878_v53  ;;  %v1416_v25 = vmul.f32 %v8476_v62, %v11330_v14  ;;  %v896_v52 = vld [vmem:[%s15547_s7 + $0x1c8] sm:$0xff]  ;;  %v8494_v53 = vld [vmem:[%s15547_s7 + $0x4c0] sm:$0xff] }
  0x45   : > { %v11651_v21 = vadd.f32 %v1432_v3, %v990_v60  ;;  %v11653_v22 = vadd.f32 %v1433_v5, %v991_v2  ;;  %v1417_v26 = vmul.f32 %v8477_v63, %v11330_v14  ;;  %v960_v34 = vmul.f32 %v11317_v8, %v863_v6  ;;  %v8495_v54 = vld [vmem:[%s15547_s7 + $0x4c8] sm:$0xff]  ;;  %v879_v2 = vld [vmem:[%s15547_s7 + $0x140] sm:$0xff] }
  0x46   : > { %10528 = vmatprep.subr.bf16.mxu0 %v10527_v12  ;;  %v10529_v33 = vpack.c.bf16 %v11644_v13, %v11628_v1  ;;  %v961_v35 = vmul.f32 %v11317_v8, %v864_v7  ;;  %v1402_v40 = vmul.f32 %v8462_v9, %v11330_v14  ;;  %v11680_v48 = vadd.f32 %v1416_v25, %v974_v15  ;;  %v880_v3 = vld [vmem:[%s15547_s7 + $0x148] sm:$0xff]  ;;  %v8478_v12 = vld [vmem:[%s15547_s7 + $0x440] sm:$0xff] }
  0x47   : > { %15788 = vst [vmem:[#allocation21_spill] sm:$0xff] %v11651_v21  ;;  %15789 = vst [vmem:[#allocation22_spill] sm:$0xff] %v11653_v22  ;;  %v10559_v46 = vpack.c.bf16 %v11653_v22, %v11651_v21  ;;  %v11682_v50 = vadd.f32 %v1417_v26, %v975_v18  ;;  %v1403_v51 = vmul.f32 %v8463_v20, %v11330_v14  ;;  %v8479_v15 = vld [vmem:[%s15547_s7 + $0x448] sm:$0xff] }
  0x48   : > { %15790 = vst [vmem:[#allocation23_spill] sm:$0xff] %v11680_v48  ;;  %10530 = vmatpush3.bf16.msra.mxu0 %v10529_v33  ;;  %v11694_v59 = vadd.f32 %v1402_v40, %v960_v34  ;;  %v944_v60 = vmul.f32 %v11317_v8, %v847_v27  ;;  %v945_v62 = vmul.f32 %v11317_v8, %v848_v28  ;;  %v865_v27 = vld [vmem:[%s15547_s7 + $0xd0] sm:$0xff]  ;;  %v866_v28 = vld [vmem:[%s15547_s7 + $0xd8] sm:$0xff] }
  0x49   : > { %15791 = vst [vmem:[#allocation24_spill] sm:$0xff] %v11682_v50  ;;  %v1386_v63 = vmul.f32 %v8446_v32, %v11330_v14  ;;  %10560 = vmatprep.subr.bf16.mxu1 %v10559_v46  ;;  %v10561_v5 = vpack.c.bf16 %v11682_v50, %v11680_v48  ;;  %v11707_v6 = vadd.f32 %v1403_v51, %v961_v35  ;;  %v8464_v32 = vld [vmem:[%s15547_s7 + $0x3d0] sm:$0xff]  ;;  %v8499_v48 = vld [vmem:[%s15547_s7 + $0x4e8] sm:$0xff] }
  0x4a   : > { %v1387_v7 = vmul.f32 %v8447_v41, %v11330_v14  ;;  %v992_v9 = vmul.f32 %v11317_v8, %v895_v45  ;;  %v993_v20 = vmul.f32 %v11317_v8, %v896_v52  ;;  %v1434_v25 = vmul.f32 %v8494_v53, %v11330_v14  ;;  %v8465_v41 = vld [vmem:[%s15547_s7 + $0x3d8] sm:$0xff]  ;;  %v849_v45 = vld [vmem:[%s15547_s7 + $0x50] sm:$0xff] }
  0x4b   : > { %v11724_v18 = vadd.f32 %v1386_v63, %v944_v60  ;;  %v1435_v26 = vmul.f32 %v8495_v54, %v11330_v14  ;;  %10562 = vmatpush3.bf16.msra.mxu1 %v10561_v5  ;;  %v10531_v33 = vpack.c.bf16 %v11707_v6, %v11694_v59  ;;  %v976_v35 = vmul.f32 %v11317_v8, %v879_v2  ;;  %v850_v54 = vld [vmem:[%s15547_s7 + $0x58] sm:$0xff]  ;;  %v8448_v60 = vld [vmem:[%s15547_s7 + $0x350] sm:$0xff] }
  0x4c   : > { %v11740_v34 = vadd.f32 %v1387_v7, %v945_v62  ;;  %v977_v40 = vmul.f32 %v11317_v8, %v880_v3  ;;  %v11750_v46 = vadd.f32 %v1434_v25, %v992_v9  ;;  %v1418_v52 = vmul.f32 %v8478_v12, %v11330_v14  ;;  %v609_v62 = vld [vmem:[%s11722_s28 + $0x8] sm:$0xff]  ;;  %v8449_v7 = vld [vmem:[%s15547_s7 + $0x358] sm:$0xff]  ;;  %v897_v9 = vld [vmem:[%s15547_s7 + $0x1d0] sm:$0xff] }
  0x4d   : > { %v11752_v51 = vadd.f32 %v1435_v26, %v993_v20  ;;  %v1419_v53 = vmul.f32 %v8479_v15, %v11330_v14  ;;  %10532 = vmatprep.subr.bf16.mxu0 %v10531_v33  ;;  %v962_v2 = vmul.f32 %v11317_v8, %v865_v27  ;;  %v963_v3 = vmul.f32 %v11317_v8, %v866_v28  ;;  %v898_v26 = vld [vmem:[%s15547_s7 + $0x1d8] sm:$0xff]  ;;  %v8496_v27 = vld [vmem:[%s15547_s7 + $0x4d0] sm:$0xff] }
  0x4e   : > { %15793 = vst [vmem:[#allocation25_spill] sm:$0xff] %v11750_v46  ;;  %v10533_v63 = vpack.c.bf16 %v11740_v34, %v11724_v18  ;;  %v1404_v5 = vmul.f32 %v8464_v32, %v11330_v14  ;;  %v11776_v15 = vadd.f32 %v1418_v52, %v976_v35  ;;  %v1405_v25 = vmul.f32 %v8465_v41, %v11330_v14  ;;  %v8497_v28 = vld [vmem:[%s15547_s7 + $0x4d8] sm:$0xff]  ;;  %v881_v41 = vld [vmem:[%s15547_s7 + $0x150] sm:$0xff] }
  0x4f   : > { %15794 = vst [vmem:[#allocation26_spill] sm:$0xff] %v11752_v51  ;;  %v10563_v12 = vpack.c.bf16 %v11752_v51, %v11750_v46  ;;  %v11778_v20 = vadd.f32 %v1419_v53, %v977_v40  ;;  %1943 = vmatprep.mubr.f32.mxu0 %v609_v62  ;;  %v946_v33 = vmul.f32 %v11317_v8, %v849_v45  ;;  %v882_v52 = vld [vmem:[%s15547_s7 + $0x158] sm:$0xff] }
  0x50   : > { %15795 = vst [vmem:[#allocation27_spill] sm:$0xff] %v11776_v15  ;;  %10534 = vmatpush3.bf16.msra.mxu0 %v10533_v63  ;;  %v11790_v32 = vadd.f32 %v1404_v5, %v962_v2  ;;  %v947_v35 = vmul.f32 %v11317_v8, %v850_v54  ;;  %v1388_v40 = vmul.f32 %v8448_v60, %v11330_v14  ;;  %v611_v53 = vld [vmem:[%s11722_s28 + $0x18] sm:$0xff]  ;;  %v8480_v60 = vld [vmem:[%s15547_s7 + $0x450] sm:$0xff] }
  0x51   : > { %15796 = vst [vmem:[#allocation28_spill] sm:$0xff] %v11778_v20  ;;  %10564 = vmatprep.subr.bf16.mxu1 %v10563_v12  ;;  %v10565_v62 = vpack.c.bf16 %v11778_v20, %v11776_v15  ;;  %v11804_v63 = vadd.f32 %v1405_v25, %v963_v3  ;;  %v1389_v45 = vmul.f32 %v8449_v7, %v11330_v14  ;;  %v8481_v2 = vld [vmem:[%s15547_s7 + $0x458] sm:$0xff]  ;;  %v867_v7 = vld [vmem:[%s15547_s7 + $0xe0] sm:$0xff] }
  0x52   : > { %15797 = vst [vmem:[#allocation29_spill] sm:$0xff] %v11790_v32  ;;  %v994_v54 = vmul.f32 %v11317_v8, %v897_v9  ;;  %v11814_v5 = vadd.f32 %v1388_v40, %v946_v33  ;;  %v995_v12 = vmul.f32 %v11317_v8, %v898_v26  ;;  %v1436_v15 = vmul.f32 %v8496_v27, %v11330_v14  ;;  %v868_v9 = vld [vmem:[%s15547_s7 + $0xe8] sm:$0xff]  ;;  %v8466_v25 = vld [vmem:[%s15547_s7 + $0x3e0] sm:$0xff] }
  0x53   : > { %15798 = vst [vmem:[#allocation30_spill] sm:$0xff] %v11804_v63  ;;  %v1437_v3 = vmul.f32 %v8497_v28, %v11330_v14  ;;  %2013 = vmatprep.mubr.f32.mxu1 %v611_v53  ;;  %10566 = vmatpush3.bf16.msra.mxu1 %v10565_v62  ;;  %v10535_v26 = vpack.c.bf16 %v11804_v63, %v11790_v32  ;;  %v8467_v40 = vld [vmem:[%s15547_s7 + $0x3e8] sm:$0xff] }
  0x54   : > { %15799 = vst [vmem:[#allocation31_spill] sm:$0xff] %v11814_v5  ;;  %v11830_v27 = vadd.f32 %v1389_v45, %v947_v35  ;;  %v978_v28 = vmul.f32 %v11317_v8, %v881_v41  ;;  %v979_v33 = vmul.f32 %v11317_v8, %v882_v52  ;;  %v11837_v20 = vadd.f32 %v1436_v15, %v994_v54  ;;  %v851_v35 = vld [vmem:[%s15547_s7 + $0x60] sm:$0xff]  ;;  %v852_v41 = vld [vmem:[%s15547_s7 + $0x68] sm:$0xff] }
  0x55   : > { %v11839_v46 = vadd.f32 %v1437_v3, %v995_v12  ;;  %v1420_v53 = vmul.f32 %v8480_v60, %v11330_v14  ;;  %v1421_v62 = vmul.f32 %v8481_v2, %v11330_v14  ;;  %v8450_v52 = vld [vmem:[%s15547_s7 + $0x360] sm:$0xff]  ;;  %10536 = vmatprep.subr.bf16.mxu0 %v10535_v26  ;;  %v964_v45 = vmul.f32 %v11317_v8, %v867_v7  ;;  %v8451_v2 = vld [vmem:[%s15547_s7 + $0x368] sm:$0xff] }
  0x56   : > { %15800 = vst [vmem:[#allocation32_spill] sm:$0xff] %v11830_v27  ;;  %15801 = vst [vmem:[#allocation33_spill] sm:$0xff] %v11837_v20  ;;  %v10537_v15 = vpack.c.bf16 %v11830_v27, %v11814_v5  ;;  %v965_v54 = vmul.f32 %v11317_v8, %v868_v9  ;;  %v1406_v60 = vmul.f32 %v8466_v25, %v11330_v14  ;;  %v899_v12 = vld [vmem:[%s15547_s7 + $0x1e0] sm:$0xff]  ;;  %v900_v9 = vld [vmem:[%s15547_s7 + $0x1e8] sm:$0xff]  ;;  %v15856_v27 = vmov 0.0  }
  0x57   : > { %15802 = vst [vmem:[#allocation34_spill] sm:$0xff] %v11839_v46  ;;  %v10567_v3 = vpack.c.bf16 %v11839_v46, %v11837_v20  ;;  %v11865_v26 = vadd.f32 %v1420_v53, %v978_v28  ;;  %v11867_v51 = vadd.f32 %v1421_v62, %v979_v33  ;;  %v1407_v7 = vmul.f32 %v8467_v40, %v11330_v14  ;;  %v8498_v25 = vld [vmem:[%s15547_s7 + $0x4e0] sm:$0xff]  ;;  %v884_v62 = vld [vmem:[%s15547_s7 + $0x168] sm:$0xff] }
  0x58   : > { %10538 = vmatpush3.bf16.msra.mxu0 %v10537_v15  ;;  %v11879_v20 = vadd.f32 %v1406_v60, %v964_v45  ;;  %v948_v28 = vmul.f32 %v11317_v8, %v851_v35  ;;  %v949_v33 = vmul.f32 %v11317_v8, %v852_v41  ;;  %v1390_v40 = vmul.f32 %v8450_v52, %v11330_v14  ;;  %v883_v53 = vld [vmem:[%s15547_s7 + $0x160] sm:$0xff]  ;;  %v8483_v60 = vld [vmem:[%s15547_s7 + $0x468] sm:$0xff] }
  0x59   : > { %15803 = vst [vmem:[#allocation35_spill] sm:$0xff] %v11865_v26  ;;  %15804 = vst [vmem:[#allocation36_spill] sm:$0xff] %v11867_v51  ;;  %10568 = vmatprep.subr.bf16.mxu1 %v10567_v3  ;;  %v10569_v15 = vpack.c.bf16 %v11867_v51, %v11865_v26  ;;  %v11892_v45 = vadd.f32 %v1407_v7, %v965_v54  ;;  %v1391_v35 = vmul.f32 %v8451_v2, %v11330_v14  ;;  %v8482_v52 = vld [vmem:[%s15547_s7 + $0x460] sm:$0xff]  ;;  %v869_v2 = vld [vmem:[%s15547_s7 + $0xf0] sm:$0xff] }
  0x5a   : > { %15805 = vst [vmem:[#allocation37_spill] sm:$0xff] %v11879_v20  ;;  %v996_v41 = vmul.f32 %v11317_v8, %v899_v12  ;;  %v11902_v46 = vadd.f32 %v1390_v40, %v948_v28  ;;  %v997_v3 = vmul.f32 %v11317_v8, %v900_v9  ;;  %v1438_v26 = vmul.f32 %v8498_v25, %v11330_v14  ;;  %v870_v12 = vld [vmem:[%s15547_s7 + $0xf8] sm:$0xff]  ;;  %v8468_v7 = vld [vmem:[%s15547_s7 + $0x3f0] sm:$0xff] }
  0x5b   : > { %15806 = vst [vmem:[#allocation38_spill] sm:$0xff] %v11892_v45  ;;  %v1439_v54 = vmul.f32 %v8499_v48, %v11330_v14  ;;  %10570 = vmatpush3.bf16.msra.mxu1 %v10569_v15  ;;  %v10539_v9 = vpack.c.bf16 %v11892_v45, %v11879_v20  ;;  %v11918_v28 = vadd.f32 %v1391_v35, %v949_v33  ;;  %v8469_v40 = vld [vmem:[%s15547_s7 + $0x3f8] sm:$0xff]  ;;  %v853_v33 = vld [vmem:[%s15547_s7 + $0x70] sm:$0xff] }
  0x5c   : > { %15807 = vst [vmem:[#allocation39_spill] sm:$0xff] %v11902_v46  ;;  %v980_v48 = vmul.f32 %v11317_v8, %v883_v53  ;;  %v981_v25 = vmul.f32 %v11317_v8, %v884_v62  ;;  %v11925_v51 = vadd.f32 %v1438_v26, %v996_v41  ;;  %v1422_v21 = vmul.f32 %v8482_v52, %v11330_v14  ;;  %v854_v53 = vld [vmem:[%s15547_s7 + $0x78] sm:$0xff]  ;;  %v8452_v62 = vld [vmem:[%s15547_s7 + $0x370] sm:$0xff] }
  0x5d   : > { %15808 = vst [vmem:[#allocation40_spill] sm:$0xff] %v11918_v28  ;;  %v11927_v50 = vadd.f32 %v1439_v54, %v997_v3  ;;  %v1423_v15 = vmul.f32 %v8483_v60, %v11330_v14  ;;  %10540 = vmatprep.subr.bf16.mxu0 %v10539_v9  ;;  %v10541_v26 = vpack.c.bf16 %v11918_v28, %v11902_v46  ;;  %v8453_v60 = vld [vmem:[%s15547_s7 + $0x378] sm:$0xff]  ;;  %v901_v3 = vld [vmem:[%s15547_s7 + $0x1f0] sm:$0xff] }
  0x5e   : > { %15809 = vst [vmem:[#allocation41_spill] sm:$0xff] %v11925_v51  ;;  %v966_v35 = vmul.f32 %v11317_v8, %v869_v2  ;;  %v967_v41 = vmul.f32 %v11317_v8, %v870_v12  ;;  %v1408_v52 = vmul.f32 %v8468_v7, %v11330_v14  ;;  %v11953_v9 = vadd.f32 %v1422_v21, %v980_v48  ;;  %v902_v12 = vld [vmem:[%s15547_s7 + $0x1f8] sm:$0xff]  ;;  %v8500_v7 = vld [vmem:[%s15547_s7 + $0x4f0] sm:$0xff] }
  0x5f   : > { %15810 = vst [vmem:[#allocation42_spill] sm:$0xff] %v11927_v50  ;;  %v10571_v54 = vpack.c.bf16 %v11927_v50, %v11925_v51  ;;  %v11955_v22 = vadd.f32 %v1423_v15, %v981_v25  ;;  %v1409_v2 = vmul.f32 %v8469_v40, %v11330_v14  ;;  %10542 = vmatpush3.bf16.msra.mxu0 %v10541_v26  ;;  %v885_v40 = vld [vmem:[%s15547_s7 + $0x170] sm:$0xff]  ;;  %v886_v15 = vld [vmem:[%s15547_s7 + $0x178] sm:$0xff] }
  0x60   : > { %15811 = vst [vmem:[#allocation43_spill] sm:$0xff] %v11953_v9  ;;  %v11967_v51 = vadd.f32 %v1408_v52, %v966_v35  ;;  %v950_v21 = vmul.f32 %v11317_v8, %v853_v33  ;;  %v951_v48 = vmul.f32 %v11317_v8, %v854_v53  ;;  %v1392_v25 = vmul.f32 %v8452_v62, %v11330_v14  ;;  %v8484_v62 = vld [vmem:[%s15547_s7 + $0x470] sm:$0xff]  ;;  %v8485_v52 = vld [vmem:[%s15547_s7 + $0x478] sm:$0xff] }
  0x61   : > { %15812 = vst [vmem:[#allocation44_spill] sm:$0xff] %v11955_v22  ;;  %10572 = vmatprep.subr.bf16.mxu1 %v10571_v54  ;;  %v10573_v26 = vpack.c.bf16 %v11955_v22, %v11953_v9  ;;  %v11980_v35 = vadd.f32 %v1409_v2, %v967_v41  ;;  %v1393_v33 = vmul.f32 %v8453_v60, %v11330_v14  ;;  %v919_v60 = vld [vmem:[%s15547_s7 + $0x280] sm:$0xff] }
  0x62   : > { %15813 = vst [vmem:[#allocation45_spill] sm:$0xff] %v11967_v51  ;;  %v998_v53 = vmul.f32 %v11317_v8, %v901_v3  ;;  %v11990_v50 = vadd.f32 %v1392_v25, %v950_v21  ;;  %v999_v54 = vmul.f32 %v11317_v8, %v902_v12  ;;  %v1440_v9 = vmul.f32 %v8500_v7, %v11330_v14  ;;  %v920_v3 = vld [vmem:[%s15547_s7 + $0x288] sm:$0xff]  ;;  %v8518_v2 = vld [vmem:[%s15547_s7 + $0x580] sm:$0xff] }
  0x63   : > { %15814 = vst [vmem:[#allocation46_spill] sm:$0xff] %v11980_v35  ;;  %v1441_v41 = vmul.f32 %v8501_v38, %v11330_v14  ;;  %10574 = vmatpush3.bf16.msra.mxu1 %v10573_v26  ;;  %v10543_v12 = vpack.c.bf16 %v11980_v35, %v11967_v51  ;;  %v12006_v21 = vadd.f32 %v1393_v33, %v951_v48  ;;  %v8519_v25 = vld [vmem:[%s15547_s7 + $0x588] sm:$0xff]  ;;  %v903_v48 = vld [vmem:[%s15547_s7 + $0x200] sm:$0xff] }
  0x64   : > { %15815 = vst [vmem:[#allocation47_spill] sm:$0xff] %v11990_v50  ;;  %v982_v38 = vmul.f32 %v11317_v8, %v885_v40  ;;  %v983_v7 = vmul.f32 %v11317_v8, %v886_v15  ;;  %v12013_v22 = vadd.f32 %v1440_v9, %v998_v53  ;;  %v1424_v16 = vmul.f32 %v8484_v62, %v11330_v14  ;;  %v904_v40 = vld [vmem:[%s15547_s7 + $0x208] sm:$0xff]  ;;  %v8502_v15 = vld [vmem:[%s15547_s7 + $0x500] sm:$0xff] }
  0x65   : > { %15816 = vst [vmem:[#allocation48_spill] sm:$0xff] %v12006_v21  ;;  %v12015_v39 = vadd.f32 %v1441_v41, %v999_v54  ;;  %v1425_v26 = vmul.f32 %v8485_v52, %v11330_v14  ;;  %10544 = vmatprep.subr.bf16.mxu0 %v10543_v12  ;;  %v10545_v9 = vpack.c.bf16 %v12006_v21, %v11990_v50  ;;  %v8503_v52 = vld [vmem:[%s15547_s7 + $0x508] sm:$0xff]  ;;  %v921_v54 = vld [vmem:[%s15547_s7 + $0x290] sm:$0xff]  ;;  %v821_v50 = vlaneseq }
  0x66   : > { %15817 = vst [vmem:[#allocation49_spill] sm:$0xff] %v12013_v22  ;;  %v1016_v33 = vmul.f32 %v11317_v8, %v919_v60  ;;  %v1017_v53 = vmul.f32 %v11317_v8, %v920_v3  ;;  %v1458_v62 = vmul.f32 %v8518_v2, %v11330_v14  ;;  %v12041_v12 = vadd.f32 %v1424_v16, %v982_v38  ;;  %v922_v3 = vld [vmem:[%s15547_s7 + $0x298] sm:$0xff]  ;;  %v8520_v2 = vld [vmem:[%s15547_s7 + $0x590] sm:$0xff]  ;;  %v608_v16 = vld [vmem:[%s11722_s28] sm:$0xff] }
  0x67   : > { %15818 = vst [vmem:[#allocation50_spill] sm:$0xff] %v12015_v39  ;;  %v10575_v41 = vpack.c.bf16 %v12015_v39, %v12013_v22  ;;  %v12043_v43 = vadd.f32 %v1425_v26, %v983_v7  ;;  %v1459_v60 = vmul.f32 %v8519_v25, %v11330_v14  ;;  %10546 = vmatpush3.bf16.msra.mxu0 %v10545_v9  ;;  %v905_v22 = vld [vmem:[%s15547_s7 + $0x210] sm:$0xff] }
  0x68   : > { %15819 = vst [vmem:[#allocation51_spill] sm:$0xff] %v12041_v12  ;;  %v12056_v38 = vadd.f32 %v1458_v62, %v1016_v33  ;;  %v1000_v7 = vmul.f32 %v11317_v8, %v903_v48  ;;  %v1001_v25 = vmul.f32 %v11317_v8, %v904_v40  ;;  %v1442_v26 = vmul.f32 %v8502_v15, %v11330_v14  ;;  %v906_v48 = vld [vmem:[%s15547_s7 + $0x218] sm:$0xff]  ;;  %v8504_v40 = vld [vmem:[%s15547_s7 + $0x510] sm:$0xff]  ;;  %v613_v15 = vld [vmem:[%s11722_s28 + $0x28] sm:$0xff] }
  0x69   : > { %15820 = vst [vmem:[#allocation52_spill] sm:$0xff] %v12043_v43  ;;  %10576 = vmatprep.subr.bf16.mxu1 %v10575_v41  ;;  %v10577_v39 = vpack.c.bf16 %v12043_v43, %v12041_v12  ;;  %v12066_v17 = vadd.f32 %v1459_v60, %v1017_v53  ;;  %v1443_v9 = vmul.f32 %v8503_v52, %v11330_v14  ;;  %v923_v60 = vld [vmem:[%s15547_s7 + $0x2a0] sm:$0xff]  ;;  %v924_v12 = vld [vmem:[%s15547_s7 + $0x2a8] sm:$0xff] }
  0x6a   : > { %15821 = vst [vmem:[#allocation53_spill] sm:$0xff] %v12056_v38  ;;  %v1018_v33 = vmul.f32 %v11317_v8, %v921_v54  ;;  %v12077_v62 = vadd.f32 %v1442_v26, %v1000_v7  ;;  %v1019_v41 = vmul.f32 %v11317_v8, %v922_v3  ;;  %v1460_v53 = vmul.f32 %v8520_v2, %v11330_v14  ;;  %v8505_v54 = vld [vmem:[%s15547_s7 + $0x518] sm:$0xff]  ;;  %v8522_v26 = vld [vmem:[%s15547_s7 + $0x5a0] sm:$0xff]  ;;  %v8523_v43 = vld [vmem:[%s15547_s7 + $0x5a8] sm:$0xff] }
  0x6b   : > { %15822 = vst [vmem:[#allocation54_spill] sm:$0xff] %v12066_v17  ;;  %v1461_v52 = vmul.f32 %v8521_v44, %v11330_v14  ;;  %10578 = vmatpush3.bf16.msra.mxu1 %v10577_v39  ;;  %1944 = vmatmul.mubr.f32.vlgmr.msra.gmra.mrb[0].mxu0 %v608_v16  ;;  %v10579_v3 = vpack.c.bf16 %v12066_v17, %v12056_v38  ;;  %v610_v44 = vld [vmem:[%s11722_s28 + $0x10] sm:$0xff]  ;;  %v8506_v38 = vld [vmem:[%s15547_s7 + $0x520] sm:$0xff] }
  0x6c   : > { %15823 = vst [vmem:[#allocation55_spill] sm:$0xff] %v12077_v62  ;;  %v12093_v2 = vadd.f32 %v1443_v9, %v1001_v25  ;;  %v1002_v7 = vmul.f32 %v11317_v8, %v905_v22  ;;  %v12103_v37 = vadd.f32 %v1460_v53, %v1018_v33  ;;  %v1003_v16 = vmul.f32 %v11317_v8, %v906_v48  ;;  %v907_v22 = vld [vmem:[%s15547_s7 + $0x220] sm:$0xff]  ;;  %v908_v9 = vld [vmem:[%s15547_s7 + $0x228] sm:$0xff] }
  0x6d   : > { %v12105_v39 = vadd.f32 %v1461_v52, %v1019_v41  ;;  %v1444_v25 = vmul.f32 %v8504_v40, %v11330_v14  ;;  %2083 = vmatprep.mubr.f32.mxu0 %v613_v15  ;;  %10580 = vmatprep.subr.bf16.mxu0 %v10579_v3  ;;  %v1445_v48 = vmul.f32 %v8505_v54, %v11330_v14  ;;  %v8507_v53 = vld [vmem:[%s15547_s7 + $0x528] sm:$0xff]  ;;  %v925_v52 = vld [vmem:[%s15547_s7 + $0x2b0] sm:$0xff] }
  0x6e   : > { %15824 = vst [vmem:[#allocation56_spill] sm:$0xff] %v12093_v2  ;;  %15825 = vst [vmem:[#allocation57_spill] sm:$0xff] %v12103_v37  ;;  %v10581_v33 = vpack.c.bf16 %v12093_v2, %v12077_v62  ;;  %v1020_v40 = vmul.f32 %v11317_v8, %v923_v60  ;;  %v1021_v41 = vmul.f32 %v11317_v8, %v924_v12  ;;  %2014 = vmatmul.mubr.f32.vlgmr.msra.gmra.mrb[0].mxu1 %v610_v44  ;;  %v926_v12 = vld [vmem:[%s15547_s7 + $0x2b8] sm:$0xff]  ;;  %v8524_v62 = vld [vmem:[%s15547_s7 + $0x5b0] sm:$0xff] }
  0x6f   : > { %15826 = vst [vmem:[#allocation58_spill] sm:$0xff] %v12105_v39  ;;  %v10583_v15 = vpack.c.bf16 %v12105_v39, %v12103_v37  ;;  %v12131_v3 = vadd.f32 %v1444_v25, %v1002_v7  ;;  %v1462_v54 = vmul.f32 %v8522_v26, %v11330_v14  ;;  %v1463_v60 = vmul.f32 %v8523_v43, %v11330_v14  ;;  %v8525_v43 = vld [vmem:[%s15547_s7 + $0x5b8] sm:$0xff]  ;;  %v909_v26 = vld [vmem:[%s15547_s7 + $0x230] sm:$0xff] }
  0x70   : > { %10582 = vmatpush3.bf16.msra.mxu0 %v10581_v33  ;;  %v12141_v2 = vadd.f32 %v1445_v48, %v1003_v16  ;;  %v1004_v44 = vmul.f32 %v11317_v8, %v907_v22  ;;  %v1005_v7 = vmul.f32 %v11317_v8, %v908_v9  ;;  %v1446_v25 = vmul.f32 %v8506_v38, %v11330_v14  ;;  %v910_v38 = vld [vmem:[%s15547_s7 + $0x238] sm:$0xff]  ;;  %v8508_v9 = vld [vmem:[%s15547_s7 + $0x530] sm:$0xff] }
  0x71   : > { %15827 = vst [vmem:[#allocation59_spill] sm:$0xff] %v12131_v3  ;;  %10584 = vmatprep.subr.bf16.mxu0 %v10583_v15  ;;  %v12152_v37 = vadd.f32 %v1462_v54, %v1020_v40  ;;  %v12154_v33 = vadd.f32 %v1463_v60, %v1021_v41  ;;  %v1447_v16 = vmul.f32 %v8507_v53, %v11330_v14  ;;  %v8509_v48 = vld [vmem:[%s15547_s7 + $0x538] sm:$0xff]  ;;  %v927_v15 = vld [vmem:[%s15547_s7 + $0x2c0] sm:$0xff]  ;;  %v928_v54 = vld [vmem:[%s15547_s7 + $0x2c8] sm:$0xff] }
  0x72   : > { %15828 = vst [vmem:[#allocation60_spill] sm:$0xff] %v12141_v2  ;;  %v1022_v22 = vmul.f32 %v11317_v8, %v925_v52  ;;  %v10585_v40 = vpack.c.bf16 %v12141_v2, %v12131_v3  ;;  %v12169_v41 = vadd.f32 %v1446_v25, %v1004_v44  ;;  %v1023_v53 = vmul.f32 %v11317_v8, %v926_v12  ;;  %v8527_v12 = vld [vmem:[%s15547_s7 + $0x5c8] sm:$0xff] }
  0x73   : > { %15829 = vst [vmem:[#allocation61_spill] sm:$0xff] %v12152_v37  ;;  %15830 = vst [vmem:[#allocation62_spill] sm:$0xff] %v12154_v33  ;;  %v1464_v52 = vmul.f32 %v8524_v62, %v11330_v14  ;;  %v10587_v60 = vpack.c.bf16 %v12154_v33, %v12152_v37  ;;  %v12181_v39 = vadd.f32 %v1447_v16, %v1005_v7  ;;  %v8526_v62 = vld [vmem:[%s15547_s7 + $0x5c0] sm:$0xff] }
  0x74   : > { %15831 = vst [vmem:[#allocation63_spill] sm:$0xff] %v12169_v41  ;;  %v1465_v44 = vmul.f32 %v8525_v43, %v11330_v14  ;;  %v1006_v25 = vmul.f32 %v11317_v8, %v909_v26  ;;  %10586 = vmatpush3.bf16.msra.mxu0 %v10585_v40  ;;  %v1007_v2 = vmul.f32 %v11317_v8, %v910_v38  ;;  %v911_v43 = vld [vmem:[%s15547_s7 + $0x240] sm:$0xff]  ;;  %v912_v26 = vld [vmem:[%s15547_s7 + $0x248] sm:$0xff] }
  0x75   : > { %15832 = vst [vmem:[#allocation64_spill] sm:$0xff] %v12181_v39  ;;  %v12191_v3 = vadd.f32 %v1464_v52, %v1022_v22  ;;  %v1448_v7 = vmul.f32 %v8508_v9, %v11330_v14  ;;  %v1449_v16 = vmul.f32 %v8509_v48, %v11330_v14  ;;  %v8510_v40 = vld [vmem:[%s15547_s7 + $0x540] sm:$0xff]  ;;  %10588 = vmatprep.subr.bf16.mxu0 %v10587_v60  ;;  %v8511_v52 = vld [vmem:[%s15547_s7 + $0x548] sm:$0xff] }
  0x76   : > { %v10589_v22 = vpack.c.bf16 %v12181_v39, %v12169_v41  ;;  %v12207_v38 = vadd.f32 %v1465_v44, %v1023_v53  ;;  %v1024_v9 = vmul.f32 %v11317_v8, %v927_v15  ;;  %v1025_v48 = vmul.f32 %v11317_v8, %v928_v54  ;;  %v929_v53 = vld [vmem:[%s15547_s7 + $0x2d0] sm:$0xff]  ;;  %v930_v15 = vld [vmem:[%s15547_s7 + $0x2d8] sm:$0xff] }
  0x77   : > { %15833 = vst [vmem:[#allocation65_spill] sm:$0xff] %v12191_v3  ;;  %v12214_v37 = vadd.f32 %v1448_v7, %v1006_v25  ;;  %v12216_v33 = vadd.f32 %v1449_v16, %v1007_v2  ;;  %v1466_v17 = vmul.f32 %v8526_v62, %v11330_v14  ;;  %v1467_v60 = vmul.f32 %v8527_v12, %v11330_v14  ;;  %v8528_v54 = vld [vmem:[%s15547_s7 + $0x5d0] sm:$0xff]  ;;  %v8529_v12 = vld [vmem:[%s15547_s7 + $0x5d8] sm:$0xff] }
  0x78   : > { %15834 = vst [vmem:[#allocation66_spill] sm:$0xff] %v12207_v38  ;;  %v10591_v2 = vpack.c.bf16 %v12207_v38, %v12191_v3  ;;  %v1008_v44 = vmul.f32 %v11317_v8, %v911_v43  ;;  %v1009_v25 = vmul.f32 %v11317_v8, %v912_v26  ;;  %v1450_v62 = vmul.f32 %v8510_v40, %v11330_v14  ;;  %v913_v7 = vld [vmem:[%s15547_s7 + $0x250] sm:$0xff]  ;;  %v914_v26 = vld [vmem:[%s15547_s7 + $0x258] sm:$0xff] }
  0x79   : > { %15835 = vst [vmem:[#allocation67_spill] sm:$0xff] %v12214_v37  ;;  %15836 = vst [vmem:[#allocation68_spill] sm:$0xff] %v12216_v33  ;;  %10590 = vmatpush3.bf16.msra.mxu0 %v10589_v22  ;;  %v10593_v16 = vpack.c.bf16 %v12216_v33, %v12214_v37  ;;  %v12242_v41 = vadd.f32 %v1466_v17, %v1024_v9  ;;  %v12244_v3 = vadd.f32 %v1467_v60, %v1025_v48  ;;  %v8512_v40 = vld [vmem:[%s15547_s7 + $0x550] sm:$0xff]  ;;  %v8513_v22 = vld [vmem:[%s15547_s7 + $0x558] sm:$0xff] }
  0x7a   : > { %v1451_v43 = vmul.f32 %v8511_v52, %v11330_v14  ;;  %10592 = vmatprep.subr.bf16.mxu0 %v10591_v2  ;;  %v12256_v37 = vadd.f32 %v1450_v62, %v1008_v44  ;;  %v1026_v17 = vmul.f32 %v11317_v8, %v929_v53  ;;  %v1027_v9 = vmul.f32 %v11317_v8, %v930_v15  ;;  %v931_v52 = vld [vmem:[%s15547_s7 + $0x2e0] sm:$0xff]  ;;  %v932_v60 = vld [vmem:[%s15547_s7 + $0x2e8] sm:$0xff] }
  0x7b   : > { %15837 = vst [vmem:[#allocation69_spill] sm:$0xff] %v12242_v41  ;;  %15838 = vst [vmem:[#allocation70_spill] sm:$0xff] %v12244_v3  ;;  %v1468_v48 = vmul.f32 %v8528_v54, %v11330_v14  ;;  %v10595_v33 = vpack.c.bf16 %v12244_v3, %v12242_v41  ;;  %v1469_v44 = vmul.f32 %v8529_v12, %v11330_v14  ;;  %v8530_v15 = vld [vmem:[%s15547_s7 + $0x5e0] sm:$0xff]  ;;  %v8531_v54 = vld [vmem:[%s15547_s7 + $0x5e8] sm:$0xff] }
  0x7c   : > { %15839 = vst [vmem:[#allocation71_spill] sm:$0xff] %v12256_v37  ;;  %v12269_v2 = vadd.f32 %v1451_v43, %v1009_v25  ;;  %v1010_v53 = vmul.f32 %v11317_v8, %v913_v7  ;;  %v1011_v38 = vmul.f32 %v11317_v8, %v914_v26  ;;  %v1452_v41 = vmul.f32 %v8512_v40, %v11330_v14  ;;  %v915_v12 = vld [vmem:[%s15547_s7 + $0x260] sm:$0xff]  ;;  %v916_v7 = vld [vmem:[%s15547_s7 + $0x268] sm:$0xff] }
  0x7d   : > { %v12279_v62 = vadd.f32 %v1468_v48, %v1026_v17  ;;  %v1453_v25 = vmul.f32 %v8513_v22, %v11330_v14  ;;  %v8514_v43 = vld [vmem:[%s15547_s7 + $0x560] sm:$0xff]  ;;  %10594 = vmatpush3.bf16.msra.mxu0 %v10593_v16  ;;  %v12295_v17 = vadd.f32 %v1469_v44, %v1027_v9  ;;  %v1028_v40 = vmul.f32 %v11317_v8, %v931_v52  ;;  %v8515_v48 = vld [vmem:[%s15547_s7 + $0x568] sm:$0xff]  ;;  %v933_v9 = vld [vmem:[%s15547_s7 + $0x2f0] sm:$0xff] }
  0x7e   : > { %15840 = vst [vmem:[#allocation72_spill] sm:$0xff] %v12269_v2  ;;  %v10597_v26 = vpack.c.bf16 %v12269_v2, %v12256_v37  ;;  %v1029_v22 = vmul.f32 %v11317_v8, %v932_v60  ;;  %10596 = vmatprep.subr.bf16.mxu0 %v10595_v33  ;;  %v12302_v3 = vadd.f32 %v1452_v41, %v1010_v53  ;;  %v934_v52 = vld [vmem:[%s15547_s7 + $0x2f8] sm:$0xff]  ;;  %v8532_v33 = vld [vmem:[%s15547_s7 + $0x5f0] sm:$0xff] }
  0x7f   : > { %15841 = vst [vmem:[#allocation73_spill] sm:$0xff] %v12279_v62  ;;  %15842 = vst [vmem:[#allocation74_spill] sm:$0xff] %v12295_v17  ;;  %v12304_v39 = vadd.f32 %v1453_v25, %v1011_v38  ;;  %v1470_v16 = vmul.f32 %v8530_v15, %v11330_v14  ;;  %v1471_v23 = vmul.f32 %v8531_v54, %v11330_v14  ;;  %v8533_v53 = vld [vmem:[%s15547_s7 + $0x5f8] sm:$0xff]  ;;  %v917_v15 = vld [vmem:[%s15547_s7 + $0x270] sm:$0xff] }
  0x80   : > { %15843 = vst [vmem:[#allocation75_spill] sm:$0xff] %v12302_v3  ;;  %v10599_v41 = vpack.c.bf16 %v12295_v17, %v12279_v62  ;;  %v1012_v38 = vmul.f32 %v11317_v8, %v915_v12  ;;  %v1013_v60 = vmul.f32 %v11317_v8, %v916_v7  ;;  %v1454_v44 = vmul.f32 %v8514_v43, %v11330_v14  ;;  %v918_v7 = vld [vmem:[%s15547_s7 + $0x278] sm:$0xff]  ;;  %v8516_v43 = vld [vmem:[%s15547_s7 + $0x570] sm:$0xff] }
  0x81   : > { %15844 = vst [vmem:[#allocation76_spill] sm:$0xff] %v12304_v39  ;;  %v10601_v54 = vpack.c.bf16 %v12304_v39, %v12302_v3  ;;  %v12330_v25 = vadd.f32 %v1470_v16, %v1028_v40  ;;  %v12332_v37 = vadd.f32 %v1471_v23, %v1029_v22  ;;  %v1455_v12 = vmul.f32 %v8515_v48, %v11330_v14  ;;  %v8517_v2 = vld [vmem:[%s15547_s7 + $0x578] sm:$0xff] }
  0x82   : > { %10598 = vmatpush3.bf16.msra.mxu0 %v10597_v26  ;;  %v12344_v3 = vadd.f32 %v1454_v44, %v1012_v38  ;;  %v1030_v23 = vmul.f32 %v11317_v8, %v933_v9  ;;  %v1031_v40 = vmul.f32 %v11317_v8, %v934_v52  ;;  %v1472_v22 = vmul.f32 %v8532_v33, %v11330_v14 }
  0x83   : > { %15845 = vst [vmem:[#allocation77_spill] sm:$0xff] %v12330_v25  ;;  %15846 = vst [vmem:[#allocation78_spill] sm:$0xff] %v12332_v37  ;;  %10600 = vmatprep.subr.bf16.mxu0 %v10599_v41  ;;  %v10603_v48 = vpack.c.bf16 %v12332_v37, %v12330_v25  ;;  %v12351_v16 = vadd.f32 %v1455_v12, %v1013_v60  ;;  %v1473_v39 = vmul.f32 %v8533_v53, %v11330_v14 }
  0x84   : > { %15847 = vst [vmem:[#allocation79_spill] sm:$0xff] %v12344_v3  ;;  %v1014_v62 = vmul.f32 %v11317_v8, %v917_v15  ;;  %v12355_v26 = vadd.f32 %v1472_v22, %v1030_v23  ;;  %v1015_v38 = vmul.f32 %v11317_v8, %v918_v7  ;;  %v1456_v9 = vmul.f32 %v8516_v43, %v11330_v14  ;;  %v1131_v23 = vld [vmem:[%s15549_s9] sm:$0xff] }
  0x85   : > { %15848 = vst [vmem:[#allocation80_spill] sm:$0xff] %v12351_v16  ;;  %v1457_v52 = vmul.f32 %v8517_v2, %v11330_v14  ;;  %v12360_v33 = vadd.f32 %v1473_v39, %v1031_v40  ;;  %v10605_v41 = vpack.c.bf16 %v12351_v16, %v12344_v3  ;;  %v612_v39 = vld [vmem:[%s11722_s28 + $0x20] sm:$0xff]  ;;  %v1132_v40 = vld [vmem:[%s15549_s9 + $0x8] sm:$0xff] }
  0x86   : > { %15849 = vst [vmem:[#allocation81_spill] sm:$0xff] %v12355_v26  ;;  %10602 = vmatpush3.bf16.msra.mxu0 %v10601_v54  ;;  %v12364_v60 = vadd.f32 %v1456_v9, %v1014_v62  ;;  %v1128_v2 = vld [vmem:[%s15548_s8] sm:$0x1]  ;;  %v8534_v54 = vld [vmem:[%s15548_s8 + $0x1] sm:$0x1]  ;;  %v8536_v9 = vld [vmem:[%s15549_s9 + $0x88] sm:$0xff] }
  0x87   : > { %15850 = vst [vmem:[#allocation82_spill] sm:$0xff] %v12360_v33  ;;  %v12366_v44 = vadd.f32 %v1457_v52, %v1015_v38  ;;  %10604 = vmatprep.subr.bf16.mxu0 %v10603_v48  ;;  %v10607_v53 = vpack.c.bf16 %v12360_v33, %v12355_v26  ;;  %v1129_v62 = vmul.f32 %v1128_v2, %v11317_v8  ;;  %v8535_v22 = vld [vmem:[%s15549_s9 + $0x80] sm:$0xff]  ;;  %v15607_v2 = vmov 0.0|0.0  }
  0x88   : > { %15851 = vst [vmem:[#allocation83_spill] sm:$0xff] %v12364_v60  ;;  %v1669_v12 = vmul.f32 %v8534_v54, %v11330_v14  ;;  %v1147_v48 = vmul.f32 %v1131_v23, %v11317_v8  ;;  %v1148_v38 = vmul.f32 %v1132_v40, %v11317_v8  ;;  %v1705_v52 = vmul.f32 %v8535_v22, %v11330_v14  ;;  %v1135_v23 = vld [vmem:[%s15549_s9 + $0x20] sm:$0xff]  ;;  %v1136_v40 = vld [vmem:[%s15549_s9 + $0x28] sm:$0xff] }
  0x89   : > { %15852 = vst [vmem:[#allocation84_spill] sm:$0xff] %v12366_v44  ;;  %v10609_v15 = vpack.c.bf16 %v12366_v44, %v12364_v60  ;;  %1130 = vst [vmem:[#allocation3] sm:$0x1] %v1129_v62  ;;  %10611 = vmatprep.subr.bf16.mxu1 %v15607_v2  ;;  %v8542_v2 = vld [vmem:[%s15549_s9 + $0xb8] sm:$0xff] }
  0x8a   : > { %10606 = vmatpush3.bf16.msra.mxu0 %v10605_v41  ;;  %v1706_v41 = vmul.f32 %v8536_v9, %v11330_v14  ;;  %v12407_v62 = vadd.f32 %v1705_v52, %v1147_v48  ;;  %v1151_v9 = vmul.f32 %v1135_v23, %v11317_v8  ;;  %v1152_v52 = vmul.f32 %v1136_v40, %v11317_v8  ;;  %v1138_v23 = vld [vmem:[%s15549_s9 + $0x38] sm:$0xff]  ;;  %v8541_v40 = vld [vmem:[%s15549_s9 + $0xb0] sm:$0xff] }
  0x8b   : > { %10608 = vmatprep.subr.bf16.mxu0 %v10607_v53  ;;  %v1133_v53 = vld [vmem:[%s15549_s9 + $0x10] sm:$0xff]  ;;  %v1711_v60 = vmul.f32 %v8541_v40, %v11330_v14  ;;  %v1712_v26 = vmul.f32 %v8542_v2, %v11330_v14 }
  0x8c   : > { %v1149_v54 = vmul.f32 %v1133_v53, %v11317_v8  ;;  %v12421_v22 = vadd.f32 %v1706_v41, %v1148_v38  ;;  %v8539_v53 = vld [vmem:[%s15549_s9 + $0xa0] sm:$0xff] }
  0x8d   : > { %v1709_v41 = vmul.f32 %v8539_v53, %v11330_v14 }
  0x8e   : > { %10610 = vmatpush3.bf16.msra.mxu0 %v10609_v15  ;;  %v1134_v15 = vld [vmem:[%s15549_s9 + $0x18] sm:$0xff] }
  0x8f   : > { %v12462_v3 = vadd.f32 %v1709_v41, %v1151_v9  ;;  %v8544_v9 = vld [vmem:[%s15549_s9 + $0xc8] sm:$0xff] }
  0x90   : > { %v1666_v7 = vld [vmem:[#allocation3] sm:$0x1]  ;;  %v1714_v25 = vmul.f32 %v8544_v9, %v11330_v14 }
  0x91   : > { %2084 = vmatmul.mubr.f32.vlgmr.msra.gmra.mrb[2].mxu0 %v612_v39  ;;  %v1670_v43 = vadd.f32 %v1669_v12, %v1666_v7  ;;  %v8537_v39 = vld [vmem:[%s15549_s9 + $0x90] sm:$0xff]  ;;  %v1150_v12 = vmul.f32 %v1134_v15, %v11317_v8  ;;  %v8538_v7 = vld [vmem:[%s15549_s9 + $0x98] sm:$0xff]  ;;  %v8540_v15 = vld [vmem:[%s15549_s9 + $0xa8] sm:$0xff] }
  0x92   : > { %v1708_v48 = vmul.f32 %v8538_v7, %v11330_v14  ;;  %v1710_v7 = vmul.f32 %v8540_v15, %v11330_v14  ;;  %v1154_v15 = vmul.f32 %v1138_v23, %v11317_v8  ;;  %v1140_v23 = vld [vmem:[%s15549_s9 + $0x48] sm:$0xff] }
  0x93   : > { %1671 = vst [vmem:[#allocation3] sm:$0x1] %v1670_v43  ;;  %v1707_v43 = vmul.f32 %v8537_v39, %v11330_v14  ;;  %v1137_v39 = vld [vmem:[%s15549_s9 + $0x30] sm:$0xff]  ;;  %v1156_v33 = vmul.f32 %v1140_v23, %v11317_v8 }
  0x94   : > { %v1153_v53 = vmul.f32 %v1137_v39, %v11317_v8  ;;  %v12464_v16 = vadd.f32 %v1710_v7, %v1152_v52  ;;  %v15853_v39 = vmov 0.0|0.0   ;;  %v12489_v40 = vadd.f32 %v1712_v26, %v1154_v15  ;;  %v8546_v26 = vld [vmem:[%s15549_s9 + $0xd8] sm:$0xff] }
  0x95   : > { %v12435_v38 = vadd.f32 %v1707_v43, %v1149_v54  ;;  %v12450_v54 = vpack.c.bf16 %v12421_v22, %v12407_v62  ;;  %v12452_v43 = vadd.f32 %v1708_v48, %v1150_v12  ;;  %v1139_v12 = vld [vmem:[%s15549_s9 + $0x40] sm:$0xff]  ;;  %v12515_v37 = vadd.f32 %v1714_v25, %v1156_v33 }
  0x96   : > { %v8543_v48 = vld [vmem:[%s15549_s9 + $0xc0] sm:$0xff]  ;;  %v12480_v52 = vadd.f32 %v1711_v60, %v1153_v53  ;;  %v1155_v2 = vmul.f32 %v1139_v12, %v11317_v8  ;;  %v12487_v7 = vpack.c.bf16 %v12464_v16, %v12462_v3  ;;  %v1141_v60 = vld [vmem:[%s15549_s9 + $0x50] sm:$0xff]  ;;  %v1142_v53 = vld [vmem:[%s15549_s9 + $0x58] sm:$0xff]  ;;  %v1716_v24 = vmul.f32 %v8546_v26, %v11330_v14 }
  0x97   : > { %10613 = vmatpush3.bf16.msra.mxu1 %v12450_v54  ;;  %v12460_v44 = vpack.c.bf16 %v12452_v43, %v12435_v38  ;;  %v1713_v41 = vmul.f32 %v8543_v48, %v11330_v14  ;;  %v8545_v12 = vld [vmem:[%s15549_s9 + $0xd0] sm:$0xff]  ;;  %v1157_v48 = vmul.f32 %v1141_v60, %v11317_v8  ;;  %v1158_v23 = vmul.f32 %v1142_v53, %v11317_v8  ;;  %v1143_v33 = vld [vmem:[%s15549_s9 + $0x60] sm:$0xff]  ;;  %v1144_v53 = vld [vmem:[%s15549_s9 + $0x68] sm:$0xff] }
  0x98   : > { %10614 = vmatprep.subr.bf16.mxu1 %v15853_v39  ;;  %v12513_v9 = vpack.c.bf16 %v12489_v40, %v12480_v52  ;;  %v1715_v17 = vmul.f32 %v8545_v12, %v11330_v14  ;;  %v1160_v12 = vmul.f32 %v1144_v53, %v11317_v8  ;;  %v8548_v26 = vld [vmem:[%s15549_s9 + $0xe8] sm:$0xff]  ;;  %v1146_v53 = vld [vmem:[%s15549_s9 + $0x78] sm:$0xff] }
  0x99   : > { %v12506_v15 = vadd.f32 %v1713_v41, %v1155_v2  ;;  %v12527_v60 = vadd.f32 %v1716_v24, %v1158_v23  ;;  %v8547_v24 = vld [vmem:[%s15549_s9 + $0xe0] sm:$0xff]  ;;  %v1718_v23 = vmul.f32 %v8548_v26, %v11330_v14  ;;  %v1162_v26 = vmul.f32 %v1146_v53, %v11317_v8 }
  0x9a   : > { %v12525_v41 = vadd.f32 %v1715_v17, %v1157_v48  ;;  %v1159_v17 = vmul.f32 %v1143_v33, %v11317_v8  ;;  %v1717_v48 = vmul.f32 %v8547_v24, %v11330_v14  ;;  %v1145_v33 = vld [vmem:[%s15549_s9 + $0x70] sm:$0xff]  ;;  %v15625_v53 = vmov 0.0   ;;  %v12599_v20 = vld [vmem:[#allocation3] sm:$0x1] }
  0x9b   : > { %10616 = vmatpush3.bf16.msra.mxu1 %v12460_v44  ;;  %v12523_v2 = vpack.c.bf16 %v12515_v37, %v12506_v15  ;;  %v12555_v55 = vadd.f32 %v1718_v23, %v1160_v12  ;;  %v8549_v24 = vld [vmem:[%s15549_s9 + $0xf0] sm:$0xff]  ;;  %v8550_v12 = vld [vmem:[%s15549_s9 + $0xf8] sm:$0xff]  ;;  %9817 = vmatprep.mubr.msk.f32.mxu1 %vm11181_vm0, %v15625_v53  ;;  %v12594_v53 = vshrl.u32 %v821_v50, 7 }
  0x9c   : > { %10617 = vmatprep.subr.bf16.mxu1 %v15853_v39  ;;  %v12533_v25 = vpack.c.bf16 %v12527_v60, %v12525_v41  ;;  %v12552_v42 = vadd.f32 %v1717_v48, %v1159_v17  ;;  %v1161_v17 = vmul.f32 %v1145_v33, %v11317_v8  ;;  %v1719_v48 = vmul.f32 %v8549_v24, %v11330_v14  ;;  %v1179_v24 = vld [vmem:[%s15550_s10] sm:$0x1] }
  0x9d   : > { %v1720_v56 = vmul.f32 %v8550_v12, %v11330_v14  ;;  %15854 = vst [vmem:[#allocation85_spill] sm:$0xff] %v12594_v53  ;;  %v12597_v21 = vsub.s32 0, %v12594_v53  ;;  %vm827_vm3 = vcmp.lt.s32.totalorder %v12594_v53, 5 }
  0x9e   : > { %v10630_v23 = vpack.c.bf16 %v12555_v55, %v12552_v42  ;;  %v12576_v51 = vadd.f32 %v1719_v48, %v1161_v17  ;;  %v8551_v17 = vld [vmem:[%s15550_s10 + $0x1] sm:$0x1] }
  0x9f   : > { %10619 = vmatpush3.bf16.msra.mxu1 %v12487_v7  ;;  %v12578_v35 = vadd.f32 %v1720_v56, %v1162_v26  ;;  %v1180_v56 = vmul.f32 %v1179_v24, %v11317_v8  ;;  %v1756_v26 = vmul.f32 %v8551_v17, %v11330_v14  ;;  %15855 = vst [vmem:[#allocation86_spill] sm:$0xff] %v12597_v21 }
  0xa0   : > { %10620 = vmatprep.subr.bf16.mxu1 %v15853_v39  ;;  %v1877_v8 = vrot.slane %v12599_v20, %v12597_v21 }
  0xa1   : > { %v10633_v33 = vpack.c.bf16 %v12578_v35, %v12576_v51  ;;  %1181 = vst [vmem:[#allocation5] sm:$0x1] %v1180_v56 }
  0xa3   : > { %10622 = vmatpush3.bf16.msra.mxu1 %v12513_v9 }
  0xa4   : > { %10623 = vmatprep.subr.bf16.mxu1 %v15853_v39 }
  0xa7   : > { %10625 = vmatpush3.bf16.msra.mxu1 %v12523_v2 }
  0xa8   : > { %10626 = vmatprep.subr.bf16.mxu1 %v15853_v39  ;;  %v1753_v12 = vld [vmem:[#allocation5] sm:$0x1] }
  0xa9   : > { %v1757_v48 = vadd.f32 %v1756_v26, %v1753_v12 }
  0xab   : > { %10628 = vmatpush3.bf16.msra.mxu1 %v12533_v25  ;;  %1758 = vst [vmem:[#allocation5] sm:$0x1] %v1757_v48 }
  0xac   : > { %10629 = vmatprep.subr.bf16.mxu1 %v15853_v39 }
  0xaf   : > { %10631 = vmatpush3.bf16.msra.mxu1 %v10630_v23 }
  0xb0   : > { %10632 = vmatprep.subr.bf16.mxu1 %v15853_v39 }
  0xb3   : > { %10634 = vmatpush3.bf16.msra.mxu1 %v10633_v33 }
  0xb4   : > { %10635 = vmatprep.subr.bf16.mxu1 %v15853_v39 }
 0x13e   : > { %v9045_v45 = vpop.f32.mrb[0].mxu0 }
 0x13f   : > { %v9046_v24 = vpop.f32.mrb[1].mxu0 }
 0x140   : > { %v9047_v56 = vadd.f32 %v9046_v24, %v9045_v45 }
 0x141   : > { %v9080_v46 = vpop.f32.mrb[0].mxu1 }
 0x142   : > { %v1946_v28 = vadd.f32 %v9047_v56, %v1877_v8  ;;  %v9081_v14 = vpop.f32.mrb[1].mxu1 }
 0x143   : > { %v9082_v17 = vadd.f32 %v9081_v14, %v9080_v46  ;;  %v12621_v46 = vand.u32 127, %v821_v50 }
 0x145   : > { %v2016_v26 = vadd.f32 %v9082_v17, %v1946_v28  ;;  %15857 = vst [vmem:[#allocation87_spill] sm:$0xff] %v12621_v46  ;;  %vm823_vm1 = vcmp.lt.s32.totalorder %v12621_v46, 5  ;;  %v11183_v28 = vmov -1e+30  }
 0x164   : > { %v9115_v12 = vpop.f32.mrb[2].mxu0 }
 0x165   : > { %v9116_v48 = vpop.f32.mrb[3].mxu0 }
 0x166   : > { %v9117_v32 = vadd.f32 %v9116_v48, %v9115_v12 }
 0x168   : > { %v12603_v63 = vadd.f32 %v9117_v32, %v2016_v26  ;;  %v1776_v32 = vld [vmem:[#allocation5] sm:$0x1] }
 0x16a   : > { %v2089_v5 = vmax.f32 %v12603_v63, 0.0  ;;  %vm2481_vm4 = vcmp.gt.f32.partialorder %v12603_v63, 0.0 }
 0x16c   : > { %2179 = vxpose.xlu1.b32.start.end [1/1] (short) %v2089_v5, 128  ;;  %9818 = vmatmul.mubr.f32.vlgmr.msra.gmra.mrb[2].mxu1 %v2089_v5  ;;  %v2094_v5 = vrot.slane %v1776_v32, %v12597_v21 }
 0x16d   : > { %10637 = vmatpush3.bf16.xpose.msra.mxu1 %v12450_v54  ;;  %9878 = vmatprep.mubr.msk.f32.mxu1 %vm11181_vm0, %v15856_v27 }
 0x16e   : > { %10638 = vmatprep.subr.bf16.mxu1 %v15853_v39 }
 0x175   : > { %10640 = vmatpush3.bf16.xpose.msra.mxu1 %v12460_v44  ;;  %v12625_v44 = vsel %vm823_vm1, 0.0, %v11183_v28 }
 0x176   : > { %10641 = vmatprep.subr.bf16.mxu1 %v15853_v39  ;;  %15858 = vst [vmem:[#allocation88_spill] sm:$0xff] %v12625_v44 }
 0x17d   : > { %10643 = vmatpush3.bf16.xpose.msra.mxu1 %v12487_v7 }
 0x17e   : > { %10644 = vmatprep.subr.bf16.mxu1 %v15853_v39 }
 0x185   : > { %10646 = vmatpush3.bf16.xpose.msra.mxu1 %v12513_v9 }
 0x186   : > { %10647 = vmatprep.subr.bf16.mxu1 %v15853_v39 }
 0x18d   : > { %10649 = vmatpush3.bf16.xpose.msra.mxu1 %v12523_v2 }
 0x18e   : > { %10650 = vmatprep.subr.bf16.mxu1 %v15853_v39 }
 0x195   : > { %10652 = vmatpush3.bf16.xpose.msra.mxu1 %v12533_v25 }
 0x196   : > { %10653 = vmatprep.subr.bf16.mxu1 %v15853_v39 }
 0x19d   : > { %10655 = vmatpush3.bf16.xpose.msra.mxu1 %v10630_v23 }
 0x19e   : > { %10656 = vmatprep.subr.bf16.mxu1 %v15853_v39 }
 0x1a5   : > { %10658 = vmatpush3.bf16.xpose.msra.mxu1 %v10633_v33 }
 0x1ec   : > { %v2195_v33 = vpop.trf.xlu1 }
 0x1ed   : > { %9822 = vmatprep.mubr.msk.f32.mxu0 %vm2211_vm2, %v2195_v33 }
 0x1f0   : > { %v2196_v8 = vpop.trf.xlu1 }
 0x1f4   : > { %v2197_v24 = vpop.trf.xlu1 }
 0x1f8   : > { %v2198_v56 = vpop.trf.xlu1 }
 0x1fc   : > { %v2199_v14 = vpop.trf.xlu1 }
 0x200   : > { %v2200_v17 = vpop.trf.xlu1 }
 0x204   : > { %v2201_v26 = vpop.trf.xlu1 }
 0x208   : > { %v2202_v12 = vpop.trf.xlu1 }
 0x23f   : > { %v2162_v45 = vpop.f32.mrb[2].mxu1 }
 0x240   : > { %v2163_v54 = vadd.f32 %v2162_v45, %v2094_v5  ;;  %v9819_v7 = vpop.f32.mrb[3].mxu1  ;;  %v2203_v5 = vpop.trf.xlu1  ;;  %v8435_v45 = vsel %vm827_vm3, 1.0, %v15856_v27 }
 0x241   : > { %v818_v7 = vld [vmem:[%s15545_s5] sm:$0xff] }
 0x242   : > { %v2166_v9 = vadd.f32 %v2163_v54, %v12625_v44 }
 0x244   : > { %2167 = vmax.xlane.f32.xlu0 %v2166_v9  ;;  %v2204_v28 = vpop.trf.xlu1 }
 0x2d1   : > { %v2168_v2 = vpop.xlane.xlu0 %2167 }
 0x2d2   : > { %v2169_v25 = vsub.f32 %v2166_v9, %v2168_v2  ;;  %v12634_v2 = vmul.f32 0.2, %v8435_v45 }
 0x2d4   : > { %v2170_v23 = vmul.f32 1.442695, %v2169_v25  ;;  %15859 = vst [vmem:[#allocation89_spill] sm:$0xff] %v12634_v2 }
 0x2d6   : > { %11029 = vpow2.f32 %v2170_v23  ;;  %v2205_v23 = vpop.trf.xlu1 }
 0x2da   : > { %v2206_v46 = vpop.trf.xlu1 }
 0x2de   : > { %v2207_v45 = vpop.trf.xlu1 }
 0x2e0   : > { %v11030_v50 = vpop.eup %11029 }
 0x2e1   : > { %2172 = vadd.xlane.f32.xlu0 %v11030_v50 }
 0x36e   : > { %v2173_v48 = vpop.xlane.xlu0 %2172 }
 0x36f   : > { %11031 = vrcp.f32 %v2173_v48 }
 0x379   : > { %v11032_v54 = vpop.eup %11031 }
 0x37a   : > { %v2175_v9 = vmul.f32 %v11032_v54, %v11030_v50 }
 0x37c   : > { %v2176_v25 = vsub.f32 %v2175_v9, %v818_v7 }
 0x37e   : > { %v2178_v33 = vmul.f32 %v12634_v2, %v2176_v25 }
 0x380   : > { %9820 = vmatprep.subr.mxu0 %v2178_v33  ;;  %v2405_v48 = vrot.slane %v2178_v33, 4  ;;  %9879 = vmatmul.mubr.f32.vlgmr.msra.gmra.mrb[4].mxu1 %v2178_v33 }
 0x381   : > { %9821 = vmatpush3.msra.mxu0 %v2178_v33 }
 0x382   : > { %v2406_v53 = vadd.f32 %v2405_v48, %v2178_v33  ;;  %9823 = vmatmul.mubr.msk.f32.vlgmr.msra.gmra.mrb[4].mxu0 %vm2211_vm2, %v2196_v8  ;;  %v2208_v8 = vpop.trf.xlu1  ;;  %v617_v33 = vld [vmem:[%s12659_s16 + $0x18] sm:$0xff]  ;;  %v667_v48 = vld [vmem:[%s12659_s16 + $0x1a8] sm:$0xff] }
 0x383   : > { %9825 = vmatprep.mubr.msk.f32.mxu0 %vm2211_vm2, %v2197_v24  ;;  %v615_v24 = vld [vmem:[%s12659_s16 + $0x8] sm:$0xff] }
 0x384   : > { %v2407_v44 = vrot.slane %v2406_v53, 2 }
 0x386   : > { %v2408_v21 = vadd.f32 %v2407_v44, %v2406_v53  ;;  %9826 = vmatmul.mubr.msk.f32.gmra.mrb[6].mxu0 %vm2211_vm2, %v2198_v56  ;;  %v2209_v53 = vpop.trf.xlu1  ;;  %v665_v56 = vld [vmem:[%s12659_s16 + $0x198] sm:$0xff] }
 0x387   : > { %9828 = vmatprep.mubr.msk.f32.mxu0 %vm2211_vm2, %v2199_v14 }
 0x388   : > { %v2409_v50 = vrot.slane %v2408_v21, 1 }
 0x38a   : > { %v2410_v54 = vadd.f32 %v2409_v50, %v2408_v21  ;;  %9829 = vmatmul.mubr.msk.f32.gmra.mrb[8].mxu0 %vm2211_vm2, %v2200_v17  ;;  %v2210_v21 = vpop.trf.xlu1 }
 0x38b   : > { %9831 = vmatprep.mubr.msk.f32.mxu0 %vm2211_vm2, %v2201_v26  ;;  %v616_v26 = vld [vmem:[%s12659_s16 + $0x10] sm:$0xff] }
 0x38c   : > { %v3661_v7 = vmul.f32 0.01, %v2410_v54  ;;  %v668_v54 = vld [vmem:[%s12659_s16 + $0x1b0] sm:$0xff] }
 0x38e   : > { %v3662_v9 = vsub.f32 %v1776_v32, %v3661_v7  ;;  %9832 = vmatmul.mubr.msk.f32.gmra.mrb[10].mxu0 %vm2211_vm2, %v2202_v12  ;;  %v664_v32 = vld [vmem:[%s12659_s16 + $0x190] sm:$0xff]  ;;  %v666_v12 = vld [vmem:[%s12659_s16 + $0x1a0] sm:$0xff] }
 0x38f   : > { %9834 = vmatprep.mubr.msk.f32.mxu0 %vm2211_vm2, %v2203_v5  ;;  %9958 = vmatprep.mubr.msk.f32.mxu1 %vm2211_vm2, %v664_v32 }
 0x390   : > { %3663 = vst [vmem:[#allocation5] sm:$0x1] %v3662_v9 }
 0x392   : > { %9835 = vmatmul.mubr.msk.f32.gmra.mrb[12].mxu0 %vm2211_vm2, %v2204_v28 }
 0x393   : > { %9837 = vmatprep.mubr.msk.f32.mxu0 %vm2211_vm2, %v2205_v23 }
 0x396   : > { %9838 = vmatmul.mubr.msk.f32.gmra.mrb[14].mxu0 %vm2211_vm2, %v2206_v46  ;;  %v614_v46 = vld [vmem:[%s12659_s16] sm:$0xff] }
 0x397   : > { %9840 = vmatprep.mubr.msk.f32.mxu0 %vm2211_vm2, %v2207_v45  ;;  %v618_v45 = vld [vmem:[%s12659_s16 + $0x20] sm:$0xff] }
 0x39a   : > { %9841 = vmatmul.mubr.msk.f32.gmra.mrb[16].mxu0 %vm2211_vm2, %v2208_v8 }
 0x39b   : > { %9843 = vmatprep.mubr.msk.f32.mxu0 %vm2211_vm2, %v2209_v53 }
 0x39e   : > { %9844 = vmatmul.mubr.msk.f32.gmra.mrb[18].mxu0 %vm2211_vm2, %v2210_v21 }
 0x39f   : > { %9883 = vmatprep.mubr.msk.f32.mxu0 %vm2211_vm2, %v614_v46 }
 0x453   : > { %v2477_v44 = vpop.f32.mrb[4].mxu1 }
 0x454   : > { %v2482_v14 = vsel %vm2481_vm4, %v2477_v44, 0.0  ;;  %v9880_v17 = vpop.f32.mrb[5].mxu1  ;;  %9881 = vmatprep.subr.msk.mxu0 %vm2481_vm4, %v2477_v44  ;;  %10973 = vmatprep.subr.msk.mxu1 %vm2481_vm4, %v2477_v44 }
 0x455   : > { %v3316_v5 = vrot.slane %v2482_v14, 4  ;;  %9882 = vmatpush3.msk.msra.mxu0 %vm2481_vm4, %v2477_v44  ;;  %10974 = vmatpush3.msk.msra.mxu1 %vm2481_vm4, %v2477_v44  ;;  %v9824_v28 = vpop.f32.mrb[4].mxu0  ;;  %v669_v44 = vld [vmem:[%s12659_s16 + $0x1b8] sm:$0xff] }
 0x456   : > { %9884 = vmatmul.mubr.msk.f32.vlgmr.msra.gmra.mrb[20].mxu0 %vm2211_vm2, %v615_v24  ;;  %9959 = vmatmul.mubr.msk.f32.vlgmr.msra.gmra.mrb[6].mxu1 %vm2211_vm2, %v665_v56  ;;  %v3614_v63 = vmul.f32 0.01, %v9824_v28  ;;  %v2326_v25 = vpop.f32.mrb[5].mxu0  ;;  %v620_v56 = vld [vmem:[%s12659_s16 + $0x30] sm:$0xff] }
 0x457   : > { %v3317_v23 = vadd.f32 %v3316_v5, %v2482_v14  ;;  %9886 = vmatprep.mubr.msk.f32.mxu0 %vm2211_vm2, %v616_v26  ;;  %9961 = vmatprep.mubr.msk.f32.mxu1 %vm2211_vm2, %v666_v12  ;;  %v3613_v50 = vmul.f32 0.01, %v2326_v25  ;;  %v670_v14 = vld [vmem:[%s12659_s16 + $0x1c0] sm:$0xff]  ;;  %v621_v25 = vld [vmem:[%s12659_s16 + $0x38] sm:$0xff] }
 0x458   : > { %v12679_v7 = vsub.f32 %v12421_v22, %v3614_v63  ;;  %10779 = vmatprep.subr.bf16.mxu0 %v15853_v39  ;;  %v619_v22 = vld [vmem:[%s12659_s16 + $0x28] sm:$0xff] }
 0x459   : > { %v3318_v9 = vrot.slane %v3317_v23, 2  ;;  %v12683_v8 = vsub.f32 %v12407_v62, %v3613_v50  ;;  %v9827_v53 = vpop.f32.mrb[6].mxu0 }
 0x45a   : > { %15861 = vst [vmem:[#allocation90_spill] sm:$0xff] %v12679_v7  ;;  %9887 = vmatmul.mubr.msk.f32.gmra.mrb[22].mxu0 %vm2211_vm2, %v617_v33  ;;  %9962 = vmatmul.mubr.msk.f32.gmra.mrb[8].mxu1 %vm2211_vm2, %v667_v48  ;;  %v3616_v21 = vmul.f32 0.01, %v9827_v53  ;;  %v2336_v46 = vpop.f32.mrb[7].mxu0  ;;  %v672_v33 = vld [vmem:[%s12659_s16 + $0x1d0] sm:$0xff] }
 0x45b   : > { %15862 = vst [vmem:[#allocation91_spill] sm:$0xff] %v12683_v8  ;;  %v3319_v32 = vadd.f32 %v3318_v9, %v3317_v23  ;;  %9889 = vmatprep.mubr.msk.f32.mxu0 %vm2211_vm2, %v618_v45  ;;  %9964 = vmatprep.mubr.msk.f32.mxu1 %vm2211_vm2, %v668_v54  ;;  %v12693_v24 = vpack.c.bf16 %v12679_v7, %v12683_v8  ;;  %v3615_v62 = vmul.f32 0.01, %v2336_v46  ;;  %v622_v23 = vld [vmem:[%s12659_s16 + $0x40] sm:$0xff]  ;;  %v673_v46 = vld [vmem:[%s12659_s16 + $0x1d8] sm:$0xff] }
 0x45c   : > { %v12698_v26 = vsub.f32 %v12452_v43, %v3616_v21  ;;  %v671_v43 = vld [vmem:[%s12659_s16 + $0x1c8] sm:$0xff] }
 0x45d   : > { %15863 = vst [vmem:[#allocation92_spill] sm:$0xff] %v12693_v24  ;;  %v3320_v17 = vrot.slane %v3319_v32, 1  ;;  %10781 = vmatpush3.bf16.xpose.msra.mxu0 %v12693_v24  ;;  %v12702_v12 = vsub.f32 %v12435_v38, %v3615_v62  ;;  %v9830_v5 = vpop.f32.mrb[8].mxu0  ;;  %v623_v21 = vld [vmem:[%s12659_s16 + $0x48] sm:$0xff] }
 0x45e   : > { %15864 = vst [vmem:[#allocation93_spill] sm:$0xff] %v12698_v26  ;;  %9890 = vmatmul.mubr.msk.f32.gmra.mrb[24].mxu0 %vm2211_vm2, %v619_v22  ;;  %9965 = vmatmul.mubr.msk.f32.gmra.mrb[10].mxu1 %vm2211_vm2, %v669_v44  ;;  %v2346_v28 = vpop.f32.mrb[9].mxu0  ;;  %v3618_v38 = vmul.f32 0.01, %v9830_v5  ;;  %v674_v22 = vld [vmem:[%s12659_s16 + $0x1e0] sm:$0xff]  ;;  %v676_v5 = vld [vmem:[%s12659_s16 + $0x1f0] sm:$0xff] }
 0x45f   : > { %15865 = vst [vmem:[#allocation94_spill] sm:$0xff] %v12702_v12  ;;  %v3321_v63 = vadd.f32 %v3320_v17, %v3319_v32  ;;  %9892 = vmatprep.mubr.msk.f32.mxu0 %vm2211_vm2, %v620_v56  ;;  %9967 = vmatprep.mubr.msk.f32.mxu1 %vm2211_vm2, %v670_v14  ;;  %v12715_v50 = vpack.c.bf16 %v12698_v26, %v12702_v12  ;;  %v3617_v45 = vmul.f32 0.01, %v2346_v28  ;;  %v624_v32 = vld [vmem:[%s12659_s16 + $0x50] sm:$0xff]  ;;  %v625_v14 = vld [vmem:[%s12659_s16 + $0x58] sm:$0xff]  ;;  %v626_v17 = vld [vmem:[%s12659_s16 + $0x60] sm:$0xff] }
 0x460   : > { %10782 = vmatprep.subr.bf16.mxu0 %v15853_v39  ;;  %v12727_v44 = vsub.f32 %v12464_v16, %v3618_v38  ;;  %v675_v16 = vld [vmem:[%s12659_s16 + $0x1e8] sm:$0xff]  ;;  %v628_v38 = vld [vmem:[%s12659_s16 + $0x70] sm:$0xff] }
 0x461   : > { %v3610_v48 = vmul.f32 0.01, %v3321_v63  ;;  %15866 = vst [vmem:[#allocation95_spill] sm:$0xff] %v12715_v50  ;;  %v9833_v54 = vpop.f32.mrb[10].mxu0 }
 0x462   : > { %9893 = vmatmul.mubr.msk.f32.gmra.mrb[26].mxu0 %vm2211_vm2, %v621_v25  ;;  %9968 = vmatmul.mubr.msk.f32.gmra.mrb[12].mxu1 %vm2211_vm2, %v671_v43  ;;  %v2356_v9 = vpop.f32.mrb[11].mxu0  ;;  %15867 = vst [vmem:[#allocation96_spill] sm:$0xff] %v12727_v44  ;;  %v3620_v28 = vmul.f32 0.01, %v9833_v54 }
 0x463   : > { %v3611_v53 = vsub.f32 %v12599_v20, %v3610_v48  ;;  %9895 = vmatprep.mubr.msk.f32.mxu0 %vm2211_vm2, %v622_v23  ;;  %9970 = vmatprep.mubr.msk.f32.mxu1 %vm2211_vm2, %v672_v33  ;;  %v12731_v20 = vsub.f32 %v12462_v3, %v3617_v45  ;;  %v3619_v63 = vmul.f32 0.01, %v2356_v9  ;;  %v627_v23 = vld [vmem:[%s12659_s16 + $0x68] sm:$0xff]  ;;  %v677_v33 = vld [vmem:[%s12659_s16 + $0x1f8] sm:$0xff]  ;;  %v678_v48 = vld [vmem:[%s12659_s16 + $0x200] sm:$0xff] }
 0x464   : > { %v12755_v45 = vsub.f32 %v12489_v40, %v3620_v28  ;;  %v679_v40 = vld [vmem:[%s12659_s16 + $0x208] sm:$0xff]  ;;  %v681_v28 = vld [vmem:[%s12659_s16 + $0x218] sm:$0xff] }
 0x465   : > { %3612 = vst [vmem:[#allocation3] sm:$0x1] %v3611_v53  ;;  %10784 = vmatpush3.bf16.xpose.msra.mxu0 %v12715_v50  ;;  %15868 = vst [vmem:[#allocation97_spill] sm:$0xff] %v12731_v20  ;;  %v9836_v62 = vpop.f32.mrb[12].mxu0  ;;  %v12744_v3 = vpack.c.bf16 %v12727_v44, %v12731_v20  ;;  %v12759_v54 = vsub.f32 %v12480_v52, %v3619_v63 }
 0x466   : > { %9896 = vmatmul.mubr.msk.f32.gmra.mrb[28].mxu0 %vm2211_vm2, %v623_v21  ;;  %9971 = vmatmul.mubr.msk.f32.gmra.mrb[14].mxu1 %vm2211_vm2, %v673_v46  ;;  %v2366_v56 = vpop.f32.mrb[13].mxu0  ;;  %15870 = vst [vmem:[#allocation99_spill] sm:$0xff] %v12755_v45  ;;  %v629_v21 = vld [vmem:[%s12659_s16 + $0x78] sm:$0xff]  ;;  %v630_v46 = vld [vmem:[%s12659_s16 + $0x80] sm:$0xff] }
 0x467   : > { %9898 = vmatprep.mubr.msk.f32.mxu0 %vm2211_vm2, %v624_v32  ;;  %9973 = vmatprep.mubr.msk.f32.mxu1 %vm2211_vm2, %v674_v22  ;;  %15869 = vst [vmem:[#allocation98_spill] sm:$0xff] %v12744_v3  ;;  %15871 = vst [vmem:[#allocation100_spill] sm:$0xff] %v12759_v54  ;;  %v680_v32 = vld [vmem:[%s12659_s16 + $0x210] sm:$0xff]  ;;  %v12772_v52 = vpack.c.bf16 %v12755_v45, %v12759_v54  ;;  %v3622_v22 = vmul.f32 0.01, %v9836_v62 }
 0x468   : > { %10785 = vmatprep.subr.bf16.mxu0 %v15853_v39  ;;  %v632_v62 = vld [vmem:[%s12659_s16 + $0x90] sm:$0xff] }
 0x469   : > { %v9839_v25 = vpop.f32.mrb[14].mxu0  ;;  %15872 = vst [vmem:[#allocation101_spill] sm:$0xff] %v12772_v52  ;;  %v12787_v63 = vsub.f32 %v12515_v37, %v3622_v22  ;;  %v683_v37 = vld [vmem:[%s12659_s16 + $0x228] sm:$0xff]  ;;  %v636_v22 = vld [vmem:[%s12659_s16 + $0xb0] sm:$0xff] }
 0x46a   : > { %9899 = vmatmul.mubr.msk.f32.gmra.mrb[30].mxu0 %vm2211_vm2, %v625_v14  ;;  %9974 = vmatmul.mubr.msk.f32.gmra.mrb[16].mxu1 %vm2211_vm2, %v675_v16  ;;  %v2376_v43 = vpop.f32.mrb[15].mxu0  ;;  %v3621_v14 = vmul.f32 0.01, %v2366_v56  ;;  %v682_v56 = vld [vmem:[%s12659_s16 + $0x220] sm:$0xff] }
 0x46b   : > { %9901 = vmatprep.mubr.msk.f32.mxu0 %vm2211_vm2, %v626_v17  ;;  %9976 = vmatprep.mubr.msk.f32.mxu1 %vm2211_vm2, %v676_v5  ;;  %v631_v5 = vld [vmem:[%s12659_s16 + $0x88] sm:$0xff]  ;;  %15873 = vst [vmem:[#allocation102_spill] sm:$0xff] %v12787_v63 }
 0x46d   : > { %10787 = vmatpush3.bf16.xpose.msra.mxu0 %v12744_v3  ;;  %v9842_v9 = vpop.f32.mrb[16].mxu0 }
 0x46e   : > { %9902 = vmatmul.mubr.msk.f32.gmra.mrb[32].mxu0 %vm2211_vm2, %v627_v23  ;;  %9977 = vmatmul.mubr.msk.f32.gmra.mrb[18].mxu1 %vm2211_vm2, %v677_v33  ;;  %v2386_v53 = vpop.f32.mrb[17].mxu0  ;;  %v12791_v23 = vsub.f32 %v12506_v15, %v3621_v14  ;;  %v633_v33 = vld [vmem:[%s12659_s16 + $0x98] sm:$0xff]  ;;  %v686_v14 = vld [vmem:[%s12659_s16 + $0x240] sm:$0xff] }
 0x46f   : > { %9904 = vmatprep.mubr.msk.f32.mxu0 %vm2211_vm2, %v628_v38  ;;  %9979 = vmatprep.mubr.msk.f32.mxu1 %vm2211_vm2, %v678_v48  ;;  %v634_v38 = vld [vmem:[%s12659_s16 + $0xa0] sm:$0xff]  ;;  %v684_v48 = vld [vmem:[%s12659_s16 + $0x230] sm:$0xff] }
 0x470   : > { %10788 = vmatprep.subr.bf16.mxu0 %v15853_v39  ;;  %15874 = vst [vmem:[#allocation103_spill] sm:$0xff] %v12791_v23  ;;  %v12804_v15 = vpack.c.bf16 %v12787_v63, %v12791_v23 }
 0x471   : > { %v12774_v16 = vpop.f32.mrb[18].mxu0 }
 0x472   : > { %9905 = vmatmul.mubr.msk.f32.gmra.mrb[34].mxu0 %vm2211_vm2, %v629_v21  ;;  %9980 = vmatmul.mubr.msk.f32.gmra.mrb[20].mxu1 %vm2211_vm2, %v679_v40  ;;  %v12778_v17 = vpop.f32.mrb[19].mxu0  ;;  %15875 = vst [vmem:[#allocation104_spill] sm:$0xff] %v12804_v15  ;;  %v3624_v21 = vmul.f32 0.01, %v9839_v25  ;;  %v3623_v40 = vmul.f32 0.01, %v2376_v43 }
 0x473   : > { %9907 = vmatprep.mubr.msk.f32.mxu0 %vm2211_vm2, %v630_v46  ;;  %9982 = vmatprep.mubr.msk.f32.mxu1 %vm2211_vm2, %v680_v32  ;;  %v635_v46 = vld [vmem:[%s12659_s16 + $0xa8] sm:$0xff]  ;;  %v685_v32 = vld [vmem:[%s12659_s16 + $0x238] sm:$0xff] }
 0x474   : > { %v12819_v25 = vsub.f32 %v12525_v41, %v3623_v40  ;;  %v637_v43 = vld [vmem:[%s12659_s16 + $0xb8] sm:$0xff] }
 0x475   : > { %10790 = vmatpush3.bf16.xpose.msra.mxu0 %v12772_v52 }
 0x476   : > { %9908 = vmatmul.mubr.msk.f32.gmra.mrb[36].mxu0 %vm2211_vm2, %v631_v5  ;;  %9983 = vmatmul.mubr.msk.f32.gmra.mrb[22].mxu1 %vm2211_vm2, %v681_v28  ;;  %v12815_v5 = vsub.f32 %v12527_v60, %v3624_v21  ;;  %15877 = vst [vmem:[#allocation106_spill] sm:$0xff] %v12819_v25  ;;  %v687_v60 = vld [vmem:[%s12659_s16 + $0x248] sm:$0xff]  ;;  %v638_v28 = vld [vmem:[%s12659_s16 + $0xc0] sm:$0xff] }
 0x477   : > { %9910 = vmatprep.mubr.msk.f32.mxu0 %vm2211_vm2, %v632_v62  ;;  %9985 = vmatprep.mubr.msk.f32.mxu1 %vm2211_vm2, %v682_v56  ;;  %v688_v62 = vld [vmem:[%s12659_s16 + $0x250] sm:$0xff]  ;;  %v3626_v56 = vmul.f32 0.01, %v9842_v9  ;;  %v690_v21 = vld [vmem:[%s12659_s16 + $0x260] sm:$0xff] }
 0x478   : > { %10791 = vmatprep.subr.bf16.mxu0 %v15853_v39  ;;  %15876 = vst [vmem:[#allocation105_spill] sm:$0xff] %v12815_v5  ;;  %v12832_v41 = vpack.c.bf16 %v12815_v5, %v12819_v25 }
 0x479   : > { %v12843_v40 = vsub.f32 %v12555_v55, %v3626_v56  ;;  %v691_v55 = vld [vmem:[%s12659_s16 + $0x268] sm:$0xff]  ;;  %v645_v56 = vld [vmem:[%s12659_s16 + $0xf8] sm:$0xff] }
 0x47a   : > { %9911 = vmatmul.mubr.msk.f32.gmra.mrb[38].mxu0 %vm2211_vm2, %v633_v33  ;;  %9986 = vmatmul.mubr.msk.f32.gmra.mrb[24].mxu1 %vm2211_vm2, %v683_v37  ;;  %15878 = vst [vmem:[#allocation107_spill] sm:$0xff] %v12832_v41  ;;  %v3625_v33 = vmul.f32 0.01, %v2386_v53  ;;  %v639_v37 = vld [vmem:[%s12659_s16 + $0xc8] sm:$0xff]  ;;  %v641_v53 = vld [vmem:[%s12659_s16 + $0xd8] sm:$0xff] }
 0x47b   : > { %9913 = vmatprep.mubr.msk.f32.mxu0 %vm2211_vm2, %v634_v38  ;;  %9988 = vmatprep.mubr.msk.f32.mxu1 %vm2211_vm2, %v684_v48  ;;  %v689_v38 = vld [vmem:[%s12659_s16 + $0x258] sm:$0xff]  ;;  %v640_v48 = vld [vmem:[%s12659_s16 + $0xd0] sm:$0xff]  ;;  %15879 = vst [vmem:[#allocation108_spill] sm:$0xff] %v12843_v40 }
 0x47c   : > { %v12847_v9 = vsub.f32 %v12552_v42, %v3625_v33  ;;  %v646_v33 = vld [vmem:[%s12659_s16 + $0x100] sm:$0xff] }
 0x47d   : > { %10793 = vmatpush3.bf16.xpose.msra.mxu0 %v12804_v15 }
 0x47e   : > { %9914 = vmatmul.mubr.msk.f32.gmra.mrb[40].mxu0 %vm2211_vm2, %v635_v46  ;;  %9989 = vmatmul.mubr.msk.f32.gmra.mrb[26].mxu1 %vm2211_vm2, %v685_v32  ;;  %15880 = vst [vmem:[#allocation109_spill] sm:$0xff] %v12847_v9  ;;  %v642_v46 = vld [vmem:[%s12659_s16 + $0xe0] sm:$0xff]  ;;  %v692_v32 = vld [vmem:[%s12659_s16 + $0x270] sm:$0xff]  ;;  %v12860_v42 = vpack.c.bf16 %v12843_v40, %v12847_v9 }
 0x47f   : > { %9916 = vmatprep.mubr.msk.f32.mxu0 %vm2211_vm2, %v636_v22  ;;  %9991 = vmatprep.mubr.msk.f32.mxu1 %vm2211_vm2, %v686_v14  ;;  %v3628_v22 = vmul.f32 0.01, %v12774_v16  ;;  %v3627_v14 = vmul.f32 0.01, %v12778_v17 }
 0x480   : > { %10794 = vmatprep.subr.bf16.mxu0 %v15853_v39  ;;  %15881 = vst [vmem:[#allocation110_spill] sm:$0xff] %v12860_v42 }
 0x481   : > { %v12873_v16 = vsub.f32 %v12578_v35, %v3628_v22  ;;  %v12877_v17 = vsub.f32 %v12576_v51, %v3627_v14  ;;  %v695_v35 = vld [vmem:[%s12659_s16 + $0x288] sm:$0xff]  ;;  %v700_v22 = vld [vmem:[%s12659_s16 + $0x2b0] sm:$0xff] }
 0x482   : > { %9917 = vmatmul.mubr.msk.f32.gmra.mrb[42].mxu0 %vm2211_vm2, %v637_v43  ;;  %9992 = vmatmul.mubr.msk.f32.gmra.mrb[28].mxu1 %vm2211_vm2, %v687_v60  ;;  %v643_v43 = vld [vmem:[%s12659_s16 + $0xe8] sm:$0xff]  ;;  %v693_v60 = vld [vmem:[%s12659_s16 + $0x278] sm:$0xff] }
 0x483   : > { %9919 = vmatprep.mubr.msk.f32.mxu0 %vm2211_vm2, %v638_v28  ;;  %9994 = vmatprep.mubr.msk.f32.mxu1 %vm2211_vm2, %v688_v62  ;;  %v644_v28 = vld [vmem:[%s12659_s16 + $0xf0] sm:$0xff]  ;;  %v694_v62 = vld [vmem:[%s12659_s16 + $0x280] sm:$0xff]  ;;  %15882 = vst [vmem:[#allocation111_spill] sm:$0xff] %v12873_v16  ;;  %15883 = vst [vmem:[#allocation112_spill] sm:$0xff] %v12877_v17  ;;  %v12890_v51 = vpack.c.bf16 %v12873_v16, %v12877_v17 }
 0x484   : > { %v651_v14 = vld [vmem:[%s12659_s16 + $0x128] sm:$0xff] }
 0x485   : > { %10796 = vmatpush3.bf16.xpose.msra.mxu0 %v12832_v41  ;;  %15884 = vst [vmem:[#allocation113_spill] sm:$0xff] %v12890_v51 }
 0x486   : > { %9920 = vmatmul.mubr.msk.f32.gmra.mrb[44].mxu0 %vm2211_vm2, %v639_v37  ;;  %9995 = vmatmul.mubr.msk.f32.gmra.mrb[30].mxu1 %vm2211_vm2, %v689_v38  ;;  %v696_v37 = vld [vmem:[%s12659_s16 + $0x290] sm:$0xff]  ;;  %v647_v38 = vld [vmem:[%s12659_s16 + $0x108] sm:$0xff] }
 0x487   : > { %9922 = vmatprep.mubr.msk.f32.mxu0 %vm2211_vm2, %v640_v48  ;;  %9997 = vmatprep.mubr.msk.f32.mxu1 %vm2211_vm2, %v690_v21  ;;  %v697_v48 = vld [vmem:[%s12659_s16 + $0x298] sm:$0xff]  ;;  %v648_v21 = vld [vmem:[%s12659_s16 + $0x110] sm:$0xff] }
 0x488   : > { %10797 = vmatprep.subr.bf16.mxu0 %v15853_v39 }
 0x48a   : > { %9923 = vmatmul.mubr.msk.f32.gmra.mrb[46].mxu0 %vm2211_vm2, %v641_v53  ;;  %9998 = vmatmul.mubr.msk.f32.gmra.mrb[32].mxu1 %vm2211_vm2, %v691_v55  ;;  %v698_v53 = vld [vmem:[%s12659_s16 + $0x2a0] sm:$0xff]  ;;  %v649_v55 = vld [vmem:[%s12659_s16 + $0x118] sm:$0xff] }
 0x48b   : > { %9925 = vmatprep.mubr.msk.f32.mxu0 %vm2211_vm2, %v642_v46  ;;  %10000 = vmatprep.mubr.msk.f32.mxu1 %vm2211_vm2, %v692_v32  ;;  %v699_v46 = vld [vmem:[%s12659_s16 + $0x2a8] sm:$0xff]  ;;  %v650_v32 = vld [vmem:[%s12659_s16 + $0x120] sm:$0xff] }
 0x48d   : > { %10799 = vmatpush3.bf16.xpose.msra.mxu0 %v12860_v42 }
 0x48e   : > { %9926 = vmatmul.mubr.msk.f32.gmra.mrb[48].mxu0 %vm2211_vm2, %v643_v43  ;;  %10001 = vmatmul.mubr.msk.f32.gmra.mrb[34].mxu1 %vm2211_vm2, %v693_v60  ;;  %v701_v43 = vld [vmem:[%s12659_s16 + $0x2b8] sm:$0xff]  ;;  %v652_v60 = vld [vmem:[%s12659_s16 + $0x130] sm:$0xff] }
 0x48f   : > { %9928 = vmatprep.mubr.msk.f32.mxu0 %vm2211_vm2, %v644_v28  ;;  %10003 = vmatprep.mubr.msk.f32.mxu1 %vm2211_vm2, %v694_v62  ;;  %v702_v28 = vld [vmem:[%s12659_s16 + $0x2c0] sm:$0xff]  ;;  %v653_v62 = vld [vmem:[%s12659_s16 + $0x138] sm:$0xff] }
 0x490   : > { %10800 = vmatprep.subr.bf16.mxu0 %v15853_v39 }
 0x492   : > { %9929 = vmatmul.mubr.msk.f32.gmra.mrb[50].mxu0 %vm2211_vm2, %v645_v56  ;;  %10004 = vmatmul.mubr.msk.f32.gmra.mrb[36].mxu1 %vm2211_vm2, %v695_v35  ;;  %v703_v56 = vld [vmem:[%s12659_s16 + $0x2c8] sm:$0xff]  ;;  %v654_v35 = vld [vmem:[%s12659_s16 + $0x140] sm:$0xff] }
 0x493   : > { %9931 = vmatprep.mubr.msk.f32.mxu0 %vm2211_vm2, %v646_v33  ;;  %10006 = vmatprep.mubr.msk.f32.mxu1 %vm2211_vm2, %v696_v37  ;;  %v704_v33 = vld [vmem:[%s12659_s16 + $0x2d0] sm:$0xff]  ;;  %v655_v37 = vld [vmem:[%s12659_s16 + $0x148] sm:$0xff] }
 0x495   : > { %10802 = vmatpush3.bf16.xpose.msra.mxu0 %v12890_v51 }
 0x496   : > { %9932 = vmatmul.mubr.msk.f32.gmra.mrb[52].mxu0 %vm2211_vm2, %v647_v38  ;;  %10007 = vmatmul.mubr.msk.f32.gmra.mrb[38].mxu1 %vm2211_vm2, %v697_v48  ;;  %v705_v38 = vld [vmem:[%s12659_s16 + $0x2d8] sm:$0xff]  ;;  %v656_v48 = vld [vmem:[%s12659_s16 + $0x150] sm:$0xff] }
 0x497   : > { %9934 = vmatprep.mubr.msk.f32.mxu0 %vm2211_vm2, %v648_v21  ;;  %10009 = vmatprep.mubr.msk.f32.mxu1 %vm2211_vm2, %v698_v53  ;;  %v706_v21 = vld [vmem:[%s12659_s16 + $0x2e0] sm:$0xff]  ;;  %v657_v53 = vld [vmem:[%s12659_s16 + $0x158] sm:$0xff] }
 0x49a   : > { %9935 = vmatmul.mubr.msk.f32.gmra.mrb[54].mxu0 %vm2211_vm2, %v649_v55  ;;  %10010 = vmatmul.mubr.msk.f32.gmra.mrb[40].mxu1 %vm2211_vm2, %v699_v46  ;;  %v707_v55 = vld [vmem:[%s12659_s16 + $0x2e8] sm:$0xff]  ;;  %v658_v46 = vld [vmem:[%s12659_s16 + $0x160] sm:$0xff] }
 0x49b   : > { %9937 = vmatprep.mubr.msk.f32.mxu0 %vm2211_vm2, %v650_v32  ;;  %10012 = vmatprep.mubr.msk.f32.mxu1 %vm2211_vm2, %v700_v22  ;;  %v708_v32 = vld [vmem:[%s12659_s16 + $0x2f0] sm:$0xff]  ;;  %v659_v22 = vld [vmem:[%s12659_s16 + $0x168] sm:$0xff] }
 0x49e   : > { %9938 = vmatmul.mubr.msk.f32.gmra.mrb[56].mxu0 %vm2211_vm2, %v651_v14  ;;  %10013 = vmatmul.mubr.msk.f32.gmra.mrb[42].mxu1 %vm2211_vm2, %v701_v43  ;;  %v709_v14 = vld [vmem:[%s12659_s16 + $0x2f8] sm:$0xff]  ;;  %v660_v43 = vld [vmem:[%s12659_s16 + $0x170] sm:$0xff] }
 0x49f   : > { %9940 = vmatprep.mubr.msk.f32.mxu0 %vm2211_vm2, %v652_v60  ;;  %10015 = vmatprep.mubr.msk.f32.mxu1 %vm2211_vm2, %v702_v28  ;;  %v661_v60 = vld [vmem:[%s12659_s16 + $0x178] sm:$0xff]  ;;  %v11049_v28 = vld [vmem:[%s11722_s28 + $0x8] sm:$0xff] }
 0x4a2   : > { %9941 = vmatmul.mubr.msk.f32.gmra.mrb[58].mxu0 %vm2211_vm2, %v653_v62  ;;  %10016 = vmatmul.mubr.msk.f32.gmra.mrb[44].mxu1 %vm2211_vm2, %v703_v56  ;;  %v662_v62 = vld [vmem:[%s12659_s16 + $0x180] sm:$0xff]  ;;  %v663_v56 = vld [vmem:[%s12659_s16 + $0x188] sm:$0xff] }
 0x4a3   : > { %9943 = vmatprep.mubr.msk.f32.mxu0 %vm2211_vm2, %v654_v35  ;;  %10018 = vmatprep.mubr.msk.f32.mxu1 %vm2211_vm2, %v704_v33 }
 0x4a6   : > { %9944 = vmatmul.mubr.msk.f32.gmra.mrb[60].mxu0 %vm2211_vm2, %v655_v37  ;;  %10019 = vmatmul.mubr.msk.f32.gmra.mrb[46].mxu1 %vm2211_vm2, %v705_v38 }
 0x4a7   : > { %9946 = vmatprep.mubr.msk.f32.mxu0 %vm2211_vm2, %v656_v48  ;;  %10021 = vmatprep.mubr.msk.f32.mxu1 %vm2211_vm2, %v706_v21 }
 0x4aa   : > { %9947 = vmatmul.mubr.msk.f32.gmra.mrb[62].mxu0 %vm2211_vm2, %v657_v53  ;;  %10022 = vmatmul.mubr.msk.f32.gmra.mrb[48].mxu1 %vm2211_vm2, %v707_v55 }
 0x4ab   : > { %9949 = vmatprep.mubr.msk.f32.mxu0 %vm2211_vm2, %v658_v46  ;;  %10024 = vmatprep.mubr.msk.f32.mxu1 %vm2211_vm2, %v708_v32 }
 0x4ae   : > { %9950 = vmatmul.mubr.msk.f32.gmra.mrb[64].mxu0 %vm2211_vm2, %v659_v22  ;;  %10025 = vmatmul.mubr.msk.f32.gmra.mrb[50].mxu1 %vm2211_vm2, %v709_v14 }
 0x4af   : > { %9952 = vmatprep.mubr.msk.f32.mxu0 %vm2211_vm2, %v660_v43  ;;  %3848 = vmatprep.mubr.f32.mxu1 %v11049_v28 }
 0x4b2   : > { %9953 = vmatmul.mubr.msk.f32.gmra.mrb[66].mxu0 %vm2211_vm2, %v661_v60 }
 0x4b3   : > { %9955 = vmatprep.mubr.msk.f32.mxu0 %vm2211_vm2, %v662_v62 }
 0x4b6   : > { %9956 = vmatmul.mubr.msk.f32.gmra.mrb[68].mxu0 %vm2211_vm2, %v663_v56 }
 0x4b7   : > { %10120 = vmatprep.mubr.msk.f32.mxu0 %vm11181_vm0, %v15856_v27 }
 0x529   : > { %v9885_v35 = vpop.f32.mrb[20].mxu0  ;;  %v12960_v33 = vpop.f32.mrb[6].mxu1 }
 0x52a   : > { %v2837_v37 = vpop.f32.mrb[21].mxu0  ;;  %v12962_v38 = vpop.f32.mrb[7].mxu1  ;;  %v3323_v7 = vmul.f32 0.01, %v9885_v35 }
 0x52b   : > { %v3322_v2 = vmul.f32 0.01, %v2837_v37 }
 0x52c   : > { %v13013_v3 = vsub.f32 %v11372_v36, %v3323_v7 }
 0x52d   : > { %v9888_v48 = vpop.f32.mrb[22].mxu0  ;;  %v12964_v21 = vpop.f32.mrb[8].mxu1  ;;  %v13016_v27 = vsub.f32 %v11360_v31, %v3322_v2 }
 0x52e   : > { %v2847_v53 = vpop.f32.mrb[23].mxu0  ;;  %v12966_v55 = vpop.f32.mrb[9].mxu1  ;;  %15889 = vst [vmem:[#allocation118_spill] sm:$0xff] %v13013_v3  ;;  %v3325_v24 = vmul.f32 0.01, %v9888_v48 }
 0x52f   : > { %15890 = vst [vmem:[#allocation119_spill] sm:$0xff] %v13016_v27  ;;  %v3324_v39 = vmul.f32 0.01, %v2847_v53 }
 0x530   : > { %v13033_v2 = vsub.f32 %v11462_v19, %v3325_v24 }
 0x531   : > { %v9891_v46 = vpop.f32.mrb[24].mxu0  ;;  %v12968_v32 = vpop.f32.mrb[10].mxu1 }
 0x532   : > { %v2857_v22 = vpop.f32.mrb[25].mxu0  ;;  %v12970_v14 = vpop.f32.mrb[11].mxu1  ;;  %15893 = vst [vmem:[#allocation122_spill] sm:$0xff] %v13033_v2 }
 0x533   : > { %v3326_v7 = vmul.f32 0.01, %v2857_v22 }
 0x535   : > { %v9894_v43 = vpop.f32.mrb[26].mxu0  ;;  %v12972_v60 = vpop.f32.mrb[12].mxu1 }
 0x536   : > { %v2867_v28 = vpop.f32.mrb[27].mxu0  ;;  %v12974_v62 = vpop.f32.mrb[13].mxu1 }
 0x539   : > { %v12976_v56 = vpop.f32.mrb[28].mxu0  ;;  %v12978_v17 = vpop.f32.mrb[14].mxu1 }
 0x53a   : > { %v12980_v16 = vpop.f32.mrb[29].mxu0  ;;  %v12982_v9 = vpop.f32.mrb[15].mxu1 }
 0x53d   : > { %v12984_v40 = vpop.f32.mrb[30].mxu0  ;;  %v12986_v25 = vpop.f32.mrb[16].mxu1 }
 0x53e   : > { %v12988_v5 = vpop.f32.mrb[31].mxu0  ;;  %v12990_v23 = vpop.f32.mrb[17].mxu1 }
 0x541   : > { %v12992_v63 = vpop.f32.mrb[32].mxu0  ;;  %v12994_v54 = vpop.f32.mrb[18].mxu1 }
 0x542   : > { %v12996_v45 = vpop.f32.mrb[33].mxu0  ;;  %v12998_v20 = vpop.f32.mrb[19].mxu1 }
 0x545   : > { %v13000_v44 = vpop.f32.mrb[34].mxu0  ;;  %v13002_v12 = vpop.f32.mrb[20].mxu1 }
 0x546   : > { %15885 = vst [vmem:[#allocation114_spill] sm:$0xff] %v13002_v12  ;;  %v13004_v26 = vpop.f32.mrb[35].mxu0  ;;  %v13006_v8 = vpop.f32.mrb[21].mxu1 }
 0x547   : > { %15886 = vst [vmem:[#allocation115_spill] sm:$0xff] %v13006_v8 }
 0x549   : > { %v9909_v51 = vpop.f32.mrb[36].mxu0  ;;  %v13008_v42 = vpop.f32.mrb[22].mxu1 }
 0x54a   : > { %15887 = vst [vmem:[#allocation116_spill] sm:$0xff] %v13008_v42  ;;  %v3339_v41 = vmul.f32 0.01, %v9909_v51  ;;  %v2917_v15 = vpop.f32.mrb[37].mxu0  ;;  %v13010_v52 = vpop.f32.mrb[23].mxu1 }
 0x54b   : > { %15888 = vst [vmem:[#allocation117_spill] sm:$0xff] %v13010_v52  ;;  %v3338_v50 = vmul.f32 0.01, %v2917_v15  ;;  %v3327_v42 = vmul.f32 0.01, %v9891_v46 }
 0x54c   : > { %v13019_v8 = vsub.f32 %v11358_v30, %v3339_v41  ;;  %v10661_v30 = vpack.c.bf16 %v13013_v3, %v13016_v27 }
 0x54d   : > { %v13022_v35 = vsub.f32 %v11356_v29, %v3338_v50  ;;  %v9912_v37 = vpop.f32.mrb[38].mxu0  ;;  %v13024_v51 = vpop.f32.mrb[24].mxu1  ;;  %v13036_v29 = vsub.f32 %v11446_v10, %v3324_v39  ;;  %v13047_v53 = vsub.f32 %v11550_v11, %v3327_v42  ;;  %v13052_v10 = vsub.f32 %v11534_v0, %v3326_v7 }
 0x54e   : > { %15891 = vst [vmem:[#allocation120_spill] sm:$0xff] %v13019_v8  ;;  %v3341_v52 = vmul.f32 0.01, %v9912_v37  ;;  %v2927_v12 = vpop.f32.mrb[39].mxu0  ;;  %v13026_v36 = vpop.f32.mrb[25].mxu1 }
 0x54f   : > { %15892 = vst [vmem:[#allocation121_spill] sm:$0xff] %v13022_v35  ;;  %v3340_v15 = vmul.f32 0.01, %v2927_v12  ;;  %v10659_v31 = vpack.c.bf16 %v13019_v8, %v13022_v35  ;;  %15894 = vst [vmem:[#allocation123_spill] sm:$0xff] %v13036_v29  ;;  %v10665_v24 = vpack.c.bf16 %v13033_v2, %v13036_v29  ;;  %v3373_v29 = vmul.f32 0.01, %v12960_v33 }
 0x550   : > { %v13039_v50 = vsub.f32 %v11436_v4, %v3341_v52  ;;  %15897 = vst [vmem:[#allocation126_spill] sm:$0xff] %v13047_v53  ;;  %15898 = vst [vmem:[#allocation127_spill] sm:$0xff] %v13052_v10  ;;  %v3329_v4 = vmul.f32 0.01, %v9894_v43  ;;  %v3328_v52 = vmul.f32 0.01, %v2867_v28 }
 0x551   : > { %v13042_v41 = vsub.f32 %v11423_v61, %v3340_v15  ;;  %v9915_v48 = vpop.f32.mrb[40].mxu0  ;;  %10660 = vmatprep.subr.bf16.mxu1 %v10659_v31  ;;  %v13044_v12 = vpop.f32.mrb[26].mxu1  ;;  %v10669_v31 = vpack.c.bf16 %v13047_v53, %v13052_v10  ;;  %v3372_v2 = vmul.f32 0.01, %v12962_v38  ;;  %v15948_v38 = vld [vmem:[#allocation14_spill] sm:$0xff] }
 0x552   : > { %15895 = vst [vmem:[#allocation124_spill] sm:$0xff] %v13039_v50  ;;  %v3343_v46 = vmul.f32 0.01, %v9915_v48  ;;  %v2937_v22 = vpop.f32.mrb[41].mxu0  ;;  %10662 = vmatpush3.bf16.msra.mxu1 %v10661_v30  ;;  %v13049_v19 = vpop.f32.mrb[27].mxu1  ;;  %v13071_v28 = vsub.f32 %v11644_v13, %v3329_v4  ;;  %v13076_v30 = vsub.f32 %v11628_v1, %v3328_v52 }
 0x553   : > { %15896 = vst [vmem:[#allocation125_spill] sm:$0xff] %v13042_v41  ;;  %v3342_v39 = vmul.f32 0.01, %v2937_v22  ;;  %v10663_v61 = vpack.c.bf16 %v13039_v50, %v13042_v41  ;;  %v3331_v48 = vmul.f32 0.01, %v12976_v56  ;;  %v11051_v41 = vld [vmem:[%s11722_s28 + $0x18] sm:$0xff] }
 0x554   : > { %v13059_v11 = vsub.f32 %v11524_v58, %v3343_v46  ;;  %15902 = vst [vmem:[#allocation131_spill] sm:$0xff] %v13071_v28  ;;  %15903 = vst [vmem:[#allocation132_spill] sm:$0xff] %v13076_v30  ;;  %v3330_v46 = vmul.f32 0.01, %v12980_v16  ;;  %v3333_v4 = vmul.f32 0.01, %v12984_v40 }
 0x555   : > { %v13062_v42 = vsub.f32 %v11511_v49, %v3342_v39  ;;  %v9918_v37 = vpop.f32.mrb[42].mxu0  ;;  %10664 = vmatprep.subr.bf16.mxu1 %v10663_v61  ;;  %v13064_v15 = vpop.f32.mrb[28].mxu1  ;;  %v3332_v56 = vmul.f32 0.01, %v12988_v5  ;;  %v13097_v52 = vsub.f32 %v11740_v34, %v3331_v48 }
 0x556   : > { %15899 = vst [vmem:[#allocation128_spill] sm:$0xff] %v13059_v11  ;;  %v3345_v0 = vmul.f32 0.01, %v9918_v37  ;;  %v2947_v43 = vpop.f32.mrb[43].mxu0  ;;  %10666 = vmatpush3.bf16.msra.mxu1 %v10665_v24  ;;  %v13066_v7 = vpop.f32.mrb[29].mxu1 }
 0x557   : > { %15900 = vst [vmem:[#allocation129_spill] sm:$0xff] %v13062_v42  ;;  %15901 = vst [vmem:[#allocation130_spill] sm:$0xff] %v13066_v7  ;;  %v3344_v58 = vmul.f32 0.01, %v2947_v43  ;;  %v10667_v49 = vpack.c.bf16 %v13059_v11, %v13062_v42 }
 0x558   : > { %v13081_v22 = vsub.f32 %v11618_v57, %v3345_v0  ;;  %15908 = vst [vmem:[#allocation137_spill] sm:$0xff] %v13097_v52  ;;  %v13100_v0 = vsub.f32 %v11724_v18, %v3330_v46  ;;  %v15916_v18 = vld [vmem:[#allocation31_spill] sm:$0xff] }
 0x559   : > { %v13084_v39 = vsub.f32 %v11600_v47, %v3344_v58  ;;  %v9921_v61 = vpop.f32.mrb[44].mxu0  ;;  %10668 = vmatprep.subr.bf16.mxu1 %v10667_v49  ;;  %v13086_v13 = vpop.f32.mrb[30].mxu1  ;;  %v10673_v47 = vpack.c.bf16 %v13071_v28, %v13076_v30  ;;  %v15913_v58 = vld [vmem:[#allocation32_spill] sm:$0xff]  ;;  %v13116_v48 = vsub.f32 %v15916_v18, %v3332_v56 }
 0x55a   : > { %15904 = vst [vmem:[#allocation133_spill] sm:$0xff] %v13081_v22  ;;  %15906 = vst [vmem:[#allocation135_spill] sm:$0xff] %v13086_v13  ;;  %v3347_v24 = vmul.f32 0.01, %v9921_v61  ;;  %v2957_v37 = vpop.f32.mrb[45].mxu0  ;;  %10670 = vmatpush3.bf16.msra.mxu1 %v10669_v31  ;;  %v13089_v1 = vpop.f32.mrb[31].mxu1  ;;  %v13111_v49 = vsub.f32 %v15913_v58, %v3333_v4  ;;  %v13234_v13 = vsub.f32 %v15948_v38, %v3373_v29 }
 0x55b   : > { %15905 = vst [vmem:[#allocation134_spill] sm:$0xff] %v13084_v39  ;;  %15907 = vst [vmem:[#allocation136_spill] sm:$0xff] %v13089_v1  ;;  %v3346_v16 = vmul.f32 0.01, %v2957_v37  ;;  %v10671_v57 = vpack.c.bf16 %v13081_v22, %v13084_v39  ;;  %v3334_v4 = vmul.f32 0.01, %v12996_v45 }
 0x55c   : > { %15909 = vst [vmem:[#allocation138_spill] sm:$0xff] %v13100_v0  ;;  %v13103_v40 = vsub.f32 %v11707_v6, %v3347_v24  ;;  %15914 = vst [vmem:[#allocation32_spill] sm:$0xff] %v13111_v49  ;;  %v3335_v6 = vmul.f32 0.01, %v12992_v63  ;;  %v10677_v24 = vpack.c.bf16 %v13097_v52, %v13100_v0  ;;  %v15930_v22 = vld [vmem:[#allocation37_spill] sm:$0xff]  ;;  %v15946_v1 = vld [vmem:[#allocation10_spill] sm:$0xff] }
 0x55d   : > { %v13106_v43 = vsub.f32 %v11694_v59, %v3346_v16  ;;  %v9924_v5 = vpop.f32.mrb[46].mxu0  ;;  %10672 = vmatprep.subr.bf16.mxu1 %v10671_v57  ;;  %v13108_v31 = vpop.f32.mrb[32].mxu1  ;;  %15917 = vst [vmem:[#allocation31_spill] sm:$0xff] %v13116_v48  ;;  %v15918_v16 = vld [vmem:[#allocation30_spill] sm:$0xff]  ;;  %v15960_v38 = vld [vmem:[#allocation20_spill] sm:$0xff] }
 0x55e   : > { %15910 = vst [vmem:[#allocation139_spill] sm:$0xff] %v13103_v40  ;;  %15912 = vst [vmem:[#allocation141_spill] sm:$0xff] %v13108_v31  ;;  %v3349_v61 = vmul.f32 0.01, %v9924_v5  ;;  %v2967_v37 = vpop.f32.mrb[47].mxu0  ;;  %10674 = vmatpush3.bf16.msra.mxu1 %v10673_v47  ;;  %v13113_v34 = vpop.f32.mrb[33].mxu1 }
 0x55f   : > { %15911 = vst [vmem:[#allocation140_spill] sm:$0xff] %v13106_v43  ;;  %15915 = vst [vmem:[#allocation142_spill] sm:$0xff] %v13113_v34  ;;  %v3348_v46 = vmul.f32 0.01, %v2967_v37  ;;  %v10675_v59 = vpack.c.bf16 %v13103_v40, %v13106_v43  ;;  %v15920_v47 = vld [vmem:[#allocation29_spill] sm:$0xff]  ;;  %v10681_v43 = vpack.c.bf16 %v13111_v49, %v13116_v48  ;;  %v15924_v40 = vld [vmem:[#allocation40_spill] sm:$0xff] }
 0x560   : > { %v13125_v57 = vsub.f32 %v15918_v16, %v3349_v61  ;;  %v13137_v45 = vsub.f32 %v15924_v40, %v3335_v6  ;;  %v15926_v16 = vld [vmem:[#allocation39_spill] sm:$0xff]  ;;  %v3375_v31 = vmul.f32 0.01, %v12964_v21  ;;  %v15954_v21 = vld [vmem:[#allocation18_spill] sm:$0xff] }
 0x561   : > { %v13128_v5 = vsub.f32 %v15920_v47, %v3348_v46  ;;  %v9927_v58 = vpop.f32.mrb[48].mxu0  ;;  %10676 = vmatprep.subr.bf16.mxu1 %v10675_v59  ;;  %v13130_v56 = vpop.f32.mrb[34].mxu1  ;;  %v13142_v47 = vsub.f32 %v15926_v16, %v3334_v4  ;;  %v3337_v59 = vmul.f32 0.01, %v13000_v44 }
 0x562   : > { %15919 = vst [vmem:[#allocation30_spill] sm:$0xff] %v13125_v57  ;;  %15922 = vst [vmem:[#allocation143_spill] sm:$0xff] %v13130_v56  ;;  %v3351_v63 = vmul.f32 0.01, %v9927_v58  ;;  %v2977_v37 = vpop.f32.mrb[49].mxu0  ;;  %10678 = vmatpush3.bf16.msra.mxu1 %v10677_v24  ;;  %v13132_v18 = vpop.f32.mrb[35].mxu1 }
 0x563   : > { %15921 = vst [vmem:[#allocation29_spill] sm:$0xff] %v13128_v5  ;;  %15923 = vst [vmem:[#allocation144_spill] sm:$0xff] %v13132_v18  ;;  %v3350_v61 = vmul.f32 0.01, %v2977_v37  ;;  %v10679_v46 = vpack.c.bf16 %v13125_v57, %v13128_v5  ;;  %v3336_v58 = vmul.f32 0.01, %v13004_v26  ;;  %v10685_v26 = vpack.c.bf16 %v13137_v45, %v13142_v47 }
 0x564   : > { %15925 = vst [vmem:[#allocation40_spill] sm:$0xff] %v13137_v45  ;;  %15927 = vst [vmem:[#allocation39_spill] sm:$0xff] %v13142_v47  ;;  %v15928_v24 = vld [vmem:[#allocation38_spill] sm:$0xff]  ;;  %v15944_v56 = vld [vmem:[#allocation12_spill] sm:$0xff] }
 0x565   : > { %v13147_v39 = vsub.f32 %v15928_v24, %v3351_v63  ;;  %v13150_v42 = vsub.f32 %v15930_v22, %v3350_v61  ;;  %v9930_v11 = vpop.f32.mrb[50].mxu0  ;;  %10680 = vmatprep.subr.bf16.mxu1 %v10679_v46  ;;  %v13152_v40 = vpop.f32.mrb[36].mxu1  ;;  %v15932_v63 = vld [vmem:[#allocation48_spill] sm:$0xff]  ;;  %v15934_v22 = vld [vmem:[#allocation47_spill] sm:$0xff]  ;;  %v15936_v46 = vld [vmem:[#allocation46_spill] sm:$0xff] }
 0x566   : > { %v3353_v6 = vmul.f32 0.01, %v9930_v11  ;;  %v2987_v37 = vpop.f32.mrb[51].mxu0  ;;  %10682 = vmatpush3.bf16.msra.mxu1 %v10681_v43  ;;  %v13154_v5 = vpop.f32.mrb[37].mxu1  ;;  %v13161_v16 = vsub.f32 %v15932_v63, %v3337_v59  ;;  %v13164_v61 = vsub.f32 %v15934_v22, %v3336_v58  ;;  %v15938_v11 = vld [vmem:[#allocation45_spill] sm:$0xff] }
 0x567   : > { %15929 = vst [vmem:[#allocation38_spill] sm:$0xff] %v13147_v39  ;;  %15931 = vst [vmem:[#allocation37_spill] sm:$0xff] %v13150_v42  ;;  %v3352_v4 = vmul.f32 0.01, %v2987_v37  ;;  %v10683_v44 = vpack.c.bf16 %v13147_v39, %v13150_v42 }
 0x568   : > { %15933 = vst [vmem:[#allocation48_spill] sm:$0xff] %v13161_v16  ;;  %15935 = vst [vmem:[#allocation47_spill] sm:$0xff] %v13164_v61  ;;  %v13167_v24 = vsub.f32 %v15936_v46, %v3353_v6  ;;  %v10689_v58 = vpack.c.bf16 %v13161_v16, %v13164_v61  ;;  %v11050_v46 = vld [vmem:[%s11722_s28] sm:$0xff] }
 0x569   : > { %v13170_v43 = vsub.f32 %v15938_v11, %v3352_v4  ;;  %v9933_v37 = vpop.f32.mrb[52].mxu0  ;;  %10684 = vmatprep.subr.bf16.mxu1 %v10683_v44  ;;  %v13172_v57 = vpop.f32.mrb[38].mxu1 }
 0x56a   : > { %15937 = vst [vmem:[#allocation46_spill] sm:$0xff] %v13167_v24  ;;  %v2997_v42 = vpop.f32.mrb[53].mxu0  ;;  %10686 = vmatpush3.bf16.msra.mxu1 %v10685_v26  ;;  %v13174_v39 = vpop.f32.mrb[39].mxu1  ;;  %v3355_v10 = vmul.f32 0.01, %v9933_v37 }
 0x56b   : > { %15939 = vst [vmem:[#allocation45_spill] sm:$0xff] %v13170_v43  ;;  %v10687_v59 = vpack.c.bf16 %v13167_v24, %v13170_v43  ;;  %v3354_v53 = vmul.f32 0.01, %v2997_v42 }
 0x56c   : > { %v13223_v34 = vsub.f32 %v15944_v56, %v3355_v10  ;;  %v15952_v10 = vld [vmem:[#allocation9_spill] sm:$0xff] }
 0x56d   : > { %v9936_v6 = vpop.f32.mrb[54].mxu0  ;;  %10688 = vmatprep.subr.bf16.mxu1 %v10687_v59  ;;  %v13180_v4 = vpop.f32.mrb[40].mxu1 }
 0x56e   : > { %v3007_v63 = vpop.f32.mrb[55].mxu0  ;;  %10690 = vmatpush3.bf16.msra.mxu1 %v10689_v58  ;;  %v13182_v44 = vpop.f32.mrb[41].mxu1  ;;  %v3357_v37 = vmul.f32 0.01, %v9936_v6  ;;  %v15957_v6 = vld [vmem:[#allocation15_spill] sm:$0xff] }
 0x56f   : > { %v3356_v42 = vmul.f32 0.01, %v3007_v63  ;;  %v15958_v63 = vld [vmem:[#allocation17_spill] sm:$0xff] }
 0x571   : > { %v9939_v22 = vpop.f32.mrb[56].mxu0  ;;  %3849 = vmatmul.mubr.f32.vlgmr.msra.gmra.mrb[52].mxu1 %v11050_v46  ;;  %v13185_v26 = vpop.f32.mrb[42].mxu1 }
 0x572   : > { %v3017_v11 = vpop.f32.mrb[57].mxu0  ;;  %3918 = vmatprep.mubr.f32.mxu1 %v11051_v41  ;;  %v13188_v43 = vpop.f32.mrb[43].mxu1 }
 0x575   : > { %v9942_v24 = vpop.f32.mrb[58].mxu0  ;;  %v13190_v50 = vpop.f32.mrb[44].mxu1 }
 0x576   : > { %v3027_v59 = vpop.f32.mrb[59].mxu0  ;;  %v13192_v35 = vpop.f32.mrb[45].mxu1 }
 0x579   : > { %v13194_v8 = vpop.f32.mrb[60].mxu0  ;;  %v13196_v58 = vpop.f32.mrb[46].mxu1 }
 0x57a   : > { %v3037_v61 = vpop.f32.mrb[61].mxu0  ;;  %v13198_v16 = vpop.f32.mrb[47].mxu1 }
 0x57d   : > { %v13200_v46 = vpop.f32.mrb[62].mxu0  ;;  %v13202_v47 = vpop.f32.mrb[48].mxu1 }
 0x57e   : > { %15940 = vst [vmem:[#allocation145_spill] sm:$0xff] %v13202_v47  ;;  %v13204_v41 = vpop.f32.mrb[63].mxu0  ;;  %v13206_v45 = vpop.f32.mrb[49].mxu1 }
 0x57f   : > { %15941 = vst [vmem:[#allocation146_spill] sm:$0xff] %v13206_v45  ;;  %v15945_v45 = vld [vmem:[#allocation11_spill] sm:$0xff] }
 0x580   : > { %v13228_v47 = vsub.f32 %v15945_v45, %v3354_v53  ;;  %15949 = vst [vmem:[#allocation11_spill] sm:$0xff] %v13234_v13  ;;  %v3358_v53 = vmul.f32 0.01, %v3017_v11 }
 0x581   : > { %v13208_v48 = vpop.f32.mrb[64].mxu0  ;;  %v13210_v49 = vpop.f32.mrb[50].mxu1 }
 0x582   : > { %15942 = vst [vmem:[#allocation147_spill] sm:$0xff] %v13210_v49  ;;  %v13212_v0 = vpop.f32.mrb[65].mxu0  ;;  %v13214_v52 = vpop.f32.mrb[51].mxu1 }
 0x583   : > { %15943 = vst [vmem:[#allocation148_spill] sm:$0xff] %v13214_v52  ;;  %v3374_v52 = vmul.f32 0.01, %v12966_v55  ;;  %v13243_v55 = vsub.f32 %v15954_v21, %v3375_v31  ;;  %v3377_v31 = vmul.f32 0.01, %v12968_v32 }
 0x584   : > { %v3360_v21 = vmul.f32 0.01, %v3027_v59  ;;  %v3380_v59 = vmul.f32 0.01, %v12982_v9  ;;  %v15972_v9 = vld [vmem:[#allocation34_spill] sm:$0xff] }
 0x585   : > { %v13216_v30 = vpop.f32.mrb[66].mxu0 }
 0x586   : > { %v13218_v28 = vpop.f32.mrb[67].mxu0 }
 0x589   : > { %v9957_v27 = vpop.f32.mrb[68].mxu0 }
 0x58a   : > { %v3371_v3 = vmul.f32 0.01, %v9957_v27  ;;  %v3077_v18 = vpop.f32.mrb[69].mxu0  ;;  %v15950_v27 = vld [vmem:[#allocation13_spill] sm:$0xff] }
 0x58b   : > { %v3370_v49 = vmul.f32 0.01, %v3077_v18  ;;  %v13237_v7 = vsub.f32 %v15950_v27, %v3372_v2  ;;  %15955 = vst [vmem:[#allocation13_spill] sm:$0xff] %v13243_v55  ;;  %v3359_v18 = vmul.f32 0.01, %v9939_v22  ;;  %v13253_v2 = vsub.f32 %v15957_v6, %v3356_v42 }
 0x58c   : > { %v13231_v33 = vsub.f32 %v15946_v1, %v3371_v3  ;;  %v10693_v3 = vpack.c.bf16 %v13223_v34, %v13228_v47  ;;  %v15956_v1 = vld [vmem:[#allocation16_spill] sm:$0xff]  ;;  %v3376_v22 = vmul.f32 0.01, %v12970_v14  ;;  %v3361_v42 = vmul.f32 0.01, %v9942_v24  ;;  %v15962_v14 = vld [vmem:[#allocation22_spill] sm:$0xff] }
 0x58d   : > { %15951 = vst [vmem:[#allocation10_spill] sm:$0xff] %v13237_v7  ;;  %v13240_v56 = vsub.f32 %v15952_v10, %v3370_v49  ;;  %v13250_v29 = vsub.f32 %v15956_v1, %v3357_v37  ;;  %v13256_v49 = vsub.f32 %v15958_v63, %v3374_v52  ;;  %v10695_v11 = vpack.c.bf16 %v13234_v13, %v13237_v7  ;;  %v15961_v37 = vld [vmem:[#allocation19_spill] sm:$0xff]  ;;  %v15964_v1 = vld [vmem:[#allocation21_spill] sm:$0xff]  ;;  %v15966_v63 = vld [vmem:[#allocation24_spill] sm:$0xff] }
 0x58e   : > { %15947 = vst [vmem:[#allocation12_spill] sm:$0xff] %v13231_v33  ;;  %v13263_v27 = vsub.f32 %v15960_v38, %v3359_v18  ;;  %v13266_v10 = vsub.f32 %v15961_v37, %v3358_v53  ;;  %v3379_v18 = vmul.f32 0.01, %v12972_v60  ;;  %v3378_v53 = vmul.f32 0.01, %v12974_v62  ;;  %v15968_v37 = vld [vmem:[#allocation26_spill] sm:$0xff] }
 0x58f   : > { %15953 = vst [vmem:[#allocation14_spill] sm:$0xff] %v13240_v56  ;;  %v10691_v45 = vpack.c.bf16 %v13231_v33, %v13240_v56  ;;  %15959 = vst [vmem:[#allocation9_spill] sm:$0xff] %v13256_v49  ;;  %v10697_v52 = vpack.c.bf16 %v13250_v29, %v13253_v2  ;;  %v10699_v32 = vpack.c.bf16 %v13243_v55, %v13256_v49  ;;  %v3381_v24 = vmul.f32 0.01, %v12978_v17  ;;  %v16134_v56 = vld [vmem:[#allocation124_spill] sm:$0xff] }
 0x590   : > { %v10701_v6 = vpack.c.bf16 %v13263_v27, %v13266_v10  ;;  %v3362_v60 = vmul.f32 0.01, %v3037_v61  ;;  %v13292_v62 = vsub.f32 %v15968_v37, %v3379_v18  ;;  %v15974_v61 = vld [vmem:[#allocation28_spill] sm:$0xff]  ;;  %v15975_v18 = vld [vmem:[#allocation27_spill] sm:$0xff] }
 0x591   : > { %10692 = vmatprep.subr.bf16.mxu1 %v10691_v45  ;;  %v13273_v45 = vsub.f32 %v15962_v14, %v3377_v31  ;;  %v15967_v31 = vld [vmem:[#allocation23_spill] sm:$0xff] }
 0x592   : > { %10694 = vmatpush3.bf16.msra.mxu1 %v10693_v3  ;;  %v13276_v3 = vsub.f32 %v15964_v1, %v3376_v22  ;;  %v13288_v38 = vsub.f32 %v15967_v31, %v3360_v21  ;;  %v3363_v22 = vmul.f32 0.01, %v13194_v8  ;;  %15969 = vst [vmem:[#allocation15_spill] sm:$0xff] %v13292_v62  ;;  %v3364_v21 = vmul.f32 0.01, %v13204_v41  ;;  %v15978_v41 = vld [vmem:[#allocation36_spill] sm:$0xff] }
 0x593   : > { %10696 = vmatprep.subr.bf16.mxu1 %v10695_v11  ;;  %15963 = vst [vmem:[#allocation18_spill] sm:$0xff] %v13273_v45  ;;  %v13285_v11 = vsub.f32 %v15966_v63, %v3361_v42  ;;  %v3365_v42 = vmul.f32 0.01, %v13200_v46  ;;  %v15976_v63 = vld [vmem:[#allocation33_spill] sm:$0xff] }
 0x594   : > { %15965 = vst [vmem:[#allocation16_spill] sm:$0xff] %v13276_v3  ;;  %v10703_v17 = vpack.c.bf16 %v13273_v45, %v13276_v3  ;;  %v13307_v1 = vsub.f32 %v15974_v61, %v3363_v22  ;;  %v13313_v31 = vsub.f32 %v15976_v63, %v3380_v59  ;;  %v3367_v59 = vmul.f32 0.01, %v13208_v48  ;;  %v15985_v63 = vld [vmem:[#allocation44_spill] sm:$0xff] }
 0x595   : > { %v10705_v8 = vpack.c.bf16 %v13285_v11, %v13288_v38  ;;  %v13320_v37 = vsub.f32 %v15978_v41, %v3365_v42  ;;  %v3384_v61 = vmul.f32 0.01, %v12998_v20  ;;  %v3402_v48 = vmul.f32 0.01, %v13154_v5  ;;  %v15989_v20 = vld [vmem:[#allocation50_spill] sm:$0xff] }
 0x596   : > { %10698 = vmatpush3.bf16.msra.mxu1 %v10697_v52  ;;  %v15970_v52 = vld [vmem:[#allocation25_spill] sm:$0xff]  ;;  %15977 = vst [vmem:[#allocation19_spill] sm:$0xff] %v13313_v31  ;;  %v15993_v5 = vld [vmem:[#allocation114_spill] sm:$0xff] }
 0x597   : > { %10700 = vmatprep.subr.bf16.mxu1 %v10699_v32  ;;  %v13295_v14 = vsub.f32 %v15970_v52, %v3378_v53  ;;  %v13300_v32 = vsub.f32 %v15972_v9, %v3381_v24  ;;  %v13310_v53 = vsub.f32 %v15975_v18, %v3362_v60  ;;  %v3382_v24 = vmul.f32 0.01, %v12990_v23  ;;  %v15979_v52 = vld [vmem:[#allocation35_spill] sm:$0xff] }
 0x598   : > { %v13323_v22 = vsub.f32 %v15979_v52, %v3364_v21  ;;  %v3385_v21 = vmul.f32 0.01, %v12994_v54  ;;  %v3368_v54 = vmul.f32 0.01, %v13218_v28  ;;  %v3405_v28 = vmul.f32 0.01, %v13172_v57 }
 0x599   : > { %15971 = vst [vmem:[#allocation17_spill] sm:$0xff] %v13295_v14  ;;  %15973 = vst [vmem:[#allocation20_spill] sm:$0xff] %v13300_v32  ;;  %v10707_v46 = vpack.c.bf16 %v13292_v62, %v13295_v14  ;;  %v10709_v60 = vpack.c.bf16 %v13307_v1, %v13310_v53  ;;  %v10711_v23 = vpack.c.bf16 %v13300_v32, %v13313_v31  ;;  %v3406_v57 = vmul.f32 0.01, %v13182_v44  ;;  %v16011_v44 = vld [vmem:[#allocation116_spill] sm:$0xff]  ;;  %v8910_v62 = vld [vmem:[%s15547_s7 + $0x370] sm:$0xff] }
 0x59a   : > { %10702 = vmatpush3.bf16.msra.mxu1 %v10701_v6  ;;  %v3383_v6 = vmul.f32 0.01, %v12986_v25  ;;  %15980 = vst [vmem:[#allocation22_spill] sm:$0xff] %v13323_v22  ;;  %v3366_v25 = vmul.f32 0.01, %v13212_v0  ;;  %v10713_v18 = vpack.c.bf16 %v13320_v37, %v13323_v22  ;;  %v13352_v52 = vsub.f32 %v15989_v20, %v3385_v21  ;;  %v16000_v20 = vld [vmem:[#allocation51_spill] sm:$0xff] }
 0x59b   : > { %10704 = vmatprep.subr.bf16.mxu1 %v10703_v17  ;;  %v15981_v17 = vld [vmem:[#allocation42_spill] sm:$0xff]  ;;  %v3403_v0 = vmul.f32 0.01, %v13152_v40  ;;  %v3404_v21 = vmul.f32 0.01, %v13174_v39  ;;  %v16003_v39 = vld [vmem:[#allocation56_spill] sm:$0xff] }
 0x59c   : > { %v13332_v9 = vsub.f32 %v15981_v17, %v3383_v6  ;;  %v15987_v6 = vld [vmem:[#allocation43_spill] sm:$0xff]  ;;  %15990 = vst [vmem:[#allocation25_spill] sm:$0xff] %v13352_v52 }
 0x59d   : > { %v13347_v41 = vsub.f32 %v15987_v6, %v3366_v25 }
 0x59e   : > { %10706 = vmatpush3.bf16.msra.mxu1 %v10705_v8  ;;  %15982 = vst [vmem:[#allocation21_spill] sm:$0xff] %v13332_v9  ;;  %v15983_v8 = vld [vmem:[#allocation41_spill] sm:$0xff] }
 0x59f   : > { %10708 = vmatprep.subr.bf16.mxu1 %v10707_v46  ;;  %v13335_v42 = vsub.f32 %v15983_v8, %v3382_v24  ;;  %v13344_v46 = vsub.f32 %v15985_v63, %v3367_v59  ;;  %15988 = vst [vmem:[#allocation26_spill] sm:$0xff] %v13347_v41  ;;  %v3369_v24 = vmul.f32 0.01, %v13216_v30  ;;  %v15994_v59 = vld [vmem:[#allocation54_spill] sm:$0xff]  ;;  %v15996_v8 = vld [vmem:[#allocation53_spill] sm:$0xff]  ;;  %v15998_v63 = vld [vmem:[#allocation52_spill] sm:$0xff] }
 0x5a0   : > { %v13361_v25 = vsub.f32 %v15994_v59, %v3403_v0  ;;  %v13364_v30 = vsub.f32 %v15996_v8, %v3402_v48  ;;  %v3407_v48 = vmul.f32 0.01, %v13180_v4  ;;  %v16005_v59 = vld [vmem:[#allocation58_spill] sm:$0xff]  ;;  %v16007_v8 = vld [vmem:[#allocation57_spill] sm:$0xff] }
 0x5a1   : > { %15984 = vst [vmem:[#allocation24_spill] sm:$0xff] %v13335_v42  ;;  %15986 = vst [vmem:[#allocation23_spill] sm:$0xff] %v13344_v46  ;;  %v10715_v40 = vpack.c.bf16 %v13332_v9, %v13335_v42  ;;  %v13371_v6 = vsub.f32 %v15998_v63, %v3369_v24  ;;  %v13385_v24 = vsub.f32 %v16005_v59, %v3405_v28  ;;  %v3391_v28 = vmul.f32 0.01, %v13024_v51 }
 0x5a2   : > { %10710 = vmatpush3.bf16.msra.mxu1 %v10709_v60  ;;  %v15991_v60 = vld [vmem:[#allocation49_spill] sm:$0xff]  ;;  %15995 = vst [vmem:[#allocation28_spill] sm:$0xff] %v13361_v25  ;;  %15997 = vst [vmem:[#allocation27_spill] sm:$0xff] %v13364_v30  ;;  %v10723_v63 = vpack.c.bf16 %v13361_v25, %v13364_v30  ;;  %v16071_v25 = vld [vmem:[#allocation144_spill] sm:$0xff] }
 0x5a3   : > { %10712 = vmatprep.subr.bf16.mxu1 %v10711_v23  ;;  %v13355_v17 = vsub.f32 %v15991_v60, %v3384_v61  ;;  %v3387_v23 = vmul.f32 0.01, %v15993_v5  ;;  %v10717_v61 = vpack.c.bf16 %v13344_v46, %v13347_v41  ;;  %15999 = vst [vmem:[#allocation33_spill] sm:$0xff] %v13371_v6  ;;  %v13374_v60 = vsub.f32 %v16000_v20, %v3368_v54  ;;  %v16009_v20 = vld [vmem:[#allocation55_spill] sm:$0xff] }
 0x5a4   : > { %16006 = vst [vmem:[#allocation42_spill] sm:$0xff] %v13385_v24  ;;  %v13388_v54 = vsub.f32 %v16007_v8, %v3404_v21  ;;  %v16013_v21 = vld [vmem:[#allocation62_spill] sm:$0xff]  ;;  %v16015_v8 = vld [vmem:[#allocation61_spill] sm:$0xff] }
 0x5a5   : > { %15992 = vst [vmem:[#allocation34_spill] sm:$0xff] %v13355_v17  ;;  %16001 = vst [vmem:[#allocation36_spill] sm:$0xff] %v13374_v60  ;;  %v10719_v0 = vpack.c.bf16 %v13352_v52, %v13355_v17  ;;  %v13382_v5 = vsub.f32 %v16003_v39, %v3387_v23  ;;  %v3389_v23 = vmul.f32 0.01, %v16011_v44  ;;  %v3390_v39 = vmul.f32 0.01, %v13026_v36 }
 0x5a6   : > { %10714 = vmatpush3.bf16.msra.mxu1 %v10713_v18  ;;  %v16002_v18 = vld [vmem:[#allocation115_spill] sm:$0xff]  ;;  %16008 = vst [vmem:[#allocation41_spill] sm:$0xff] %v13388_v54  ;;  %v13402_v59 = vsub.f32 %v16013_v21, %v3407_v48  ;;  %v13405_v30 = vsub.f32 %v16015_v8, %v3406_v57  ;;  %v3408_v44 = vmul.f32 0.01, %v13188_v43  ;;  %v16017_v36 = vld [vmem:[#allocation60_spill] sm:$0xff] }
 0x5a7   : > { %10716 = vmatprep.subr.bf16.mxu1 %v10715_v40  ;;  %v3386_v40 = vmul.f32 0.01, %v16002_v18  ;;  %16004 = vst [vmem:[#allocation35_spill] sm:$0xff] %v13382_v5  ;;  %v16012_v18 = vld [vmem:[#allocation117_spill] sm:$0xff]  ;;  %v11052_v21 = vld [vmem:[%s11722_s28 + $0x10] sm:$0xff]  ;;  %v16021_v57 = vld [vmem:[#allocation64_spill] sm:$0xff] }
 0x5a8   : > { %16014 = vst [vmem:[#allocation43_spill] sm:$0xff] %v13402_v59  ;;  %16016 = vst [vmem:[#allocation50_spill] sm:$0xff] %v13405_v30  ;;  %v10731_v43 = vpack.c.bf16 %v13402_v59, %v13405_v30  ;;  %v16038_v30 = vld [vmem:[#allocation135_spill] sm:$0xff]  ;;  %v16042_v59 = vld [vmem:[#allocation73_spill] sm:$0xff] }
 0x5a9   : > { %v13395_v4 = vsub.f32 %v16009_v20, %v3386_v40  ;;  %v3409_v40 = vmul.f32 0.01, %v13185_v26  ;;  %v10727_v20 = vpack.c.bf16 %v13385_v24, %v13388_v54  ;;  %v16023_v26 = vld [vmem:[#allocation63_spill] sm:$0xff]  ;;  %v11053_v54 = vld [vmem:[%s11722_s28 + $0x28] sm:$0xff] }
 0x5aa   : > { %10718 = vmatpush3.bf16.msra.mxu1 %v10717_v61  ;;  %v10721_v61 = vpack.c.bf16 %v13371_v6, %v13374_v60  ;;  %v13424_v8 = vsub.f32 %v16023_v26, %v3390_v39  ;;  %v16025_v24 = vld [vmem:[#allocation66_spill] sm:$0xff]  ;;  %v16035_v26 = vld [vmem:[#allocation67_spill] sm:$0xff] }
 0x5ab   : > { %10720 = vmatprep.subr.bf16.mxu1 %v10719_v0  ;;  %16010 = vst [vmem:[#allocation44_spill] sm:$0xff] %v13395_v4  ;;  %v3388_v0 = vmul.f32 0.01, %v16012_v18  ;;  %v10725_v51 = vpack.c.bf16 %v13382_v5, %v13395_v4  ;;  %v16019_v18 = vld [vmem:[#allocation59_spill] sm:$0xff]  ;;  %v16124_v4 = vld [vmem:[#allocation137_spill] sm:$0xff] }
 0x5ac   : > { %16024 = vst [vmem:[#allocation53_spill] sm:$0xff] %v13424_v8 }
 0x5ad   : > { %v13417_v48 = vsub.f32 %v16019_v18, %v3388_v0  ;;  %v16027_v0 = vld [vmem:[#allocation65_spill] sm:$0xff]  ;;  %v3411_v18 = vmul.f32 0.01, %v13190_v50 }
 0x5ae   : > { %10722 = vmatpush3.bf16.msra.mxu1 %v10721_v61  ;;  %v13414_v61 = vsub.f32 %v16017_v36, %v3389_v23  ;;  %v13430_v23 = vsub.f32 %v16025_v24, %v3409_v40  ;;  %v13433_v36 = vsub.f32 %v16027_v0, %v3408_v44  ;;  %v3412_v24 = vmul.f32 0.01, %v13198_v16  ;;  %v16037_v0 = vld [vmem:[#allocation130_spill] sm:$0xff] }
 0x5af   : > { %10724 = vmatprep.subr.bf16.mxu1 %v10723_v63  ;;  %16020 = vst [vmem:[#allocation114_spill] sm:$0xff] %v13417_v48  ;;  %v13421_v63 = vsub.f32 %v16021_v57, %v3391_v28  ;;  %v3410_v28 = vmul.f32 0.01, %v13192_v35  ;;  %v16031_v35 = vld [vmem:[#allocation69_spill] sm:$0xff]  ;;  %v16033_v57 = vld [vmem:[#allocation68_spill] sm:$0xff] }
 0x5b0   : > { %16018 = vst [vmem:[#allocation49_spill] sm:$0xff] %v13414_v61  ;;  %16026 = vst [vmem:[#allocation52_spill] sm:$0xff] %v13430_v23  ;;  %v10729_v39 = vpack.c.bf16 %v13414_v61, %v13417_v48  ;;  %v3395_v16 = vmul.f32 0.01, %v13064_v15  ;;  %v16045_v15 = vld [vmem:[#allocation146_spill] sm:$0xff] }
 0x5b1   : > { %3919 = vmatmul.mubr.f32.vlgmr.msra.gmra.mrb[54].mxu1 %v11052_v21  ;;  %16022 = vst [vmem:[#allocation54_spill] sm:$0xff] %v13421_v63  ;;  %16028 = vst [vmem:[#allocation51_spill] sm:$0xff] %v13433_v36  ;;  %v3392_v21 = vmul.f32 0.01, %v13049_v19  ;;  %v10733_v40 = vpack.c.bf16 %v13421_v63, %v13424_v8  ;;  %v13449_v50 = vsub.f32 %v16031_v35, %v3410_v28  ;;  %v16040_v28 = vld [vmem:[#allocation74_spill] sm:$0xff]  ;;  %v16121_v8 = vld [vmem:[#allocation127_spill] sm:$0xff] }
 0x5b2   : > { %10726 = vmatpush3.bf16.msra.mxu1 %v10725_v51  ;;  %3988 = vmatprep.mubr.f32.mxu1 %v11053_v54  ;;  %v3393_v51 = vmul.f32 0.01, %v13044_v12  ;;  %v3413_v54 = vmul.f32 0.01, %v13196_v58  ;;  %v10735_v12 = vpack.c.bf16 %v13430_v23, %v13433_v36  ;;  %v13467_v36 = vsub.f32 %v16042_v59, %v3412_v24  ;;  %v16052_v24 = vld [vmem:[#allocation75_spill] sm:$0xff] }
 0x5b3   : > { %10728 = vmatprep.subr.bf16.mxu1 %v10727_v20  ;;  %v16029_v20 = vld [vmem:[#allocation70_spill] sm:$0xff]  ;;  %16032 = vst [vmem:[#allocation56_spill] sm:$0xff] %v13449_v50  ;;  %v13457_v58 = vsub.f32 %v16035_v26, %v3392_v21  ;;  %v3414_v26 = vmul.f32 0.01, %v16045_v15 }
 0x5b4   : > { %v13446_v44 = vsub.f32 %v16029_v20, %v3411_v18  ;;  %v13454_v19 = vsub.f32 %v16033_v57, %v3393_v51  ;;  %v3397_v18 = vmul.f32 0.01, %v16038_v30  ;;  %v16039_v20 = vld [vmem:[#allocation136_spill] sm:$0xff]  ;;  %v13464_v35 = vsub.f32 %v16040_v28, %v3413_v54  ;;  %16043 = vst [vmem:[#allocation116_spill] sm:$0xff] %v13467_v36  ;;  %v16044_v51 = vld [vmem:[#allocation145_spill] sm:$0xff]  ;;  %v16054_v15 = vld [vmem:[#allocation78_spill] sm:$0xff] }
 0x5b5   : > { %16036 = vst [vmem:[#allocation57_spill] sm:$0xff] %v13457_v58  ;;  %v3415_v57 = vmul.f32 0.01, %v16044_v51  ;;  %v16050_v28 = vld [vmem:[#allocation76_spill] sm:$0xff] }
 0x5b6   : > { %10730 = vmatpush3.bf16.msra.mxu1 %v10729_v39  ;;  %16030 = vst [vmem:[#allocation115_spill] sm:$0xff] %v13446_v44  ;;  %16034 = vst [vmem:[#allocation58_spill] sm:$0xff] %v13454_v19  ;;  %v3394_v39 = vmul.f32 0.01, %v16037_v0  ;;  %v10739_v21 = vpack.c.bf16 %v13446_v44, %v13449_v50  ;;  %v10737_v30 = vpack.c.bf16 %v13454_v19, %v13457_v58  ;;  %v16046_v0 = vld [vmem:[#allocation72_spill] sm:$0xff]  ;;  %v16056_v50 = vld [vmem:[#allocation77_spill] sm:$0xff] }
 0x5b7   : > { %10732 = vmatprep.subr.bf16.mxu1 %v10731_v43  ;;  %v3396_v43 = vmul.f32 0.01, %v16039_v20  ;;  %16041 = vst [vmem:[#allocation55_spill] sm:$0xff] %v13464_v35  ;;  %v13476_v20 = vsub.f32 %v16046_v0, %v3395_v16  ;;  %v13482_v59 = vsub.f32 %v16050_v28, %v3397_v18  ;;  %v10743_v51 = vpack.c.bf16 %v13464_v35, %v13467_v36  ;;  %v16058_v0 = vld [vmem:[#allocation147_spill] sm:$0xff] }
 0x5b8   : > { %v13490_v44 = vsub.f32 %v16054_v15, %v3415_v57  ;;  %v13493_v16 = vsub.f32 %v16056_v50, %v3414_v26  ;;  %v16062_v15 = vld [vmem:[#allocation82_spill] sm:$0xff]  ;;  %v16064_v50 = vld [vmem:[#allocation81_spill] sm:$0xff] }
 0x5b9   : > { %16047 = vst [vmem:[#allocation117_spill] sm:$0xff] %v13476_v20  ;;  %16051 = vst [vmem:[#allocation61_spill] sm:$0xff] %v13482_v59 }
 0x5ba   : > { %10734 = vmatpush3.bf16.msra.mxu1 %v10733_v40  ;;  %v16048_v40 = vld [vmem:[#allocation71_spill] sm:$0xff]  ;;  %16055 = vst [vmem:[#allocation59_spill] sm:$0xff] %v13490_v44  ;;  %16057 = vst [vmem:[#allocation64_spill] sm:$0xff] %v13493_v16 }
 0x5bb   : > { %10736 = vmatprep.subr.bf16.mxu1 %v10735_v12  ;;  %v13479_v54 = vsub.f32 %v16048_v40, %v3394_v39  ;;  %v13485_v12 = vsub.f32 %v16052_v24, %v3396_v43  ;;  %v3417_v39 = vmul.f32 0.01, %v16058_v0  ;;  %v16059_v40 = vld [vmem:[#allocation148_spill] sm:$0xff]  ;;  %v16060_v43 = vld [vmem:[#allocation141_spill] sm:$0xff]  ;;  %v10747_v0 = vpack.c.bf16 %v13490_v44, %v13493_v16 }
 0x5bc   : > { %v3416_v23 = vmul.f32 0.01, %v16059_v40  ;;  %v3399_v28 = vmul.f32 0.01, %v16060_v43  ;;  %v16066_v40 = vld [vmem:[#allocation80_spill] sm:$0xff]  ;;  %v16068_v43 = vld [vmem:[#allocation79_spill] sm:$0xff] }
 0x5bd   : > { %16049 = vst [vmem:[#allocation62_spill] sm:$0xff] %v13479_v54  ;;  %16053 = vst [vmem:[#allocation60_spill] sm:$0xff] %v13485_v12  ;;  %v10741_v18 = vpack.c.bf16 %v13476_v20, %v13479_v54  ;;  %v10745_v57 = vpack.c.bf16 %v13482_v59, %v13485_v12  ;;  %v3400_v12 = vmul.f32 0.01, %v16071_v25  ;;  %v16076_v25 = vmov 0.0|0.0  }
 0x5be   : > { %10738 = vmatpush3.bf16.msra.mxu1 %v10737_v30  ;;  %v16061_v30 = vld [vmem:[#allocation142_spill] sm:$0xff]  ;;  %v13507_v26 = vsub.f32 %v16064_v50, %v3416_v23  ;;  %v13512_v36 = vsub.f32 %v16066_v40, %v3399_v28  ;;  %v16074_v28 = vld [vmem:[#allocation83_spill] sm:$0xff]  ;;  %v16078_v40 = vmov 0.0  }
 0x5bf   : > { %10740 = vmatprep.subr.bf16.mxu1 %v10739_v21  ;;  %v3398_v24 = vmul.f32 0.01, %v16061_v30  ;;  %v13504_v21 = vsub.f32 %v16062_v15, %v3417_v39  ;;  %v16072_v39 = vld [vmem:[#allocation84_spill] sm:$0xff]  ;;  %v13527_v50 = vsub.f32 %v16074_v28, %v3400_v12  ;;  %v16080_v12 = vld [vmem:[#allocation98_spill] sm:$0xff] }
 0x5c0   : > { %16065 = vst [vmem:[#allocation66_spill] sm:$0xff] %v13507_v26  ;;  %16067 = vst [vmem:[#allocation65_spill] sm:$0xff] %v13512_v36 }
 0x5c1   : > { %16063 = vst [vmem:[#allocation63_spill] sm:$0xff] %v13504_v21  ;;  %v13515_v30 = vsub.f32 %v16068_v43, %v3398_v24  ;;  %v10751_v23 = vpack.c.bf16 %v13504_v21, %v13507_v26  ;;  %16075 = vst [vmem:[#allocation68_spill] sm:$0xff] %v13527_v50  ;;  %v16081_v43 = vld [vmem:[#allocation101_spill] sm:$0xff] }
 0x5c2   : > { %10742 = vmatpush3.bf16.msra.mxu1 %v10741_v18  ;;  %v16070_v18 = vld [vmem:[#allocation143_spill] sm:$0xff] }
 0x5c3   : > { %10744 = vmatprep.subr.bf16.mxu1 %v10743_v51  ;;  %16069 = vst [vmem:[#allocation70_spill] sm:$0xff] %v13515_v30  ;;  %v3401_v35 = vmul.f32 0.01, %v16070_v18  ;;  %v10749_v51 = vpack.c.bf16 %v13512_v36, %v13515_v30  ;;  %v16082_v18 = vld [vmem:[#allocation104_spill] sm:$0xff] }
 0x5c4   : > { %v16087_v30 = vld [vmem:[#allocation88_spill] sm:$0xff] }
 0x5c5   : > { %v13524_v15 = vsub.f32 %v16072_v39, %v3401_v35  ;;  %v16079_v35 = vld [vmem:[#allocation95_spill] sm:$0xff]  ;;  %v16085_v39 = vld [vmem:[#allocation113_spill] sm:$0xff] }
 0x5c6   : > { %10746 = vmatpush3.bf16.msra.mxu1 %v10745_v57  ;;  %v11054_v57 = vld [vmem:[%s11722_s28 + $0x20] sm:$0xff] }
 0x5c7   : > { %10748 = vmatprep.subr.bf16.mxu1 %v10747_v0  ;;  %16073 = vst [vmem:[#allocation69_spill] sm:$0xff] %v13524_v15  ;;  %v10753_v24 = vpack.c.bf16 %v13524_v15, %v13527_v50  ;;  %v16077_v0 = vld [vmem:[#allocation92_spill] sm:$0xff] }
 0x5ca   : > { %10750 = vmatpush3.bf16.msra.mxu1 %v10749_v51  ;;  %v16084_v51 = vld [vmem:[#allocation110_spill] sm:$0xff] }
 0x5cb   : > { %10752 = vmatprep.subr.bf16.mxu1 %v10751_v23  ;;  %v16083_v23 = vld [vmem:[#allocation107_spill] sm:$0xff] }
 0x5ce   : > { %10754 = vmatpush3.bf16.msra.mxu1 %v10753_v24 }
 0x5cf   : > { %10755 = vmatprep.subr.bf16.mxu1 %v16076_v25 }
 0x5d1   : > { %3989 = vmatmul.mubr.f32.vlgmr.msra.gmra.mrb[56].mxu1 %v11054_v57 }
 0x5d2   : > { %10757 = vmatpush3.bf16.msra.mxu1 %v16077_v0  ;;  %10059 = vmatprep.mubr.msk.f32.mxu1 %vm11181_vm0, %v16078_v40  ;;  %v13550_v0 = vld [vmem:[#allocation3] sm:$0x1]  ;;  %vm5831_vm0 = vcmask 130048  }
 0x5d3   : > { %10758 = vmatprep.subr.bf16.mxu1 %v16076_v25 }
 0x5d6   : > { %10760 = vmatpush3.bf16.msra.mxu1 %v16079_v35  ;;  %v16086_v35 = vld [vmem:[#allocation86_spill] sm:$0xff] }
 0x5d7   : > { %10761 = vmatprep.subr.bf16.mxu1 %v16076_v25 }
 0x5da   : > { %10763 = vmatpush3.bf16.msra.mxu1 %v16080_v12  ;;  %v3782_v12 = vrot.slane %v13550_v0, %v16086_v35 }
 0x5db   : > { %10764 = vmatprep.subr.bf16.mxu1 %v16076_v25 }
 0x5de   : > { %10766 = vmatpush3.bf16.msra.mxu1 %v16081_v43 }
 0x5df   : > { %10767 = vmatprep.subr.bf16.mxu1 %v16076_v25 }
 0x5e2   : > { %10769 = vmatpush3.bf16.msra.mxu1 %v16082_v18 }
 0x5e3   : > { %10770 = vmatprep.subr.bf16.mxu1 %v16076_v25 }
 0x5e6   : > { %10772 = vmatpush3.bf16.msra.mxu1 %v16083_v23 }
 0x5e7   : > { %10773 = vmatprep.subr.bf16.mxu1 %v16076_v25 }
 0x5ea   : > { %10775 = vmatpush3.bf16.msra.mxu1 %v16084_v51 }
 0x5eb   : > { %10776 = vmatprep.subr.bf16.mxu1 %v16076_v25 }
 0x5ee   : > { %10778 = vmatpush3.bf16.msra.mxu1 %v16085_v39  ;;  %v3681_v39 = vld [vmem:[#allocation5] sm:$0x1] }
 0x644   : > { %v9298_v28 = vpop.f32.mrb[52].mxu1 }
 0x645   : > { %v9299_v24 = vpop.f32.mrb[53].mxu1 }
 0x646   : > { %v9300_v57 = vadd.f32 %v9299_v24, %v9298_v28  ;;  %v3999_v28 = vrot.slane %v3681_v39, %v16086_v35  ;;  %v11055_v35 = vld [vmem:[%s15545_s5] sm:$0xff] }
 0x648   : > { %v3851_v40 = vadd.f32 %v9300_v57, %v3782_v12 }
 0x684   : > { %v9333_v43 = vpop.f32.mrb[54].mxu1 }
 0x685   : > { %v9334_v18 = vpop.f32.mrb[55].mxu1 }
 0x686   : > { %v9335_v23 = vadd.f32 %v9334_v18, %v9333_v43 }
 0x688   : > { %v3921_v26 = vadd.f32 %v9335_v23, %v3851_v40 }
 0x6a4   : > { %v9368_v21 = vpop.f32.mrb[56].mxu1 }
 0x6a5   : > { %v9369_v16 = vpop.f32.mrb[57].mxu1 }
 0x6a6   : > { %v9370_v51 = vadd.f32 %v9369_v16, %v9368_v21 }
 0x6a8   : > { %v13554_v44 = vadd.f32 %v9370_v51, %v3921_v26 }
 0x6aa   : > { %v3994_v25 = vmax.f32 %v13554_v44, 0.0  ;;  %vm4384_vm5 = vcmp.gt.f32.partialorder %v13554_v44, 0.0  ;;  %v11059_v44 = vld [vmem:[%s12659_s16 + $0x18] sm:$0xff] }
 0x6ac   : > { %10060 = vmatmul.mubr.f32.vlgmr.msra.gmra.mrb[58].mxu1 %v3994_v25 }
 0x77f   : > { %v4067_v24 = vpop.f32.mrb[58].mxu1 }
 0x780   : > { %v4068_v50 = vadd.f32 %v4067_v24, %v3999_v28  ;;  %v10061_v15 = vpop.f32.mrb[59].mxu1 }
 0x781   : > { %v16088_v15 = vld [vmem:[#allocation89_spill] sm:$0xff] }
 0x782   : > { %v4071_v36 = vadd.f32 %v4068_v50, %v16087_v30 }
 0x784   : > { %4072 = vmax.xlane.f32.xlu1 %v4071_v36 }
 0x811   : > { %v4073_v57 = vpop.xlane.xlu1 %4072 }
 0x812   : > { %v4074_v12 = vsub.f32 %v4071_v36, %v4073_v57 }
 0x814   : > { %v4075_v40 = vmul.f32 1.442695, %v4074_v12 }
 0x816   : > { %11033 = vpow2.f32 %v4075_v40 }
 0x820   : > { %v11034_v43 = vpop.eup %11033 }
 0x821   : > { %4077 = vadd.xlane.f32.xlu0 %v11034_v43 }
 0x84e   : > { %4083 = vxpose.xlu0.b32.start.end [1/1] (short) %v3994_v25, 128 }
 0x8ae   : > { %v4078_v16 = vpop.xlane.xlu0 %4077 }
 0x8af   : > { %11035 = vrcp.f32 %v4078_v16 }
 0x8b9   : > { %v11036_v21 = vpop.eup %11035 }
 0x8ba   : > { %v4080_v26 = vmul.f32 %v11036_v21, %v11034_v43 }
 0x8bc   : > { %v4081_v18 = vsub.f32 %v4080_v26, %v11055_v35 }
 0x8be   : > { %v4082_v23 = vmul.f32 %v4081_v18, %v16088_v15 }
 0x8c0   : > { %10062 = vmatprep.subr.mxu1 %v4082_v23  ;;  %v4308_v50 = vrot.slane %v4082_v23, 4  ;;  %10121 = vmatmul.mubr.f32.vlgmr.msra.gmra.mrb[70].mxu0 %v4082_v23 }
 0x8c1   : > { %10063 = vmatpush3.msra.mxu1 %v4082_v23 }
 0x8c2   : > { %v4309_v36 = vadd.f32 %v4308_v50, %v4082_v23 }
 0x8c4   : > { %v4310_v51 = vrot.slane %v4309_v36, 2 }
 0x8c6   : > { %v4311_v28 = vadd.f32 %v4310_v51, %v4309_v36 }
 0x8c8   : > { %v4312_v24 = vrot.slane %v4311_v28, 1 }
 0x8ca   : > { %v4313_v25 = vadd.f32 %v4312_v24, %v4311_v28 }
 0x8cc   : > { %v5276_v57 = vmul.f32 0.01, %v4313_v25 }
 0x8ce   : > { %v5277_v12 = vsub.f32 %v3681_v39, %v5276_v57  ;;  %v4099_v40 = vpop.trf.xlu0  ;;  %v11056_v57 = vld [vmem:[%s12659_s16] sm:$0xff] }
 0x8cf   : > { %10064 = vmatprep.mubr.msk.f32.mxu1 %vm2211_vm2, %v4099_v40 }
 0x8d0   : > { %5278 = vst [vmem:[#allocation5] sm:$0x1] %v5277_v12 }
 0x8d2   : > { %v4100_v43 = vpop.trf.xlu0 }
 0x8d3   : > { %10065 = vmatmul.mubr.msk.f32.vlgmr.msra.gmra.mrb[60].mxu1 %vm2211_vm2, %v4100_v43 }
 0x8d6   : > { %v4101_v16 = vpop.trf.xlu0 }
 0x8d7   : > { %10067 = vmatprep.mubr.msk.f32.mxu1 %vm2211_vm2, %v4101_v16 }
 0x8da   : > { %v4102_v21 = vpop.trf.xlu0 }
 0x8db   : > { %10068 = vmatmul.mubr.msk.f32.gmra.mrb[62].mxu1 %vm2211_vm2, %v4102_v21  ;;  %v11057_v21 = vld [vmem:[%s12659_s16 + $0x8] sm:$0xff] }
 0x8de   : > { %v4103_v26 = vpop.trf.xlu0 }
 0x8df   : > { %10070 = vmatprep.mubr.msk.f32.mxu1 %vm2211_vm2, %v4103_v26 }
 0x8e2   : > { %v4104_v35 = vpop.trf.xlu0 }
 0x8e3   : > { %10071 = vmatmul.mubr.msk.f32.gmra.mrb[64].mxu1 %vm2211_vm2, %v4104_v35  ;;  %v11058_v35 = vld [vmem:[%s12659_s16 + $0x10] sm:$0xff] }
 0x8e6   : > { %v4105_v39 = vpop.trf.xlu0 }
 0x8e7   : > { %10073 = vmatprep.mubr.msk.f32.mxu1 %vm2211_vm2, %v4105_v39 }
 0x8ea   : > { %v4106_v18 = vpop.trf.xlu0 }
 0x8eb   : > { %10074 = vmatmul.mubr.msk.f32.gmra.mrb[66].mxu1 %vm2211_vm2, %v4106_v18 }
 0x8ee   : > { %v4107_v15 = vpop.trf.xlu0 }
 0x8ef   : > { %10076 = vmatprep.mubr.msk.f32.mxu1 %vm2211_vm2, %v4107_v15  ;;  %v11060_v15 = vld [vmem:[%s12659_s16 + $0x20] sm:$0xff] }
 0x8f2   : > { %v4108_v23 = vpop.trf.xlu0 }
 0x8f3   : > { %10077 = vmatmul.mubr.msk.f32.gmra.mrb[68].mxu1 %vm2211_vm2, %v4108_v23 }
 0x8f6   : > { %v4109_v50 = vpop.trf.xlu0 }
 0x8f7   : > { %10079 = vmatprep.mubr.msk.f32.mxu1 %vm2211_vm2, %v4109_v50  ;;  %v11061_v50 = vld [vmem:[%s12659_s16 + $0x28] sm:$0xff] }
 0x8fa   : > { %v4110_v36 = vpop.trf.xlu0 }
 0x8fb   : > { %10080 = vmatmul.mubr.msk.f32.gmra.mrb[70].mxu1 %vm2211_vm2, %v4110_v36 }
 0x8fe   : > { %v4111_v51 = vpop.trf.xlu0 }
 0x8ff   : > { %10082 = vmatprep.mubr.msk.f32.mxu1 %vm2211_vm2, %v4111_v51  ;;  %v11062_v51 = vld [vmem:[%s12659_s16 + $0x30] sm:$0xff] }
 0x902   : > { %v4112_v28 = vpop.trf.xlu0 }
 0x903   : > { %10083 = vmatmul.mubr.msk.f32.gmra.mrb[72].mxu1 %vm2211_vm2, %v4112_v28 }
 0x906   : > { %v4113_v24 = vpop.trf.xlu0 }
 0x907   : > { %10085 = vmatprep.mubr.msk.f32.mxu1 %vm2211_vm2, %v4113_v24  ;;  %v11063_v24 = vld [vmem:[%s12659_s16 + $0x38] sm:$0xff] }
 0x90a   : > { %v4114_v25 = vpop.trf.xlu0 }
 0x90b   : > { %10086 = vmatmul.mubr.msk.f32.gmra.mrb[74].mxu1 %vm2211_vm2, %v4114_v25 }
 0x90c   : > { %10125 = vmatprep.mubr.msk.f32.mxu1 %vm2211_vm2, %v11056_v57  ;;  %v11064_v57 = vld [vmem:[%s12659_s16 + $0x40] sm:$0xff] }
 0x993   : > { %v4380_v12 = vpop.f32.mrb[70].mxu0 }
 0x994   : > { %v4385_v40 = vsel %vm4384_vm5, %v4380_v12, 0.0  ;;  %v10122_v43 = vpop.f32.mrb[71].mxu0  ;;  %10123 = vmatprep.subr.msk.mxu1 %vm4384_vm5, %v4380_v12 }
 0x995   : > { %v4931_v16 = vrot.slane %v4385_v40, 4  ;;  %10124 = vmatpush3.msk.msra.mxu1 %vm4384_vm5, %v4380_v12 }
 0x996   : > { %10126 = vmatmul.mubr.msk.f32.vlgmr.msra.gmra.mrb[76].mxu1 %vm2211_vm2, %v11057_v21  ;;  %v11066_v21 = vld [vmem:[%s12659_s16 + $0x50] sm:$0xff] }
 0x997   : > { %v4932_v26 = vadd.f32 %v4931_v16, %v4385_v40  ;;  %10128 = vmatprep.mubr.msk.f32.mxu1 %vm2211_vm2, %v11058_v35  ;;  %v11065_v40 = vld [vmem:[%s12659_s16 + $0x48] sm:$0xff] }
 0x999   : > { %v4933_v39 = vrot.slane %v4932_v26, 2 }
 0x99a   : > { %10129 = vmatmul.mubr.msk.f32.gmra.mrb[78].mxu1 %vm2211_vm2, %v11059_v44 }
 0x99b   : > { %v4934_v18 = vadd.f32 %v4933_v39, %v4932_v26  ;;  %10131 = vmatprep.mubr.msk.f32.mxu1 %vm2211_vm2, %v11060_v15  ;;  %v7748_v26 = vld [vmem:[%s15549_s9 + $0x8] sm:$0xff]  ;;  %v8993_v15 = vld [vmem:[%s15549_s9 + $0x80] sm:$0xff] }
 0x99c   : > { %v16089_v39 = vld [vmem:[#allocation90_spill] sm:$0xff] }
 0x99d   : > { %v4935_v23 = vrot.slane %v4934_v18, 1 }
 0x99e   : > { %10132 = vmatmul.mubr.msk.f32.gmra.mrb[80].mxu1 %vm2211_vm2, %v11061_v50 }
 0x99f   : > { %v4936_v36 = vadd.f32 %v4935_v23, %v4934_v18  ;;  %10134 = vmatprep.mubr.msk.f32.mxu1 %vm2211_vm2, %v11062_v51  ;;  %v7747_v18 = vld [vmem:[%s15549_s9] sm:$0xff]  ;;  %v16090_v23 = vld [vmem:[#allocation91_spill] sm:$0xff] }
 0x9a1   : > { %v5225_v28 = vmul.f32 0.01, %v4936_v36  ;;  %v11067_v36 = vld [vmem:[%s12659_s16 + $0x58] sm:$0xff] }
 0x9a2   : > { %10135 = vmatmul.mubr.msk.f32.gmra.mrb[82].mxu1 %vm2211_vm2, %v11063_v24 }
 0x9a3   : > { %v5226_v25 = vsub.f32 %v13550_v0, %v5225_v28  ;;  %10137 = vmatprep.mubr.msk.f32.mxu1 %vm2211_vm2, %v11064_v57  ;;  %v8994_v0 = vld [vmem:[%s15549_s9 + $0x88] sm:$0xff] }
 0x9a5   : > { %5227 = vst [vmem:[#allocation3] sm:$0x1] %v5226_v25  ;;  %v11068_v25 = vld [vmem:[%s12659_s16 + $0x60] sm:$0xff] }
 0x9a6   : > { %v10066_v12 = vpop.f32.mrb[60].mxu1  ;;  %10138 = vmatmul.mubr.msk.f32.gmra.mrb[84].mxu1 %vm2211_vm2, %v11065_v40 }
 0x9a7   : > { %v5229_v43 = vmul.f32 0.01, %v10066_v12  ;;  %v4229_v16 = vpop.f32.mrb[61].mxu1  ;;  %10140 = vmatprep.mubr.msk.f32.mxu1 %vm2211_vm2, %v11066_v21 }
 0x9a8   : > { %v5228_v35 = vmul.f32 0.01, %v4229_v16 }
 0x9a9   : > { %v5245_v44 = vsub.f32 %v16089_v39, %v5229_v43 }
 0x9aa   : > { %v5244_v50 = vsub.f32 %v16090_v23, %v5228_v35  ;;  %10141 = vmatmul.mubr.msk.f32.gmra.mrb[86].mxu1 %vm2211_vm2, %v11067_v36  ;;  %v11069_v23 = vld [vmem:[%s12659_s16 + $0x68] sm:$0xff]  ;;  %v11070_v36 = vld [vmem:[%s12659_s16 + $0x70] sm:$0xff] }
 0x9ab   : > { %v7376_v51 = vmul.f32 %v5245_v44, %v5245_v44  ;;  %v7764_v28 = vmul.f32 %v7748_v26, %v5245_v44  ;;  %v8146_v24 = vmul.f32 %v8994_v0, %v5245_v44  ;;  %10143 = vmatprep.mubr.msk.f32.mxu1 %vm2211_vm2, %v11068_v25  ;;  %v16093_v25 = vld [vmem:[#allocation94_spill] sm:$0xff] }
 0x9ac   : > { %v7375_v57 = vmul.f32 %v5244_v50, %v5244_v50  ;;  %v7763_v12 = vmul.f32 %v7747_v18, %v5244_v50  ;;  %v8145_v40 = vmul.f32 %v8993_v15, %v5244_v50  ;;  %v13621_v43 = vpack.c.bf16 %v5245_v44, %v5244_v50  ;;  %v16092_v18 = vld [vmem:[#allocation93_spill] sm:$0xff]  ;;  %v7749_v50 = vld [vmem:[%s15549_s9 + $0x10] sm:$0xff] }
 0x9ae   : > { %16091 = vst [vmem:[#allocation67_spill] sm:$0xff] %v13621_v43  ;;  %v7391_v16 = vadd.f32 %v7376_v51, %v7375_v57  ;;  %v7779_v21 = vadd.f32 %v7764_v28, %v7763_v12  ;;  %v8161_v39 = vadd.f32 %v8146_v24, %v8145_v40  ;;  %v10069_v35 = vpop.f32.mrb[62].mxu1  ;;  %10144 = vmatmul.mubr.msk.f32.gmra.mrb[88].mxu1 %vm2211_vm2, %v11069_v23  ;;  %v8995_v51 = vld [vmem:[%s15549_s9 + $0x90] sm:$0xff]  ;;  %v7750_v28 = vld [vmem:[%s15549_s9 + $0x18] sm:$0xff]  ;;  %v11072_v40 = vld [vmem:[%s12659_s16 + $0x80] sm:$0xff] }
 0x9af   : > { %10936 = vmatprep.subr.bf16.mxu1 %v13621_v43  ;;  %v5231_v26 = vmul.f32 0.01, %v10069_v35  ;;  %v4239_v0 = vpop.f32.mrb[63].mxu1  ;;  %10146 = vmatprep.mubr.msk.f32.mxu1 %vm2211_vm2, %v11070_v36  ;;  %v8996_v24 = vld [vmem:[%s15549_s9 + $0x98] sm:$0xff] }
 0x9b0   : > { %10938 = vmatpush3.bf16.xpose.msra.mxu1 %v13621_v43  ;;  %v5230_v44 = vmul.f32 0.01, %v4239_v0  ;;  %v11071_v12 = vld [vmem:[%s12659_s16 + $0x78] sm:$0xff] }
 0x9b1   : > { %v5247_v15 = vsub.f32 %v16092_v18, %v5231_v26 }
 0x9b2   : > { %v5246_v57 = vsub.f32 %v16093_v25, %v5230_v44  ;;  %10147 = vmatmul.mubr.msk.f32.gmra.mrb[90].mxu1 %vm2211_vm2, %v11071_v12  ;;  %v11073_v25 = vld [vmem:[%s12659_s16 + $0x88] sm:$0xff] }
 0x9b3   : > { %10149 = vmatprep.mubr.msk.f32.mxu1 %vm2211_vm2, %v11072_v40  ;;  %v7378_v36 = vmul.f32 %v5247_v15, %v5247_v15  ;;  %v7766_v18 = vmul.f32 %v7750_v28, %v5247_v15  ;;  %v8148_v30 = vmul.f32 %v8996_v24, %v5247_v15  ;;  %v7751_v24 = vld [vmem:[%s15549_s9 + $0x20] sm:$0xff] }
 0x9b4   : > { %v7377_v35 = vmul.f32 %v5246_v57, %v5246_v57  ;;  %v7765_v23 = vmul.f32 %v7749_v50, %v5246_v57  ;;  %v8147_v26 = vmul.f32 %v8995_v51, %v5246_v57  ;;  %v13647_v0 = vpack.c.bf16 %v5247_v15, %v5246_v57  ;;  %v11074_v50 = vld [vmem:[%s12659_s16 + $0x90] sm:$0xff]  ;;  %v8997_v57 = vld [vmem:[%s15549_s9 + $0xa0] sm:$0xff] }
 0x9b6   : > { %16094 = vst [vmem:[#allocation130_spill] sm:$0xff] %v13647_v0  ;;  %v7392_v43 = vadd.f32 %v7391_v16, %v7377_v35  ;;  %v7780_v59 = vadd.f32 %v7779_v21, %v7765_v23  ;;  %v8162_v54 = vadd.f32 %v8161_v39, %v8147_v26  ;;  %v10072_v44 = vpop.f32.mrb[64].mxu1  ;;  %10150 = vmatmul.mubr.msk.f32.gmra.mrb[92].mxu1 %vm2211_vm2, %v11073_v25  ;;  %v16095_v39 = vld [vmem:[#allocation96_spill] sm:$0xff]  ;;  %v7752_v35 = vld [vmem:[%s15549_s9 + $0x28] sm:$0xff] }
 0x9b7   : > { %10940 = vmatprep.subr.bf16.mxu1 %v13647_v0  ;;  %v5233_v12 = vmul.f32 0.01, %v10072_v44  ;;  %v4249_v40 = vpop.f32.mrb[65].mxu1  ;;  %10152 = vmatprep.mubr.msk.f32.mxu1 %vm2211_vm2, %v11074_v50  ;;  %v11076_v23 = vld [vmem:[%s12659_s16 + $0xa0] sm:$0xff] }
 0x9b8   : > { %10942 = vmatpush3.bf16.xpose.msra.mxu1 %v13647_v0  ;;  %v5232_v51 = vmul.f32 0.01, %v4249_v40  ;;  %v7393_v15 = vadd.f32 %v7392_v43, %v7378_v36  ;;  %v7781_v16 = vadd.f32 %v7780_v59, %v7766_v18  ;;  %v8163_v21 = vadd.f32 %v8162_v54, %v8148_v30  ;;  %v8998_v43 = vld [vmem:[%s15549_s9 + $0xa8] sm:$0xff]  ;;  %v11075_v30 = vld [vmem:[%s12659_s16 + $0x98] sm:$0xff] }
 0x9b9   : > { %v5249_v28 = vsub.f32 %v16095_v39, %v5233_v12  ;;  %v16096_v59 = vld [vmem:[#allocation97_spill] sm:$0xff] }
 0x9ba   : > { %v5248_v54 = vsub.f32 %v16096_v59, %v5232_v51  ;;  %10153 = vmatmul.mubr.msk.f32.gmra.mrb[94].mxu1 %vm2211_vm2, %v11075_v30  ;;  %v11077_v59 = vld [vmem:[%s12659_s16 + $0xa8] sm:$0xff] }
 0x9bb   : > { %10155 = vmatprep.mubr.msk.f32.mxu1 %vm2211_vm2, %v11076_v23  ;;  %v7380_v25 = vmul.f32 %v5249_v28, %v5249_v28  ;;  %v7768_v12 = vmul.f32 %v7752_v35, %v5249_v28  ;;  %v8150_v40 = vmul.f32 %v8998_v43, %v5249_v28  ;;  %v7753_v43 = vld [vmem:[%s15549_s9 + $0x30] sm:$0xff] }
 0x9bc   : > { %v7379_v26 = vmul.f32 %v5248_v54, %v5248_v54  ;;  %v7767_v36 = vmul.f32 %v7751_v24, %v5248_v54  ;;  %v8149_v18 = vmul.f32 %v8997_v57, %v5248_v54  ;;  %v13673_v44 = vpack.c.bf16 %v5249_v28, %v5248_v54  ;;  %v11078_v24 = vld [vmem:[%s12659_s16 + $0xb0] sm:$0xff] }
 0x9bd   : > { %v8999_v54 = vld [vmem:[%s15549_s9 + $0xb0] sm:$0xff] }
 0x9be   : > { %16097 = vst [vmem:[#allocation135_spill] sm:$0xff] %v13673_v44  ;;  %v7394_v50 = vadd.f32 %v7393_v15, %v7379_v26  ;;  %v7782_v39 = vadd.f32 %v7781_v16, %v7767_v36  ;;  %v8164_v0 = vadd.f32 %v8163_v21, %v8149_v18  ;;  %v10075_v51 = vpop.f32.mrb[66].mxu1  ;;  %10156 = vmatmul.mubr.msk.f32.gmra.mrb[96].mxu1 %vm2211_vm2, %v11077_v59  ;;  %v16098_v21 = vld [vmem:[#allocation99_spill] sm:$0xff]  ;;  %v16099_v18 = vld [vmem:[#allocation100_spill] sm:$0xff] }
 0x9bf   : > { %10944 = vmatprep.subr.bf16.mxu1 %v13673_v44  ;;  %v5235_v30 = vmul.f32 0.01, %v10075_v51  ;;  %v4259_v23 = vpop.f32.mrb[67].mxu1  ;;  %10158 = vmatprep.mubr.msk.f32.mxu1 %vm2211_vm2, %v11078_v24  ;;  %v7754_v26 = vld [vmem:[%s15549_s9 + $0x38] sm:$0xff] }
 0x9c0   : > { %10946 = vmatpush3.bf16.xpose.msra.mxu1 %v13673_v44  ;;  %v5234_v57 = vmul.f32 0.01, %v4259_v23  ;;  %v7395_v28 = vadd.f32 %v7394_v50, %v7380_v25  ;;  %v7783_v15 = vadd.f32 %v7782_v39, %v7768_v12  ;;  %v8165_v16 = vadd.f32 %v8164_v0, %v8150_v40  ;;  %v9000_v36 = vld [vmem:[%s15549_s9 + $0xb8] sm:$0xff]  ;;  %v11080_v12 = vld [vmem:[%s12659_s16 + $0xc0] sm:$0xff] }
 0x9c1   : > { %v5251_v35 = vsub.f32 %v16098_v21, %v5235_v30  ;;  %v11079_v25 = vld [vmem:[%s12659_s16 + $0xb8] sm:$0xff] }
 0x9c2   : > { %v5250_v0 = vsub.f32 %v16099_v18, %v5234_v57  ;;  %10159 = vmatmul.mubr.msk.f32.gmra.mrb[98].mxu1 %vm2211_vm2, %v11079_v25  ;;  %v11081_v18 = vld [vmem:[%s12659_s16 + $0xc8] sm:$0xff] }
 0x9c3   : > { %10161 = vmatprep.mubr.msk.f32.mxu1 %vm2211_vm2, %v11080_v12  ;;  %v7382_v59 = vmul.f32 %v5251_v35, %v5251_v35  ;;  %v7770_v30 = vmul.f32 %v7754_v26, %v5251_v35  ;;  %v8152_v23 = vmul.f32 %v9000_v36, %v5251_v35  ;;  %v7755_v36 = vld [vmem:[%s15549_s9 + $0x40] sm:$0xff] }
 0x9c4   : > { %v7381_v40 = vmul.f32 %v5250_v0, %v5250_v0  ;;  %v7769_v50 = vmul.f32 %v7753_v43, %v5250_v0  ;;  %v8151_v39 = vmul.f32 %v8999_v54, %v5250_v0  ;;  %v13699_v51 = vpack.c.bf16 %v5251_v35, %v5250_v0  ;;  %v11082_v43 = vld [vmem:[%s12659_s16 + $0xd0] sm:$0xff]  ;;  %v9001_v0 = vld [vmem:[%s15549_s9 + $0xc0] sm:$0xff] }
 0x9c6   : > { %16100 = vst [vmem:[#allocation136_spill] sm:$0xff] %v13699_v51  ;;  %v7396_v24 = vadd.f32 %v7395_v28, %v7381_v40  ;;  %v7784_v21 = vadd.f32 %v7783_v15, %v7769_v50  ;;  %v8166_v44 = vadd.f32 %v8165_v16, %v8151_v39  ;;  %v10078_v57 = vpop.f32.mrb[68].mxu1  ;;  %10162 = vmatmul.mubr.msk.f32.gmra.mrb[100].mxu1 %vm2211_vm2, %v11081_v18  ;;  %v16101_v16 = vld [vmem:[#allocation102_spill] sm:$0xff]  ;;  %v16102_v39 = vld [vmem:[#allocation103_spill] sm:$0xff] }
 0x9c7   : > { %10948 = vmatprep.subr.bf16.mxu1 %v13699_v51  ;;  %v5237_v25 = vmul.f32 0.01, %v10078_v57  ;;  %v4269_v12 = vpop.f32.mrb[69].mxu1  ;;  %10164 = vmatprep.mubr.msk.f32.mxu1 %vm2211_vm2, %v11082_v43  ;;  %v7756_v40 = vld [vmem:[%s15549_s9 + $0x48] sm:$0xff] }
 0x9c8   : > { %10950 = vmatpush3.bf16.xpose.msra.mxu1 %v13699_v51  ;;  %v5236_v54 = vmul.f32 0.01, %v4269_v12  ;;  %v7397_v35 = vadd.f32 %v7396_v24, %v7382_v59  ;;  %v7785_v28 = vadd.f32 %v7784_v21, %v7770_v30  ;;  %v8167_v15 = vadd.f32 %v8166_v44, %v8152_v23  ;;  %v9002_v50 = vld [vmem:[%s15549_s9 + $0xc8] sm:$0xff]  ;;  %v11083_v59 = vld [vmem:[%s12659_s16 + $0xd8] sm:$0xff]  ;;  %v11084_v30 = vld [vmem:[%s12659_s16 + $0xe0] sm:$0xff] }
 0x9c9   : > { %v5253_v26 = vsub.f32 %v16101_v16, %v5237_v25 }
 0x9ca   : > { %v5252_v44 = vsub.f32 %v16102_v39, %v5236_v54  ;;  %10165 = vmatmul.mubr.msk.f32.gmra.mrb[102].mxu1 %vm2211_vm2, %v11083_v59  ;;  %v11085_v39 = vld [vmem:[%s12659_s16 + $0xe8] sm:$0xff] }
 0x9cb   : > { %10167 = vmatprep.mubr.msk.f32.mxu1 %vm2211_vm2, %v11084_v30  ;;  %v7384_v18 = vmul.f32 %v5253_v26, %v5253_v26  ;;  %v7772_v25 = vmul.f32 %v7756_v40, %v5253_v26  ;;  %v8154_v12 = vmul.f32 %v9002_v50, %v5253_v26  ;;  %v7757_v50 = vld [vmem:[%s15549_s9 + $0x50] sm:$0xff] }
 0x9cc   : > { %v7383_v23 = vmul.f32 %v5252_v44, %v5252_v44  ;;  %v7771_v24 = vmul.f32 %v7755_v36, %v5252_v44  ;;  %v8153_v21 = vmul.f32 %v9001_v0, %v5252_v44  ;;  %v13725_v57 = vpack.c.bf16 %v5253_v26, %v5252_v44  ;;  %v11086_v36 = vld [vmem:[%s12659_s16 + $0xf0] sm:$0xff] }
 0x9cd   : > { %v9003_v44 = vld [vmem:[%s15549_s9 + $0xd0] sm:$0xff] }
 0x9ce   : > { %16103 = vst [vmem:[#allocation74_spill] sm:$0xff] %v13725_v57  ;;  %v7398_v43 = vadd.f32 %v7397_v35, %v7383_v23  ;;  %v7786_v16 = vadd.f32 %v7785_v28, %v7771_v24  ;;  %v8168_v51 = vadd.f32 %v8167_v15, %v8153_v21  ;;  %v10081_v54 = vpop.f32.mrb[70].mxu1  ;;  %10168 = vmatmul.mubr.msk.f32.gmra.mrb[104].mxu1 %vm2211_vm2, %v11085_v39  ;;  %v16104_v15 = vld [vmem:[#allocation105_spill] sm:$0xff]  ;;  %v7758_v23 = vld [vmem:[%s15549_s9 + $0x58] sm:$0xff] }
 0x9cf   : > { %10952 = vmatprep.subr.bf16.mxu1 %v13725_v57  ;;  %v5239_v59 = vmul.f32 0.01, %v10081_v54  ;;  %v4279_v30 = vpop.f32.mrb[71].mxu1  ;;  %10170 = vmatprep.mubr.msk.f32.mxu1 %vm2211_vm2, %v11086_v36  ;;  %v9004_v24 = vld [vmem:[%s15549_s9 + $0xd8] sm:$0xff] }
 0x9d0   : > { %10954 = vmatpush3.bf16.xpose.msra.mxu1 %v13725_v57  ;;  %v5238_v0 = vmul.f32 0.01, %v4279_v30  ;;  %v7399_v26 = vadd.f32 %v7398_v43, %v7384_v18  ;;  %v7787_v35 = vadd.f32 %v7786_v16, %v7772_v25  ;;  %v8169_v28 = vadd.f32 %v8168_v51, %v8154_v12  ;;  %v16105_v51 = vld [vmem:[#allocation106_spill] sm:$0xff]  ;;  %v11087_v18 = vld [vmem:[%s12659_s16 + $0xf8] sm:$0xff]  ;;  %v11088_v25 = vld [vmem:[%s12659_s16 + $0x100] sm:$0xff] }
 0x9d1   : > { %v5255_v40 = vsub.f32 %v16104_v15, %v5239_v59  ;;  %v11089_v15 = vld [vmem:[%s12659_s16 + $0x108] sm:$0xff] }
 0x9d2   : > { %v5254_v21 = vsub.f32 %v16105_v51, %v5238_v0  ;;  %10171 = vmatmul.mubr.msk.f32.gmra.mrb[106].mxu1 %vm2211_vm2, %v11087_v18 }
 0x9d3   : > { %10173 = vmatprep.mubr.msk.f32.mxu1 %vm2211_vm2, %v11088_v25  ;;  %v7386_v39 = vmul.f32 %v5255_v40, %v5255_v40  ;;  %v7774_v59 = vmul.f32 %v7758_v23, %v5255_v40  ;;  %v8156_v30 = vmul.f32 %v9004_v24, %v5255_v40 }
 0x9d4   : > { %v7385_v12 = vmul.f32 %v5254_v21, %v5254_v21  ;;  %v7773_v43 = vmul.f32 %v7757_v50, %v5254_v21  ;;  %v8155_v16 = vmul.f32 %v9003_v44, %v5254_v21  ;;  %v13751_v54 = vpack.c.bf16 %v5255_v40, %v5254_v21  ;;  %v11090_v50 = vld [vmem:[%s12659_s16 + $0x110] sm:$0xff]  ;;  %v16107_v21 = vld [vmem:[#allocation108_spill] sm:$0xff] }
 0x9d6   : > { %16106 = vst [vmem:[#allocation73_spill] sm:$0xff] %v13751_v54  ;;  %v10084_v36 = vpop.f32.mrb[72].mxu1  ;;  %10174 = vmatmul.mubr.msk.f32.gmra.mrb[108].mxu1 %vm2211_vm2, %v11089_v15  ;;  %10956 = vmatprep.subr.bf16.mxu1 %v13751_v54  ;;  %v7400_v0 = vadd.f32 %v7399_v26, %v7385_v12  ;;  %v7788_v51 = vadd.f32 %v7787_v35, %v7773_v43  ;;  %v7759_v26 = vld [vmem:[%s15549_s9 + $0x60] sm:$0xff]  ;;  %v11091_v43 = vld [vmem:[%s12659_s16 + $0x118] sm:$0xff] }
 0x9d7   : > { %v8170_v18 = vadd.f32 %v8169_v28, %v8155_v16  ;;  %v5241_v25 = vmul.f32 0.01, %v10084_v36  ;;  %v4289_v57 = vpop.f32.mrb[73].mxu1  ;;  %10176 = vmatprep.mubr.msk.f32.mxu1 %vm2211_vm2, %v11090_v50  ;;  %v9005_v35 = vld [vmem:[%s15549_s9 + $0xe0] sm:$0xff]  ;;  %v9006_v16 = vld [vmem:[%s15549_s9 + $0xe8] sm:$0xff] }
 0x9d8   : > { %10958 = vmatpush3.bf16.xpose.msra.mxu1 %v13751_v54  ;;  %v5240_v44 = vmul.f32 0.01, %v4289_v57  ;;  %v7401_v40 = vadd.f32 %v7400_v0, %v7386_v39  ;;  %v7789_v23 = vadd.f32 %v7788_v51, %v7774_v59  ;;  %v16108_v28 = vld [vmem:[#allocation109_spill] sm:$0xff] }
 0x9d9   : > { %v8171_v24 = vadd.f32 %v8170_v18, %v8156_v30  ;;  %v5257_v15 = vsub.f32 %v16107_v21, %v5241_v25  ;;  %v7760_v57 = vld [vmem:[%s15549_s9 + $0x68] sm:$0xff]  ;;  %v11092_v39 = vld [vmem:[%s12659_s16 + $0x120] sm:$0xff] }
 0x9da   : > { %v5256_v12 = vsub.f32 %v16108_v28, %v5240_v44  ;;  %10177 = vmatmul.mubr.msk.f32.gmra.mrb[110].mxu1 %vm2211_vm2, %v11091_v43  ;;  %v11093_v44 = vld [vmem:[%s12659_s16 + $0x128] sm:$0xff] }
 0x9db   : > { %10179 = vmatprep.mubr.msk.f32.mxu1 %vm2211_vm2, %v11092_v39  ;;  %v7388_v51 = vmul.f32 %v5257_v15, %v5257_v15  ;;  %v7776_v18 = vmul.f32 %v7760_v57, %v5257_v15  ;;  %v8158_v25 = vmul.f32 %v9006_v16, %v5257_v15  ;;  %v16110_v16 = vld [vmem:[#allocation111_spill] sm:$0xff] }
 0x9dc   : > { %v13777_v59 = vpack.c.bf16 %v5257_v15, %v5256_v12  ;;  %v7387_v30 = vmul.f32 %v5256_v12, %v5256_v12  ;;  %v7775_v36 = vmul.f32 %v7759_v26, %v5256_v12  ;;  %v8157_v0 = vmul.f32 %v9005_v35, %v5256_v12  ;;  %v11094_v26 = vld [vmem:[%s12659_s16 + $0x130] sm:$0xff] }
 0x9de   : > { %16109 = vst [vmem:[#allocation145_spill] sm:$0xff] %v13777_v59  ;;  %v10087_v50 = vpop.f32.mrb[74].mxu1  ;;  %10180 = vmatmul.mubr.msk.f32.gmra.mrb[112].mxu1 %vm2211_vm2, %v11093_v44  ;;  %10960 = vmatprep.subr.bf16.mxu1 %v13777_v59  ;;  %v7402_v21 = vadd.f32 %v7401_v40, %v7387_v30  ;;  %v7790_v28 = vadd.f32 %v7789_v23, %v7775_v36  ;;  %v7761_v40 = vld [vmem:[%s15549_s9 + $0x70] sm:$0xff]  ;;  %v11095_v36 = vld [vmem:[%s12659_s16 + $0x138] sm:$0xff] }
 0x9df   : > { %v8172_v43 = vadd.f32 %v8171_v24, %v8157_v0  ;;  %v5243_v39 = vmul.f32 0.01, %v10087_v50  ;;  %v4299_v54 = vpop.f32.mrb[75].mxu1  ;;  %10182 = vmatprep.mubr.msk.f32.mxu1 %vm2211_vm2, %v11094_v26  ;;  %v9007_v23 = vld [vmem:[%s15549_s9 + $0xf0] sm:$0xff]  ;;  %v16111_v24 = vld [vmem:[#allocation112_spill] sm:$0xff]  ;;  %v11097_v26 = vld [vmem:[%s12659_s16 + $0x148] sm:$0xff] }
 0x9e0   : > { %10962 = vmatpush3.bf16.xpose.msra.mxu1 %v13777_v59  ;;  %v5242_v35 = vmul.f32 0.01, %v4299_v54  ;;  %v7403_v15 = vadd.f32 %v7402_v21, %v7388_v51  ;;  %v7791_v12 = vadd.f32 %v7790_v28, %v7776_v18  ;;  %v7762_v54 = vld [vmem:[%s15549_s9 + $0x78] sm:$0xff]  ;;  %v11096_v51 = vld [vmem:[%s12659_s16 + $0x140] sm:$0xff] }
 0x9e1   : > { %v8173_v57 = vadd.f32 %v8172_v43, %v8158_v25  ;;  %v5259_v44 = vsub.f32 %v16110_v16, %v5243_v39  ;;  %v9008_v0 = vld [vmem:[%s15549_s9 + $0xf8] sm:$0xff] }
 0x9e2   : > { %v5258_v30 = vsub.f32 %v16111_v24, %v5242_v35  ;;  %10183 = vmatmul.mubr.msk.f32.gmra.mrb[114].mxu1 %vm2211_vm2, %v11095_v36  ;;  %v11099_v36 = vld [vmem:[%s12659_s16 + $0x158] sm:$0xff] }
 0x9e3   : > { %10185 = vmatprep.mubr.msk.f32.mxu1 %vm2211_vm2, %v11096_v51  ;;  %v7390_v28 = vmul.f32 %v5259_v44, %v5259_v44  ;;  %v7778_v43 = vmul.f32 %v7762_v54, %v5259_v44  ;;  %v8160_v39 = vmul.f32 %v9008_v0, %v5259_v44  ;;  %v11103_v54 = vld [vmem:[%s12659_s16 + $0x178] sm:$0xff]  ;;  %v11104_v0 = vld [vmem:[%s12659_s16 + $0x180] sm:$0xff]  ;;  %v11105_v51 = vld [vmem:[%s12659_s16 + $0x188] sm:$0xff] }
 0x9e4   : > { %v13803_v18 = vpack.c.bf16 %v5259_v44, %v5258_v30  ;;  %v7389_v25 = vmul.f32 %v5258_v30, %v5258_v30  ;;  %v7777_v50 = vmul.f32 %v7761_v40, %v5258_v30  ;;  %v8159_v21 = vmul.f32 %v9007_v23, %v5258_v30  ;;  %v11098_v40 = vld [vmem:[%s12659_s16 + $0x150] sm:$0xff] }
 0x9e6   : > { %16112 = vst [vmem:[#allocation146_spill] sm:$0xff] %v13803_v18  ;;  %10186 = vmatmul.mubr.msk.f32.gmra.mrb[116].mxu1 %vm2211_vm2, %v11097_v26  ;;  %10964 = vmatprep.subr.bf16.mxu1 %v13803_v18  ;;  %v7404_v35 = vadd.f32 %v7403_v15, %v7389_v25  ;;  %v7792_v16 = vadd.f32 %v7791_v12, %v7777_v50  ;;  %v11100_v15 = vld [vmem:[%s12659_s16 + $0x160] sm:$0xff]  ;;  %v11101_v12 = vld [vmem:[%s12659_s16 + $0x168] sm:$0xff]  ;;  %v11106_v25 = vld [vmem:[%s12659_s16 + $0x190] sm:$0xff] }
 0x9e7   : > { %v8174_v24 = vadd.f32 %v8173_v57, %v8159_v21  ;;  %10188 = vmatprep.mubr.msk.f32.mxu1 %vm2211_vm2, %v11098_v40  ;;  %v11102_v57 = vld [vmem:[%s12659_s16 + $0x170] sm:$0xff]  ;;  %v11107_v50 = vld [vmem:[%s12659_s16 + $0x198] sm:$0xff]  ;;  %v11108_v21 = vld [vmem:[%s12659_s16 + $0x1a0] sm:$0xff] }
 0x9e8   : > { %10966 = vmatpush3.bf16.xpose.msra.mxu1 %v13803_v18  ;;  %v13811_v23 = vadd.f32 %v7404_v35, %v7390_v28  ;;  %v13813_v44 = vadd.f32 %v7792_v16, %v7778_v43  ;;  %v11109_v28 = vld [vmem:[%s12659_s16 + $0x1a8] sm:$0xff]  ;;  %v11110_v43 = vld [vmem:[%s12659_s16 + $0x1b0] sm:$0xff]  ;;  %v11112_v26 = vld [vmem:[%s12659_s16 + $0x1c0] sm:$0xff] }
 0x9e9   : > { %v13815_v30 = vadd.f32 %v8174_v24, %v8160_v39  ;;  %v11111_v39 = vld [vmem:[%s12659_s16 + $0x1b8] sm:$0xff]  ;;  %v11113_v35 = vld [vmem:[%s12659_s16 + $0x1c8] sm:$0xff]  ;;  %v11114_v16 = vld [vmem:[%s12659_s16 + $0x1d0] sm:$0xff] }
 0x9ea   : > { %16113 = vst [vmem:[#allocation72_spill] sm:$0xff] %v13811_v23  ;;  %16114 = vst [vmem:[#allocation71_spill] sm:$0xff] %v13813_v44  ;;  %10189 = vmatmul.mubr.msk.f32.gmra.mrb[118].mxu1 %vm2211_vm2, %v11099_v36  ;;  %v11115_v24 = vld [vmem:[%s12659_s16 + $0x1d8] sm:$0xff]  ;;  %v11116_v40 = vld [vmem:[%s12659_s16 + $0x1e0] sm:$0xff] }
 0x9eb   : > { %16115 = vst [vmem:[#allocation76_spill] sm:$0xff] %v13815_v30  ;;  %10191 = vmatprep.mubr.msk.f32.mxu1 %vm2211_vm2, %v11100_v15  ;;  %v11117_v36 = vld [vmem:[%s12659_s16 + $0x1e8] sm:$0xff]  ;;  %v11118_v15 = vld [vmem:[%s12659_s16 + $0x1f0] sm:$0xff] }
 0x9ec   : > { %v7440_v30 = vld [vmem:[%s15547_s7 + $0x10] sm:$0xff] }
 0x9ee   : > { %10192 = vmatmul.mubr.msk.f32.gmra.mrb[120].mxu1 %vm2211_vm2, %v11101_v12  ;;  %v11119_v12 = vld [vmem:[%s12659_s16 + $0x1f8] sm:$0xff] }
 0x9ef   : > { %10194 = vmatprep.mubr.msk.f32.mxu1 %vm2211_vm2, %v11102_v57  ;;  %v11120_v57 = vld [vmem:[%s12659_s16 + $0x200] sm:$0xff] }
 0x9f2   : > { %10195 = vmatmul.mubr.msk.f32.gmra.mrb[122].mxu1 %vm2211_vm2, %v11103_v54  ;;  %v11121_v54 = vld [vmem:[%s12659_s16 + $0x208] sm:$0xff] }
 0x9f3   : > { %10197 = vmatprep.mubr.msk.f32.mxu1 %vm2211_vm2, %v11104_v0  ;;  %v11122_v0 = vld [vmem:[%s12659_s16 + $0x210] sm:$0xff] }
 0x9f6   : > { %10198 = vmatmul.mubr.msk.f32.gmra.mrb[124].mxu1 %vm2211_vm2, %v11105_v51  ;;  %v11123_v51 = vld [vmem:[%s12659_s16 + $0x218] sm:$0xff] }
 0x9f7   : > { %10200 = vmatprep.mubr.msk.f32.mxu1 %vm2211_vm2, %v11106_v25  ;;  %v11124_v25 = vld [vmem:[%s12659_s16 + $0x220] sm:$0xff] }
 0x9fa   : > { %10201 = vmatmul.mubr.msk.f32.gmra.mrb[126].mxu1 %vm2211_vm2, %v11107_v50  ;;  %v11125_v50 = vld [vmem:[%s12659_s16 + $0x228] sm:$0xff] }
 0x9fb   : > { %10203 = vmatprep.mubr.msk.f32.mxu1 %vm2211_vm2, %v11108_v21  ;;  %v11126_v21 = vld [vmem:[%s12659_s16 + $0x230] sm:$0xff] }
 0x9fe   : > { %10204 = vmatmul.mubr.msk.f32.gmra.mrb[128].mxu1 %vm2211_vm2, %v11109_v28  ;;  %v11127_v28 = vld [vmem:[%s12659_s16 + $0x238] sm:$0xff] }
 0x9ff   : > { %10206 = vmatprep.mubr.msk.f32.mxu1 %vm2211_vm2, %v11110_v43  ;;  %v11128_v43 = vld [vmem:[%s12659_s16 + $0x240] sm:$0xff] }
 0xa02   : > { %10207 = vmatmul.mubr.msk.f32.gmra.mrb[130].mxu1 %vm2211_vm2, %v11111_v39  ;;  %v11129_v39 = vld [vmem:[%s12659_s16 + $0x248] sm:$0xff] }
 0xa03   : > { %10209 = vmatprep.mubr.msk.f32.mxu1 %vm2211_vm2, %v11112_v26  ;;  %v11130_v26 = vld [vmem:[%s12659_s16 + $0x250] sm:$0xff] }
 0xa06   : > { %10210 = vmatmul.mubr.msk.f32.gmra.mrb[132].mxu1 %vm2211_vm2, %v11113_v35  ;;  %v11131_v35 = vld [vmem:[%s12659_s16 + $0x258] sm:$0xff] }
 0xa07   : > { %10212 = vmatprep.mubr.msk.f32.mxu1 %vm2211_vm2, %v11114_v16  ;;  %v11132_v16 = vld [vmem:[%s12659_s16 + $0x260] sm:$0xff] }
 0xa0a   : > { %10213 = vmatmul.mubr.msk.f32.gmra.mrb[134].mxu1 %vm2211_vm2, %v11115_v24  ;;  %v11133_v24 = vld [vmem:[%s12659_s16 + $0x268] sm:$0xff] }
 0xa0b   : > { %10215 = vmatprep.mubr.msk.f32.mxu1 %vm2211_vm2, %v11116_v40  ;;  %v11134_v40 = vld [vmem:[%s12659_s16 + $0x270] sm:$0xff] }
 0xa0e   : > { %10216 = vmatmul.mubr.msk.f32.gmra.mrb[136].mxu1 %vm2211_vm2, %v11117_v36  ;;  %v11135_v36 = vld [vmem:[%s12659_s16 + $0x278] sm:$0xff] }
 0xa0f   : > { %10218 = vmatprep.mubr.msk.f32.mxu1 %vm2211_vm2, %v11118_v15  ;;  %v11136_v15 = vld [vmem:[%s12659_s16 + $0x280] sm:$0xff] }
 0xa12   : > { %10219 = vmatmul.mubr.msk.f32.gmra.mrb[138].mxu1 %vm2211_vm2, %v11119_v12  ;;  %v11137_v12 = vld [vmem:[%s12659_s16 + $0x288] sm:$0xff] }
 0xa13   : > { %10221 = vmatprep.mubr.msk.f32.mxu1 %vm2211_vm2, %v11120_v57  ;;  %v11138_v57 = vld [vmem:[%s12659_s16 + $0x290] sm:$0xff] }
 0xa16   : > { %10222 = vmatmul.mubr.msk.f32.gmra.mrb[140].mxu1 %vm2211_vm2, %v11121_v54  ;;  %v11139_v54 = vld [vmem:[%s12659_s16 + $0x298] sm:$0xff] }
 0xa17   : > { %10224 = vmatprep.mubr.msk.f32.mxu1 %vm2211_vm2, %v11122_v0  ;;  %v11140_v0 = vld [vmem:[%s12659_s16 + $0x2a0] sm:$0xff] }
 0xa1a   : > { %10225 = vmatmul.mubr.msk.f32.gmra.mrb[142].mxu1 %vm2211_vm2, %v11123_v51  ;;  %v11141_v51 = vld [vmem:[%s12659_s16 + $0x2a8] sm:$0xff] }
 0xa1b   : > { %10227 = vmatprep.mubr.msk.f32.mxu1 %vm2211_vm2, %v11124_v25  ;;  %v711_v25 = vld [vmem:[%s13905_s27 + $0x8] sm:$0xff] }
 0xa1c   : > { %5462 = vmatprep.mubr.f32.mxu0 %v711_v25 }
 0xa1e   : > { %10228 = vmatmul.mubr.msk.f32.gmra.mrb[144].mxu1 %vm2211_vm2, %v11125_v50  ;;  %v11142_v50 = vld [vmem:[%s12659_s16 + $0x2b0] sm:$0xff] }
 0xa1f   : > { %10230 = vmatprep.mubr.msk.f32.mxu1 %vm2211_vm2, %v11126_v21  ;;  %v11143_v21 = vld [vmem:[%s12659_s16 + $0x2b8] sm:$0xff] }
 0xa22   : > { %10231 = vmatmul.mubr.msk.f32.gmra.mrb[146].mxu1 %vm2211_vm2, %v11127_v28  ;;  %v11144_v28 = vld [vmem:[%s12659_s16 + $0x2c0] sm:$0xff] }
 0xa23   : > { %10233 = vmatprep.mubr.msk.f32.mxu1 %vm2211_vm2, %v11128_v43  ;;  %v11145_v43 = vld [vmem:[%s12659_s16 + $0x2c8] sm:$0xff] }
 0xa26   : > { %10234 = vmatmul.mubr.msk.f32.gmra.mrb[148].mxu1 %vm2211_vm2, %v11129_v39  ;;  %v11146_v39 = vld [vmem:[%s12659_s16 + $0x2d0] sm:$0xff] }
 0xa27   : > { %10236 = vmatprep.mubr.msk.f32.mxu1 %vm2211_vm2, %v11130_v26  ;;  %v11147_v26 = vld [vmem:[%s12659_s16 + $0x2d8] sm:$0xff] }
 0xa2a   : > { %10237 = vmatmul.mubr.msk.f32.gmra.mrb[150].mxu1 %vm2211_vm2, %v11131_v35  ;;  %v11148_v35 = vld [vmem:[%s12659_s16 + $0x2e0] sm:$0xff] }
 0xa2b   : > { %10239 = vmatprep.mubr.msk.f32.mxu1 %vm2211_vm2, %v11132_v16  ;;  %v11149_v16 = vld [vmem:[%s12659_s16 + $0x2e8] sm:$0xff] }
 0xa2e   : > { %10240 = vmatmul.mubr.msk.f32.gmra.mrb[152].mxu1 %vm2211_vm2, %v11133_v24  ;;  %v11150_v24 = vld [vmem:[%s12659_s16 + $0x2f0] sm:$0xff] }
 0xa2f   : > { %10242 = vmatprep.mubr.msk.f32.mxu1 %vm2211_vm2, %v11134_v40  ;;  %v11151_v40 = vld [vmem:[%s12659_s16 + $0x2f8] sm:$0xff]  ;;  %s599_s16 = scalar_lea.vmem %s15553_s13, %s16224_s19 }
 0xa32   : > { %10243 = vmatmul.mubr.msk.f32.gmra.mrb[154].mxu1 %vm2211_vm2, %v11135_v36 }
 0xa33   : > { %10245 = vmatprep.mubr.msk.f32.mxu1 %vm2211_vm2, %v11136_v15 }
 0xa36   : > { %10246 = vmatmul.mubr.msk.f32.gmra.mrb[156].mxu1 %vm2211_vm2, %v11137_v12 }
 0xa37   : > { %10248 = vmatprep.mubr.msk.f32.mxu1 %vm2211_vm2, %v11138_v57  ;;  %v7439_v57 = vld [vmem:[%s15547_s7 + $0x8] sm:$0xff] }
 0xa3a   : > { %10249 = vmatmul.mubr.msk.f32.gmra.mrb[158].mxu1 %vm2211_vm2, %v11139_v54  ;;  %v8897_v54 = vld [vmem:[%s15547_s7 + $0x308] sm:$0xff] }
 0xa3b   : > { %10251 = vmatprep.mubr.msk.f32.mxu1 %vm2211_vm2, %v11140_v0 }
 0xa3e   : > { %10252 = vmatmul.mubr.msk.f32.gmra.mrb[160].mxu1 %vm2211_vm2, %v11141_v51  ;;  %v16116_v51 = vld [vmem:[#allocation118_spill] sm:$0xff] }
 0xa3f   : > { %10254 = vmatprep.mubr.msk.f32.mxu1 %vm2211_vm2, %v11142_v50  ;;  %v7438_v50 = vld [vmem:[%s15547_s7] sm:$0xff] }
 0xa42   : > { %10255 = vmatmul.mubr.msk.f32.gmra.mrb[162].mxu1 %vm2211_vm2, %v11143_v21  ;;  %v8896_v21 = vld [vmem:[%s15547_s7 + $0x300] sm:$0xff] }
 0xa43   : > { %10257 = vmatprep.mubr.msk.f32.mxu1 %vm2211_vm2, %v11144_v28  ;;  %v16117_v28 = vld [vmem:[#allocation119_spill] sm:$0xff] }
 0xa46   : > { %10258 = vmatmul.mubr.msk.f32.gmra.mrb[164].mxu1 %vm2211_vm2, %v11145_v43 }
 0xa47   : > { %10260 = vmatprep.mubr.msk.f32.mxu1 %vm2211_vm2, %v11146_v39 }
 0xa4a   : > { %10261 = vmatmul.mubr.msk.f32.gmra.mrb[166].mxu1 %vm2211_vm2, %v11147_v26 }
 0xa4b   : > { %10263 = vmatprep.mubr.msk.f32.mxu1 %vm2211_vm2, %v11148_v35 }
 0xa4e   : > { %10264 = vmatmul.mubr.msk.f32.gmra.mrb[168].mxu1 %vm2211_vm2, %v11149_v16 }
 0xa4f   : > { %10266 = vmatprep.mubr.msk.f32.mxu1 %vm2211_vm2, %v11150_v24 }
 0xa52   : > { %10267 = vmatmul.mubr.msk.f32.gmra.mrb[170].mxu1 %vm2211_vm2, %v11151_v40 }
 0xa69   : > { %v10127_v36 = vpop.f32.mrb[76].mxu1 }
 0xa6a   : > { %v4938_v15 = vmul.f32 0.01, %v10127_v36  ;;  %v4452_v12 = vpop.f32.mrb[77].mxu1 }
 0xa6b   : > { %v4937_v0 = vmul.f32 0.01, %v4452_v12 }
 0xa6c   : > { %v13937_v25 = vsub.f32 %v16116_v51, %v4938_v15 }
 0xa6d   : > { %v13946_v43 = vsub.f32 %v16117_v28, %v4937_v0  ;;  %v10130_v39 = vpop.f32.mrb[78].mxu1  ;;  %v16118_v0 = vld [vmem:[#allocation122_spill] sm:$0xff] }
 0xa6e   : > { %v7162_v26 = vmul.f32 %v13937_v25, %v13937_v25  ;;  %v7535_v35 = vmul.f32 %v7439_v57, %v13937_v25  ;;  %v7917_v16 = vmul.f32 %v8897_v54, %v13937_v25  ;;  %v4940_v24 = vmul.f32 0.01, %v10130_v39  ;;  %v4462_v40 = vpop.f32.mrb[79].mxu1  ;;  %v8898_v57 = vld [vmem:[%s15547_s7 + $0x310] sm:$0xff] }
 0xa6f   : > { %v7161_v36 = vmul.f32 %v13946_v43, %v13946_v43  ;;  %v7534_v15 = vmul.f32 %v7438_v50, %v13946_v43  ;;  %v7916_v12 = vmul.f32 %v8896_v21, %v13946_v43  ;;  %v4939_v51 = vmul.f32 0.01, %v4462_v40  ;;  %v7441_v21 = vld [vmem:[%s15547_s7 + $0x18] sm:$0xff] }
 0xa70   : > { %v13957_v28 = vsub.f32 %v16118_v0, %v4940_v24  ;;  %v8899_v24 = vld [vmem:[%s15547_s7 + $0x318] sm:$0xff] }
 0xa71   : > { %v7257_v39 = vadd.f32 %v7162_v26, %v7161_v36  ;;  %v7630_v44 = vadd.f32 %v7535_v35, %v7534_v15  ;;  %v8012_v50 = vadd.f32 %v7917_v16, %v7916_v12  ;;  %v16119_v40 = vld [vmem:[#allocation123_spill] sm:$0xff]  ;;  %v10133_v23 = vpop.f32.mrb[80].mxu1 }
 0xa72   : > { %v13974_v0 = vsub.f32 %v16119_v40, %v4939_v51  ;;  %v7164_v18 = vmul.f32 %v13957_v28, %v13957_v28  ;;  %v4942_v59 = vmul.f32 0.01, %v10133_v23  ;;  %v4472_v54 = vpop.f32.mrb[81].mxu1  ;;  %v7537_v15 = vmul.f32 %v7441_v21, %v13957_v28  ;;  %v16120_v51 = vld [vmem:[#allocation126_spill] sm:$0xff] }
 0xa73   : > { %v4941_v36 = vmul.f32 0.01, %v4472_v54  ;;  %v7919_v12 = vmul.f32 %v8899_v24, %v13957_v28 }
 0xa74   : > { %v7163_v26 = vmul.f32 %v13974_v0, %v13974_v0  ;;  %v7536_v35 = vmul.f32 %v7440_v30, %v13974_v0  ;;  %v7918_v16 = vmul.f32 %v8898_v57, %v13974_v0  ;;  %v13985_v40 = vsub.f32 %v16120_v51, %v4942_v59  ;;  %v7442_v30 = vld [vmem:[%s15547_s7 + $0x20] sm:$0xff] }
 0xa75   : > { %v13990_v63 = vsub.f32 %v16121_v8, %v4941_v36  ;;  %v8900_v57 = vld [vmem:[%s15547_s7 + $0x320] sm:$0xff]  ;;  %v10136_v54 = vpop.f32.mrb[82].mxu1  ;;  %v8901_v8 = vld [vmem:[%s15547_s7 + $0x328] sm:$0xff]  ;;  %v7445_v36 = vld [vmem:[%s15547_s7 + $0x38] sm:$0xff] }
 0xa76   : > { %v7258_v23 = vadd.f32 %v7257_v39, %v7163_v26  ;;  %v7631_v58 = vadd.f32 %v7630_v44, %v7536_v35  ;;  %v8013_v19 = vadd.f32 %v8012_v50, %v7918_v16  ;;  %v4944_v59 = vmul.f32 0.01, %v10136_v54  ;;  %v4482_v21 = vpop.f32.mrb[83].mxu1  ;;  %v7443_v44 = vld [vmem:[%s15547_s7 + $0x28] sm:$0xff]  ;;  %v16122_v35 = vld [vmem:[#allocation131_spill] sm:$0xff] }
 0xa77   : > { %v7165_v39 = vmul.f32 %v13990_v63, %v13990_v63  ;;  %v7538_v50 = vmul.f32 %v7442_v30, %v13990_v63  ;;  %v7920_v26 = vmul.f32 %v8900_v57, %v13990_v63  ;;  %v7921_v30 = vmul.f32 %v8901_v8, %v13985_v40  ;;  %v16123_v8 = vld [vmem:[#allocation132_spill] sm:$0xff] }
 0xa78   : > { %v7259_v24 = vadd.f32 %v7258_v23, %v7164_v18  ;;  %v7632_v51 = vadd.f32 %v7631_v58, %v7537_v15  ;;  %v8014_v20 = vadd.f32 %v8013_v19, %v7919_v12  ;;  %v14009_v16 = vsub.f32 %v16122_v35, %v4944_v59  ;;  %v7444_v59 = vld [vmem:[%s15547_s7 + $0x30] sm:$0xff] }
 0xa79   : > { %v4943_v58 = vmul.f32 0.01, %v4482_v21  ;;  %v7166_v19 = vmul.f32 %v13985_v40, %v13985_v40  ;;  %v10139_v15 = vpop.f32.mrb[84].mxu1  ;;  %v7539_v23 = vmul.f32 %v7443_v44, %v13985_v40  ;;  %v8902_v21 = vld [vmem:[%s15547_s7 + $0x330] sm:$0xff]  ;;  %v8903_v44 = vld [vmem:[%s15547_s7 + $0x338] sm:$0xff] }
 0xa7a   : > { %v7260_v18 = vadd.f32 %v7259_v24, %v7165_v39  ;;  %v7633_v57 = vadd.f32 %v7632_v51, %v7538_v50  ;;  %v8015_v54 = vadd.f32 %v8014_v20, %v7920_v26  ;;  %v4492_v24 = vpop.f32.mrb[85].mxu1  ;;  %v7168_v35 = vmul.f32 %v14009_v16, %v14009_v16 }
 0xa7b   : > { %v14032_v51 = vsub.f32 %v16123_v8, %v4943_v58  ;;  %v4946_v20 = vmul.f32 0.01, %v10139_v15  ;;  %v7541_v12 = vmul.f32 %v7445_v36, %v14009_v16  ;;  %v4945_v48 = vmul.f32 0.01, %v4492_v24  ;;  %v7447_v58 = vld [vmem:[%s15547_s7 + $0x48] sm:$0xff]  ;;  %v7446_v36 = vld [vmem:[%s15547_s7 + $0x40] sm:$0xff] }
 0xa7c   : > { %v7261_v39 = vadd.f32 %v7260_v18, %v7166_v19  ;;  %v7634_v50 = vadd.f32 %v7633_v57, %v7539_v23  ;;  %v8016_v26 = vadd.f32 %v8015_v54, %v7921_v30  ;;  %v8905_v15 = vld [vmem:[%s15547_s7 + $0x348] sm:$0xff]  ;;  %v7923_v30 = vmul.f32 %v8903_v44, %v14009_v16 }
 0xa7d   : > { %v7167_v61 = vmul.f32 %v14032_v51, %v14032_v51  ;;  %v7540_v19 = vmul.f32 %v7444_v59, %v14032_v51  ;;  %v7922_v18 = vmul.f32 %v8902_v21, %v14032_v51  ;;  %v14040_v5 = vsub.f32 %v16124_v4, %v4946_v20  ;;  %v10142_v23 = vpop.f32.mrb[86].mxu1  ;;  %v16125_v57 = vld [vmem:[#allocation138_spill] sm:$0xff]  ;;  %v8904_v4 = vld [vmem:[%s15547_s7 + $0x340] sm:$0xff] }
 0xa7e   : > { %v14053_v54 = vsub.f32 %v16125_v57, %v4945_v48  ;;  %v4948_v59 = vmul.f32 0.01, %v10142_v23  ;;  %v4502_v21 = vpop.f32.mrb[87].mxu1 }
 0xa7f   : > { %v7262_v8 = vadd.f32 %v7261_v39, %v7167_v61  ;;  %v7635_v20 = vadd.f32 %v7634_v50, %v7540_v19  ;;  %v8017_v17 = vadd.f32 %v8016_v26, %v7922_v18  ;;  %v7170_v52 = vmul.f32 %v14040_v5, %v14040_v5  ;;  %v7449_v61 = vld [vmem:[%s15547_s7 + $0x58] sm:$0xff] }
 0xa80   : > { %v7543_v44 = vmul.f32 %v7447_v58, %v14040_v5  ;;  %v7925_v48 = vmul.f32 %v8905_v15, %v14040_v5  ;;  %v7169_v57 = vmul.f32 %v14053_v54, %v14053_v54  ;;  %v7542_v42 = vmul.f32 %v7446_v36, %v14053_v54  ;;  %v16126_v50 = vld [vmem:[#allocation32_spill] sm:$0xff] }
 0xa81   : > { %v7263_v23 = vadd.f32 %v7262_v8, %v7168_v35  ;;  %v7636_v9 = vadd.f32 %v7635_v20, %v7541_v12  ;;  %v8018_v31 = vadd.f32 %v8017_v17, %v7923_v30  ;;  %v7924_v24 = vmul.f32 %v8904_v4, %v14053_v54  ;;  %v10145_v39 = vpop.f32.mrb[88].mxu1  ;;  %v7448_v17 = vld [vmem:[%s15547_s7 + $0x50] sm:$0xff]  ;;  %v8907_v8 = vld [vmem:[%s15547_s7 + $0x358] sm:$0xff] }
 0xa82   : > { %v14072_v26 = vsub.f32 %v16126_v50, %v4948_v59  ;;  %v4947_v19 = vmul.f32 0.01, %v4502_v21  ;;  %v4950_v18 = vmul.f32 0.01, %v10145_v39  ;;  %v4512_v58 = vpop.f32.mrb[89].mxu1  ;;  %v8906_v30 = vld [vmem:[%s15547_s7 + $0x350] sm:$0xff] }
 0xa83   : > { %v7264_v36 = vadd.f32 %v7263_v23, %v7169_v57  ;;  %v7637_v35 = vadd.f32 %v7636_v9, %v7542_v42  ;;  %v8019_v12 = vadd.f32 %v8018_v31, %v7924_v24  ;;  %v4949_v4 = vmul.f32 0.01, %v4512_v58  ;;  %v16127_v9 = vld [vmem:[#allocation31_spill] sm:$0xff]  ;;  %v7451_v42 = vld [vmem:[%s15547_s7 + $0x68] sm:$0xff]  ;;  %v16128_v23 = vld [vmem:[#allocation40_spill] sm:$0xff] }
 0xa84   : > { %v7172_v59 = vmul.f32 %v14072_v26, %v14072_v26  ;;  %v7545_v21 = vmul.f32 %v7449_v61, %v14072_v26  ;;  %v14089_v31 = vsub.f32 %v16127_v9, %v4947_v19  ;;  %v14095_v39 = vsub.f32 %v16128_v23, %v4950_v18  ;;  %v16129_v19 = vld [vmem:[#allocation39_spill] sm:$0xff]  ;;  %v8909_v23 = vld [vmem:[%s15547_s7 + $0x368] sm:$0xff] }
 0xa85   : > { %v7265_v24 = vadd.f32 %v7264_v36, %v7170_v52  ;;  %v7638_v20 = vadd.f32 %v7637_v35, %v7543_v44  ;;  %v8020_v57 = vadd.f32 %v8019_v12, %v7925_v48  ;;  %v10148_v50 = vpop.f32.mrb[90].mxu1  ;;  %v14102_v9 = vsub.f32 %v16129_v19, %v4949_v4  ;;  %v7450_v52 = vld [vmem:[%s15547_s7 + $0x60] sm:$0xff] }
 0xa86   : > { %v7171_v61 = vmul.f32 %v14089_v31, %v14089_v31  ;;  %v7544_v58 = vmul.f32 %v7448_v17, %v14089_v31  ;;  %v7926_v15 = vmul.f32 %v8906_v30, %v14089_v31  ;;  %v8908_v44 = vld [vmem:[%s15547_s7 + $0x360] sm:$0xff]  ;;  %v4522_v48 = vpop.f32.mrb[91].mxu1  ;;  %v7927_v18 = vmul.f32 %v8907_v8, %v14072_v26  ;;  %v7453_v8 = vld [vmem:[%s15547_s7 + $0x78] sm:$0xff] }
 0xa87   : > { %v7174_v36 = vmul.f32 %v14095_v39, %v14095_v39  ;;  %v7547_v35 = vmul.f32 %v7451_v42, %v14095_v39  ;;  %v4952_v12 = vmul.f32 0.01, %v10148_v50  ;;  %v7173_v19 = vmul.f32 %v14102_v9, %v14102_v9  ;;  %v16130_v42 = vld [vmem:[#allocation48_spill] sm:$0xff] }
 0xa88   : > { %v7266_v17 = vadd.f32 %v7265_v24, %v7171_v61  ;;  %v7639_v30 = vadd.f32 %v7638_v20, %v7544_v58  ;;  %v8021_v4 = vadd.f32 %v8020_v57, %v7926_v15  ;;  %v7546_v32 = vmul.f32 %v7450_v52, %v14102_v9  ;;  %v7452_v58 = vld [vmem:[%s15547_s7 + $0x70] sm:$0xff] }
 0xa89   : > { %v7928_v14 = vmul.f32 %v8908_v44, %v14102_v9  ;;  %v14125_v50 = vsub.f32 %v16130_v42, %v4952_v12  ;;  %v4951_v24 = vmul.f32 0.01, %v4522_v48  ;;  %v10151_v15 = vpop.f32.mrb[92].mxu1  ;;  %v7929_v44 = vmul.f32 %v8909_v23, %v14095_v39  ;;  %v16132_v42 = vld [vmem:[#allocation120_spill] sm:$0xff]  ;;  %v7455_v23 = vld [vmem:[%s15547_s7 + $0x88] sm:$0xff] }
 0xa8a   : > { %v7267_v20 = vadd.f32 %v7266_v17, %v7172_v59  ;;  %v7640_v57 = vadd.f32 %v7639_v30, %v7545_v21  ;;  %v8022_v61 = vadd.f32 %v8021_v4, %v7927_v18  ;;  %v4954_v3 = vmul.f32 0.01, %v10151_v15  ;;  %v4532_v52 = vpop.f32.mrb[93].mxu1  ;;  %v8911_v59 = vld [vmem:[%s15547_s7 + $0x378] sm:$0xff] }
 0xa8b   : > { %v7176_v12 = vmul.f32 %v14125_v50, %v14125_v50  ;;  %v7549_v48 = vmul.f32 %v7453_v8, %v14125_v50  ;;  %v16131_v21 = vld [vmem:[#allocation47_spill] sm:$0xff]  ;;  %v4953_v55 = vmul.f32 0.01, %v4532_v52 }
 0xa8c   : > { %v14141_v18 = vsub.f32 %v16131_v21, %v4951_v24  ;;  %v7268_v17 = vadd.f32 %v7267_v20, %v7173_v19  ;;  %v7641_v30 = vadd.f32 %v7640_v57, %v7546_v32  ;;  %v8023_v4 = vadd.f32 %v8022_v61, %v7928_v14  ;;  %v8912_v32 = vld [vmem:[%s15547_s7 + $0x380] sm:$0xff] }
 0xa8d   : > { %v5050_v15 = vsub.f32 %v16132_v42, %v4954_v3  ;;  %v10154_v7 = vpop.f32.mrb[94].mxu1  ;;  %v7931_v14 = vmul.f32 %v8911_v59, %v14125_v50  ;;  %v7454_v3 = vld [vmem:[%s15547_s7 + $0x80] sm:$0xff]  ;;  %v7457_v59 = vld [vmem:[%s15547_s7 + $0x98] sm:$0xff] }
 0xa8e   : > { %v7175_v45 = vmul.f32 %v14141_v18, %v14141_v18  ;;  %v7548_v8 = vmul.f32 %v7452_v58, %v14141_v18  ;;  %v7930_v49 = vmul.f32 %v8910_v62, %v14141_v18  ;;  %v7269_v24 = vadd.f32 %v7268_v17, %v7174_v36  ;;  %v4542_v20 = vpop.f32.mrb[95].mxu1  ;;  %v16133_v58 = vld [vmem:[#allocation121_spill] sm:$0xff] }
 0xa8f   : > { %v7642_v21 = vadd.f32 %v7641_v30, %v7547_v35  ;;  %v8024_v19 = vadd.f32 %v8023_v4, %v7929_v44  ;;  %v7178_v57 = vmul.f32 %v5050_v15, %v5050_v15  ;;  %v7551_v61 = vmul.f32 %v7455_v23, %v5050_v15  ;;  %v8913_v44 = vld [vmem:[%s15547_s7 + $0x388] sm:$0xff] }
 0xa90   : > { %v5049_v62 = vsub.f32 %v16133_v58, %v4953_v55  ;;  %v4956_v52 = vmul.f32 0.01, %v10154_v7  ;;  %v7270_v42 = vadd.f32 %v7269_v24, %v7175_v45  ;;  %v4955_v17 = vmul.f32 0.01, %v4542_v20  ;;  %v7456_v24 = vld [vmem:[%s15547_s7 + $0x90] sm:$0xff] }
 0xa91   : > { %v7643_v36 = vadd.f32 %v7642_v21, %v7548_v8  ;;  %v8025_v35 = vadd.f32 %v8024_v19, %v7930_v49  ;;  %v10157_v33 = vpop.f32.mrb[96].mxu1  ;;  %v16135_v8 = vld [vmem:[#allocation125_spill] sm:$0xff]  ;;  %v8914_v21 = vld [vmem:[%s15547_s7 + $0x390] sm:$0xff]  ;;  %v7933_v20 = vmul.f32 %v8913_v44, %v5050_v15 }
 0xa92   : > { %v7177_v30 = vmul.f32 %v5049_v62, %v5049_v62  ;;  %v7550_v4 = vmul.f32 %v7454_v3, %v5049_v62  ;;  %v7932_v13 = vmul.f32 %v8912_v32, %v5049_v62  ;;  %v5052_v23 = vsub.f32 %v16134_v56, %v4956_v52  ;;  %v4552_v19 = vpop.f32.mrb[97].mxu1 }
 0xa93   : > { %v7271_v55 = vadd.f32 %v7270_v42, %v7176_v12  ;;  %v7644_v7 = vadd.f32 %v7643_v36, %v7549_v48  ;;  %v8026_v45 = vadd.f32 %v8025_v35, %v7931_v14  ;;  %v5051_v49 = vsub.f32 %v16135_v8, %v4955_v17  ;;  %v8915_v48 = vld [vmem:[%s15547_s7 + $0x398] sm:$0xff]  ;;  %v7459_v42 = vld [vmem:[%s15547_s7 + $0xa8] sm:$0xff] }
 0xa94   : > { %v7180_v3 = vmul.f32 %v5052_v23, %v5052_v23  ;;  %v7553_v32 = vmul.f32 %v7457_v59, %v5052_v23  ;;  %v4958_v58 = vmul.f32 0.01, %v10157_v33  ;;  %v16136_v17 = vld [vmem:[#allocation128_spill] sm:$0xff]  ;;  %v10803_v44 = vpack.c.bf16 %v5050_v15, %v5049_v62  ;;  %v16139_v62 = vld [vmem:[#allocation133_spill] sm:$0xff] }
 0xa95   : > { %v7272_v56 = vadd.f32 %v7271_v55, %v7177_v30  ;;  %v7645_v52 = vadd.f32 %v7644_v7, %v7550_v4  ;;  %v8027_v12 = vadd.f32 %v8026_v45, %v7932_v13  ;;  %v7179_v14 = vmul.f32 %v5051_v49, %v5051_v49  ;;  %v10160_v60 = vpop.f32.mrb[98].mxu1 }
 0xa96   : > { %v7552_v36 = vmul.f32 %v7456_v24, %v5051_v49  ;;  %v7934_v35 = vmul.f32 %v8914_v21, %v5051_v49  ;;  %v5054_v8 = vsub.f32 %v16136_v17, %v4958_v58  ;;  %v4957_v4 = vmul.f32 0.01, %v4552_v19  ;;  %v4562_v13 = vpop.f32.mrb[99].mxu1  ;;  %10804 = vmatprep.subr.bf16.mxu0 %v10803_v44  ;;  %v8917_v24 = vld [vmem:[%s15547_s7 + $0x3a8] sm:$0xff] }
 0xa97   : > { %v7273_v59 = vadd.f32 %v7272_v56, %v7178_v57  ;;  %v7646_v33 = vadd.f32 %v7645_v52, %v7551_v61  ;;  %v8028_v30 = vadd.f32 %v8027_v12, %v7933_v20  ;;  %v7935_v55 = vmul.f32 %v8915_v48, %v5052_v23  ;;  %v16137_v21 = vld [vmem:[#allocation129_spill] sm:$0xff]  ;;  %v7461_v20 = vld [vmem:[%s15547_s7 + $0xb8] sm:$0xff] }
 0xa98   : > { %v7182_v7 = vmul.f32 %v5054_v8, %v5054_v8  ;;  %v7555_v45 = vmul.f32 %v7459_v42, %v5054_v8  ;;  %v4960_v6 = vmul.f32 0.01, %v10160_v60  ;;  %v5053_v15 = vsub.f32 %v16137_v21, %v4957_v4  ;;  %v7458_v57 = vld [vmem:[%s15547_s7 + $0xa0] sm:$0xff] }
 0xa99   : > { %v7274_v41 = vadd.f32 %v7273_v59, %v7179_v14  ;;  %v7647_v46 = vadd.f32 %v7646_v33, %v7552_v36  ;;  %v8029_v22 = vadd.f32 %v8028_v30, %v7934_v35  ;;  %v8916_v61 = vld [vmem:[%s15547_s7 + $0x3a0] sm:$0xff]  ;;  %v16138_v60 = vpack.c.bf16 %v13937_v25, %v13946_v43  ;;  %v10163_v52 = vpop.f32.mrb[100].mxu1 }
 0xa9a   : > { %v5056_v19 = vsub.f32 %v16139_v62, %v4960_v6  ;;  %v10807_v58 = vpack.c.bf16 %v5052_v23, %v5051_v49  ;;  %v4959_v56 = vmul.f32 0.01, %v4562_v13  ;;  %v10825_v12 = vpack.c.bf16 %v14072_v26, %v14089_v31  ;;  %v4572_v35 = vpop.f32.mrb[101].mxu1  ;;  %v7460_v6 = vld [vmem:[%s15547_s7 + $0xb0] sm:$0xff] }
 0xa9b   : > { %10806 = vmatpush3.bf16.msra.mxu0 %v16138_v60  ;;  %v7275_v48 = vadd.f32 %v7274_v41, %v7180_v3  ;;  %v7648_v14 = vadd.f32 %v7647_v46, %v7553_v32  ;;  %v8030_v42 = vadd.f32 %v8029_v22, %v7935_v55  ;;  %v7181_v36 = vmul.f32 %v5053_v15, %v5053_v15  ;;  %v8918_v23 = vld [vmem:[%s15547_s7 + $0x3b0] sm:$0xff] }
 0xa9c   : > { %v7937_v17 = vmul.f32 %v8917_v24, %v5054_v8  ;;  %v7554_v25 = vmul.f32 %v7458_v57, %v5053_v15  ;;  %v7936_v43 = vmul.f32 %v8916_v61, %v5053_v15  ;;  %v7184_v44 = vmul.f32 %v5056_v19, %v5056_v19  ;;  %10808 = vmatprep.subr.bf16.mxu0 %v10807_v58  ;;  %v16140_v41 = vld [vmem:[#allocation134_spill] sm:$0xff]  ;;  %v8919_v24 = vld [vmem:[%s15547_s7 + $0x3b8] sm:$0xff] }
 0xa9d   : > { %v7276_v49 = vadd.f32 %v7275_v48, %v7181_v36  ;;  %v7557_v59 = vmul.f32 %v7461_v20, %v5056_v19  ;;  %v5055_v46 = vsub.f32 %v16140_v41, %v4959_v56  ;;  %v16141_v22 = vpack.c.bf16 %v13957_v28, %v13974_v0  ;;  %v10166_v13 = vpop.f32.mrb[102].mxu1  ;;  %v16142_v58 = vld [vmem:[#allocation139_spill] sm:$0xff]  ;;  %v7463_v0 = vld [vmem:[%s15547_s7 + $0xc8] sm:$0xff] }
 0xa9e   : > { %v4962_v3 = vmul.f32 0.01, %v10163_v52  ;;  %v7649_v32 = vadd.f32 %v7648_v14, %v7554_v25  ;;  %v8031_v33 = vadd.f32 %v8030_v42, %v7936_v43  ;;  %v10811_v30 = vpack.c.bf16 %v5054_v8, %v5053_v15  ;;  %v4582_v60 = vpop.f32.mrb[103].mxu1  ;;  %v16143_v8 = vld [vmem:[#allocation140_spill] sm:$0xff] }
 0xa9f   : > { %10810 = vmatpush3.bf16.msra.mxu0 %v16141_v22  ;;  %v4961_v4 = vmul.f32 0.01, %v4572_v35  ;;  %v7277_v55 = vadd.f32 %v7276_v49, %v7182_v7  ;;  %v7183_v21 = vmul.f32 %v5055_v46, %v5055_v46  ;;  %v7556_v57 = vmul.f32 %v7460_v6, %v5055_v46  ;;  %v7462_v7 = vld [vmem:[%s15547_s7 + $0xc0] sm:$0xff]  ;;  %v8921_v49 = vld [vmem:[%s15547_s7 + $0x3c8] sm:$0xff] }
 0xaa0   : > { %v7938_v61 = vmul.f32 %v8918_v23, %v5055_v46  ;;  %v7650_v62 = vadd.f32 %v7649_v32, %v7555_v45  ;;  %v8032_v20 = vadd.f32 %v8031_v33, %v7937_v17  ;;  %v5058_v28 = vsub.f32 %v16142_v58, %v4962_v3  ;;  %10812 = vmatprep.subr.bf16.mxu0 %v10811_v30  ;;  %v8920_v52 = vld [vmem:[%s15547_s7 + $0x3c0] sm:$0xff] }
 0xaa1   : > { %v5057_v15 = vsub.f32 %v16143_v8, %v4961_v4  ;;  %v7278_v56 = vadd.f32 %v7277_v55, %v7183_v21  ;;  %v16144_v45 = vpack.c.bf16 %v13985_v40, %v13990_v63  ;;  %v4964_v48 = vmul.f32 0.01, %v10166_v13  ;;  %v10169_v43 = vpop.f32.mrb[104].mxu1  ;;  %v16146_v4 = vld [vmem:[#allocation29_spill] sm:$0xff]  ;;  %v8922_v55 = vld [vmem:[%s15547_s7 + $0x3d0] sm:$0xff]  ;;  %v8923_v8 = vld [vmem:[%s15547_s7 + $0x3d8] sm:$0xff] }
 0xaa2   : > { %v10815_v14 = vpack.c.bf16 %v5056_v19, %v5055_v46  ;;  %v4963_v42 = vmul.f32 0.01, %v4582_v60  ;;  %v7939_v36 = vmul.f32 %v8919_v24, %v5056_v19  ;;  %v7651_v35 = vadd.f32 %v7650_v62, %v7556_v57  ;;  %v4592_v3 = vpop.f32.mrb[105].mxu1  ;;  %v16145_v46 = vld [vmem:[#allocation30_spill] sm:$0xff]  ;;  %v7465_v19 = vld [vmem:[%s15547_s7 + $0xd8] sm:$0xff] }
 0xaa3   : > { %10814 = vmatpush3.bf16.msra.mxu0 %v16144_v45  ;;  %v8033_v17 = vadd.f32 %v8032_v20, %v7938_v61  ;;  %v7186_v25 = vmul.f32 %v5058_v28, %v5058_v28  ;;  %v7279_v6 = vadd.f32 %v7278_v56, %v7184_v44  ;;  %v7559_v23 = vmul.f32 %v7463_v0, %v5058_v28  ;;  %v7464_v44 = vld [vmem:[%s15547_s7 + $0xd0] sm:$0xff] }
 0xaa4   : > { %v7185_v41 = vmul.f32 %v5057_v15, %v5057_v15  ;;  %v7558_v22 = vmul.f32 %v7462_v7, %v5057_v15  ;;  %10816 = vmatprep.subr.bf16.mxu0 %v10815_v14  ;;  %v7652_v63 = vadd.f32 %v7651_v35, %v7557_v59  ;;  %v7940_v32 = vmul.f32 %v8920_v52, %v5057_v15 }
 0xaa5   : > { %v8034_v40 = vadd.f32 %v8033_v17, %v7939_v36  ;;  %v5060_v33 = vsub.f32 %v16145_v46, %v4964_v48  ;;  %v5059_v13 = vsub.f32 %v16146_v4, %v4963_v42  ;;  %v16147_v59 = vpack.c.bf16 %v14009_v16, %v14032_v51  ;;  %v10172_v20 = vpop.f32.mrb[106].mxu1  ;;  %v16148_v48 = vld [vmem:[#allocation38_spill] sm:$0xff] }
 0xaa6   : > { %v7280_v30 = vadd.f32 %v7279_v6, %v7185_v41  ;;  %v4966_v24 = vmul.f32 0.01, %v10169_v43  ;;  %v10819_v21 = vpack.c.bf16 %v5058_v28, %v5057_v15  ;;  %v7941_v57 = vmul.f32 %v8921_v49, %v5058_v28  ;;  %v4602_v52 = vpop.f32.mrb[107].mxu1  ;;  %v7467_v28 = vld [vmem:[%s15547_s7 + $0xe8] sm:$0xff]  ;;  %v7466_v41 = vld [vmem:[%s15547_s7 + $0xe0] sm:$0xff] }
 0xaa7   : > { %10818 = vmatpush3.bf16.msra.mxu0 %v16147_v59  ;;  %v7653_v61 = vadd.f32 %v7652_v63, %v7558_v22  ;;  %v8035_v60 = vadd.f32 %v8034_v40, %v7940_v32  ;;  %v7188_v62 = vmul.f32 %v5060_v33, %v5060_v33  ;;  %v7561_v0 = vmul.f32 %v7465_v19, %v5060_v33  ;;  %v8925_v49 = vld [vmem:[%s15547_s7 + $0x3e8] sm:$0xff]  ;;  %v8924_v22 = vld [vmem:[%s15547_s7 + $0x3e0] sm:$0xff] }
 0xaa8   : > { %v7281_v58 = vadd.f32 %v7280_v30, %v7186_v25  ;;  %v7187_v7 = vmul.f32 %v5059_v13, %v5059_v13  ;;  %v7560_v56 = vmul.f32 %v7464_v44, %v5059_v13  ;;  %10820 = vmatprep.subr.bf16.mxu0 %v10819_v21  ;;  %v7942_v51 = vmul.f32 %v8922_v55, %v5059_v13  ;;  %v16150_v63 = vld [vmem:[#allocation37_spill] sm:$0xff]  ;;  %v16151_v32 = vld [vmem:[#allocation46_spill] sm:$0xff] }
 0xaa9   : > { %v7654_v45 = vadd.f32 %v7653_v61, %v7559_v23  ;;  %v8036_v16 = vadd.f32 %v8035_v60, %v7941_v57  ;;  %v5062_v15 = vsub.f32 %v16148_v48, %v4966_v24  ;;  %v4965_v42 = vmul.f32 0.01, %v4592_v3  ;;  %v8927_v57 = vld [vmem:[%s15547_s7 + $0x3f8] sm:$0xff]  ;;  %v7468_v61 = vld [vmem:[%s15547_s7 + $0xf0] sm:$0xff] }
 0xaaa   : > { %v7282_v14 = vadd.f32 %v7281_v58, %v7187_v7  ;;  %v16149_v36 = vpack.c.bf16 %v14040_v5, %v14053_v54  ;;  %v4968_v35 = vmul.f32 0.01, %v10172_v20  ;;  %v10823_v17 = vpack.c.bf16 %v5060_v33, %v5059_v13  ;;  %v10175_v5 = vpop.f32.mrb[108].mxu1  ;;  %v8926_v60 = vld [vmem:[%s15547_s7 + $0x3f0] sm:$0xff]  ;;  %v16152_v58 = vld [vmem:[#allocation45_spill] sm:$0xff] }
 0xaab   : > { %v7943_v25 = vmul.f32 %v8923_v8, %v5060_v33  ;;  %v7655_v43 = vadd.f32 %v7654_v45, %v7560_v56  ;;  %v8037_v6 = vadd.f32 %v8036_v16, %v7942_v51  ;;  %v7190_v23 = vmul.f32 %v5062_v15, %v5062_v15  ;;  %v7469_v33 = vld [vmem:[%s15547_s7 + $0xf8] sm:$0xff]  ;;  %v4612_v19 = vpop.f32.mrb[109].mxu1  ;;  %v7471_v16 = vld [vmem:[%s15547_s7 + $0x108] sm:$0xff] }
 0xaac   : > { %10822 = vmatpush3.bf16.msra.mxu0 %v16149_v36  ;;  %v7283_v54 = vadd.f32 %v7282_v14, %v7188_v62  ;;  %v7563_v3 = vmul.f32 %v7467_v28, %v5062_v15  ;;  %v5061_v40 = vsub.f32 %v16150_v63, %v4965_v42  ;;  %v5064_v46 = vsub.f32 %v16151_v32, %v4968_v35  ;;  %v7473_v63 = vld [vmem:[%s15547_s7 + $0x118] sm:$0xff] }
 0xaad   : > { %10824 = vmatprep.subr.bf16.mxu0 %v10823_v17  ;;  %v7656_v44 = vadd.f32 %v7655_v43, %v7561_v0  ;;  %v8038_v30 = vadd.f32 %v8037_v6, %v7943_v25  ;;  %v4967_v4 = vmul.f32 0.01, %v4602_v52  ;;  %v4970_v13 = vmul.f32 0.01, %v10175_v5  ;;  %v10178_v7 = vpop.f32.mrb[110].mxu1  ;;  %v8928_v5 = vld [vmem:[%s15547_s7 + $0x400] sm:$0xff] }
 0xaae   : > { %v7945_v55 = vmul.f32 %v8925_v49, %v5062_v15  ;;  %v7189_v59 = vmul.f32 %v5061_v40, %v5061_v40  ;;  %v7562_v24 = vmul.f32 %v7466_v41, %v5061_v40  ;;  %v7944_v21 = vmul.f32 %v8924_v22, %v5061_v40  ;;  %v4622_v48 = vpop.f32.mrb[111].mxu1  ;;  %v7470_v22 = vld [vmem:[%s15547_s7 + $0x100] sm:$0xff] }
 0xaaf   : > { %v7192_v62 = vmul.f32 %v5064_v46, %v5064_v46  ;;  %v7565_v20 = vmul.f32 %v7469_v33, %v5064_v46  ;;  %v5063_v0 = vsub.f32 %v16152_v58, %v4967_v4  ;;  %v14281_v8 = vsub.f32 %v13223_v34, %v4970_v13  ;;  %v8931_v13 = vld [vmem:[%s15547_s7 + $0x418] sm:$0xff]  ;;  %v7475_v58 = vld [vmem:[%s15547_s7 + $0x128] sm:$0xff] }
 0xab0   : > { %10826 = vmatpush3.bf16.msra.mxu0 %v10825_v12  ;;  %v7284_v56 = vadd.f32 %v7283_v54, %v7189_v59  ;;  %v7657_v52 = vadd.f32 %v7656_v44, %v7562_v24  ;;  %v8039_v45 = vadd.f32 %v8038_v30, %v7944_v21  ;;  %v10827_v51 = vpack.c.bf16 %v5062_v15, %v5061_v40 }
 0xab1   : > { %v7947_v28 = vmul.f32 %v8927_v57, %v5064_v46  ;;  %v7191_v26 = vmul.f32 %v5063_v0, %v5063_v0  ;;  %v7564_v31 = vmul.f32 %v7468_v61, %v5063_v0  ;;  %v7946_v12 = vmul.f32 %v8926_v60, %v5063_v0  ;;  %v10181_v15 = vpop.f32.mrb[112].mxu1 }
 0xab2   : > { %v7285_v14 = vadd.f32 %v7284_v56, %v7190_v23  ;;  %v7658_v42 = vadd.f32 %v7657_v52, %v7563_v3  ;;  %v8040_v36 = vadd.f32 %v8039_v45, %v7945_v55  ;;  %v7194_v34 = vmul.f32 %v14281_v8, %v14281_v8  ;;  %10828 = vmatprep.subr.bf16.mxu0 %v10827_v51  ;;  %v8929_v23 = vld [vmem:[%s15547_s7 + $0x408] sm:$0xff]  ;;  %v4632_v3 = vpop.f32.mrb[113].mxu1  ;;  %v717_v45 = vld [vmem:[%s13905_s27 + $0x38] sm:$0xff] }
 0xab3   : > { %v7567_v35 = vmul.f32 %v7471_v16, %v14281_v8  ;;  %v4969_v17 = vmul.f32 0.01, %v4612_v19  ;;  %v10829_v25 = vpack.c.bf16 %v14095_v39, %v14102_v9  ;;  %v4972_v43 = vmul.f32 0.01, %v10178_v7 }
 0xab4   : > { %v7286_v6 = vadd.f32 %v7285_v14, %v7191_v26  ;;  %v7659_v49 = vadd.f32 %v7658_v42, %v7564_v31  ;;  %v8041_v41 = vadd.f32 %v8040_v36, %v7946_v12  ;;  %v10831_v54 = vpack.c.bf16 %v5064_v46, %v5063_v0  ;;  %v710_v0 = vld [vmem:[%s13905_s27] sm:$0xff] }
 0xab5   : > { %v14301_v39 = vsub.f32 %v13228_v47, %v4969_v17  ;;  %10830 = vmatpush3.bf16.msra.mxu0 %v10829_v25  ;;  %v14304_v9 = vsub.f32 %v13250_v29, %v4972_v43  ;;  %v4971_v40 = vmul.f32 0.01, %v4622_v48  ;;  %v10833_v32 = vpack.c.bf16 %v14125_v50, %v14141_v18  ;;  %v7472_v50 = vld [vmem:[%s15547_s7 + $0x110] sm:$0xff]  ;;  %v10184_v55 = vpop.f32.mrb[114].mxu1  ;;  %v7474_v26 = vld [vmem:[%s15547_s7 + $0x120] sm:$0xff] }
 0xab6   : > { %v7287_v33 = vadd.f32 %v7286_v6, %v7192_v62  ;;  %v7660_v19 = vadd.f32 %v7659_v49, %v7565_v20  ;;  %v8042_v44 = vadd.f32 %v8041_v41, %v7947_v28  ;;  %10832 = vmatprep.subr.bf16.mxu0 %v10831_v54  ;;  %v4974_v46 = vmul.f32 0.01, %v10181_v15  ;;  %v8930_v18 = vld [vmem:[%s15547_s7 + $0x410] sm:$0xff]  ;;  %v4642_v61 = vpop.f32.mrb[115].mxu1  ;;  %v8932_v31 = vld [vmem:[%s15547_s7 + $0x420] sm:$0xff]  ;;  %v8933_v15 = vld [vmem:[%s15547_s7 + $0x428] sm:$0xff] }
 0xab7   : > { %v7949_v47 = vmul.f32 %v8929_v23, %v14281_v8  ;;  %v7193_v30 = vmul.f32 %v14301_v39, %v14301_v39  ;;  %v7566_v29 = vmul.f32 %v7470_v22, %v14301_v39  ;;  %v7948_v4 = vmul.f32 %v8928_v5, %v14301_v39  ;;  %v7477_v6 = vld [vmem:[%s15547_s7 + $0x138] sm:$0xff]  ;;  %v716_v49 = vld [vmem:[%s13905_s27 + $0x30] sm:$0xff] }
 0xab8   : > { %v7196_v59 = vmul.f32 %v14304_v9, %v14304_v9  ;;  %v7569_v24 = vmul.f32 %v7473_v63, %v14304_v9  ;;  %v14329_v21 = vsub.f32 %v13253_v2, %v4971_v40  ;;  %v14332_v57 = vsub.f32 %v13263_v27, %v4974_v46  ;;  %v713_v54 = vld [vmem:[%s13905_s27 + $0x18] sm:$0xff] }
 0xab9   : > { %v7288_v60 = vadd.f32 %v7287_v33, %v7193_v30  ;;  %v7661_v62 = vadd.f32 %v7660_v19, %v7566_v29  ;;  %v8043_v20 = vadd.f32 %v8042_v44, %v7948_v4  ;;  %10834 = vmatpush3.bf16.msra.mxu0 %v10833_v32  ;;  %v4973_v7 = vmul.f32 0.01, %v4632_v3  ;;  %v10187_v12 = vpop.f32.mrb[116].mxu1  ;;  %v8935_v32 = vld [vmem:[%s15547_s7 + $0x438] sm:$0xff]  ;;  %v7476_v19 = vld [vmem:[%s15547_s7 + $0x130] sm:$0xff]  ;;  %v7479_v29 = vld [vmem:[%s15547_s7 + $0x148] sm:$0xff] }
 0xaba   : > { %v7951_v56 = vmul.f32 %v8931_v13, %v14304_v9  ;;  %v7195_v2 = vmul.f32 %v14329_v21, %v14329_v21  ;;  %v7568_v52 = vmul.f32 %v7472_v50, %v14329_v21  ;;  %v7950_v27 = vmul.f32 %v8930_v18, %v14329_v21 }
 0xabb   : > { %v7289_v16 = vadd.f32 %v7288_v60, %v7194_v34  ;;  %v7662_v51 = vadd.f32 %v7661_v62, %v7567_v35  ;;  %v8044_v48 = vadd.f32 %v8043_v20, %v7949_v47  ;;  %v7198_v28 = vmul.f32 %v14332_v57, %v14332_v57  ;;  %v4652_v35 = vpop.f32.mrb[117].mxu1 }
 0xabc   : > { %v7571_v14 = vmul.f32 %v7475_v58, %v14332_v57  ;;  %5463 = vmatmul.mubr.f32.vlgmr.msra.gmra.mrb[72].mxu0 %v710_v0  ;;  %v14354_v42 = vsub.f32 %v13266_v10, %v4973_v7  ;;  %v4976_v36 = vmul.f32 0.01, %v10184_v55  ;;  %v4975_v34 = vmul.f32 0.01, %v4642_v61 }
 0xabd   : > { %v7290_v17 = vadd.f32 %v7289_v16, %v7195_v2  ;;  %v7663_v25 = vadd.f32 %v7662_v51, %v7568_v52  ;;  %v8045_v43 = vadd.f32 %v8044_v48, %v7950_v27  ;;  %5467 = vmatprep.mubr.f32.mxu0 %v717_v45  ;;  %v4978_v41 = vmul.f32 0.01, %v10187_v12  ;;  %v10190_v44 = vpop.f32.mrb[118].mxu1  ;;  %v8937_v51 = vld [vmem:[%s15547_s7 + $0x448] sm:$0xff]  ;;  %v7478_v48 = vld [vmem:[%s15547_s7 + $0x140] sm:$0xff] }
 0xabe   : > { %v7197_v10 = vmul.f32 %v14354_v42, %v14354_v42  ;;  %v7570_v23 = vmul.f32 %v7474_v26, %v14354_v42  ;;  %v7952_v22 = vmul.f32 %v8932_v31, %v14354_v42  ;;  %v14368_v5 = vsub.f32 %v13285_v11, %v4976_v36  ;;  %v8934_v11 = vld [vmem:[%s15547_s7 + $0x430] sm:$0xff]  ;;  %v4662_v4 = vpop.f32.mrb[119].mxu1  ;;  %v7481_v36 = vld [vmem:[%s15547_s7 + $0x158] sm:$0xff] }
 0xabf   : > { %v7291_v3 = vadd.f32 %v7290_v17, %v7196_v59  ;;  %v7664_v63 = vadd.f32 %v7663_v25, %v7569_v24  ;;  %v8046_v40 = vadd.f32 %v8045_v43, %v7951_v56  ;;  %v14375_v33 = vsub.f32 %v13288_v38, %v4975_v34  ;;  %v16153_v34 = vld [vmem:[#allocation22_spill] sm:$0xff] }
 0xac0   : > { %v7953_v46 = vmul.f32 %v8933_v15, %v14332_v57  ;;  %v7200_v47 = vmul.f32 %v14368_v5, %v14368_v5  ;;  %v7573_v30 = vmul.f32 %v7477_v6, %v14368_v5  ;;  %5468 = vmatmul.mubr.f32.gmra.mrb[74].mxu0 %v716_v49  ;;  %v14388_v38 = vsub.f32 %v13307_v1, %v4978_v41  ;;  %v7480_v17 = vld [vmem:[%s15547_s7 + $0x150] sm:$0xff] }
 0xac1   : > { %v7292_v13 = vadd.f32 %v7291_v3, %v7197_v10  ;;  %v7665_v50 = vadd.f32 %v7664_v63, %v7570_v23  ;;  %v8047_v18 = vadd.f32 %v8046_v40, %v7952_v22  ;;  %v7199_v55 = vmul.f32 %v14375_v33, %v14375_v33  ;;  %5537 = vmatprep.mubr.f32.mxu0 %v713_v54  ;;  %v10193_v0 = vpop.f32.mrb[120].mxu1  ;;  %v8939_v3 = vld [vmem:[%s15547_s7 + $0x458] sm:$0xff]  ;;  %v7483_v63 = vld [vmem:[%s15547_s7 + $0x168] sm:$0xff] }
 0xac2   : > { %v7955_v59 = vmul.f32 %v8935_v32, %v14368_v5  ;;  %v7572_v24 = vmul.f32 %v7476_v19, %v14375_v33  ;;  %v7954_v61 = vmul.f32 %v8934_v11, %v14375_v33  ;;  %v7202_v1 = vmul.f32 %v14388_v38, %v14388_v38  ;;  %v4672_v31 = vpop.f32.mrb[121].mxu1 }
 0xac3   : > { %v7293_v60 = vadd.f32 %v7292_v13, %v7198_v28  ;;  %v7666_v62 = vadd.f32 %v7665_v50, %v7571_v14  ;;  %v8048_v20 = vadd.f32 %v8047_v18, %v7953_v46  ;;  %v7575_v58 = vmul.f32 %v7479_v29, %v14388_v38  ;;  %v8936_v28 = vld [vmem:[%s15547_s7 + $0x440] sm:$0xff] }
 0xac4   : > { %v4977_v7 = vmul.f32 0.01, %v4652_v35  ;;  %v4980_v56 = vmul.f32 0.01, %v10190_v44  ;;  %v4979_v2 = vmul.f32 0.01, %v4662_v4  ;;  %v10837_v52 = vpack.c.bf16 %v14281_v8, %v14301_v39 }
 0xac5   : > { %v7294_v27 = vadd.f32 %v7293_v60, %v7199_v55  ;;  %v7667_v45 = vadd.f32 %v7666_v62, %v7572_v24  ;;  %v8049_v16 = vadd.f32 %v8048_v20, %v7954_v61  ;;  %v4982_v26 = vmul.f32 0.01, %v10193_v0  ;;  %v10196_v41 = vpop.f32.mrb[122].mxu1  ;;  %v7482_v4 = vld [vmem:[%s15547_s7 + $0x160] sm:$0xff] }
 0xac6   : > { %v14413_v12 = vsub.f32 %v13310_v53, %v4977_v7  ;;  %v14416_v14 = vsub.f32 %v13320_v37, %v4980_v56  ;;  %v14422_v35 = vsub.f32 %v16153_v34, %v4979_v2  ;;  %v4981_v25 = vmul.f32 0.01, %v4672_v31  ;;  %v8938_v53 = vld [vmem:[%s15547_s7 + $0x450] sm:$0xff]  ;;  %v4682_v40 = vpop.f32.mrb[123].mxu1  ;;  %v8940_v13 = vld [vmem:[%s15547_s7 + $0x460] sm:$0xff]  ;;  %v8941_v56 = vld [vmem:[%s15547_s7 + $0x468] sm:$0xff] }
 0xac7   : > { %v7295_v43 = vadd.f32 %v7294_v27, %v7200_v47  ;;  %v7668_v15 = vadd.f32 %v7667_v45, %v7573_v30  ;;  %v8050_v6 = vadd.f32 %v8049_v16, %v7955_v59  ;;  %v16154_v37 = vld [vmem:[#allocation23_spill] sm:$0xff]  ;;  %v7957_v10 = vmul.f32 %v8937_v51, %v14388_v38  ;;  %v16155_v59 = vld [vmem:[#allocation26_spill] sm:$0xff] }
 0xac8   : > { %v14431_v49 = vsub.f32 %v16154_v37, %v4982_v26  ;;  %v7201_v23 = vmul.f32 %v14413_v12, %v14413_v12  ;;  %v7574_v22 = vmul.f32 %v7478_v48, %v14413_v12  ;;  %v7956_v54 = vmul.f32 %v8936_v28, %v14413_v12  ;;  %v7485_v26 = vld [vmem:[%s15547_s7 + $0x178] sm:$0xff]  ;;  %v7484_v31 = vld [vmem:[%s15547_s7 + $0x170] sm:$0xff] }
 0xac9   : > { %v7204_v32 = vmul.f32 %v14416_v14, %v14416_v14  ;;  %v7577_v19 = vmul.f32 %v7481_v36, %v14416_v14  ;;  %v7203_v11 = vmul.f32 %v14422_v35, %v14422_v35  ;;  %v7576_v44 = vmul.f32 %v7480_v17, %v14422_v35  ;;  %v10199_v61 = vpop.f32.mrb[124].mxu1  ;;  %v16157_v36 = vld [vmem:[#allocation36_spill] sm:$0xff]  ;;  %v8942_v17 = vld [vmem:[%s15547_s7 + $0x470] sm:$0xff] }
 0xaca   : > { %v7296_v46 = vadd.f32 %v7295_v43, %v7201_v23  ;;  %v7669_v47 = vadd.f32 %v7668_v15, %v7574_v22  ;;  %v8051_v30 = vadd.f32 %v8050_v6, %v7956_v54  ;;  %v7958_v29 = vmul.f32 %v8938_v53, %v14422_v35  ;;  %v4692_v7 = vpop.f32.mrb[125].mxu1 }
 0xacb   : > { %v7959_v50 = vmul.f32 %v8939_v3, %v14416_v14  ;;  %v7206_v18 = vmul.f32 %v14431_v49, %v14431_v49  ;;  %v7579_v55 = vmul.f32 %v7483_v63, %v14431_v49  ;;  %v14462_v24 = vsub.f32 %v16155_v59, %v4981_v25 }
 0xacc   : > { %v7297_v60 = vadd.f32 %v7296_v46, %v7202_v1  ;;  %v7670_v62 = vadd.f32 %v7669_v47, %v7575_v58  ;;  %v8052_v20 = vadd.f32 %v8051_v30, %v7957_v10  ;;  %v4984_v0 = vmul.f32 0.01, %v10196_v41  ;;  %v16156_v1 = vld [vmem:[#allocation33_spill] sm:$0xff]  ;;  %v16158_v47 = vld [vmem:[#allocation12_spill] sm:$0xff] }
 0xacd   : > { %v7205_v2 = vmul.f32 %v14462_v24, %v14462_v24  ;;  %v7578_v27 = vmul.f32 %v7482_v4, %v14462_v24  ;;  %v7960_v45 = vmul.f32 %v8940_v13, %v14462_v24  ;;  %v4983_v16 = vmul.f32 0.01, %v4682_v40  ;;  %v10202_v15 = vpop.f32.mrb[126].mxu1  ;;  %v7487_v46 = vld [vmem:[%s15547_s7 + $0x188] sm:$0xff]  ;;  %v7486_v13 = vld [vmem:[%s15547_s7 + $0x180] sm:$0xff] }
 0xace   : > { %v7298_v51 = vadd.f32 %v7297_v60, %v7203_v11  ;;  %v7671_v48 = vadd.f32 %v7670_v62, %v7576_v44  ;;  %v8053_v28 = vadd.f32 %v8052_v20, %v7958_v29  ;;  %v14472_v58 = vsub.f32 %v16156_v1, %v4984_v0  ;;  %v4702_v23 = vpop.f32.mrb[127].mxu1  ;;  %v16159_v29 = vld [vmem:[#allocation14_spill] sm:$0xff]  ;;  %v8944_v0 = vld [vmem:[%s15547_s7 + $0x480] sm:$0xff]  ;;  %v7489_v1 = vld [vmem:[%s15547_s7 + $0x198] sm:$0xff] }
 0xacf   : > { %v14481_v34 = vsub.f32 %v16157_v36, %v4983_v16  ;;  %v4986_v25 = vmul.f32 0.01, %v10199_v61  ;;  %v4985_v43 = vmul.f32 0.01, %v4692_v7  ;;  %v10841_v6 = vpack.c.bf16 %v14304_v9, %v14329_v21 }
 0xad0   : > { %v7961_v53 = vmul.f32 %v8941_v56, %v14431_v49  ;;  %v7299_v37 = vadd.f32 %v7298_v51, %v7204_v32  ;;  %v7672_v41 = vadd.f32 %v7671_v48, %v7577_v19  ;;  %v8054_v10 = vadd.f32 %v8053_v28, %v7959_v50  ;;  %v8943_v32 = vld [vmem:[%s15547_s7 + $0x478] sm:$0xff] }
 0xad1   : > { %v7208_v22 = vmul.f32 %v14472_v58, %v14472_v58  ;;  %v7581_v54 = vmul.f32 %v7485_v26, %v14472_v58  ;;  %v7207_v3 = vmul.f32 %v14481_v34, %v14481_v34  ;;  %v7580_v63 = vmul.f32 %v7484_v31, %v14481_v34  ;;  %v10205_v61 = vpop.f32.mrb[128].mxu1  ;;  %v16160_v31 = vld [vmem:[#allocation11_spill] sm:$0xff] }
 0xad2   : > { %v7300_v40 = vadd.f32 %v7299_v37, %v7205_v2  ;;  %v7673_v11 = vadd.f32 %v7672_v41, %v7578_v27  ;;  %v8055_v44 = vadd.f32 %v8054_v10, %v7960_v45  ;;  %v7962_v19 = vmul.f32 %v8942_v17, %v14481_v34  ;;  %v4712_v56 = vpop.f32.mrb[129].mxu1  ;;  %v16161_v17 = vld [vmem:[#allocation10_spill] sm:$0xff] }
 0xad3   : > { %v5082_v30 = vsub.f32 %v16158_v47, %v4986_v25  ;;  %v5081_v4 = vsub.f32 %v16159_v29, %v4985_v43  ;;  %v4988_v50 = vmul.f32 0.01, %v10202_v15  ;;  %v4987_v59 = vmul.f32 0.01, %v4702_v23  ;;  %v7488_v43 = vld [vmem:[%s15547_s7 + $0x190] sm:$0xff]  ;;  %v16162_v15 = vld [vmem:[#allocation13_spill] sm:$0xff] }
 0xad4   : > { %v7301_v60 = vadd.f32 %v7300_v40, %v7206_v18  ;;  %v7674_v62 = vadd.f32 %v7673_v11, %v7579_v55  ;;  %v8056_v20 = vadd.f32 %v8055_v44, %v7961_v53  ;;  %v4990_v7 = vmul.f32 0.01, %v10205_v61  ;;  %v8945_v18 = vld [vmem:[%s15547_s7 + $0x488] sm:$0xff] }
 0xad5   : > { %v7963_v2 = vmul.f32 %v8943_v32, %v14472_v58  ;;  %v7210_v27 = vmul.f32 %v5082_v30, %v5082_v30  ;;  %v7583_v45 = vmul.f32 %v7487_v46, %v5082_v30  ;;  %v7209_v16 = vmul.f32 %v5081_v4, %v5081_v4  ;;  %v10208_v37 = vpop.f32.mrb[130].mxu1  ;;  %v7491_v40 = vld [vmem:[%s15547_s7 + $0x1a8] sm:$0xff] }
 0xad6   : > { %v7302_v51 = vadd.f32 %v7301_v60, %v7207_v3  ;;  %v7675_v48 = vadd.f32 %v7674_v62, %v7580_v63  ;;  %v8057_v28 = vadd.f32 %v8056_v20, %v7962_v19  ;;  %v7582_v55 = vmul.f32 %v7486_v13, %v5081_v4  ;;  %v8947_v3 = vld [vmem:[%s15547_s7 + $0x498] sm:$0xff]  ;;  %v8946_v63 = vld [vmem:[%s15547_s7 + $0x490] sm:$0xff]  ;;  %v4722_v44 = vpop.f32.mrb[131].mxu1 }
 0xad7   : > { %v7964_v26 = vmul.f32 %v8944_v0, %v5081_v4  ;;  %v5084_v36 = vsub.f32 %v16160_v31, %v4988_v50  ;;  %v5083_v25 = vsub.f32 %v16161_v17, %v4987_v59  ;;  %v14523_v53 = vsub.f32 %v16162_v15, %v4990_v7  ;;  %v8949_v0 = vld [vmem:[%s15547_s7 + $0x4a8] sm:$0xff]  ;;  %v7493_v31 = vld [vmem:[%s15547_s7 + $0x1b8] sm:$0xff] }
 0xad8   : > { %v7303_v41 = vadd.f32 %v7302_v51, %v7208_v22  ;;  %v7676_v10 = vadd.f32 %v7675_v48, %v7581_v54  ;;  %v8058_v23 = vadd.f32 %v8057_v28, %v7963_v2  ;;  %v10835_v11 = vpack.c.bf16 %v5082_v30, %v5081_v4  ;;  %v7490_v2 = vld [vmem:[%s15547_s7 + $0x1a0] sm:$0xff] }
 0xad9   : > { %v7965_v32 = vmul.f32 %v8945_v18, %v5082_v30  ;;  %v7212_v19 = vmul.f32 %v5084_v36, %v5084_v36  ;;  %v7585_v46 = vmul.f32 %v7489_v1, %v5084_v36  ;;  %v7211_v22 = vmul.f32 %v5083_v25, %v5083_v25  ;;  %v10211_v30 = vpop.f32.mrb[132].mxu1  ;;  %v16164_v1 = vld [vmem:[#allocation18_spill] sm:$0xff] }
 0xada   : > { %v7304_v54 = vadd.f32 %v7303_v41, %v7209_v16  ;;  %v7677_v47 = vadd.f32 %v7676_v10, %v7582_v55  ;;  %v8059_v29 = vadd.f32 %v8058_v23, %v7964_v26  ;;  %v7584_v13 = vmul.f32 %v7488_v43, %v5083_v25  ;;  %10836 = vmatprep.subr.bf16.mxu0 %v10835_v11  ;;  %v4732_v16 = vpop.f32.mrb[133].mxu1  ;;  %v8948_v55 = vld [vmem:[%s15547_s7 + $0x4a0] sm:$0xff] }
 0xadb   : > { %v7967_v50 = vmul.f32 %v8947_v3, %v5084_v36  ;;  %v7966_v59 = vmul.f32 %v8946_v63, %v5083_v25  ;;  %v7214_v61 = vmul.f32 %v14523_v53, %v14523_v53  ;;  %v7587_v60 = vmul.f32 %v7491_v40, %v14523_v53  ;;  %10838 = vmatpush3.bf16.msra.mxu0 %v10837_v52  ;;  %v8951_v3 = vld [vmem:[%s15547_s7 + $0x4b8] sm:$0xff]  ;;  %v7492_v63 = vld [vmem:[%s15547_s7 + $0x1b0] sm:$0xff] }
 0xadc   : > { %v7305_v4 = vadd.f32 %v7304_v54, %v7210_v27  ;;  %v7678_v62 = vadd.f32 %v7677_v47, %v7583_v45  ;;  %v8060_v20 = vadd.f32 %v8059_v29, %v7965_v32  ;;  %v4989_v7 = vmul.f32 0.01, %v4712_v56  ;;  %v16163_v27 = vld [vmem:[#allocation9_spill] sm:$0xff]  ;;  %v8950_v40 = vld [vmem:[%s15547_s7 + $0x4b0] sm:$0xff] }
 0xadd   : > { %v4992_v51 = vmul.f32 0.01, %v10208_v37  ;;  %v10839_v48 = vpack.c.bf16 %v5084_v36, %v5083_v25  ;;  %v4991_v28 = vmul.f32 0.01, %v4722_v44  ;;  %v4994_v18 = vmul.f32 0.01, %v10211_v30 }
 0xade   : > { %v7306_v8 = vadd.f32 %v7305_v4, %v7211_v22  ;;  %v7679_v39 = vadd.f32 %v7678_v62, %v7584_v13  ;;  %v8061_v52 = vadd.f32 %v8060_v20, %v7966_v59  ;;  %v5085_v45 = vsub.f32 %v16163_v27, %v4989_v7  ;;  %v16165_v36 = vld [vmem:[#allocation16_spill] sm:$0xff]  ;;  %v16166_v25 = vld [vmem:[#allocation15_spill] sm:$0xff]  ;;  %v10214_v15 = vpop.f32.mrb[134].mxu1  ;;  %v8953_v27 = vld [vmem:[%s15547_s7 + $0x4c8] sm:$0xff] }
 0xadf   : > { %v7969_v56 = vmul.f32 %v8949_v0, %v14523_v53  ;;  %v5088_v26 = vsub.f32 %v16164_v1, %v4992_v51  ;;  %10840 = vmatprep.subr.bf16.mxu0 %v10839_v48  ;;  %v5087_v17 = vsub.f32 %v16165_v36, %v4991_v28  ;;  %v14557_v43 = vsub.f32 %v16166_v25, %v4994_v18  ;;  %v4742_v11 = vpop.f32.mrb[135].mxu1  ;;  %v7494_v0 = vld [vmem:[%s15547_s7 + $0x1c0] sm:$0xff] }
 0xae0   : > { %v7213_v37 = vmul.f32 %v5085_v45, %v5085_v45  ;;  %v7307_v41 = vadd.f32 %v7306_v8, %v7212_v19  ;;  %v7586_v10 = vmul.f32 %v7490_v2, %v5085_v45  ;;  %v7680_v23 = vadd.f32 %v7679_v39, %v7585_v46  ;;  %10842 = vmatpush3.bf16.msra.mxu0 %v10841_v6  ;;  %v7495_v46 = vld [vmem:[%s15547_s7 + $0x1c8] sm:$0xff]  ;;  %v8952_v7 = vld [vmem:[%s15547_s7 + $0x4c0] sm:$0xff] }
 0xae1   : > { %v7968_v44 = vmul.f32 %v8948_v55, %v5085_v45  ;;  %v8062_v32 = vadd.f32 %v8061_v52, %v7967_v50  ;;  %v7216_v19 = vmul.f32 %v5088_v26, %v5088_v26  ;;  %v4993_v22 = vmul.f32 0.01, %v4732_v16  ;;  %v10217_v20 = vpop.f32.mrb[136].mxu1  ;;  %v16167_v48 = vld [vmem:[#allocation17_spill] sm:$0xff]  ;;  %v16168_v36 = vld [vmem:[#allocation20_spill] sm:$0xff] }
 0xae2   : > { %v7308_v54 = vadd.f32 %v7307_v41, %v7213_v37  ;;  %v7681_v47 = vadd.f32 %v7680_v23, %v7586_v10  ;;  %v7589_v29 = vmul.f32 %v7493_v31, %v5088_v26  ;;  %v7215_v13 = vmul.f32 %v5087_v17, %v5087_v17  ;;  %v4752_v2 = vpop.f32.mrb[137].mxu1 }
 0xae3   : > { %v8063_v59 = vadd.f32 %v8062_v32, %v7968_v44  ;;  %v7971_v30 = vmul.f32 %v8951_v3, %v5088_v26  ;;  %v7588_v4 = vmul.f32 %v7492_v63, %v5087_v17  ;;  %v7970_v62 = vmul.f32 %v8950_v40, %v5087_v17  ;;  %v7496_v40 = vld [vmem:[%s15547_s7 + $0x1d0] sm:$0xff] }
 0xae4   : > { %v7309_v9 = vadd.f32 %v7308_v54, %v7214_v61  ;;  %v7682_v21 = vadd.f32 %v7681_v47, %v7587_v60  ;;  %v7218_v6 = vmul.f32 %v14557_v43, %v14557_v43  ;;  %v7591_v50 = vmul.f32 %v7495_v46, %v14557_v43 }
 0xae5   : > { %v8064_v16 = vadd.f32 %v8063_v59, %v7969_v56  ;;  %v10843_v51 = vpack.c.bf16 %v14523_v53, %v5085_v45  ;;  %v5089_v61 = vsub.f32 %v16167_v48, %v4993_v22  ;;  %v10845_v60 = vpack.c.bf16 %v14332_v57, %v14354_v42  ;;  %v10220_v31 = vpop.f32.mrb[138].mxu1  ;;  %v7497_v57 = vld [vmem:[%s15547_s7 + $0x1d8] sm:$0xff]  ;;  %v7499_v22 = vld [vmem:[%s15547_s7 + $0x1e8] sm:$0xff] }
 0xae6   : > { %v7310_v28 = vadd.f32 %v7309_v9, %v7215_v13  ;;  %v7683_v18 = vadd.f32 %v7682_v21, %v7588_v4  ;;  %v4996_v8 = vmul.f32 0.01, %v10214_v15  ;;  %v10847_v39 = vpack.c.bf16 %v5088_v26, %v5087_v17  ;;  %v4762_v26 = vpop.f32.mrb[139].mxu1  ;;  %v7498_v21 = vld [vmem:[%s15547_s7 + $0x1e0] sm:$0xff] }
 0xae7   : > { %v8065_v52 = vadd.f32 %v8064_v16, %v7970_v62  ;;  %10844 = vmatprep.subr.bf16.mxu0 %v10843_v51  ;;  %v7217_v55 = vmul.f32 %v5089_v61, %v5089_v61  ;;  %v7590_v1 = vmul.f32 %v7494_v0, %v5089_v61  ;;  %v7972_v56 = vmul.f32 %v8952_v7, %v5089_v61 }
 0xae8   : > { %v7311_v53 = vadd.f32 %v7310_v28, %v7216_v19  ;;  %v7684_v45 = vadd.f32 %v7683_v18, %v7589_v29  ;;  %10846 = vmatpush3.bf16.msra.mxu0 %v10845_v60  ;;  %v5092_v25 = vsub.f32 %v16168_v36, %v4996_v8  ;;  %v4995_v42 = vmul.f32 0.01, %v4742_v11  ;;  %v8954_v11 = vld [vmem:[%s15547_s7 + $0x4d0] sm:$0xff]  ;;  %v8957_v60 = vld [vmem:[%s15547_s7 + $0x4e8] sm:$0xff] }
 0xae9   : > { %v8066_v17 = vadd.f32 %v8065_v52, %v7971_v30  ;;  %10848 = vmatprep.subr.bf16.mxu0 %v10847_v39  ;;  %v10849_v15 = vpack.c.bf16 %v14368_v5, %v14375_v33  ;;  %v4998_v37 = vmul.f32 0.01, %v10217_v20  ;;  %v10851_v41 = vpack.c.bf16 %v14557_v43, %v5089_v61  ;;  %v8955_v5 = vld [vmem:[%s15547_s7 + $0x4d8] sm:$0xff]  ;;  %v10223_v54 = vpop.f32.mrb[140].mxu1 }
 0xaea   : > { %v7973_v10 = vmul.f32 %v8953_v27, %v14557_v43  ;;  %v7312_v23 = vadd.f32 %v7311_v53, %v7217_v55  ;;  %v7685_v3 = vadd.f32 %v7684_v45, %v7590_v1  ;;  %v7220_v63 = vmul.f32 %v5092_v25, %v5092_v25  ;;  %v16169_v33 = vld [vmem:[#allocation19_spill] sm:$0xff]  ;;  %v16170_v43 = vld [vmem:[#allocation21_spill] sm:$0xff]  ;;  %v4772_v30 = vpop.f32.mrb[141].mxu1 }
 0xaeb   : > { %v8067_v44 = vadd.f32 %v8066_v17, %v7972_v56  ;;  %v7593_v32 = vmul.f32 %v7497_v57, %v5092_v25  ;;  %v5091_v19 = vsub.f32 %v16169_v33, %v4995_v42  ;;  %v5094_v46 = vsub.f32 %v16170_v43, %v4998_v37  ;;  %v16172_v56 = vld [vmem:[#allocation25_spill] sm:$0xff] }
 0xaec   : > { %v7313_v47 = vadd.f32 %v7312_v23, %v7218_v6  ;;  %v7686_v29 = vadd.f32 %v7685_v3, %v7591_v50  ;;  %10850 = vmatpush3.bf16.msra.mxu0 %v10849_v15  ;;  %v4997_v13 = vmul.f32 0.01, %v4752_v2  ;;  %v10853_v59 = vpack.c.bf16 %v14388_v38, %v14413_v12  ;;  %v8956_v6 = vld [vmem:[%s15547_s7 + $0x4e0] sm:$0xff]  ;;  %v16173_v3 = vld [vmem:[#allocation34_spill] sm:$0xff] }
 0xaed   : > { %v7219_v4 = vmul.f32 %v5091_v19, %v5091_v19  ;;  %v7592_v62 = vmul.f32 %v7496_v40, %v5091_v19  ;;  %v7974_v20 = vmul.f32 %v8954_v11, %v5091_v19  ;;  %v8068_v9 = vadd.f32 %v8067_v44, %v7973_v10  ;;  %10852 = vmatprep.subr.bf16.mxu0 %v10851_v41  ;;  %v16171_v2 = vld [vmem:[#allocation24_spill] sm:$0xff]  ;;  %v10226_v61 = vpop.f32.mrb[142].mxu1  ;;  %v7500_v10 = vld [vmem:[%s15547_s7 + $0x1f0] sm:$0xff]  ;;  %v7503_v44 = vld [vmem:[%s15547_s7 + $0x208] sm:$0xff] }
 0xaee   : > { %v7975_v50 = vmul.f32 %v8955_v5, %v5092_v25  ;;  %v7222_v0 = vmul.f32 %v5094_v46, %v5094_v46  ;;  %v7595_v7 = vmul.f32 %v7499_v22, %v5094_v46  ;;  %v5093_v16 = vsub.f32 %v16171_v2, %v4997_v13  ;;  %v4782_v52 = vpop.f32.mrb[143].mxu1  ;;  %v8959_v41 = vld [vmem:[%s15547_s7 + $0x4f8] sm:$0xff]  ;;  %v8960_v13 = vld [vmem:[%s15547_s7 + $0x500] sm:$0xff]  ;;  %v8961_v2 = vld [vmem:[%s15547_s7 + $0x508] sm:$0xff] }
 0xaef   : > { %v7314_v38 = vadd.f32 %v7313_v47, %v7219_v4  ;;  %v7687_v12 = vadd.f32 %v7686_v29, %v7592_v62  ;;  %v8069_v51 = vadd.f32 %v8068_v9, %v7974_v20  ;;  %v5000_v48 = vmul.f32 0.01, %v10220_v31  ;;  %v7501_v31 = vld [vmem:[%s15547_s7 + $0x1f8] sm:$0xff]  ;;  %v7502_v29 = vld [vmem:[%s15547_s7 + $0x200] sm:$0xff] }
 0xaf0   : > { %v7221_v28 = vmul.f32 %v5093_v16, %v5093_v16  ;;  %v7594_v18 = vmul.f32 %v7498_v21, %v5093_v16  ;;  %v7976_v8 = vmul.f32 %v8956_v6, %v5093_v16  ;;  %10854 = vmatpush3.bf16.msra.mxu0 %v10853_v59  ;;  %v10855_v39 = vpack.c.bf16 %v5092_v25, %v5091_v19  ;;  %v16174_v40 = vld [vmem:[#allocation35_spill] sm:$0xff]  ;;  %v16175_v62 = vld [vmem:[#allocation44_spill] sm:$0xff] }
 0xaf1   : > { %v7315_v27 = vadd.f32 %v7314_v38, %v7220_v63  ;;  %v7688_v55 = vadd.f32 %v7687_v12, %v7593_v32  ;;  %v8070_v1 = vadd.f32 %v8069_v51, %v7975_v50  ;;  %v5096_v53 = vsub.f32 %v16172_v56, %v5000_v48  ;;  %v10229_v23 = vpop.f32.mrb[144].mxu1 }
 0xaf2   : > { %10856 = vmatprep.subr.bf16.mxu0 %v10855_v39  ;;  %v4999_v45 = vmul.f32 0.01, %v4762_v26  ;;  %v10857_v36 = vpack.c.bf16 %v14416_v14, %v14422_v35  ;;  %v5002_v57 = vmul.f32 0.01, %v10223_v54  ;;  %v10859_v42 = vpack.c.bf16 %v5094_v46, %v5093_v16  ;;  %v8958_v26 = vld [vmem:[%s15547_s7 + $0x4f0] sm:$0xff]  ;;  %v4792_v32 = vpop.f32.mrb[145].mxu1 }
 0xaf3   : > { %v7977_v17 = vmul.f32 %v8957_v60, %v5094_v46  ;;  %v7316_v15 = vadd.f32 %v7315_v27, %v7221_v28  ;;  %v7689_v25 = vadd.f32 %v7688_v55, %v7594_v18  ;;  %v8071_v37 = vadd.f32 %v8070_v1, %v7976_v8  ;;  %v16176_v60 = vld [vmem:[#allocation49_spill] sm:$0xff] }
 0xaf4   : > { %v7224_v14 = vmul.f32 %v5096_v53, %v5096_v53  ;;  %v7597_v35 = vmul.f32 %v7501_v31, %v5096_v53  ;;  %v5095_v63 = vsub.f32 %v16173_v3, %v4999_v45  ;;  %10858 = vmatpush3.bf16.msra.mxu0 %v10857_v36  ;;  %v14641_v11 = vsub.f32 %v16174_v40, %v5002_v57  ;;  %v7504_v31 = vld [vmem:[%s15547_s7 + $0x210] sm:$0xff]  ;;  %v8963_v45 = vld [vmem:[%s15547_s7 + $0x518] sm:$0xff]  ;;  %v719_v3 = vld [vmem:[%s13905_s27 + $0x48] sm:$0xff] }
 0xaf5   : > { %v7317_v5 = vadd.f32 %v7316_v15, %v7222_v0  ;;  %v7690_v33 = vadd.f32 %v7689_v25, %v7595_v7  ;;  %v8072_v19 = vadd.f32 %v8071_v37, %v7977_v17  ;;  %10860 = vmatprep.subr.bf16.mxu0 %v10859_v42  ;;  %v5001_v43 = vmul.f32 0.01, %v4772_v30  ;;  %v10232_v9 = vpop.f32.mrb[146].mxu1  ;;  %v16177_v36 = vld [vmem:[#allocation114_spill] sm:$0xff]  ;;  %v7506_v25 = vld [vmem:[%s15547_s7 + $0x220] sm:$0xff] }
 0xaf6   : > { %v7979_v46 = vmul.f32 %v8959_v41, %v5096_v53  ;;  %v7223_v22 = vmul.f32 %v5095_v63, %v5095_v63  ;;  %v7596_v54 = vmul.f32 %v7500_v10, %v5095_v63  ;;  %v7978_v47 = vmul.f32 %v8958_v26, %v5095_v63  ;;  %v4802_v7 = vpop.f32.mrb[147].mxu1  ;;  %v16178_v42 = vld [vmem:[#allocation54_spill] sm:$0xff] }
 0xaf7   : > { %v7226_v59 = vmul.f32 %v14641_v11, %v14641_v11  ;;  %v7599_v4 = vmul.f32 %v7503_v44, %v14641_v11  ;;  %v14656_v20 = vsub.f32 %v16175_v62, %v5001_v43  ;;  %v10861_v30 = vpack.c.bf16 %v14431_v49, %v14462_v24  ;;  %v712_v15 = vld [vmem:[%s13905_s27 + $0x10] sm:$0xff]  ;;  %v715_v62 = vld [vmem:[%s13905_s27 + $0x28] sm:$0xff] }
 0xaf8   : > { %v7318_v21 = vadd.f32 %v7317_v5, %v7223_v22  ;;  %v7691_v6 = vadd.f32 %v7690_v33, %v7596_v54  ;;  %v8073_v50 = vadd.f32 %v8072_v19, %v7978_v47  ;;  %v5004_v0 = vmul.f32 0.01, %v10226_v61 }
 0xaf9   : > { %v7225_v16 = vmul.f32 %v14656_v20, %v14656_v20  ;;  %v7598_v38 = vmul.f32 %v7502_v29, %v14656_v20  ;;  %v7980_v12 = vmul.f32 %v8960_v13, %v14656_v20  ;;  %10862 = vmatpush3.bf16.msra.mxu0 %v10861_v30  ;;  %v10863_v51 = vpack.c.bf16 %v5096_v53, %v5095_v63  ;;  %v7505_v53 = vld [vmem:[%s15547_s7 + $0x218] sm:$0xff]  ;;  %v7507_v13 = vld [vmem:[%s15547_s7 + $0x228] sm:$0xff] }
 0xafa   : > { %v7319_v49 = vadd.f32 %v7318_v21, %v7224_v14  ;;  %v7692_v24 = vadd.f32 %v7691_v6, %v7597_v35  ;;  %v8074_v48 = vadd.f32 %v8073_v50, %v7979_v46  ;;  %v14668_v28 = vsub.f32 %v16176_v60, %v5004_v0  ;;  %v8964_v35 = vld [vmem:[%s15547_s7 + $0x520] sm:$0xff]  ;;  %v8965_v0 = vld [vmem:[%s15547_s7 + $0x528] sm:$0xff]  ;;  %v7508_v60 = vld [vmem:[%s15547_s7 + $0x230] sm:$0xff] }
 0xafb   : > { %10864 = vmatprep.subr.bf16.mxu0 %v10863_v51  ;;  %v5003_v61 = vmul.f32 0.01, %v4782_v52  ;;  %v10865_v18 = vpack.c.bf16 %v14472_v58, %v14481_v34  ;;  %v5006_v8 = vmul.f32 0.01, %v10229_v23  ;;  %v5005_v39 = vmul.f32 0.01, %v4792_v32 }
 0xafc   : > { %v7981_v27 = vmul.f32 %v8961_v2, %v14641_v11  ;;  %v7320_v55 = vadd.f32 %v7319_v49, %v7225_v16  ;;  %v7693_v1 = vadd.f32 %v7692_v24, %v7598_v38  ;;  %v8075_v56 = vadd.f32 %v8074_v48, %v7980_v12  ;;  %v8962_v58 = vld [vmem:[%s15547_s7 + $0x510] sm:$0xff]  ;;  %v10235_v34 = vpop.f32.mrb[148].mxu1  ;;  %v16179_v23 = vld [vmem:[#allocation53_spill] sm:$0xff] }
 0xafd   : > { %v7228_v52 = vmul.f32 %v14668_v28, %v14668_v28  ;;  %v14688_v57 = vsub.f32 %v16177_v36, %v5003_v61  ;;  %10866 = vmatpush3.bf16.msra.mxu0 %v10865_v18  ;;  %v14691_v17 = vsub.f32 %v16178_v42, %v5006_v8  ;;  %v4812_v37 = vpop.f32.mrb[149].mxu1  ;;  %v14698_v14 = vsub.f32 %v16179_v23, %v5005_v39  ;;  %v16180_v24 = vld [vmem:[#allocation58_spill] sm:$0xff]  ;;  %v16182_v18 = vld [vmem:[#allocation117_spill] sm:$0xff] }
 0xafe   : > { %v7321_v41 = vadd.f32 %v7320_v55, %v7226_v59  ;;  %v7694_v10 = vadd.f32 %v7693_v1, %v7599_v4  ;;  %v8076_v26 = vadd.f32 %v8075_v56, %v7981_v27  ;;  %v7601_v63 = vmul.f32 %v7505_v53, %v14668_v28  ;;  %v10238_v5 = vpop.f32.mrb[150].mxu1  ;;  %v718_v4 = vld [vmem:[%s13905_s27 + $0x40] sm:$0xff]  ;;  %v8966_v61 = vld [vmem:[%s15547_s7 + $0x530] sm:$0xff]  ;;  %v7509_v56 = vld [vmem:[%s15547_s7 + $0x238] sm:$0xff] }
 0xaff   : > { %v7227_v40 = vmul.f32 %v14688_v57, %v14688_v57  ;;  %v7600_v44 = vmul.f32 %v7504_v31, %v14688_v57  ;;  %v7982_v32 = vmul.f32 %v8962_v58, %v14688_v57  ;;  %v7983_v33 = vmul.f32 %v8963_v45, %v14668_v28  ;;  %v4822_v22 = vpop.f32.mrb[151].mxu1  ;;  %v8967_v53 = vld [vmem:[%s15547_s7 + $0x538] sm:$0xff]  ;;  %v16183_v31 = vld [vmem:[#allocation62_spill] sm:$0xff]  ;;  %v7510_v36 = vld [vmem:[%s15547_s7 + $0x240] sm:$0xff] }
 0xb00   : > { %v7230_v19 = vmul.f32 %v14691_v17, %v14691_v17  ;;  %5538 = vmatmul.mubr.f32.vlgmr.msra.gmra.mrb[76].mxu0 %v712_v15  ;;  %v7229_v43 = vmul.f32 %v14698_v14, %v14698_v14  ;;  %v7602_v46 = vmul.f32 %v7506_v25, %v14698_v14  ;;  %v7984_v59 = vmul.f32 %v8964_v35, %v14698_v14 }
 0xb01   : > { %v7322_v54 = vadd.f32 %v7321_v41, %v7227_v40  ;;  %v7695_v47 = vadd.f32 %v7694_v10, %v7600_v44  ;;  %v8077_v29 = vadd.f32 %v8076_v26, %v7982_v32  ;;  %5542 = vmatprep.mubr.f32.mxu0 %v719_v3  ;;  %v5008_v30 = vmul.f32 0.01, %v10232_v9  ;;  %v10241_v51 = vpop.f32.mrb[152].mxu1  ;;  %v16181_v9 = vld [vmem:[#allocation57_spill] sm:$0xff] }
 0xb02   : > { %v5007_v21 = vmul.f32 0.01, %v4802_v7  ;;  %v5010_v6 = vmul.f32 0.01, %v10235_v34  ;;  %v10869_v50 = vpack.c.bf16 %v14641_v11, %v14656_v20  ;;  %v5009_v12 = vmul.f32 0.01, %v4812_v37 }
 0xb03   : > { %v7323_v2 = vadd.f32 %v7322_v54, %v7228_v52  ;;  %v7696_v16 = vadd.f32 %v7695_v47, %v7601_v63  ;;  %v8078_v38 = vadd.f32 %v8077_v29, %v7983_v33  ;;  %v7603_v49 = vmul.f32 %v7507_v13, %v14691_v17  ;;  %v4832_v39 = vpop.f32.mrb[153].mxu1  ;;  %v8968_v10 = vld [vmem:[%s15547_s7 + $0x540] sm:$0xff]  ;;  %v8969_v33 = vld [vmem:[%s15547_s7 + $0x548] sm:$0xff]  ;;  %v7524_v11 = vld [vmem:[%s15547_s7 + $0x2b0] sm:$0xff] }
 0xb04   : > { %v14728_v48 = vsub.f32 %v16180_v24, %v5008_v30  ;;  %5543 = vmatmul.mubr.f32.gmra.mrb[78].mxu0 %v718_v4  ;;  %v14731_v7 = vsub.f32 %v16181_v9, %v5007_v21  ;;  %v14740_v8 = vsub.f32 %v16182_v18, %v5010_v6  ;;  %v14749_v58 = vsub.f32 %v16183_v31, %v5009_v12  ;;  %v16184_v47 = vld [vmem:[#allocation61_spill] sm:$0xff]  ;;  %v8971_v24 = vld [vmem:[%s15547_s7 + $0x558] sm:$0xff] }
 0xb05   : > { %v7324_v27 = vadd.f32 %v7323_v2, %v7229_v43  ;;  %v7697_v55 = vadd.f32 %v7696_v16, %v7602_v46  ;;  %v8079_v1 = vadd.f32 %v8078_v38, %v7984_v59  ;;  %5612 = vmatprep.mubr.f32.mxu0 %v715_v62  ;;  %v7985_v34 = vmul.f32 %v8965_v0, %v14691_v17  ;;  %v10244_v26 = vpop.f32.mrb[154].mxu1  ;;  %v7512_v38 = vld [vmem:[%s15547_s7 + $0x250] sm:$0xff]  ;;  %v16185_v9 = vld [vmem:[#allocation60_spill] sm:$0xff]  ;;  %v16186_v18 = vld [vmem:[#allocation65_spill] sm:$0xff] }
 0xb06   : > { %v7232_v52 = vmul.f32 %v14728_v48, %v14728_v48  ;;  %v7231_v45 = vmul.f32 %v14731_v7, %v14731_v7  ;;  %v5012_v42 = vmul.f32 0.01, %v10238_v5  ;;  %v7604_v25 = vmul.f32 %v7508_v60, %v14731_v7  ;;  %v4842_v40 = vpop.f32.mrb[155].mxu1  ;;  %v7511_v5 = vld [vmem:[%s15547_s7 + $0x248] sm:$0xff] }
 0xb07   : > { %v7325_v15 = vadd.f32 %v7324_v27, %v7230_v19  ;;  %v7698_v37 = vadd.f32 %v7697_v55, %v7603_v49  ;;  %v7986_v41 = vmul.f32 %v8966_v61, %v14731_v7  ;;  %v7605_v23 = vmul.f32 %v7509_v56, %v14728_v48  ;;  %v8970_v61 = vld [vmem:[%s15547_s7 + $0x550] sm:$0xff] }
 0xb08   : > { %v7987_v35 = vmul.f32 %v8967_v53, %v14728_v48  ;;  %v8080_v3 = vadd.f32 %v8079_v1, %v7985_v34  ;;  %v7234_v63 = vmul.f32 %v14740_v8, %v14740_v8  ;;  %v7233_v19 = vmul.f32 %v14749_v58, %v14749_v58  ;;  %v16187_v55 = vld [vmem:[#allocation70_spill] sm:$0xff] }
 0xb09   : > { %v7326_v44 = vadd.f32 %v7325_v15, %v7231_v45  ;;  %v7699_v32 = vadd.f32 %v7698_v37, %v7604_v25  ;;  %v7606_v43 = vmul.f32 %v7510_v36, %v14749_v58  ;;  %v7988_v54 = vmul.f32 %v8968_v10, %v14749_v58  ;;  %v10247_v21 = vpop.f32.mrb[156].mxu1  ;;  %v7514_v36 = vld [vmem:[%s15547_s7 + $0x260] sm:$0xff] }
 0xb0a   : > { %v8081_v46 = vadd.f32 %v8080_v3, %v7986_v41  ;;  %v14779_v29 = vsub.f32 %v16184_v47, %v5012_v42  ;;  %v5011_v13 = vmul.f32 0.01, %v4822_v22  ;;  %v5014_v62 = vmul.f32 0.01, %v10241_v51  ;;  %v4852_v12 = vpop.f32.mrb[157].mxu1  ;;  %v7513_v51 = vld [vmem:[%s15547_s7 + $0x258] sm:$0xff] }
 0xb0b   : > { %v7327_v59 = vadd.f32 %v7326_v44, %v7232_v52  ;;  %v7700_v4 = vadd.f32 %v7699_v32, %v7605_v23  ;;  %v5013_v30 = vmul.f32 0.01, %v4832_v39  ;;  %v7607_v6 = vmul.f32 %v7511_v5, %v14740_v8  ;;  %v8972_v42 = vld [vmem:[%s15547_s7 + $0x560] sm:$0xff] }
 0xb0c   : > { %v7989_v0 = vmul.f32 %v8969_v33, %v14740_v8  ;;  %v8082_v2 = vadd.f32 %v8081_v46, %v7987_v35  ;;  %v7236_v16 = vmul.f32 %v14779_v29, %v14779_v29  ;;  %v14795_v60 = vsub.f32 %v16185_v9, %v5011_v13  ;;  %v7516_v46 = vld [vmem:[%s15547_s7 + $0x270] sm:$0xff]  ;;  %v16189_v13 = vld [vmem:[#allocation68_spill] sm:$0xff] }
 0xb0d   : > { %v7328_v49 = vadd.f32 %v7327_v59, %v7233_v19  ;;  %v7701_v22 = vadd.f32 %v7700_v4, %v7606_v43  ;;  %v14801_v39 = vsub.f32 %v16186_v18, %v5014_v62  ;;  %v14804_v1 = vsub.f32 %v16187_v55, %v5013_v30  ;;  %v10250_v15 = vpop.f32.mrb[158].mxu1  ;;  %v16188_v19 = vld [vmem:[#allocation69_spill] sm:$0xff]  ;;  %v8974_v4 = vld [vmem:[%s15547_s7 + $0x570] sm:$0xff] }
 0xb0e   : > { %v8083_v27 = vadd.f32 %v8082_v2, %v7988_v54  ;;  %v5016_v56 = vmul.f32 0.01, %v10244_v26  ;;  %v5015_v53 = vmul.f32 0.01, %v4842_v40  ;;  %v7235_v31 = vmul.f32 %v14795_v60, %v14795_v60  ;;  %v4862_v26 = vpop.f32.mrb[159].mxu1  ;;  %v8973_v40 = vld [vmem:[%s15547_s7 + $0x568] sm:$0xff] }
 0xb0f   : > { %v7329_v34 = vadd.f32 %v7328_v49, %v7234_v63  ;;  %v7608_v52 = vmul.f32 %v7512_v38, %v14795_v60  ;;  %v7702_v45 = vadd.f32 %v7701_v22, %v7607_v6  ;;  %v7609_v25 = vmul.f32 %v7513_v51, %v14779_v29  ;;  %v7515_v63 = vld [vmem:[%s15547_s7 + $0x268] sm:$0xff]  ;;  %v7517_v51 = vld [vmem:[%s15547_s7 + $0x278] sm:$0xff] }
 0xb10   : > { %v7991_v37 = vmul.f32 %v8971_v24, %v14779_v29  ;;  %v7990_v41 = vmul.f32 %v8970_v61, %v14795_v60  ;;  %v8084_v10 = vadd.f32 %v8083_v27, %v7989_v0  ;;  %v7238_v3 = vmul.f32 %v14801_v39, %v14801_v39  ;;  %v16190_v27 = vld [vmem:[#allocation28_spill] sm:$0xff] }
 0xb11   : > { %v7330_v23 = vadd.f32 %v7329_v34, %v7235_v31  ;;  %v7703_v35 = vadd.f32 %v7702_v45, %v7608_v52  ;;  %v7237_v44 = vmul.f32 %v14804_v1, %v14804_v1  ;;  %v7610_v5 = vmul.f32 %v7514_v36, %v14804_v1  ;;  %v10253_v30 = vpop.f32.mrb[160].mxu1 }
 0xb12   : > { %v8085_v32 = vadd.f32 %v8084_v10, %v7990_v41  ;;  %v7992_v33 = vmul.f32 %v8972_v42, %v14804_v1  ;;  %v14831_v43 = vsub.f32 %v16188_v19, %v5016_v56  ;;  %v14837_v59 = vsub.f32 %v16189_v13, %v5015_v53  ;;  %v4872_v49 = vpop.f32.mrb[161].mxu1  ;;  %v7518_v41 = vld [vmem:[%s15547_s7 + $0x280] sm:$0xff] }
 0xb13   : > { %v7331_v54 = vadd.f32 %v7330_v23, %v7236_v16  ;;  %v7704_v47 = vadd.f32 %v7703_v35, %v7609_v25  ;;  %v5018_v62 = vmul.f32 0.01, %v10247_v21  ;;  %v7611_v6 = vmul.f32 %v7515_v63, %v14801_v39  ;;  %v8975_v21 = vld [vmem:[%s15547_s7 + $0x578] sm:$0xff]  ;;  %v8976_v63 = vld [vmem:[%s15547_s7 + $0x580] sm:$0xff] }
 0xb14   : > { %v7993_v0 = vmul.f32 %v8973_v40, %v14801_v39  ;;  %v8086_v2 = vadd.f32 %v8085_v32, %v7991_v37  ;;  %v7240_v38 = vmul.f32 %v14831_v43, %v14831_v43  ;;  %v7239_v24 = vmul.f32 %v14837_v59, %v14837_v59  ;;  %v16192_v40 = vld [vmem:[#allocation42_spill] sm:$0xff] }
 0xb15   : > { %v7332_v16 = vadd.f32 %v7331_v54, %v7237_v44  ;;  %v7705_v22 = vadd.f32 %v7704_v47, %v7610_v5  ;;  %v7612_v9 = vmul.f32 %v7516_v46, %v14837_v59  ;;  %v7994_v18 = vmul.f32 %v8974_v4, %v14837_v59  ;;  %v10256_v45 = vpop.f32.mrb[162].mxu1  ;;  %v16193_v5 = vld [vmem:[#allocation41_spill] sm:$0xff] }
 0xb16   : > { %v8087_v61 = vadd.f32 %v8086_v2, %v7992_v33  ;;  %v5114_v55 = vsub.f32 %v16190_v27, %v5018_v62  ;;  %v5017_v56 = vmul.f32 0.01, %v4852_v12  ;;  %v5020_v34 = vmul.f32 0.01, %v10250_v15  ;;  %v4882_v10 = vpop.f32.mrb[163].mxu1  ;;  %v7519_v12 = vld [vmem:[%s15547_s7 + $0x288] sm:$0xff] }
 0xb17   : > { %v7333_v53 = vadd.f32 %v7332_v16, %v7238_v3  ;;  %v7706_v31 = vadd.f32 %v7705_v22, %v7611_v6  ;;  %v5019_v52 = vmul.f32 0.01, %v4862_v26  ;;  %v7613_v36 = vmul.f32 %v7517_v51, %v14831_v43  ;;  %v8977_v15 = vld [vmem:[%s15547_s7 + $0x588] sm:$0xff]  ;;  %v16191_v26 = vld [vmem:[#allocation27_spill] sm:$0xff] }
 0xb18   : > { %v7995_v42 = vmul.f32 %v8975_v21, %v14831_v43  ;;  %v8088_v25 = vadd.f32 %v8087_v61, %v7993_v0  ;;  %v7242_v37 = vmul.f32 %v5114_v55, %v5114_v55  ;;  %v5113_v3 = vsub.f32 %v16191_v26, %v5017_v56  ;;  %v7520_v62 = vld [vmem:[%s15547_s7 + $0x290] sm:$0xff] }
 0xb19   : > { %v7334_v23 = vadd.f32 %v7333_v53, %v7239_v24  ;;  %v7707_v35 = vadd.f32 %v7706_v31, %v7612_v9  ;;  %v5116_v44 = vsub.f32 %v16192_v40, %v5020_v34  ;;  %v5115_v33 = vsub.f32 %v16193_v5, %v5019_v52  ;;  %v8978_v6 = vld [vmem:[%s15547_s7 + $0x590] sm:$0xff]  ;;  %v10259_v0 = vpop.f32.mrb[164].mxu1  ;;  %v8979_v9 = vld [vmem:[%s15547_s7 + $0x598] sm:$0xff]  ;;  %v7522_v34 = vld [vmem:[%s15547_s7 + $0x2a0] sm:$0xff] }
 0xb1a   : > { %v8089_v32 = vadd.f32 %v8088_v25, %v7994_v18  ;;  %v5022_v19 = vmul.f32 0.01, %v10253_v30  ;;  %v5021_v46 = vmul.f32 0.01, %v4872_v49  ;;  %v7241_v54 = vmul.f32 %v5113_v3, %v5113_v3  ;;  %v4892_v21 = vpop.f32.mrb[165].mxu1  ;;  %v16194_v53 = vld [vmem:[#allocation43_spill] sm:$0xff] }
 0xb1b   : > { %v7335_v47 = vadd.f32 %v7334_v23, %v7240_v38  ;;  %v7614_v13 = vmul.f32 %v7518_v41, %v5113_v3  ;;  %v7708_v4 = vadd.f32 %v7707_v35, %v7613_v36  ;;  %v7615_v2 = vmul.f32 %v7519_v12, %v5114_v55  ;;  %v7521_v38 = vld [vmem:[%s15547_s7 + $0x298] sm:$0xff]  ;;  %v16195_v25 = vld [vmem:[#allocation50_spill] sm:$0xff]  ;;  %v8980_v23 = vld [vmem:[%s15547_s7 + $0x5a0] sm:$0xff] }
 0xb1c   : > { %v7997_v16 = vmul.f32 %v8977_v15, %v5114_v55  ;;  %v7996_v22 = vmul.f32 %v8976_v63, %v5113_v3  ;;  %v8090_v51 = vadd.f32 %v8089_v32, %v7995_v42  ;;  %v7244_v24 = vmul.f32 %v5116_v44, %v5116_v44 }
 0xb1d   : > { %v7336_v30 = vadd.f32 %v7335_v47, %v7241_v54  ;;  %v7709_v49 = vadd.f32 %v7708_v4, %v7614_v13  ;;  %v7243_v61 = vmul.f32 %v5115_v33, %v5115_v33  ;;  %v7616_v27 = vmul.f32 %v7520_v62, %v5115_v33  ;;  %v10262_v35 = vpop.f32.mrb[166].mxu1  ;;  %v8981_v13 = vld [vmem:[%s15547_s7 + $0x5a8] sm:$0xff] }
 0xb1e   : > { %v8091_v18 = vadd.f32 %v8090_v51, %v7996_v22  ;;  %v7998_v56 = vmul.f32 %v8978_v6, %v5115_v33  ;;  %v5118_v31 = vsub.f32 %v16194_v53, %v5022_v19  ;;  %v10867_v42 = vpack.c.bf16 %v5114_v55, %v5113_v3  ;;  %v14894_v40 = vpop.f32.mrb[167].mxu1 }
 0xb1f   : > { %v7337_v52 = vadd.f32 %v7336_v30, %v7242_v37  ;;  %v7710_v36 = vadd.f32 %v7709_v49, %v7615_v2  ;;  %v5117_v41 = vsub.f32 %v16195_v25, %v5021_v46  ;;  %v7617_v12 = vmul.f32 %v7521_v38, %v5116_v44  ;;  %v7523_v37 = vld [vmem:[%s15547_s7 + $0x2a8] sm:$0xff]  ;;  %v16196_v30 = vld [vmem:[#allocation52_spill] sm:$0xff] }
 0xb20   : > { %v7999_v15 = vmul.f32 %v8979_v9, %v5116_v44  ;;  %v8092_v26 = vadd.f32 %v8091_v18, %v7997_v16  ;;  %v7246_v63 = vmul.f32 %v5118_v31, %v5118_v31  ;;  %10868 = vmatprep.subr.bf16.mxu0 %v10867_v42  ;;  %v5024_v54 = vmul.f32 0.01, %v10256_v45  ;;  %v7525_v9 = vld [vmem:[%s15547_s7 + $0x2b8] sm:$0xff] }
 0xb21   : > { %v7338_v32 = vadd.f32 %v7337_v52, %v7243_v61  ;;  %v7711_v5 = vadd.f32 %v7710_v36, %v7616_v27  ;;  %v7245_v55 = vmul.f32 %v5117_v41, %v5117_v41  ;;  %v7618_v3 = vmul.f32 %v7522_v34, %v5117_v41  ;;  %10870 = vmatpush3.bf16.msra.mxu0 %v10869_v50  ;;  %v10265_v16 = vpop.f32.mrb[168].mxu1  ;;  %v8983_v18 = vld [vmem:[%s15547_s7 + $0x5b8] sm:$0xff] }
 0xb22   : > { %v8093_v19 = vadd.f32 %v8092_v26, %v7998_v56  ;;  %v8000_v46 = vmul.f32 %v8980_v23, %v5117_v41  ;;  %v10871_v47 = vpack.c.bf16 %v5116_v44, %v5115_v33  ;;  %v5023_v6 = vmul.f32 0.01, %v4882_v10  ;;  %v4912_v50 = vpop.f32.mrb[169].mxu1  ;;  %v16197_v33 = vld [vmem:[#allocation51_spill] sm:$0xff]  ;;  %v16198_v42 = vld [vmem:[#allocation56_spill] sm:$0xff] }
 0xb23   : > { %v7339_v4 = vadd.f32 %v7338_v32, %v7244_v24  ;;  %v7712_v62 = vadd.f32 %v7711_v5, %v7617_v12  ;;  %v10873_v2 = vpack.c.bf16 %v14668_v28, %v14688_v57  ;;  %v7619_v22 = vmul.f32 %v7523_v37, %v5118_v31  ;;  %v8982_v28 = vld [vmem:[%s15547_s7 + $0x5b0] sm:$0xff]  ;;  %v8984_v26 = vld [vmem:[%s15547_s7 + $0x5c0] sm:$0xff] }
 0xb24   : > { %v8094_v51 = vadd.f32 %v8093_v19, %v7999_v15  ;;  %v5120_v49 = vsub.f32 %v16196_v30, %v5024_v54  ;;  %10872 = vmatprep.subr.bf16.mxu0 %v10871_v47  ;;  %v10875_v20 = vpack.c.bf16 %v5118_v31, %v5117_v41  ;;  %v5119_v24 = vsub.f32 %v16197_v33, %v5023_v6  ;;  %v7526_v41 = vld [vmem:[%s15547_s7 + $0x2c0] sm:$0xff]  ;;  %v16199_v37 = vld [vmem:[#allocation115_spill] sm:$0xff] }
 0xb25   : > { %v7340_v45 = vadd.f32 %v7339_v4, %v7245_v55  ;;  %v7713_v44 = vadd.f32 %v7712_v62, %v7618_v3  ;;  %v5025_v57 = vmul.f32 0.01, %v4892_v21  ;;  %v8001_v10 = vmul.f32 %v8981_v13, %v5118_v31  ;;  %10874 = vmatpush3.bf16.msra.mxu0 %v10873_v2  ;;  %v10268_v52 = vpop.f32.mrb[170].mxu1 }
 0xb26   : > { %v8095_v38 = vadd.f32 %v8094_v51, %v8000_v46  ;;  %v5026_v61 = vmul.f32 0.01, %v10259_v0  ;;  %v7247_v27 = vmul.f32 %v5119_v24, %v5119_v24  ;;  %v7620_v53 = vmul.f32 %v7524_v11, %v5119_v24  ;;  %10876 = vmatprep.subr.bf16.mxu0 %v10875_v20  ;;  %v4922_v0 = vpop.f32.mrb[171].mxu1  ;;  %v16200_v51 = vld [vmem:[#allocation55_spill] sm:$0xff] }
 0xb27   : > { %v7341_v56 = vadd.f32 %v7340_v45, %v7246_v63  ;;  %v7714_v34 = vadd.f32 %v7713_v44, %v7619_v22  ;;  %v7248_v36 = vmul.f32 %v5120_v49, %v5120_v49  ;;  %v8002_v21 = vmul.f32 %v8982_v28, %v5119_v24 }
 0xb28   : > { %v8096_v31 = vadd.f32 %v8095_v38, %v8001_v10  ;;  %v5121_v25 = vsub.f32 %v16198_v42, %v5025_v57  ;;  %v7621_v23 = vmul.f32 %v7525_v9, %v5120_v49  ;;  %v10877_v63 = vpack.c.bf16 %v14691_v17, %v14698_v14  ;;  %v16202_v57 = vld [vmem:[#allocation59_spill] sm:$0xff]  ;;  %v16203_v10 = vld [vmem:[#allocation64_spill] sm:$0xff] }
 0xb29   : > { %v7342_v12 = vadd.f32 %v7341_v56, %v7247_v27  ;;  %v7715_v15 = vadd.f32 %v7714_v34, %v7620_v53  ;;  %v8003_v32 = vmul.f32 %v8983_v18, %v5120_v49  ;;  %v5122_v55 = vsub.f32 %v16199_v37, %v5026_v61  ;;  %v8985_v61 = vld [vmem:[%s15547_s7 + $0x5c8] sm:$0xff]  ;;  %v8986_v18 = vld [vmem:[%s15547_s7 + $0x5d0] sm:$0xff]  ;;  %v7529_v42 = vld [vmem:[%s15547_s7 + $0x2d8] sm:$0xff] }
 0xb2a   : > { %v8097_v5 = vadd.f32 %v8096_v31, %v8002_v21  ;;  %v5028_v3 = vmul.f32 0.01, %v10262_v35  ;;  %v7249_v19 = vmul.f32 %v5121_v25, %v5121_v25  ;;  %v7622_v54 = vmul.f32 %v7526_v41, %v5121_v25  ;;  %10878 = vmatpush3.bf16.msra.mxu0 %v10877_v63  ;;  %v16201_v35 = vld [vmem:[#allocation116_spill] sm:$0xff] }
 0xb2b   : > { %v7343_v46 = vadd.f32 %v7342_v12, %v7248_v36  ;;  %v7716_v47 = vadd.f32 %v7715_v15, %v7621_v23  ;;  %v8004_v13 = vmul.f32 %v8984_v26, %v5121_v25  ;;  %v10879_v62 = vpack.c.bf16 %v5120_v49, %v5119_v24  ;;  %v8988_v12 = vld [vmem:[%s15547_s7 + $0x5e0] sm:$0xff] }
 0xb2c   : > { %v8098_v4 = vadd.f32 %v8097_v5, %v8003_v32  ;;  %v5027_v22 = vmul.f32 0.01, %v14894_v40  ;;  %v10881_v17 = vpack.c.bf16 %v14728_v48, %v14731_v7  ;;  %v5124_v30 = vsub.f32 %v16200_v51, %v5028_v3  ;;  %v7527_v48 = vld [vmem:[%s15547_s7 + $0x2c8] sm:$0xff] }
 0xb2d   : > { %v7344_v6 = vadd.f32 %v7343_v46, %v7249_v19  ;;  %v7717_v2 = vadd.f32 %v7716_v47, %v7622_v54  ;;  %10880 = vmatprep.subr.bf16.mxu0 %v10879_v62  ;;  %v5030_v20 = vmul.f32 0.01, %v10265_v16  ;;  %v10883_v45 = vpack.c.bf16 %v5122_v55, %v5121_v25  ;;  %v7528_v16 = vld [vmem:[%s15547_s7 + $0x2d0] sm:$0xff]  ;;  %v7531_v3 = vld [vmem:[%s15547_s7 + $0x2e8] sm:$0xff] }
 0xb2e   : > { %v8099_v14 = vadd.f32 %v8098_v4, %v8004_v13  ;;  %v5123_v11 = vsub.f32 %v16201_v35, %v5027_v22  ;;  %10882 = vmatpush3.bf16.msra.mxu0 %v10881_v17  ;;  %v5029_v44 = vmul.f32 0.01, %v4912_v50  ;;  %v10885_v49 = vpack.c.bf16 %v14740_v8, %v14749_v58  ;;  %v16204_v58 = vld [vmem:[#allocation63_spill] sm:$0xff]  ;;  %v8989_v62 = vld [vmem:[%s15547_s7 + $0x5e8] sm:$0xff] }
 0xb2f   : > { %v5032_v33 = vmul.f32 0.01, %v10268_v52  ;;  %v5031_v24 = vmul.f32 0.01, %v4922_v0  ;;  %v10889_v40 = vpack.c.bf16 %v14779_v29, %v14795_v60  ;;  %v7250_v28 = vmul.f32 %v5122_v55, %v5122_v55  ;;  %10884 = vmatprep.subr.bf16.mxu0 %v10883_v45  ;;  %v16205_v29 = vld [vmem:[#allocation66_spill] sm:$0xff]  ;;  %v8987_v0 = vld [vmem:[%s15547_s7 + $0x5d8] sm:$0xff] }
 0xb30   : > { %v7251_v7 = vmul.f32 %v5123_v11, %v5123_v11  ;;  %v5126_v50 = vsub.f32 %v16202_v57, %v5030_v20  ;;  %v5125_v8 = vsub.f32 %v16203_v10, %v5029_v44  ;;  %v10887_v9 = vpack.c.bf16 %v5124_v30, %v5123_v11  ;;  %v7532_v19 = vld [vmem:[%s15547_s7 + $0x2f0] sm:$0xff]  ;;  %v7533_v35 = vld [vmem:[%s15547_s7 + $0x2f8] sm:$0xff] }
 0xb31   : > { %v14949_v38 = vsub.f32 %v16204_v58, %v5032_v33  ;;  %v5127_v60 = vsub.f32 %v16205_v29, %v5031_v24  ;;  %v10893_v27 = vpack.c.bf16 %v14801_v39, %v14804_v1  ;;  %v10897_v56 = vpack.c.bf16 %v14831_v43, %v14837_v59  ;;  %v7530_v39 = vld [vmem:[%s15547_s7 + $0x2e0] sm:$0xff]  ;;  %v8991_v24 = vld [vmem:[%s15547_s7 + $0x5f8] sm:$0xff]  ;;  %v16207_v58 = vld [vmem:[#allocation130_spill] sm:$0xff] }
 0xb32   : > { %10886 = vmatpush3.bf16.msra.mxu0 %v10885_v49  ;;  %v7345_v53 = vadd.f32 %v7344_v6, %v7250_v28  ;;  %v7623_v34 = vmul.f32 %v7527_v48, %v5122_v55  ;;  %v7624_v52 = vmul.f32 %v7528_v16, %v5123_v11  ;;  %v10891_v36 = vpack.c.bf16 %v5126_v50, %v5125_v8  ;;  %v8990_v6 = vld [vmem:[%s15547_s7 + $0x5f0] sm:$0xff]  ;;  %v714_v49 = vld [vmem:[%s13905_s27 + $0x20] sm:$0xff]  ;;  %v721_v28 = vld [vmem:[%s13905_s27 + $0x58] sm:$0xff] }
 0xb33   : > { %10888 = vmatprep.subr.bf16.mxu0 %v10887_v9  ;;  %v10895_v21 = vpack.c.bf16 %v14949_v38, %v5127_v60  ;;  %v7252_v31 = vmul.f32 %v5124_v30, %v5124_v30  ;;  %v7253_v25 = vmul.f32 %v5125_v8, %v5125_v8  ;;  %v8005_v1 = vmul.f32 %v8985_v61, %v5122_v55  ;;  %v16208_v29 = vld [vmem:[#allocation135_spill] sm:$0xff]  ;;  %v16211_v61 = vld [vmem:[#allocation73_spill] sm:$0xff] }
 0xb34   : > { %v7346_v41 = vadd.f32 %v7345_v53, %v7251_v7  ;;  %v8006_v43 = vmul.f32 %v8986_v18, %v5123_v11  ;;  %v7718_v59 = vadd.f32 %v7717_v2, %v7623_v34  ;;  %v7625_v15 = vmul.f32 %v7529_v42, %v5124_v30  ;;  %v16212_v18 = vld [vmem:[#allocation145_spill] sm:$0xff]  ;;  %v8778_v42 = vld [vmem:[#allocation3] ss:$0 sm:$0xff] }
 0xb35   : > { %v7626_v26 = vmul.f32 %v7530_v39, %v5125_v8  ;;  %v8100_v32 = vadd.f32 %v8099_v14, %v8005_v1  ;;  %v7254_v5 = vmul.f32 %v5126_v50, %v5126_v50  ;;  %v7255_v37 = vmul.f32 %v5127_v60, %v5127_v60 }
 0xb36   : > { %10890 = vmatpush3.bf16.msra.mxu0 %v10889_v40  ;;  %v7347_v23 = vadd.f32 %v7346_v41, %v7252_v31  ;;  %v7719_v63 = vadd.f32 %v7718_v59, %v7624_v52  ;;  %v8007_v46 = vmul.f32 %v8987_v0, %v5124_v30  ;;  %v8008_v47 = vmul.f32 %v8988_v12, %v5125_v8  ;;  %v16206_v40 = vld [vmem:[#allocation67_spill] sm:$0xff] }
 0xb37   : > { %10892 = vmatprep.subr.bf16.mxu0 %v10891_v36  ;;  %v8101_v13 = vadd.f32 %v8100_v32, %v8006_v43  ;;  %v7627_v2 = vmul.f32 %v7531_v3, %v5126_v50  ;;  %v7628_v22 = vmul.f32 %v7532_v19, %v5127_v60  ;;  %v7256_v51 = vmul.f32 %v14949_v38, %v14949_v38  ;;  %v720_v8 = vld [vmem:[%s13905_s27 + $0x50] sm:$0xff] }
 0xb38   : > { %v7348_v55 = vadd.f32 %v7347_v23, %v7253_v25  ;;  %v7720_v54 = vadd.f32 %v7719_v63, %v7625_v15  ;;  %v8009_v20 = vmul.f32 %v8989_v62, %v5126_v50  ;;  %v8010_v45 = vmul.f32 %v8990_v6, %v5127_v60  ;;  %v16209_v60 = vld [vmem:[#allocation136_spill] sm:$0xff] }
 0xb39   : > { %v8102_v14 = vadd.f32 %v8101_v13, %v8007_v46  ;;  %v7629_v48 = vmul.f32 %v7533_v35, %v14949_v38  ;;  %v8011_v50 = vmul.f32 %v8991_v24, %v14949_v38  ;;  %v16210_v38 = vld [vmem:[#allocation74_spill] sm:$0xff]  ;;  %v8779_v13 = vld [vmem:[#allocation5] ss:$0 sm:$0xff] }
 0xb3a   : > { %10894 = vmatpush3.bf16.msra.mxu0 %v10893_v27  ;;  %v7349_v4 = vadd.f32 %v7348_v55, %v7254_v5  ;;  %v7721_v17 = vadd.f32 %v7720_v54, %v7626_v26  ;;  %v16213_v27 = vld [vmem:[#allocation146_spill] sm:$0xff] }
 0xb3b   : > { %10896 = vmatprep.subr.bf16.mxu0 %v10895_v21  ;;  %v8103_v44 = vadd.f32 %v8102_v14, %v8008_v47  ;;  %v15049_v14 = vld [vmem:[%s15546_s6 + $0x8] sm:$0xff] }
 0xb3c   : > { %v7350_v30 = vadd.f32 %v7349_v4, %v7255_v37  ;;  %v7722_v11 = vadd.f32 %v7721_v17, %v7627_v2  ;;  %v16216_v2 = vld [vmem:[#allocation88_spill] sm:$0xff] }
 0xb3d   : > { %v8104_v16 = vadd.f32 %v8103_v44, %v8009_v20 }
 0xb3e   : > { %10898 = vmatpush3.bf16.msra.mxu0 %v10897_v56  ;;  %v14993_v33 = vadd.f32 %v7350_v30, %v7256_v51  ;;  %v7723_v7 = vadd.f32 %v7722_v11, %v7628_v22  ;;  %v16217_v30 = vld [vmem:[#allocation87_spill] sm:$0xff] }
 0xb3f   : > { %10900 = vmatprep.subr.bf16.mxu0 %v16206_v40  ;;  %v8105_v10 = vadd.f32 %v8104_v16, %v8010_v45  ;;  %v5757_v35 = vcvt.s32.f32 %v16217_v30  ;;  %vm7429_vm1 = vcmp.eq.s32.totalorder %v16217_v30, 0  ;;  %vm7432_vm2 = vcmp.eq.s32.totalorder %v16217_v30, 1 }
 0xb40   : > { %v15001_v57 = vadd.f32 %v7723_v7, %v7629_v48  ;;  %v15068_v7 = vld [vmem:[%s15546_s6] sm:$0xff]  ;;  %vm7435_vm3 = vcmp.eq.s32.totalorder %v16217_v30, 2  ;;  %vm7817_vm4 = vcmp.eq.s32.totalorder %v16217_v30, 3  ;;  %vm8199_vm5 = vcmp.eq.s32.totalorder %v16217_v30, 4  ;;  %v796_v30 = vld [vmem:[%s15144_s29 + $0x250] sm:$0xff] }
 0xb41   : > { %5613 = vmatmul.mubr.f32.vlgmr.msra.gmra.mrb[80].mxu0 %v714_v49  ;;  %v15007_v9 = vadd.f32 %v8105_v10, %v8011_v50  ;;  %v5767_v24 = vmul.f32 %v5757_v35, %v15049_v14  ;;  %v5766_v16 = vmul.f32 %v5757_v35, %v15068_v7  ;;  %v7361_v50 = vld [vmem:[#allocation3] sm:$0x1] }
 0xb42   : > { %10902 = vmatpush3.bf16.msra.mxu0 %v16206_v40  ;;  %5617 = vmatprep.mubr.f32.mxu0 %v721_v28 }
 0xb43   : > { %10904 = vmatprep.subr.bf16.mxu0 %v16207_v58 }
 0xb45   : > { %5618 = vmatmul.mubr.f32.gmra.mrb[82].mxu0 %v720_v8  ;;  %v7362_v8 = vmul.f32 %v7361_v50, %v7361_v50 }
 0xb46   : > { %10906 = vmatpush3.bf16.msra.mxu0 %v16207_v58 }
 0xb47   : > { %10908 = vmatprep.subr.bf16.mxu0 %v16208_v29 }
 0xb4a   : > { %10910 = vmatpush3.bf16.msra.mxu0 %v16208_v29  ;;  %v7364_v29 = vsel %vm7363_vm11, %v7362_v8, 0.0 }
 0xb4b   : > { %10912 = vmatprep.subr.bf16.mxu0 %v16209_v60 }
 0xb4e   : > { %10914 = vmatpush3.bf16.msra.mxu0 %v16209_v60  ;;  %v15073_v60 = vld [vmem:[#allocation5] sm:$0x1] }
 0xb4f   : > { %10916 = vmatprep.subr.bf16.mxu0 %v16210_v38 }
 0xb52   : > { %10918 = vmatpush3.bf16.msra.mxu0 %v16210_v38  ;;  %v7417_v38 = vmul.f32 %v15073_v60, %v15073_v60 }
 0xb53   : > { %10920 = vmatprep.subr.bf16.mxu0 %v16211_v61 }
 0xb56   : > { %10922 = vmatpush3.bf16.msra.mxu0 %v16211_v61  ;;  %v16218_v61 = vld [vmem:[#allocation72_spill] sm:$0xff] }
 0xb57   : > { %10924 = vmatprep.subr.bf16.mxu0 %v16212_v18 }
 0xb5a   : > { %10926 = vmatpush3.bf16.msra.mxu0 %v16212_v18  ;;  %v7418_v18 = vsel %vm7363_vm11, %v7417_v38, 0.0 }
 0xb5b   : > { %10928 = vmatprep.subr.bf16.mxu0 %v16213_v27 }
 0xb5e   : > { %10930 = vmatpush3.bf16.msra.mxu0 %v16213_v27 }
 0xb8f   : > { %v9551_v56 = vpop.f32.mrb[72].mxu0 }
 0xb90   : > { %v9552_v53 = vpop.f32.mrb[73].mxu0 }
 0xb91   : > { %v9553_v34 = vadd.f32 %v9552_v53, %v9551_v56  ;;  %v7804_v53 = vld [vmem:[%s15550_s10] sm:$0x1] }
 0xb93   : > { %v9554_v52 = vpop.f32.mrb[74].mxu0  ;;  %v5465_v41 = vadd.f32 %v9553_v34, %v8778_v42  ;;  %v7805_v34 = vmul.f32 %v7804_v53, %v15073_v60 }
 0xb94   : > { %v9555_v36 = vpop.f32.mrb[75].mxu0 }
 0xb95   : > { %v9556_v21 = vadd.f32 %v9555_v36, %v9554_v52  ;;  %v16219_v52 = vld [vmem:[#allocation71_spill] sm:$0xff]  ;;  %v7806_v36 = vsel %vm7363_vm11, %v7805_v34, 0.0 }
 0xb97   : > { %v5470_v0 = vadd.f32 %v9556_v21, %v8778_v42  ;;  %v8992_v21 = vld [vmem:[%s15548_s8 + $0x1] sm:$0x1] }
 0xbd3   : > { %v9589_v31 = vpop.f32.mrb[76].mxu0 }
 0xbd4   : > { %v9590_v25 = vpop.f32.mrb[77].mxu0 }
 0xbd5   : > { %v9591_v39 = vadd.f32 %v9590_v25, %v9589_v31  ;;  %v8117_v31 = vmul.f32 %v8992_v21, %v7361_v50  ;;  %v722_v21 = vld [vmem:[%s15144_s29] sm:$0xff] }
 0xbd7   : > { %v5540_v1 = vadd.f32 %v9591_v39, %v5465_v41  ;;  %v9592_v43 = vpop.f32.mrb[78].mxu0  ;;  %v16220_v41 = vld [vmem:[#allocation85_spill] sm:$0xff] }
 0xbd8   : > { %v9593_v59 = vpop.f32.mrb[79].mxu0  ;;  %v830_v39 = vadd.s32 8, %v16220_v41 }
 0xbd9   : > { %v9594_v23 = vadd.f32 %v9593_v59, %v9592_v43  ;;  %v16221_v43 = vmov 0.0  }
 0xbda   : > { %vm832_vm12 = vcmp.lt.s32.totalorder %v830_v39, 15 }
 0xbdb   : > { %v5545_v12 = vadd.f32 %v9594_v23, %v5470_v0  ;;  %v15103_v59 = vsel %vm832_vm12, 1.0, %v16221_v43 }
 0xc14   : > { %v9627_v15 = vpop.f32.mrb[80].mxu0 }
 0xc15   : > { %v9628_v26 = vpop.f32.mrb[81].mxu0 }
 0xc16   : > { %v9629_v63 = vadd.f32 %v9628_v26, %v9627_v15 }
 0xc18   : > { %v15022_v32 = vadd.f32 %v9629_v63, %v5540_v1  ;;  %v9630_v5 = vpop.f32.mrb[82].mxu0 }
 0xc19   : > { %v9631_v37 = vpop.f32.mrb[83].mxu0 }
 0xc1a   : > { %v9632_v55 = vadd.f32 %v9631_v37, %v9630_v5  ;;  %v5623_v3 = vmax.f32 %v15022_v32, 0.0  ;;  %vm6107_vm7 = vcmp.gt.f32.partialorder %v15022_v32, 0.0 }
 0xc1c   : > { %v15025_v19 = vadd.f32 %v9632_v55, %v5545_v12  ;;  %10301 = vmatprep.mubr.f32.mxu0 %v5623_v3 }
 0xc1e   : > { %v5624_v46 = vmax.f32 %v15025_v19, 0.0  ;;  %vm6108_vm6 = vcmp.gt.f32.partialorder %v15025_v19, 0.0  ;;  %v723_v19 = vld [vmem:[%s15144_s29 + $0x8] sm:$0xff] }
 0xc1f   : > { %vm15036_vm8 = vmpackc.low %vm6108_vm6, %vm6107_vm7 }
 0xc20   : > { %10302 = vmatmul.mubr.f32.vlgmr.msra.gmra.mrb[84].mxu0 %v5624_v46 }
 0xcf3   : > { %v10303_v47 = vpop.f32.mrb[84].mxu0 }
 0xcf4   : > { %v5704_v4 = vadd.f32 %v10303_v47, %v8779_v13  ;;  %v5698_v62 = vpop.f32.mrb[85].mxu0 }
 0xcf5   : > { %v5699_v6 = vadd.f32 %v8779_v13, %v5698_v62 }
 0xcf6   : > { %v5708_v22 = vadd.f32 %v5704_v4, %v16216_v2 }
 0xcf7   : > { %v15044_v17 = vadd.f32 %v5699_v6, %v16216_v2  ;;  %v5796_v6 = vmul.f32 0.06666667, %v15103_v59 }
 0xcf8   : > { %5711 = vmax.xlane.f32.xlu1 %v5708_v22  ;;  %v5734_v51 = vmul.f32 %v5708_v22, %v15049_v14 }
 0xcf9   : > { %5709 = vmax.xlane.f32.xlu0 %v15044_v17 }
 0xcfd   : > { %5737 = vadd.xlane.f32.xlu0 %v5734_v51 }
 0xd85   : > { %v15054_v11 = vpop.xlane.xlu1 %5711 }
 0xd86   : > { %v15056_v20 = vpop.xlane.xlu0 %5709  ;;  %vm5759_vm9 = vcmp.ge.f32.partialorder %v5708_v22, %v15054_v11  ;;  %v5714_v45 = vsub.f32 %v5708_v22, %v15054_v11 }
 0xd87   : > { %v5713_v44 = vsub.f32 %v15044_v17, %v15056_v20  ;;  %v5761_v49 = vsel %vm5759_vm9, %v5757_v35, 128.0  ;;  %vm5758_vm10 = vcmp.ge.f32.partialorder %v15044_v17, %v15056_v20 }
 0xd88   : > { %5764 = vmin.xlane.f32.xlu0 %v5761_v49  ;;  %v5717_v28 = vmul.f32 1.442695, %v5714_v45  ;;  %v5760_v48 = vsel %vm5758_vm10, %v5757_v35, 128.0 }
 0xd89   : > { %v5715_v40 = vmul.f32 1.442695, %v5713_v44 }
 0xd8a   : > { %v15099_v42 = vpop.xlane.xlu0 %5737 }
 0xd8b   : > { %11037 = vpow2.f32 %v5715_v40 }
 0xd8c   : > { %5770 = vadd.xlane.f32.xlu0 %v5767_v24  ;;  %11039 = vpow2.f32 %v5717_v28 }
 0xd90   : > { %5762 = vmin.xlane.f32.xlu0 %v5760_v48 }
 0xd94   : > { %5768 = vadd.xlane.f32.xlu0 %v5766_v16 }
 0xd95   : > { %v11038_v10 = vpop.eup %11037 }
 0xd96   : > { %5719 = vadd.xlane.f32.xlu1 %v11038_v10  ;;  %v11040_v58 = vpop.eup %11039 }
 0xd98   : > { %7352 = vadd.xlane.f32.xlu0 %v14993_v33  ;;  %v7734_v33 = vld [vmem:[%s15548_s8] sm:$0x1] }
 0xd99   : > { %v7735_v27 = vmul.f32 %v7734_v33, %v7361_v50 }
 0xd9a   : > { %5721 = vadd.xlane.f32.xlu1 %v11040_v58 }
 0xd9b   : > { %v7736_v56 = vsel %vm7363_vm11, %v7735_v27, 0.0 }
 0xd9c   : > { %7365 = vadd.xlane.f32.xlu0 %v7364_v29 }
 0xda0   : > { %7406 = vadd.xlane.f32.xlu0 %v16218_v61 }
 0xda4   : > { %7419 = vadd.xlane.f32.xlu0 %v7418_v18 }
 0xda8   : > { %7725 = vadd.xlane.f32.xlu0 %v15001_v57  ;;  %v8118_v57 = vsel %vm7363_vm11, %v8117_v31, 0.0 }
 0xdac   : > { %7737 = vadd.xlane.f32.xlu0 %v7736_v56 }
 0xdb0   : > { %7794 = vadd.xlane.f32.xlu0 %v16219_v52 }
 0xdb4   : > { %7807 = vadd.xlane.f32.xlu0 %v7806_v36 }
 0xdb8   : > { %8107 = vadd.xlane.f32.xlu0 %v15007_v9 }
 0xdbc   : > { %8119 = vadd.xlane.f32.xlu0 %v8118_v57 }
 0xdcd   : > { %5799 = vxpose.xlu1.b32.start [1/2] (short) %v5623_v3, 128 }
 0xdd1   : > { %5800 = vxpose.xlu1.b32.end [2/2] (short) %v5624_v46, 128  ;;  %v5733_v46 = vmul.f32 %v15044_v17, %v15068_v7 }
 0xe15   : > { %v5765_v25 = vpop.xlane.xlu0 %5764 }
 0xe19   : > { %v5771_v1 = vpop.xlane.xlu0 %5770 }
 0xe1a   : > { %vm5773_vm13 = vcmp.eq.f32.partialorder %v5765_v25, %v5771_v1 }
 0xe1b   : > { %v8781_v9 = vsel %vm5773_vm13, 1.0, %v16221_v43 }
 0xe1c   : > { %v5779_v23 = vmul.f32 %v8781_v9, %v15103_v59 }
 0xe1d   : > { %v5763_v0 = vpop.xlane.xlu0 %5762 }
 0xe1e   : > { %v5781_v5 = vsel %vm5743_vm14, %v5779_v23, 0.0 }
 0xe21   : > { %v5769_v12 = vpop.xlane.xlu0 %5768 }
 0xe22   : > { %vm5772_vm15 = vcmp.eq.f32.partialorder %v5763_v0, %v5769_v12  ;;  %v9009_v0 = vld [vmem:[%s15550_s10 + $0x1] sm:$0x1] }
 0xe23   : > { %v8780_v15 = vsel %vm5772_vm15, 1.0, %v16221_v43  ;;  %v15108_v26 = vpop.xlane.xlu1 %5719  ;;  %v8187_v23 = vmul.f32 %v9009_v0, %v15073_v60  ;;  %v16222_v12 = vld [vmem:[#allocation76_spill] sm:$0xff] }
 0xe24   : > { %11041 = vrcp.f32 %v15108_v26  ;;  %v5780_v63 = vsel %vm5743_vm14, %v8780_v15, 0.0  ;;  %v750_v0 = vld [vmem:[%s15144_s29 + $0xe0] sm:$0xff] }
 0xe25   : > { %v5782_v37 = vadd.f32 %v5781_v5, %v5780_v63 }
 0xe27   : > { %v5722_v55 = vpop.xlane.xlu1 %5721  ;;  %5783 = vadd.xlane.f32.xlu0 %v5782_v37 }
 0xe28   : > { %11043 = vrcp.f32 %v5722_v55 }
 0xe29   : > { %11045 = vlog2.f32 %v5722_v55 }
 0xe2a   : > { %11047 = vlog2.f32 %v15108_v26 }
 0xe2e   : > { %v11042_v3 = vpop.eup %11041 }
 0xe2f   : > { %v5724_v47 = vmul.f32 %v11042_v3, %v11038_v10 }
 0xe30   : > { %5735 = vadd.xlane.f32.xlu1 %v5733_v46  ;;  %v724_v46 = vld [vmem:[%s15144_s29 + $0x10] sm:$0xff] }
 0xe31   : > { %v5793_v13 = vsub.f32 %v5724_v47, %v15068_v7 }
 0xe32   : > { %v11044_v4 = vpop.eup %11043 }
 0xe33   : > { %v11046_v62 = vpop.eup %11045  ;;  %v5726_v2 = vmul.f32 %v11044_v4, %v11040_v58  ;;  %v5797_v22 = vmul.f32 0.06666667, %v5793_v13  ;;  %v725_v13 = vld [vmem:[%s15144_s29 + $0x18] sm:$0xff]  ;;  %v726_v4 = vld [vmem:[%s15144_s29 + $0x20] sm:$0xff] }
 0xe34   : > { %v5730_v51 = vmul.f32 0.6931472, %v11046_v62  ;;  %v11048_v31 = vpop.eup %11047 }
 0xe35   : > { %v5794_v35 = vsub.f32 %v5726_v2, %v15049_v14  ;;  %10364 = vmatprep.mubr.f32.mxu1 %v5797_v22  ;;  %v5728_v57 = vmul.f32 0.6931472, %v11048_v31  ;;  %v727_v2 = vld [vmem:[%s15144_s29 + $0x28] sm:$0xff]  ;;  %v746_v31 = vld [vmem:[%s15144_s29 + $0xc0] sm:$0xff] }
 0xe36   : > { %v5732_v45 = vadd.f32 %v5730_v51, %v15054_v11 }
 0xe37   : > { %v5798_v44 = vmul.f32 %v5796_v6, %v5794_v35 }
 0xe38   : > { %v5740_v17 = vsub.f32 %v5732_v45, %v15099_v42  ;;  %v5731_v42 = vadd.f32 %v5728_v57, %v15056_v20  ;;  %v8188_v20 = vsel %vm7363_vm11, %v8187_v23, 0.0  ;;  %v729_v45 = vld [vmem:[%s15144_s29 + $0x38] sm:$0xff] }
 0xe39   : > { %v6025_v49 = vadd.f32 %v5798_v44, %v5797_v22  ;;  %10365 = vmatmul.mubr.f32.vlgmr.msra.gmra.mrb[172].mxu1 %v5798_v44  ;;  %v10931_v24 = vpack.c.bf16 %v5798_v44, %v5797_v22  ;;  %v728_v22 = vld [vmem:[%s15144_s29 + $0x30] sm:$0xff]  ;;  %v730_v44 = vld [vmem:[%s15144_s29 + $0x40] sm:$0xff] }
 0xe3a   : > { %v5742_v25 = vmul.f32 %v15103_v59, %v5740_v17  ;;  %v15159_v59 = vpop.xlane.xlu0 %7352  ;;  %v731_v17 = vld [vmem:[%s15144_s29 + $0x48] sm:$0xff] }
 0xe3b   : > { %v6026_v40 = vrot.slane %v6025_v49, 4  ;;  %10932 = vmatprep.subr.bf16.mxu0 %v10931_v24 }
 0xe3c   : > { %10934 = vmatpush3.bf16.msra.mxu0 %v10931_v24  ;;  %v5745_v43 = vsel %vm5743_vm14, %v5742_v25, 0.0  ;;  %v747_v25 = vld [vmem:[%s15144_s29 + $0xc8] sm:$0xff] }
 0xe3d   : > { %v6027_v28 = vadd.f32 %v6026_v40, %v6025_v49  ;;  %v732_v49 = vld [vmem:[%s15144_s29 + $0x50] sm:$0xff]  ;;  %v733_v40 = vld [vmem:[%s15144_s29 + $0x58] sm:$0xff] }
 0xe3e   : > { %v15167_v55 = vpop.xlane.xlu0 %7365 }
 0xe3f   : > { %v6028_v48 = vrot.slane %v6027_v28, 2 }
 0xe41   : > { %v6029_v7 = vadd.f32 %v6028_v48, %v6027_v28  ;;  %v734_v28 = vld [vmem:[%s15144_s29 + $0x60] sm:$0xff] }
 0xe42   : > { %v15177_v62 = vpop.xlane.xlu0 %7406 }
 0xe43   : > { %v6030_v16 = vrot.slane %v6029_v7, 1 }
 0xe45   : > { %v6031_v14 = vadd.f32 %v6030_v16, %v6029_v7  ;;  %v735_v16 = vld [vmem:[%s15144_s29 + $0x68] sm:$0xff] }
 0xe46   : > { %v15188_v35 = vpop.xlane.xlu0 %7419 }
 0xe47   : > { %7064 = vst [vmem:[%s607_s25] sm:$0x1] %v6031_v14 }
 0xe4a   : > { %v15198_v24 = vpop.xlane.xlu0 %7725 }
 0xe4d   : > { %v5815_v11 = vpop.trf.xlu1 }
 0xe4e   : > { %10308 = vmatprep.mubr.msk.f32.mxu0 %vm5831_vm0, %v5815_v11  ;;  %v15210_v7 = vpop.xlane.xlu0 %7737  ;;  %v736_v11 = vld [vmem:[%s15144_s29 + $0x70] sm:$0xff] }
 0xe51   : > { %v5816_v50 = vpop.trf.xlu1 }
 0xe52   : > { %10309 = vmatmul.mubr.msk.f32.vlgmr.msra.gmra.mrb[86].mxu0 %vm5831_vm0, %v5816_v50  ;;  %v737_v50 = vld [vmem:[%s15144_s29 + $0x78] sm:$0xff] }
 0xe55   : > { %v5817_v10 = vpop.trf.xlu1 }
 0xe56   : > { %10311 = vmatprep.mubr.msk.f32.mxu0 %vm5831_vm0, %v5817_v10  ;;  %v738_v10 = vld [vmem:[%s15144_s29 + $0x80] sm:$0xff] }
 0xe59   : > { %v5818_v8 = vpop.trf.xlu1 }
 0xe5a   : > { %10312 = vmatmul.mubr.msk.f32.gmra.mrb[88].mxu0 %vm5831_vm0, %v5818_v8  ;;  %v15221_v8 = vpop.xlane.xlu0 %7794 }
 0xe5d   : > { %v5819_v58 = vpop.trf.xlu1 }
 0xe5e   : > { %10314 = vmatprep.mubr.msk.f32.mxu0 %vm5831_vm0, %v5819_v58 }
 0xe61   : > { %v5820_v29 = vpop.trf.xlu1 }
 0xe62   : > { %10315 = vmatmul.mubr.msk.f32.gmra.mrb[90].mxu0 %vm5831_vm0, %v5820_v29  ;;  %v739_v29 = vld [vmem:[%s15144_s29 + $0x88] sm:$0xff] }
 0xe65   : > { %v5821_v38 = vpop.trf.xlu1 }
 0xe66   : > { %10317 = vmatprep.mubr.msk.f32.mxu0 %vm5831_vm0, %v5821_v38 }
 0xe69   : > { %v5822_v61 = vpop.trf.xlu1 }
 0xe6a   : > { %10318 = vmatmul.mubr.msk.f32.gmra.mrb[92].mxu0 %vm5831_vm0, %v5822_v61  ;;  %v740_v61 = vld [vmem:[%s15144_s29 + $0x90] sm:$0xff] }
 0xe6d   : > { %v5823_v18 = vpop.trf.xlu1 }
 0xe6e   : > { %10320 = vmatprep.mubr.msk.f32.mxu0 %vm5831_vm0, %v5823_v18  ;;  %v15230_v18 = vpop.xlane.xlu0 %7807 }
 0xe71   : > { %v5824_v33 = vpop.trf.xlu1 }
 0xe72   : > { %10321 = vmatmul.mubr.msk.f32.gmra.mrb[94].mxu0 %vm5831_vm0, %v5824_v33  ;;  %v741_v33 = vld [vmem:[%s15144_s29 + $0x98] sm:$0xff] }
 0xe75   : > { %v5825_v27 = vpop.trf.xlu1 }
 0xe76   : > { %10323 = vmatprep.mubr.msk.f32.mxu0 %vm5831_vm0, %v5825_v27  ;;  %v742_v27 = vld [vmem:[%s15144_s29 + $0xa0] sm:$0xff] }
 0xe79   : > { %v5826_v56 = vpop.trf.xlu1 }
 0xe7a   : > { %10324 = vmatmul.mubr.msk.f32.gmra.mrb[96].mxu0 %vm5831_vm0, %v5826_v56 }
 0xe7d   : > { %v5827_v53 = vpop.trf.xlu1 }
 0xe7e   : > { %10326 = vmatprep.mubr.msk.f32.mxu0 %vm5831_vm0, %v5827_v53  ;;  %v743_v53 = vld [vmem:[%s15144_s29 + $0xa8] sm:$0xff] }
 0xe81   : > { %v5828_v34 = vpop.trf.xlu1 }
 0xe82   : > { %10327 = vmatmul.mubr.msk.f32.gmra.mrb[98].mxu0 %vm5831_vm0, %v5828_v34 }
 0xe85   : > { %v5829_v52 = vpop.trf.xlu1 }
 0xe86   : > { %10329 = vmatprep.mubr.msk.f32.mxu0 %vm5831_vm0, %v5829_v52  ;;  %v744_v52 = vld [vmem:[%s15144_s29 + $0xb0] sm:$0xff] }
 0xe89   : > { %v5830_v36 = vpop.trf.xlu1 }
 0xe8a   : > { %10330 = vmatmul.mubr.msk.f32.gmra.mrb[100].mxu0 %vm5831_vm0, %v5830_v36  ;;  %v15241_v36 = vpop.xlane.xlu0 %8107 }
 0xe8b   : > { %10371 = vmatprep.mubr.msk.f32.mxu0 %vm5831_vm0, %v722_v21  ;;  %v745_v21 = vld [vmem:[%s15144_s29 + $0xb8] sm:$0xff] }
 0xebd   : > { %v5736_v41 = vpop.xlane.xlu1 %5735 }
 0xebe   : > { %v5739_v39 = vsub.f32 %v5731_v42, %v5736_v41  ;;  %v15248_v42 = vpop.xlane.xlu0 %8119 }
 0xec0   : > { %v5744_v1 = vsel %vm5743_vm14, %v5739_v39, 0.0  ;;  %v748_v39 = vld [vmem:[%s15144_s29 + $0xd0] sm:$0xff] }
 0xec1   : > { %v5746_v9 = vadd.f32 %v5745_v43, %v5744_v1  ;;  %v749_v43 = vld [vmem:[%s15144_s29 + $0xd8] sm:$0xff] }
 0xec2   : > { %v5784_v1 = vpop.xlane.xlu0 %5783 }
 0xec3   : > { %5747 = vadd.xlane.f32.xlu0 %v5746_v9  ;;  %v7354_v9 = vrot.slane %v15159_v59, 4  ;;  %v5785_v23 = vrot.slane %v5784_v1, 4 }
 0xec7   : > { %8176 = vadd.xlane.f32.xlu0 %v16222_v12 }
 0xecb   : > { %8189 = vadd.xlane.f32.xlu0 %v8188_v20  ;;  %v751_v20 = vld [vmem:[%s15144_s29 + $0xe8] sm:$0xff] }
 0xf0c   : > { %v10366_v15 = vpop.f32.mrb[172].mxu1 }
 0xf0d   : > { %v6110_v26 = vsel %vm6108_vm6, %v10366_v15, 0.0  ;;  %v6098_v63 = vpop.f32.mrb[173].mxu1 }
 0xf0e   : > { %v6109_v5 = vsel %vm6107_vm7, %v6098_v63, 0.0  ;;  %v10967_v37 = vpack.c.bf16 %v10366_v15, %v6098_v63  ;;  %v7367_v63 = vrot.slane %v15167_v55, 4 }
 0xf0f   : > { %v6944_v60 = vadd.f32 %v6110_v26, %v6109_v5  ;;  %v7355_v26 = vadd.f32 %v7354_v9, %v15159_v59  ;;  %v752_v5 = vld [vmem:[%s15144_s29 + $0xf0] sm:$0xff] }
 0xf10   : > { %10969 = vmatprep.subr.msk.bf16.mxu0 %vm15036_vm8, %v10967_v37  ;;  %v7368_v59 = vadd.f32 %v7367_v63, %v15167_v55 }
 0xf11   : > { %v6945_v3 = vrot.slane %v6944_v60, 4  ;;  %10972 = vmatpush3.bf16.msk.msra.mxu0 %vm15036_vm8, %v10967_v37  ;;  %v7408_v37 = vrot.slane %v15177_v62, 4 }
 0xf13   : > { %v6946_v47 = vadd.f32 %v6945_v3, %v6944_v60  ;;  %v7421_v60 = vrot.slane %v15188_v35, 4  ;;  %v7727_v3 = vrot.slane %v15198_v24, 4 }
 0xf14   : > { %10372 = vmatmul.mubr.msk.f32.vlgmr.msra.gmra.mrb[102].mxu0 %vm5831_vm0, %v723_v19  ;;  %v5786_v19 = vadd.f32 %v5785_v23, %v5784_v1 }
 0xf15   : > { %v6947_v32 = vrot.slane %v6946_v47, 2  ;;  %10374 = vmatprep.mubr.msk.f32.mxu0 %vm5831_vm0, %v724_v46  ;;  %v753_v46 = vld [vmem:[%s15144_s29 + $0xf8] sm:$0xff] }
 0xf17   : > { %v6948_v6 = vadd.f32 %v6947_v32, %v6946_v47  ;;  %v7356_v47 = vrot.slane %v7355_v26, 2  ;;  %v7739_v32 = vrot.slane %v15210_v7, 4 }
 0xf18   : > { %10375 = vmatmul.mubr.msk.f32.gmra.mrb[104].mxu0 %vm5831_vm0, %v725_v13  ;;  %v754_v13 = vld [vmem:[%s15144_s29 + $0x100] sm:$0xff] }
 0xf19   : > { %v6949_v54 = vrot.slane %v6948_v6, 1  ;;  %10377 = vmatprep.mubr.msk.f32.mxu0 %vm5831_vm0, %v726_v4  ;;  %v7409_v4 = vadd.f32 %v7408_v37, %v15177_v62  ;;  %v755_v62 = vld [vmem:[%s15144_s29 + $0x108] sm:$0xff] }
 0xf1b   : > { %v6950_v51 = vadd.f32 %v6949_v54, %v6948_v6  ;;  %v7796_v6 = vrot.slane %v15221_v8, 4  ;;  %v7422_v54 = vadd.f32 %v7421_v60, %v15188_v35  ;;  %v7369_v35 = vrot.slane %v7368_v59, 2 }
 0xf1c   : > { %10378 = vmatmul.mubr.msk.f32.gmra.mrb[106].mxu0 %vm5831_vm0, %v727_v2  ;;  %v7728_v2 = vadd.f32 %v7727_v3, %v15198_v24  ;;  %v7740_v24 = vadd.f32 %v7739_v32, %v15210_v7 }
 0xf1d   : > { %7047 = vst [vmem:[%s599_s16] sm:$0x1] %v6950_v51  ;;  %10380 = vmatprep.mubr.msk.f32.mxu0 %vm5831_vm0, %v728_v22  ;;  %v7809_v22 = vrot.slane %v15230_v18, 4  ;;  %v5787_v51 = vrot.slane %v5786_v19, 2 }
 0xf20   : > { %10381 = vmatmul.mubr.msk.f32.gmra.mrb[108].mxu0 %vm5831_vm0, %v729_v45 }
 0xf21   : > { %10383 = vmatprep.mubr.msk.f32.mxu0 %vm5831_vm0, %v730_v44  ;;  %v8109_v44 = vrot.slane %v15241_v36, 4 }
 0xf23   : > { %v8110_v7 = vadd.f32 %v8109_v44, %v15241_v36  ;;  %v762_v44 = vld [vmem:[%s15144_s29 + $0x140] sm:$0xff] }
 0xf24   : > { %10384 = vmatmul.mubr.msk.f32.gmra.mrb[110].mxu0 %vm5831_vm0, %v731_v17 }
 0xf25   : > { %10386 = vmatprep.mubr.msk.f32.mxu0 %vm5831_vm0, %v732_v49  ;;  %v10310_v48 = vpop.f32.mrb[86].mxu0 }
 0xf26   : > { %7049 = vst [vmem:[%s15206_s24 + $0x8] sm:$0xff] %v10310_v48  ;;  %v5946_v14 = vpop.f32.mrb[87].mxu0  ;;  %v756_v48 = vld [vmem:[%s15144_s29 + $0x110] sm:$0xff] }
 0xf27   : > { %7048 = vst [vmem:[%s15206_s24] sm:$0xff] %v5946_v14  ;;  %v7797_v14 = vadd.f32 %v7796_v6, %v15221_v8 }
 0xf28   : > { %10387 = vmatmul.mubr.msk.f32.gmra.mrb[112].mxu0 %vm5831_vm0, %v733_v40  ;;  %v8121_v40 = vrot.slane %v15248_v42, 4 }
 0xf29   : > { %10389 = vmatprep.mubr.msk.f32.mxu0 %vm5831_vm0, %v734_v28  ;;  %v7357_v28 = vadd.f32 %v7356_v47, %v7355_v26 }
 0xf2c   : > { %10390 = vmatmul.mubr.msk.f32.gmra.mrb[114].mxu0 %vm5831_vm0, %v735_v16  ;;  %v7410_v16 = vrot.slane %v7409_v4, 2 }
 0xf2d   : > { %10392 = vmatprep.mubr.msk.f32.mxu0 %vm5831_vm0, %v736_v11  ;;  %v10313_v58 = vpop.f32.mrb[88].mxu0 }
 0xf2e   : > { %7051 = vst [vmem:[%s15206_s24 + $0x18] sm:$0xff] %v10313_v58  ;;  %v5956_v38 = vpop.f32.mrb[89].mxu0  ;;  %v7810_v58 = vadd.f32 %v7809_v22, %v15230_v18  ;;  %v7411_v36 = vadd.f32 %v7410_v16, %v7409_v4 }
 0xf2f   : > { %7050 = vst [vmem:[%s15206_s24 + $0x10] sm:$0xff] %v5956_v38  ;;  %v5788_v38 = vadd.f32 %v5787_v51, %v5786_v19 }
 0xf30   : > { %10393 = vmatmul.mubr.msk.f32.gmra.mrb[116].mxu0 %vm5831_vm0, %v737_v50  ;;  %v7423_v50 = vrot.slane %v7422_v54, 2  ;;  %v7412_v3 = vrot.slane %v7411_v36, 1 }
 0xf31   : > { %10395 = vmatprep.mubr.msk.f32.mxu0 %vm5831_vm0, %v738_v10  ;;  %v7729_v10 = vrot.slane %v7728_v2, 2  ;;  %v5789_v1 = vrot.slane %v5788_v38, 1 }
 0xf33   : > { %v7730_v9 = vadd.f32 %v7729_v10, %v7728_v2  ;;  %v761_v2 = vld [vmem:[%s15144_s29 + $0x138] sm:$0xff] }
 0xf34   : > { %10396 = vmatmul.mubr.msk.f32.gmra.mrb[118].mxu0 %vm5831_vm0, %v739_v29 }
 0xf35   : > { %10398 = vmatprep.mubr.msk.f32.mxu0 %vm5831_vm0, %v740_v61  ;;  %v10316_v56 = vpop.f32.mrb[90].mxu0  ;;  %v7731_v4 = vrot.slane %v7730_v9, 1 }
 0xf36   : > { %7053 = vst [vmem:[%s15206_s24 + $0x28] sm:$0xff] %v10316_v56  ;;  %v5966_v34 = vpop.f32.mrb[91].mxu0  ;;  %v7741_v56 = vrot.slane %v7740_v24, 2 }
 0xf37   : > { %7052 = vst [vmem:[%s15206_s24 + $0x20] sm:$0xff] %v5966_v34  ;;  %v7358_v34 = vrot.slane %v7357_v28, 1 }
 0xf38   : > { %10399 = vmatmul.mubr.msk.f32.gmra.mrb[120].mxu0 %vm5831_vm0, %v741_v33  ;;  %v7742_v63 = vadd.f32 %v7741_v56, %v7740_v24  ;;  %v766_v56 = vld [vmem:[%s15144_s29 + $0x160] sm:$0xff] }
 0xf39   : > { %10401 = vmatprep.mubr.msk.f32.mxu0 %vm5831_vm0, %v742_v27  ;;  %v757_v27 = vld [vmem:[%s15144_s29 + $0x118] sm:$0xff]  ;;  %v7359_v47 = vadd.f32 %v7358_v34, %v7357_v28  ;;  %v7732_v28 = vadd.f32 %v7731_v4, %v7730_v9  ;;  %v768_v34 = vld [vmem:[%s15144_s29 + $0x170] sm:$0xff] }
 0xf3a   : > { %v780_v9 = vld [vmem:[%s15144_s29 + $0x1d0] sm:$0xff] }
 0xf3c   : > { %10402 = vmatmul.mubr.msk.f32.gmra.mrb[122].mxu0 %vm5831_vm0, %v743_v53  ;;  %v8122_v53 = vadd.f32 %v8121_v40, %v15248_v42  ;;  %v8111_v42 = vrot.slane %v8110_v7, 2 }
 0xf3d   : > { %10404 = vmatprep.mubr.msk.f32.mxu0 %vm5831_vm0, %v744_v52  ;;  %v10319_v57 = vpop.f32.mrb[92].mxu0  ;;  %v7370_v52 = vadd.f32 %v7369_v35, %v7368_v59 }
 0xf3e   : > { %7055 = vst [vmem:[%s15206_s24 + $0x38] sm:$0xff] %v10319_v57  ;;  %v5976_v41 = vpop.f32.mrb[93].mxu0  ;;  %v8112_v6 = vadd.f32 %v8111_v42, %v8110_v7  ;;  %v781_v42 = vld [vmem:[%s15144_s29 + $0x1d8] sm:$0xff] }
 0xf3f   : > { %7054 = vst [vmem:[%s15206_s24 + $0x30] sm:$0xff] %v5976_v41  ;;  %v7811_v41 = vrot.slane %v7810_v58, 2  ;;  %v7371_v26 = vrot.slane %v7370_v52, 1 }
 0xf40   : > { %10405 = vmatmul.mubr.msk.f32.gmra.mrb[124].mxu0 %vm5831_vm0, %v745_v21  ;;  %v758_v21 = vld [vmem:[%s15144_s29 + $0x120] sm:$0xff] }
 0xf41   : > { %10407 = vmatprep.mubr.msk.f32.mxu0 %vm5831_vm0, %v746_v31  ;;  %v7798_v31 = vrot.slane %v7797_v14, 2  ;;  %v7812_v32 = vadd.f32 %v7811_v41, %v7810_v58  ;;  %v7372_v51 = vadd.f32 %v7371_v26, %v7370_v52  ;;  %v764_v58 = vld [vmem:[%s15144_s29 + $0x150] sm:$0xff]  ;;  %v769_v52 = vld [vmem:[%s15144_s29 + $0x178] sm:$0xff]  ;;  %v787_v26 = vld [vmem:[%s15144_s29 + $0x208] sm:$0xff] }
 0xf42   : > { %v776_v41 = vld [vmem:[%s15144_s29 + $0x1b0] sm:$0xff] }
 0xf43   : > { %v7799_v19 = vadd.f32 %v7798_v31, %v7797_v14  ;;  %v7813_v40 = vrot.slane %v7812_v32, 1  ;;  %v763_v14 = vld [vmem:[%s15144_s29 + $0x148] sm:$0xff]  ;;  %v772_v31 = vld [vmem:[%s15144_s29 + $0x190] sm:$0xff] }
 0xf44   : > { %10408 = vmatmul.mubr.msk.f32.gmra.mrb[126].mxu0 %vm5831_vm0, %v747_v25 }
 0xf45   : > { %10410 = vmatprep.mubr.msk.f32.mxu0 %vm5831_vm0, %v748_v39  ;;  %v10322_v12 = vpop.f32.mrb[94].mxu0  ;;  %v7800_v35 = vrot.slane %v7799_v19, 1 }
 0xf46   : > { %7057 = vst [vmem:[%s15206_s24 + $0x48] sm:$0xff] %v10322_v12  ;;  %v5986_v15 = vpop.f32.mrb[95].mxu0 }
 0xf47   : > { %7056 = vst [vmem:[%s15206_s24 + $0x40] sm:$0xff] %v5986_v15  ;;  %v8123_v15 = vrot.slane %v8122_v53, 2 }
 0xf48   : > { %10411 = vmatmul.mubr.msk.f32.gmra.mrb[128].mxu0 %vm5831_vm0, %v749_v43  ;;  %v7424_v43 = vadd.f32 %v7423_v50, %v7422_v54 }
 0xf49   : > { %10413 = vmatprep.mubr.msk.f32.mxu0 %vm5831_vm0, %v750_v0 }
 0xf4a   : > { %v7425_v59 = vrot.slane %v7424_v43, 1 }
 0xf4c   : > { %10414 = vmatmul.mubr.msk.f32.gmra.mrb[130].mxu0 %vm5831_vm0, %v751_v20  ;;  %v759_v20 = vld [vmem:[%s15144_s29 + $0x128] sm:$0xff]  ;;  %v7426_v24 = vadd.f32 %v7425_v59, %v7424_v43  ;;  %v792_v59 = vld [vmem:[%s15144_s29 + $0x230] sm:$0xff] }
 0xf4d   : > { %10416 = vmatprep.mubr.msk.f32.mxu0 %vm5831_vm0, %v752_v5  ;;  %v10325_v55 = vpop.f32.mrb[96].mxu0  ;;  %v760_v5 = vld [vmem:[%s15144_s29 + $0x130] sm:$0xff]  ;;  %v779_v43 = vld [vmem:[%s15144_s29 + $0x1c8] sm:$0xff] }
 0xf4e   : > { %7059 = vst [vmem:[%s15206_s24 + $0x58] sm:$0xff] %v10325_v55  ;;  %v5996_v49 = vpop.f32.mrb[97].mxu0  ;;  %v8124_v55 = vadd.f32 %v8123_v15, %v8122_v53  ;;  %v767_v53 = vld [vmem:[%s15144_s29 + $0x168] sm:$0xff]  ;;  %v786_v15 = vld [vmem:[%s15144_s29 + $0x200] sm:$0xff] }
 0xf4f   : > { %7058 = vst [vmem:[%s15206_s24 + $0x50] sm:$0xff] %v5996_v49  ;;  %v7413_v49 = vadd.f32 %v7412_v3, %v7411_v36  ;;  %v775_v36 = vld [vmem:[%s15144_s29 + $0x1a8] sm:$0xff] }
 0xf50   : > { %v5748_v45 = vpop.xlane.xlu0 %5747  ;;  %10417 = vmatmul.mubr.msk.f32.gmra.mrb[132].mxu0 %vm5831_vm0, %v753_v46  ;;  %v5790_v46 = vadd.f32 %v5789_v1, %v5788_v38  ;;  %v8125_v50 = vrot.slane %v8124_v55, 1  ;;  %v7814_v38 = vadd.f32 %v7813_v40, %v7812_v32  ;;  %v778_v1 = vld [vmem:[%s15144_s29 + $0x1c0] sm:$0xff]  ;;  %v804_v40 = vld [vmem:[%s15144_s29 + $0x290] sm:$0xff] }
 0xf51   : > { %v5749_v17 = vrot.slane %v5748_v45, 4  ;;  %10419 = vmatprep.mubr.msk.f32.mxu0 %vm5831_vm0, %v754_v13 }
 0xf53   : > { %v5750_v11 = vadd.f32 %v5749_v17, %v5748_v45  ;;  %v7743_v45 = vrot.slane %v7742_v63, 1 }
 0xf54   : > { %v8177_v29 = vpop.xlane.xlu0 %8176  ;;  %10420 = vmatmul.mubr.msk.f32.gmra.mrb[134].mxu0 %vm5831_vm0, %v755_v62 }
 0xf55   : > { %v5751_v61 = vrot.slane %v5750_v11, 2  ;;  %v8178_v33 = vrot.slane %v8177_v29, 4  ;;  %10422 = vmatprep.mubr.msk.f32.mxu0 %vm5831_vm0, %v756_v48  ;;  %v10328_v8 = vpop.f32.mrb[98].mxu0  ;;  %v8113_v48 = vrot.slane %v8112_v6, 1 }
 0xf56   : > { %7061 = vst [vmem:[%s15206_s24 + $0x68] sm:$0xff] %v10328_v8  ;;  %v6006_v18 = vpop.f32.mrb[99].mxu0 }
 0xf57   : > { %v8179_v57 = vadd.f32 %v8178_v33, %v8177_v29  ;;  %v5752_v25 = vadd.f32 %v5751_v61, %v5750_v11  ;;  %7060 = vst [vmem:[%s15206_s24 + $0x60] sm:$0xff] %v6006_v18  ;;  %v7744_v11 = vadd.f32 %v7743_v45, %v7742_v63  ;;  %v7801_v29 = vadd.f32 %v7800_v35, %v7799_v19  ;;  %v765_v33 = vld [vmem:[%s15144_s29 + $0x158] sm:$0xff]  ;;  %v771_v18 = vld [vmem:[%s15144_s29 + $0x188] sm:$0xff]  ;;  %v788_v63 = vld [vmem:[%s15144_s29 + $0x210] sm:$0xff] }
 0xf58   : > { %v8190_v39 = vpop.xlane.xlu0 %8189  ;;  %10423 = vmatmul.mubr.msk.f32.gmra.mrb[136].mxu0 %vm5831_vm0, %v757_v27  ;;  %v8114_v7 = vadd.f32 %v8113_v48, %v8112_v6  ;;  %v8126_v27 = vadd.f32 %v8125_v50, %v8124_v55  ;;  %v793_v6 = vld [vmem:[%s15144_s29 + $0x238] sm:$0xff]  ;;  %v795_v45 = vld [vmem:[%s15144_s29 + $0x248] sm:$0xff]  ;;  %v802_v35 = vld [vmem:[%s15144_s29 + $0x280] sm:$0xff] }
 0xf59   : > { %v8180_v0 = vrot.slane %v8179_v57, 2  ;;  %v8191_v23 = vrot.slane %v8190_v39, 4  ;;  %v5753_v12 = vrot.slane %v5752_v25, 1  ;;  %10425 = vmatprep.mubr.msk.f32.mxu0 %vm5831_vm0, %v758_v21  ;;  %v770_v21 = vld [vmem:[%s15144_s29 + $0x180] sm:$0xff]  ;;  %v797_v55 = vld [vmem:[%s15144_s29 + $0x258] sm:$0xff] }
 0xf5a   : > { %v806_v48 = vld [vmem:[%s15144_s29 + $0x2a0] sm:$0xff] }
 0xf5b   : > { %v8192_v37 = vadd.f32 %v8191_v23, %v8190_v39  ;;  %v5754_v60 = vadd.f32 %v5753_v12, %v5752_v25  ;;  %v8181_v54 = vadd.f32 %v8180_v0, %v8179_v57  ;;  %v773_v57 = vld [vmem:[%s15144_s29 + $0x198] sm:$0xff]  ;;  %v774_v25 = vld [vmem:[%s15144_s29 + $0x1a0] sm:$0xff]  ;;  %v783_v23 = vld [vmem:[%s15144_s29 + $0x1e8] sm:$0xff] }
 0xf5c   : > { %10426 = vmatmul.mubr.msk.f32.gmra.mrb[138].mxu0 %vm5831_vm0, %v759_v20  ;;  %v777_v39 = vld [vmem:[%s15144_s29 + $0x1b8] sm:$0xff]  ;;  %v782_v0 = vld [vmem:[%s15144_s29 + $0x1e0] sm:$0xff]  ;;  %v784_v12 = vld [vmem:[%s15144_s29 + $0x1f0] sm:$0xff] }
 0xf5d   : > { %v8193_v13 = vrot.slane %v8192_v37, 2  ;;  %10978 = vpush %v5754_v60  ;;  %10428 = vmatprep.mubr.msk.f32.mxu0 %vm5831_vm0, %v760_v5  ;;  %v10331_v22 = vpop.f32.mrb[100].mxu0  ;;  %v8182_v16 = vrot.slane %v8181_v54, 1  ;;  %v785_v20 = vld [vmem:[%s15144_s29 + $0x1f8] sm:$0xff]  ;;  %v790_v60 = vld [vmem:[%s15144_s29 + $0x220] sm:$0xff] }
 0xf5e   : > { %10980 = vpush %v5790_v46  ;;  %7063 = vst [vmem:[%s15206_s24 + $0x78] sm:$0xff] %v10331_v22  ;;  %v6016_v17 = vpop.f32.mrb[101].mxu0  ;;  %v789_v5 = vld [vmem:[%s15144_s29 + $0x218] sm:$0xff]  ;;  %v791_v46 = vld [vmem:[%s15144_s29 + $0x228] sm:$0xff] }
 0xf5f   : > { %v8194_v62 = vadd.f32 %v8193_v13, %v8192_v37  ;;  %10982 = vpush %v7359_v47  ;;  %7062 = vst [vmem:[%s15206_s24 + $0x70] sm:$0xff] %v6016_v17  ;;  %v8183_v61 = vadd.f32 %v8182_v16, %v8181_v54  ;;  %v794_v54 = vld [vmem:[%s15144_s29 + $0x240] sm:$0xff]  ;;  %v799_v17 = vld [vmem:[%s15144_s29 + $0x268] sm:$0xff] }
 0xf60   : > { %10984 = vpush %v7372_v51  ;;  %10429 = vmatmul.mubr.msk.f32.gmra.mrb[140].mxu0 %vm5831_vm0, %v761_v2  ;;  %v807_v16 = vld [vmem:[%s15144_s29 + $0x2a8] sm:$0xff]  ;;  %v810_v50 = vld [vmem:[%s15144_s29 + $0x2c0] sm:$0xff] }
 0xf61   : > { %10986 = vpush %v7413_v49  ;;  %10431 = vmatprep.mubr.msk.f32.mxu0 %vm5831_vm0, %v762_v44  ;;  %v8195_v10 = vrot.slane %v8194_v62, 1  ;;  %v798_v44 = vld [vmem:[%s15144_s29 + $0x260] sm:$0xff]  ;;  %v801_v49 = vld [vmem:[%s15144_s29 + $0x278] sm:$0xff] }
 0xf62   : > { %10988 = vpush %v7426_v24  ;;  %v803_v24 = vld [vmem:[%s15144_s29 + $0x288] sm:$0xff] }
 0xf63   : > { %10990 = vpush %v7732_v28  ;;  %v8196_v8 = vadd.f32 %v8195_v10, %v8194_v62  ;;  %v800_v62 = vld [vmem:[%s15144_s29 + $0x270] sm:$0xff]  ;;  %v805_v28 = vld [vmem:[%s15144_s29 + $0x298] sm:$0xff]  ;;  %v811_v10 = vld [vmem:[%s15144_s29 + $0x2c8] sm:$0xff] }
 0xf64   : > { %10992 = vpush %v7744_v11  ;;  %10432 = vmatmul.mubr.msk.f32.gmra.mrb[142].mxu0 %vm5831_vm0, %v763_v14  ;;  %v808_v14 = vld [vmem:[%s15144_s29 + $0x2b0] sm:$0xff]  ;;  %v809_v11 = vld [vmem:[%s15144_s29 + $0x2b8] sm:$0xff] }
 0xf65   : > { %10994 = vpush %v7801_v29  ;;  %10434 = vmatprep.mubr.msk.f32.mxu0 %vm5831_vm0, %v764_v58  ;;  %v812_v58 = vld [vmem:[%s15144_s29 + $0x2d0] sm:$0xff]  ;;  %v813_v29 = vld [vmem:[%s15144_s29 + $0x2d8] sm:$0xff] }
 0xf66   : > { %10996 = vpush %v7814_v38  ;;  %v814_v38 = vld [vmem:[%s15144_s29 + $0x2e0] sm:$0xff] }
 0xf67   : > { %10998 = vpush %v8114_v7  ;;  %v815_v7 = vld [vmem:[%s15144_s29 + $0x2e8] sm:$0xff] }
 0xf68   : > { %11000 = vpush %v8126_v27  ;;  %10435 = vmatmul.mubr.msk.f32.gmra.mrb[144].mxu0 %vm5831_vm0, %v765_v33  ;;  %v817_v33 = vld [vmem:[%s15144_s29 + $0x2f8] sm:$0xff] }
 0xf69   : > { %11002 = vpush %v8183_v61  ;;  %10437 = vmatprep.mubr.msk.f32.mxu0 %vm5831_vm0, %v766_v56  ;;  %v816_v61 = vld [vmem:[%s15144_s29 + $0x2f0] sm:$0xff] }
 0xf6a   : > { %11004 = vpush %v8196_v8 }
 0xf6c   : > { %10438 = vmatmul.mubr.msk.f32.gmra.mrb[146].mxu0 %vm5831_vm0, %v767_v53 }
 0xf6d   : > { %10440 = vmatprep.mubr.msk.f32.mxu0 %vm5831_vm0, %v768_v34 }
 0xf70   : > { %10441 = vmatmul.mubr.msk.f32.gmra.mrb[148].mxu0 %vm5831_vm0, %v769_v52 }
 0xf71   : > { %10443 = vmatprep.mubr.msk.f32.mxu0 %vm5831_vm0, %v770_v21 }
 0xf74   : > { %10444 = vmatmul.mubr.msk.f32.gmra.mrb[150].mxu0 %vm5831_vm0, %v771_v18 }
 0xf75   : > { %10446 = vmatprep.mubr.msk.f32.mxu0 %vm5831_vm0, %v772_v31 }
 0xf78   : > { %10447 = vmatmul.mubr.msk.f32.gmra.mrb[152].mxu0 %vm5831_vm0, %v773_v57 }
 0xf79   : > { %10449 = vmatprep.mubr.msk.f32.mxu0 %vm5831_vm0, %v774_v25 }
 0xf7c   : > { %10450 = vmatmul.mubr.msk.f32.gmra.mrb[154].mxu0 %vm5831_vm0, %v775_v36 }
 0xf7d   : > { %10452 = vmatprep.mubr.msk.f32.mxu0 %vm5831_vm0, %v776_v41 }
 0xf80   : > { %10453 = vmatmul.mubr.msk.f32.gmra.mrb[156].mxu0 %vm5831_vm0, %v777_v39 }
 0xf81   : > { %10455 = vmatprep.mubr.msk.f32.mxu0 %vm5831_vm0, %v778_v1 }
 0xf84   : > { %10456 = vmatmul.mubr.msk.f32.gmra.mrb[158].mxu0 %vm5831_vm0, %v779_v43 }
 0xf85   : > { %10458 = vmatprep.mubr.msk.f32.mxu0 %vm5831_vm0, %v780_v9 }
 0xf88   : > { %10459 = vmatmul.mubr.msk.f32.gmra.mrb[160].mxu0 %vm5831_vm0, %v781_v42 }
 0xf89   : > { %10461 = vmatprep.mubr.msk.f32.mxu0 %vm5831_vm0, %v782_v0 }
 0xf8c   : > { %10462 = vmatmul.mubr.msk.f32.gmra.mrb[162].mxu0 %vm5831_vm0, %v783_v23 }
 0xf8d   : > { %10464 = vmatprep.mubr.msk.f32.mxu0 %vm5831_vm0, %v784_v12 }
 0xf8e   : > { %s10979_s25 = spop %10978 }
 0xf8f   : > { %s15359_s27 = spop %10980  ;;  %s5756_s28 = smul.f32 0.06666667, %s10979_s25 }
 0xf90   : > { %s10983_s30 = spop %10982  ;;  %10465 = vmatmul.mubr.msk.f32.gmra.mrb[164].mxu0 %vm5831_vm0, %v785_v20  ;;  %s5792_s23 = smul.f32 0.06666667, %s15359_s27 }
 0xf91   : > { %s10985_s17 = spop %10984  ;;  %10467 = vmatprep.mubr.msk.f32.mxu0 %vm5831_vm0, %v786_v15  ;;  %v7430_v37 = vstv %s5756_s28 }
 0xf92   : > { %s7374_s20 = sadd.f32 %s10985_s17, %s10983_s30  ;;  %s10987_s21 = spop %10986  ;;  %v7431_v3 = vsel %vm7429_vm1, %v7430_v37, 0.0  ;;  %v7433_v19 = vstv %s5792_s23 }
 0xf93   : > { %s10989_s16 = spop %10988  ;;  %v7434_v32 = vsel %vm7432_vm2, %v7433_v19, %v7431_v3 }
 0xf94   : > { %s7415_s22 = sadd.f32 %s10987_s21, %s7374_s20  ;;  %s10991_s0 = spop %10990  ;;  %10468 = vmatmul.mubr.msk.f32.gmra.mrb[166].mxu0 %vm5831_vm0, %v787_v26 }
 0xf95   : > { %s10993_s24 = spop %10992  ;;  %10470 = vmatprep.mubr.msk.f32.mxu0 %vm5831_vm0, %v788_v63 }
 0xf96   : > { %s7428_s25 = sadd.f32 %s10989_s16, %s7415_s22  ;;  %s10995_s1 = spop %10994 }
 0xf97   : > { %s7746_s30 = sadd.f32 %s10993_s24, %s10991_s0  ;;  %s10997_s17 = spop %10996 }
 0xf98   : > { %s10999_s2 = spop %10998  ;;  %10471 = vmatmul.mubr.msk.f32.gmra.mrb[168].mxu0 %vm5831_vm0, %v789_v5  ;;  %v7436_v47 = vstv %s7428_s25  ;;  %s8431_s24 = sshll.u32 %s16224_s19, 3 }
 0xf99   : > { %s7803_s27 = sadd.f32 %s10995_s1, %s7746_s30  ;;  %s11001_s20 = spop %11000  ;;  %10473 = vmatprep.mubr.msk.f32.mxu0 %vm5831_vm0, %v790_v60  ;;  %v7437_v13 = vsel %vm7435_vm3, %v7436_v47, %v7434_v32 }
 0xf9a   : > { %s8128_s28 = sadd.f32 %s11001_s20, %s10999_s2  ;;  %s11003_s21 = spop %11002 }
 0xf9b   : > { %s7816_s16 = sadd.f32 %s10997_s17, %s7803_s27  ;;  %s11005_s22 = spop %11004 }
 0xf9c   : > { %s8185_s0 = sadd.f32 %s11003_s21, %s8128_s28  ;;  %10474 = vmatmul.mubr.msk.f32.gmra.mrb[170].mxu0 %vm5831_vm0, %v791_v46  ;;  %s591_s19 = scalar_lea.vmem %s15551_s11, %s8431_s24 }
 0xf9d   : > { %v7818_v4 = vstv %s7816_s16  ;;  %10476 = vmatprep.mubr.msk.f32.mxu0 %vm5831_vm0, %v792_v59  ;;  %s15439_s17 = scalar_lea.vmem %s15552_s12, %s12653_s26 }
 0xf9e   : > { %s8198_s1 = sadd.f32 %s11005_s22, %s8185_s0  ;;  %v7819_v2 = vsel %vm7817_vm4, %v7818_v4, %v7437_v13 }
 0xfa0   : > { %v8200_v22 = vstv %s8198_s1  ;;  %10477 = vmatmul.mubr.msk.f32.gmra.mrb[172].mxu0 %vm5831_vm0, %v793_v6 }
 0xfa1   : > { %v8201_v51 = vsel %vm8199_vm5, %v8200_v22, %v7819_v2  ;;  %10479 = vmatprep.mubr.msk.f32.mxu0 %vm5831_vm0, %v794_v54 }
 0xfa2   : > { %8202 = vst [vmem:[%s591_s19] sm:$0xff] %v8201_v51 }
 0xfa4   : > { %10480 = vmatmul.mubr.msk.f32.gmra.mrb[174].mxu0 %vm5831_vm0, %v795_v45 }
 0xfa5   : > { %10482 = vmatprep.mubr.msk.f32.mxu0 %vm5831_vm0, %v796_v30 }
 0xfa8   : > { %10483 = vmatmul.mubr.msk.f32.gmra.mrb[176].mxu0 %vm5831_vm0, %v797_v55 }
 0xfa9   : > { %10485 = vmatprep.mubr.msk.f32.mxu0 %vm5831_vm0, %v798_v44 }
 0xfac   : > { %10486 = vmatmul.mubr.msk.f32.gmra.mrb[178].mxu0 %vm5831_vm0, %v799_v17 }
 0xfad   : > { %10488 = vmatprep.mubr.msk.f32.mxu0 %vm5831_vm0, %v800_v62 }
 0xfb0   : > { %10489 = vmatmul.mubr.msk.f32.gmra.mrb[180].mxu0 %vm5831_vm0, %v801_v49 }
 0xfb1   : > { %10491 = vmatprep.mubr.msk.f32.mxu0 %vm5831_vm0, %v802_v35 }
 0xfb4   : > { %10492 = vmatmul.mubr.msk.f32.gmra.mrb[182].mxu0 %vm5831_vm0, %v803_v24 }
 0xfb5   : > { %10494 = vmatprep.mubr.msk.f32.mxu0 %vm5831_vm0, %v804_v40 }
 0xfb8   : > { %10495 = vmatmul.mubr.msk.f32.gmra.mrb[184].mxu0 %vm5831_vm0, %v805_v28 }
 0xfb9   : > { %10497 = vmatprep.mubr.msk.f32.mxu0 %vm5831_vm0, %v806_v48 }
 0xfbc   : > { %10498 = vmatmul.mubr.msk.f32.gmra.mrb[186].mxu0 %vm5831_vm0, %v807_v16 }
 0xfbd   : > { %10500 = vmatprep.mubr.msk.f32.mxu0 %vm5831_vm0, %v808_v14 }
 0xfc0   : > { %10501 = vmatmul.mubr.msk.f32.gmra.mrb[188].mxu0 %vm5831_vm0, %v809_v11 }
 0xfc1   : > { %10503 = vmatprep.mubr.msk.f32.mxu0 %vm5831_vm0, %v810_v50 }
 0xfc4   : > { %10504 = vmatmul.mubr.msk.f32.gmra.mrb[190].mxu0 %vm5831_vm0, %v811_v10 }
 0xfc5   : > { %10506 = vmatprep.mubr.msk.f32.mxu0 %vm5831_vm0, %v812_v58 }
 0xfc8   : > { %10507 = vmatmul.mubr.msk.f32.gmra.mrb[192].mxu0 %vm5831_vm0, %v813_v29 }
 0xfc9   : > { %10509 = vmatprep.mubr.msk.f32.mxu0 %vm5831_vm0, %v814_v38 }
 0xfcc   : > { %10510 = vmatmul.mubr.msk.f32.gmra.mrb[194].mxu0 %vm5831_vm0, %v815_v7 }
 0xfcd   : > { %10512 = vmatprep.mubr.msk.f32.mxu0 %vm5831_vm0, %v816_v61 }
 0xfd0   : > { %10513 = vmatmul.mubr.msk.f32.gmra.mrb[196].mxu0 %vm5831_vm0, %v817_v33 }
 0xfe7   : > { %v10373_v27 = vpop.f32.mrb[102].mxu0 }
 0xfe8   : > { %6952 = vst [vmem:[%s15439_s17 + $0x8] sm:$0xff] %v10373_v27  ;;  %v6465_v8 = vpop.f32.mrb[103].mxu0 }
 0xfe9   : > { %6951 = vst [vmem:[%s15439_s17] sm:$0xff] %v6465_v8 }
 0xfeb   : > { %v10376_v56 = vpop.f32.mrb[104].mxu0 }
 0xfec   : > { %6954 = vst [vmem:[%s15439_s17 + $0x18] sm:$0xff] %v10376_v56  ;;  %v6475_v53 = vpop.f32.mrb[105].mxu0 }
 0xfed   : > { %6953 = vst [vmem:[%s15439_s17 + $0x10] sm:$0xff] %v6475_v53 }
 0xfef   : > { %v10379_v34 = vpop.f32.mrb[106].mxu0 }
 0xff0   : > { %6956 = vst [vmem:[%s15439_s17 + $0x28] sm:$0xff] %v10379_v34  ;;  %v6485_v52 = vpop.f32.mrb[107].mxu0 }
 0xff1   : > { %6955 = vst [vmem:[%s15439_s17 + $0x20] sm:$0xff] %v6485_v52 }
 0xff3   : > { %v10382_v21 = vpop.f32.mrb[108].mxu0 }
 0xff4   : > { %6958 = vst [vmem:[%s15439_s17 + $0x38] sm:$0xff] %v10382_v21  ;;  %v6495_v18 = vpop.f32.mrb[109].mxu0 }
 0xff5   : > { %6957 = vst [vmem:[%s15439_s17 + $0x30] sm:$0xff] %v6495_v18 }
 0xff7   : > { %v10385_v31 = vpop.f32.mrb[110].mxu0 }
 0xff8   : > { %6960 = vst [vmem:[%s15439_s17 + $0x48] sm:$0xff] %v10385_v31  ;;  %v6505_v57 = vpop.f32.mrb[111].mxu0 }
 0xff9   : > { %6959 = vst [vmem:[%s15439_s17 + $0x40] sm:$0xff] %v6505_v57 }
 0xffb   : > { %v10388_v25 = vpop.f32.mrb[112].mxu0 }
 0xffc   : > { %6962 = vst [vmem:[%s15439_s17 + $0x58] sm:$0xff] %v10388_v25  ;;  %v6515_v36 = vpop.f32.mrb[113].mxu0 }
 0xffd   : > { %6961 = vst [vmem:[%s15439_s17 + $0x50] sm:$0xff] %v6515_v36 }
 0xfff   : > { %v10391_v41 = vpop.f32.mrb[114].mxu0 }
0x1000   : > { %6964 = vst [vmem:[%s15439_s17 + $0x68] sm:$0xff] %v10391_v41  ;;  %v6525_v39 = vpop.f32.mrb[115].mxu0 }
0x1001   : > { %6963 = vst [vmem:[%s15439_s17 + $0x60] sm:$0xff] %v6525_v39 }
0x1003   : > { %v10394_v1 = vpop.f32.mrb[116].mxu0 }
0x1004   : > { %6966 = vst [vmem:[%s15439_s17 + $0x78] sm:$0xff] %v10394_v1  ;;  %v6535_v43 = vpop.f32.mrb[117].mxu0 }
0x1005   : > { %6965 = vst [vmem:[%s15439_s17 + $0x70] sm:$0xff] %v6535_v43 }
0x1007   : > { %v10397_v9 = vpop.f32.mrb[118].mxu0 }
0x1008   : > { %6968 = vst [vmem:[%s15439_s17 + $0x88] sm:$0xff] %v10397_v9  ;;  %v6545_v42 = vpop.f32.mrb[119].mxu0 }
0x1009   : > { %6967 = vst [vmem:[%s15439_s17 + $0x80] sm:$0xff] %v6545_v42 }
0x100b   : > { %v10400_v0 = vpop.f32.mrb[120].mxu0 }
0x100c   : > { %6970 = vst [vmem:[%s15439_s17 + $0x98] sm:$0xff] %v10400_v0  ;;  %v6555_v23 = vpop.f32.mrb[121].mxu0 }
0x100d   : > { %6969 = vst [vmem:[%s15439_s17 + $0x90] sm:$0xff] %v6555_v23 }
0x100f   : > { %v10403_v12 = vpop.f32.mrb[122].mxu0 }
0x1010   : > { %6972 = vst [vmem:[%s15439_s17 + $0xa8] sm:$0xff] %v10403_v12  ;;  %v6565_v20 = vpop.f32.mrb[123].mxu0 }
0x1011   : > { %6971 = vst [vmem:[%s15439_s17 + $0xa0] sm:$0xff] %v6565_v20 }
0x1013   : > { %v10406_v15 = vpop.f32.mrb[124].mxu0 }
0x1014   : > { %6974 = vst [vmem:[%s15439_s17 + $0xb8] sm:$0xff] %v10406_v15  ;;  %v6575_v26 = vpop.f32.mrb[125].mxu0 }
0x1015   : > { %6973 = vst [vmem:[%s15439_s17 + $0xb0] sm:$0xff] %v6575_v26 }
0x1017   : > { %v10409_v63 = vpop.f32.mrb[126].mxu0 }
0x1018   : > { %6976 = vst [vmem:[%s15439_s17 + $0xc8] sm:$0xff] %v10409_v63  ;;  %v6585_v5 = vpop.f32.mrb[127].mxu0 }
0x1019   : > { %6975 = vst [vmem:[%s15439_s17 + $0xc0] sm:$0xff] %v6585_v5 }
0x101b   : > { %v10412_v37 = vpop.f32.mrb[128].mxu0 }
0x101c   : > { %6978 = vst [vmem:[%s15439_s17 + $0xd8] sm:$0xff] %v10412_v37  ;;  %v6595_v60 = vpop.f32.mrb[129].mxu0 }
0x101d   : > { %6977 = vst [vmem:[%s15439_s17 + $0xd0] sm:$0xff] %v6595_v60 }
0x101f   : > { %v10415_v3 = vpop.f32.mrb[130].mxu0 }
0x1020   : > { %6980 = vst [vmem:[%s15439_s17 + $0xe8] sm:$0xff] %v10415_v3  ;;  %v6605_v19 = vpop.f32.mrb[131].mxu0 }
0x1021   : > { %6979 = vst [vmem:[%s15439_s17 + $0xe0] sm:$0xff] %v6605_v19 }
0x1023   : > { %v10418_v46 = vpop.f32.mrb[132].mxu0 }
0x1024   : > { %6982 = vst [vmem:[%s15439_s17 + $0xf8] sm:$0xff] %v10418_v46  ;;  %v6615_v47 = vpop.f32.mrb[133].mxu0 }
0x1025   : > { %6981 = vst [vmem:[%s15439_s17 + $0xf0] sm:$0xff] %v6615_v47 }
0x1027   : > { %v10421_v59 = vpop.f32.mrb[134].mxu0 }
0x1028   : > { %6984 = vst [vmem:[%s15439_s17 + $0x108] sm:$0xff] %v10421_v59  ;;  %v6625_v32 = vpop.f32.mrb[135].mxu0 }
0x1029   : > { %6983 = vst [vmem:[%s15439_s17 + $0x100] sm:$0xff] %v6625_v32 }
0x102b   : > { %v10424_v13 = vpop.f32.mrb[136].mxu0 }
0x102c   : > { %6986 = vst [vmem:[%s15439_s17 + $0x118] sm:$0xff] %v10424_v13  ;;  %v6635_v4 = vpop.f32.mrb[137].mxu0 }
0x102d   : > { %6985 = vst [vmem:[%s15439_s17 + $0x110] sm:$0xff] %v6635_v4 }
0x102f   : > { %v10427_v6 = vpop.f32.mrb[138].mxu0 }
0x1030   : > { %6988 = vst [vmem:[%s15439_s17 + $0x128] sm:$0xff] %v10427_v6  ;;  %v6645_v54 = vpop.f32.mrb[139].mxu0 }
0x1031   : > { %6987 = vst [vmem:[%s15439_s17 + $0x120] sm:$0xff] %v6645_v54 }
0x1033   : > { %v10430_v2 = vpop.f32.mrb[140].mxu0 }
0x1034   : > { %6990 = vst [vmem:[%s15439_s17 + $0x138] sm:$0xff] %v10430_v2  ;;  %v6655_v22 = vpop.f32.mrb[141].mxu0 }
0x1035   : > { %6989 = vst [vmem:[%s15439_s17 + $0x130] sm:$0xff] %v6655_v22 }
0x1037   : > { %v10433_v51 = vpop.f32.mrb[142].mxu0 }
0x1038   : > { %6992 = vst [vmem:[%s15439_s17 + $0x148] sm:$0xff] %v10433_v51  ;;  %v6665_v45 = vpop.f32.mrb[143].mxu0 }
0x1039   : > { %6991 = vst [vmem:[%s15439_s17 + $0x140] sm:$0xff] %v6665_v45 }
0x103b   : > { %v10436_v30 = vpop.f32.mrb[144].mxu0 }
0x103c   : > { %6994 = vst [vmem:[%s15439_s17 + $0x158] sm:$0xff] %v10436_v30  ;;  %v6675_v55 = vpop.f32.mrb[145].mxu0 }
0x103d   : > { %6993 = vst [vmem:[%s15439_s17 + $0x150] sm:$0xff] %v6675_v55 }
0x103f   : > { %v10439_v44 = vpop.f32.mrb[146].mxu0 }
0x1040   : > { %6996 = vst [vmem:[%s15439_s17 + $0x168] sm:$0xff] %v10439_v44  ;;  %v6685_v17 = vpop.f32.mrb[147].mxu0 }
0x1041   : > { %6995 = vst [vmem:[%s15439_s17 + $0x160] sm:$0xff] %v6685_v17 }
0x1043   : > { %v10442_v62 = vpop.f32.mrb[148].mxu0 }
0x1044   : > { %6998 = vst [vmem:[%s15439_s17 + $0x178] sm:$0xff] %v10442_v62  ;;  %v6695_v49 = vpop.f32.mrb[149].mxu0 }
0x1045   : > { %6997 = vst [vmem:[%s15439_s17 + $0x170] sm:$0xff] %v6695_v49 }
0x1047   : > { %v10445_v35 = vpop.f32.mrb[150].mxu0 }
0x1048   : > { %7000 = vst [vmem:[%s15439_s17 + $0x188] sm:$0xff] %v10445_v35  ;;  %v6705_v24 = vpop.f32.mrb[151].mxu0 }
0x1049   : > { %6999 = vst [vmem:[%s15439_s17 + $0x180] sm:$0xff] %v6705_v24 }
0x104b   : > { %v10448_v40 = vpop.f32.mrb[152].mxu0 }
0x104c   : > { %7002 = vst [vmem:[%s15439_s17 + $0x198] sm:$0xff] %v10448_v40  ;;  %v6715_v28 = vpop.f32.mrb[153].mxu0 }
0x104d   : > { %7001 = vst [vmem:[%s15439_s17 + $0x190] sm:$0xff] %v6715_v28 }
0x104f   : > { %v10451_v48 = vpop.f32.mrb[154].mxu0 }
0x1050   : > { %7004 = vst [vmem:[%s15439_s17 + $0x1a8] sm:$0xff] %v10451_v48  ;;  %v6725_v16 = vpop.f32.mrb[155].mxu0 }
0x1051   : > { %7003 = vst [vmem:[%s15439_s17 + $0x1a0] sm:$0xff] %v6725_v16 }
0x1053   : > { %v10454_v14 = vpop.f32.mrb[156].mxu0 }
0x1054   : > { %7006 = vst [vmem:[%s15439_s17 + $0x1b8] sm:$0xff] %v10454_v14  ;;  %v6735_v11 = vpop.f32.mrb[157].mxu0 }
0x1055   : > { %7005 = vst [vmem:[%s15439_s17 + $0x1b0] sm:$0xff] %v6735_v11 }
0x1057   : > { %v10457_v50 = vpop.f32.mrb[158].mxu0 }
0x1058   : > { %7008 = vst [vmem:[%s15439_s17 + $0x1c8] sm:$0xff] %v10457_v50  ;;  %v6745_v10 = vpop.f32.mrb[159].mxu0 }
0x1059   : > { %7007 = vst [vmem:[%s15439_s17 + $0x1c0] sm:$0xff] %v6745_v10 }
0x105b   : > { %v10460_v58 = vpop.f32.mrb[160].mxu0 }
0x105c   : > { %7010 = vst [vmem:[%s15439_s17 + $0x1d8] sm:$0xff] %v10460_v58  ;;  %v6755_v29 = vpop.f32.mrb[161].mxu0 }
0x105d   : > { %7009 = vst [vmem:[%s15439_s17 + $0x1d0] sm:$0xff] %v6755_v29 }
0x105f   : > { %v10463_v38 = vpop.f32.mrb[162].mxu0 }
0x1060   : > { %7012 = vst [vmem:[%s15439_s17 + $0x1e8] sm:$0xff] %v10463_v38  ;;  %v6765_v7 = vpop.f32.mrb[163].mxu0 }
0x1061   : > { %7011 = vst [vmem:[%s15439_s17 + $0x1e0] sm:$0xff] %v6765_v7 }
0x1063   : > { %v10466_v61 = vpop.f32.mrb[164].mxu0 }
0x1064   : > { %7014 = vst [vmem:[%s15439_s17 + $0x1f8] sm:$0xff] %v10466_v61  ;;  %v6775_v33 = vpop.f32.mrb[165].mxu0 }
0x1065   : > { %7013 = vst [vmem:[%s15439_s17 + $0x1f0] sm:$0xff] %v6775_v33 }
0x1067   : > { %v10469_v27 = vpop.f32.mrb[166].mxu0 }
0x1068   : > { %7016 = vst [vmem:[%s15439_s17 + $0x208] sm:$0xff] %v10469_v27  ;;  %v6785_v8 = vpop.f32.mrb[167].mxu0 }
0x1069   : > { %7015 = vst [vmem:[%s15439_s17 + $0x200] sm:$0xff] %v6785_v8 }
0x106b   : > { %v10472_v56 = vpop.f32.mrb[168].mxu0 }
0x106c   : > { %7018 = vst [vmem:[%s15439_s17 + $0x218] sm:$0xff] %v10472_v56  ;;  %v6795_v53 = vpop.f32.mrb[169].mxu0 }
0x106d   : > { %7017 = vst [vmem:[%s15439_s17 + $0x210] sm:$0xff] %v6795_v53 }
0x106f   : > { %v10475_v34 = vpop.f32.mrb[170].mxu0 }
0x1070   : > { %7020 = vst [vmem:[%s15439_s17 + $0x228] sm:$0xff] %v10475_v34  ;;  %v6805_v52 = vpop.f32.mrb[171].mxu0 }
0x1071   : > { %7019 = vst [vmem:[%s15439_s17 + $0x220] sm:$0xff] %v6805_v52 }
0x1073   : > { %v10478_v21 = vpop.f32.mrb[172].mxu0 }
0x1074   : > { %7022 = vst [vmem:[%s15439_s17 + $0x238] sm:$0xff] %v10478_v21  ;;  %v6815_v18 = vpop.f32.mrb[173].mxu0 }
0x1075   : > { %7021 = vst [vmem:[%s15439_s17 + $0x230] sm:$0xff] %v6815_v18 }
0x1077   : > { %v10481_v31 = vpop.f32.mrb[174].mxu0 }
0x1078   : > { %7024 = vst [vmem:[%s15439_s17 + $0x248] sm:$0xff] %v10481_v31  ;;  %v6825_v57 = vpop.f32.mrb[175].mxu0 }
0x1079   : > { %7023 = vst [vmem:[%s15439_s17 + $0x240] sm:$0xff] %v6825_v57 }
0x107b   : > { %v10484_v25 = vpop.f32.mrb[176].mxu0 }
0x107c   : > { %7026 = vst [vmem:[%s15439_s17 + $0x258] sm:$0xff] %v10484_v25  ;;  %v6835_v36 = vpop.f32.mrb[177].mxu0 }
0x107d   : > { %7025 = vst [vmem:[%s15439_s17 + $0x250] sm:$0xff] %v6835_v36 }
0x107f   : > { %v10487_v41 = vpop.f32.mrb[178].mxu0 }
0x1080   : > { %7028 = vst [vmem:[%s15439_s17 + $0x268] sm:$0xff] %v10487_v41  ;;  %v6845_v39 = vpop.f32.mrb[179].mxu0 }
0x1081   : > { %7027 = vst [vmem:[%s15439_s17 + $0x260] sm:$0xff] %v6845_v39 }
0x1083   : > { %v10490_v1 = vpop.f32.mrb[180].mxu0 }
0x1084   : > { %7030 = vst [vmem:[%s15439_s17 + $0x278] sm:$0xff] %v10490_v1  ;;  %v6855_v43 = vpop.f32.mrb[181].mxu0 }
0x1085   : > { %7029 = vst [vmem:[%s15439_s17 + $0x270] sm:$0xff] %v6855_v43 }
0x1087   : > { %v10493_v9 = vpop.f32.mrb[182].mxu0 }
0x1088   : > { %7032 = vst [vmem:[%s15439_s17 + $0x288] sm:$0xff] %v10493_v9  ;;  %v6865_v42 = vpop.f32.mrb[183].mxu0 }
0x1089   : > { %7031 = vst [vmem:[%s15439_s17 + $0x280] sm:$0xff] %v6865_v42 }
0x108b   : > { %v10496_v0 = vpop.f32.mrb[184].mxu0 }
0x108c   : > { %7034 = vst [vmem:[%s15439_s17 + $0x298] sm:$0xff] %v10496_v0  ;;  %v6875_v23 = vpop.f32.mrb[185].mxu0 }
0x108d   : > { %7033 = vst [vmem:[%s15439_s17 + $0x290] sm:$0xff] %v6875_v23 }
0x108f   : > { %v10499_v12 = vpop.f32.mrb[186].mxu0 }
0x1090   : > { %7036 = vst [vmem:[%s15439_s17 + $0x2a8] sm:$0xff] %v10499_v12  ;;  %v6885_v20 = vpop.f32.mrb[187].mxu0 }
0x1091   : > { %7035 = vst [vmem:[%s15439_s17 + $0x2a0] sm:$0xff] %v6885_v20 }
0x1093   : > { %v10502_v15 = vpop.f32.mrb[188].mxu0 }
0x1094   : > { %7038 = vst [vmem:[%s15439_s17 + $0x2b8] sm:$0xff] %v10502_v15  ;;  %v6895_v26 = vpop.f32.mrb[189].mxu0 }
0x1095   : > { %7037 = vst [vmem:[%s15439_s17 + $0x2b0] sm:$0xff] %v6895_v26 }
0x1097   : > { %v10505_v63 = vpop.f32.mrb[190].mxu0 }
0x1098   : > { %7040 = vst [vmem:[%s15439_s17 + $0x2c8] sm:$0xff] %v10505_v63  ;;  %v6905_v5 = vpop.f32.mrb[191].mxu0 }
0x1099   : > { %7039 = vst [vmem:[%s15439_s17 + $0x2c0] sm:$0xff] %v6905_v5 }
0x109b   : > { %v10508_v37 = vpop.f32.mrb[192].mxu0 }
0x109c   : > { %7042 = vst [vmem:[%s15439_s17 + $0x2d8] sm:$0xff] %v10508_v37  ;;  %v6915_v60 = vpop.f32.mrb[193].mxu0 }
0x109d   : > { %7041 = vst [vmem:[%s15439_s17 + $0x2d0] sm:$0xff] %v6915_v60 }
0x109f   : > { %v10511_v3 = vpop.f32.mrb[194].mxu0 }
0x10a0   : > { %7044 = vst [vmem:[%s15439_s17 + $0x2e8] sm:$0xff] %v10511_v3  ;;  %v6925_v19 = vpop.f32.mrb[195].mxu0 }
0x10a1   : > { %7043 = vst [vmem:[%s15439_s17 + $0x2e0] sm:$0xff] %v6925_v19 }
0x10a3   : > { %v10514_v46 = vpop.f32.mrb[196].mxu0 }
0x10a4   : > { %7046 = vst [vmem:[%s15439_s17 + $0x2f8] sm:$0xff] %v10514_v46  ;;  %v6935_v47 = vpop.f32.mrb[197].mxu0 }
0x10a5   : > { %7045 = vst [vmem:[%s15439_s17 + $0x2f0] sm:$0xff] %v6935_v47 }
0x10a6 PF: > { %s27_s18 = sadd.s32 1, %s11177_s18  }
0x10a7   : > { %p24_p1 = scmp.ge.s32.totalorder %s27_s18, 4  }
0x10a9   :  { %26 = sbr.rel (!%p24_p1) target bundleno = 5 (0x5), region = 160 }
0x10b0   :  { %8278 = vsyncpa [#allocation7], 1 }
0x10b1   :  { %8280 = vsyncpa [#allocation7 + $0x1], 1 }

// kernel: custom-call.10
= control target key start
LH: loop header
LB: loop body
LE: loop exit
PB: predicated region body
PF: predicated region fallthrough
CT: control target
= control target key end

     0   :  { %v37_v1 = vlaneseq  ;;  %v128_v9 = vmov -1.0   ;;  %s151_s0 = inlined_call_operand.vmem [shape: f32[1,2,2], index: 0, kind: input, shape index: {}]   ;;  %s152_s1 = inlined_call_operand.vmem [shape: f32[1,2,2], index: 1, kind: output, shape index: {}]  }
   0x1   :  { %v17_v0 = vld [vmem:[%s151_s0] sm:$0x3] }
   0x2   :  { %18 = vst [vmem:[#allocation1] sm:$0x3] %v17_v0  ;;  %v38_v2 = vand.u32 127, %v37_v1  ;;  %v41_v3 = vshrl.u32 %v37_v1, 7 }
   0x4   :  { %vm39_vm0 = vcmp.lt.s32.totalorder %v38_v2, 2  ;;  %vm48_vm1 = vcmp.ge.s32.totalorder %v41_v3, %v38_v2  ;;  %vm43_vm3 = vcmp.eq.s32.totalorder %v41_v3, %v38_v2  ;;  %vm59_vm4 = vcmp.eq.s32.totalorder %v38_v2, %v41_v3 }
   0x5   :  { %vm142_vm2 = vmand %vm48_vm1, %vm39_vm0  ;;  %vm62_vm5 = vcmp.eq.s32.totalorder %v38_v2, 0  ;;  %vm70_vm6 = vcmp.eq.s32.totalorder %v38_v2, 1 }
   0x6   :  { %v63_v10 = vsel %vm62_vm5, 1.0, %v128_v9 }
   0x7   :  { %v64_v11 = vsel %vm59_vm4, %v63_v10, 0.0 }
   0x9   :  { %v35_v5 = vld [vmem:[#allocation1] sm:$0x3] }
   0xa   :  { %36 = vst [vmem:[#allocation0] sm:$0x3] %v35_v5 }
  0x11   :  { %v44_v6 = vld [vmem:[#allocation0] sm:$0xff] }
  0x12   :  { %v45_v7 = vsel %vm43_vm3, %v44_v6, 0.0  ;;  %v50_v8 = vsel %vm142_vm2, %v44_v6, 0.0 }
  0x13   :  { %46 = vadd.xlane.f32.xlu0 %v45_v7 }
  0xa0   :  { %v47_v12 = vpop.xlane.xlu0 %46 }
  0xa1   :  { %126 = vrcp.f32 %v47_v12  ;;  %vm77_vm7 = vweird.f32 %v47_v12 }
  0xab   :  { %v127_v13 = vpop.eup %126 }
  0xac   :  { %v52_v14 = vmul.f32 %v127_v13, %v50_v8 }
  0xae   :  { %53 = vst [vmem:[#allocation4] sm:$0xff] %v52_v14 }
  0xb5   :  { %v66_v15 = vld [vmem:[#allocation4 + $0x1] ss:$0 sm:$0xff] }
  0xb6   :  { %v67_v16 = vxor.u32 2147483648, %v66_v15 }
  0xb8   :  { %v71_v17 = vmul.f32 %v67_v16, %v64_v11 }
  0xba   :  { %72 = vadd.xlane.f32.xlu0 %v71_v17 }
 0x147   :  { %v73_v18 = vpop.xlane.xlu0 %72 }
 0x148   :  { %v74_v19 = vsel %vm70_vm6, %v73_v18, %v64_v11 }
 0x149   :  { %v76_v20 = vmul.f32 %v127_v13, %v74_v19 }
 0x14b   :  { %v78_v21 = vsel %vm77_vm7, %v74_v19, %v76_v20 }
 0x14c   :  { %79 = vst [vmem:[#allocation2] sm:$0xff] %v78_v21 }
 0x153   :  { %v83_v22 = vld [vmem:[#allocation2] sm:$0x3] }
 0x154   :  { %85 = vst [vmem:[#allocation3] sm:$0x3] %v83_v22 }
 0x15b   :  { %v101_v23 = vld [vmem:[#allocation3] sm:$0x3] }
 0x15c   :  { %102 = vst [vmem:[%s152_s1] sm:$0x3] %v101_v23 }

// kernel: custom-call.9
= control target key start
LH: loop header
LB: loop body
LE: loop exit
PB: predicated region body
PF: predicated region fallthrough
CT: control target
= control target key end

     0   :  { %v37_v1 = vlaneseq  ;;  %v127_v9 = vmov -1.0   ;;  %s150_s0 = inlined_call_operand.vmem [shape: f32[1,2,2], index: 0, kind: input, shape index: {}]   ;;  %s151_s1 = inlined_call_operand.vmem [shape: f32[1,2,2], index: 1, kind: output, shape index: {}]  }
   0x1   :  { %v17_v0 = vld [vmem:[%s150_s0] sm:$0x3] }
   0x2   :  { %18 = vst [vmem:[#allocation1] sm:$0x3] %v17_v0  ;;  %v38_v2 = vand.u32 127, %v37_v1  ;;  %v41_v3 = vshrl.u32 %v37_v1, 7 }
   0x4   :  { %vm39_vm0 = vcmp.lt.s32.totalorder %v38_v2, 2  ;;  %vm48_vm1 = vcmp.le.s32.totalorder %v41_v3, %v38_v2  ;;  %vm43_vm3 = vcmp.eq.s32.totalorder %v41_v3, %v38_v2  ;;  %vm59_vm4 = vcmp.eq.s32.totalorder %v38_v2, %v41_v3 }
   0x5   :  { %vm141_vm2 = vmand %vm48_vm1, %vm39_vm0  ;;  %vm62_vm5 = vcmp.eq.s32.totalorder %v38_v2, 1  ;;  %vm69_vm6 = vcmp.eq.s32.totalorder %v38_v2, 0 }
   0x6   :  { %v63_v10 = vsel %vm62_vm5, 1.0, %v127_v9 }
   0x7   :  { %v64_v11 = vsel %vm59_vm4, %v63_v10, 0.0 }
   0x9   :  { %v35_v5 = vld [vmem:[#allocation1] sm:$0x3] }
   0xa   :  { %36 = vst [vmem:[#allocation0] sm:$0x3] %v35_v5 }
  0x11   :  { %v44_v6 = vld [vmem:[#allocation0] sm:$0xff] }
  0x12   :  { %v45_v7 = vsel %vm43_vm3, %v44_v6, 0.0  ;;  %v50_v8 = vsel %vm141_vm2, %v44_v6, 0.0 }
  0x13   :  { %46 = vadd.xlane.f32.xlu0 %v45_v7 }
  0xa0   :  { %v47_v12 = vpop.xlane.xlu0 %46 }
  0xa1   :  { %125 = vrcp.f32 %v47_v12  ;;  %vm76_vm7 = vweird.f32 %v47_v12 }
  0xab   :  { %v126_v13 = vpop.eup %125 }
  0xac   :  { %v52_v14 = vmul.f32 %v126_v13, %v50_v8 }
  0xae   :  { %53 = vst [vmem:[#allocation4] sm:$0xff] %v52_v14 }
  0xb5   :  { %v65_v15 = vld [vmem:[#allocation4] ss:$0 sm:$0xff] }
  0xb6   :  { %v66_v16 = vxor.u32 2147483648, %v65_v15 }
  0xb8   :  { %v70_v17 = vmul.f32 %v66_v16, %v64_v11 }
  0xba   :  { %71 = vadd.xlane.f32.xlu0 %v70_v17 }
 0x147   :  { %v72_v18 = vpop.xlane.xlu0 %71 }
 0x148   :  { %v73_v19 = vsel %vm69_vm6, %v72_v18, %v64_v11 }
 0x149   :  { %v75_v20 = vmul.f32 %v126_v13, %v73_v19 }
 0x14b   :  { %v77_v21 = vsel %vm76_vm7, %v73_v19, %v75_v20 }
 0x14c   :  { %78 = vst [vmem:[#allocation2] sm:$0xff] %v77_v21 }
 0x153   :  { %v82_v22 = vld [vmem:[#allocation2] sm:$0x3] }
 0x154   :  { %84 = vst [vmem:[#allocation3] sm:$0x3] %v82_v22 }
 0x15b   :  { %v100_v23 = vld [vmem:[#allocation3] sm:$0x3] }
 0x15c   :  { %101 = vst [vmem:[%s151_s1] sm:$0x3] %v100_v23 }

</bundles_post_ra>
